<compile_context>
chip_gen: v5e
topology: v5e:2x2
jax: 0.10.0
libtpu: 0.0.40
codegen_flags: <defaults>
</compile_context>

<pallas_src>
import functools

import jax
import jax.numpy as jnp
import numpy as np
from jax import lax
from jax.experimental import pallas as pl
from jax.experimental.pallas import tpu as pltpu


def _round_up(n, m):
    return ((n + m - 1) // m) * m


def _lstm_kernel(xp_ref, m_ref, wh_ref, h0_ref, c0_ref,
                 h_out_ref, c_out_ref, h_scr, c_scr,
                 *, hidden_size, tt, reverse):
    """One grid step == TT timesteps of the LSTM recurrence.

    xp_ref : (B, TT, 4H)  pre-computed input projection (i2h hoisted + biases)
    m_ref  : (B, TT, 1)   0/1 sequence mask
    wh_ref : (H, 4H)      h2h weight (transposed), loop invariant
    h0/c0  : (B, H)       initial state (used only at grid step 0)
    h_out/c_out : (B, TT, H) output tiles (batch-major, written in place)
    h_scr/c_scr : (B, H)  recurrent state carried across grid steps
    """
    g = pl.program_id(0)

    @pl.when(g == 0)
    def _():
        h_scr[...] = h0_ref[...]
        c_scr[...] = c0_ref[...]

    H = hidden_size
    h = h_scr[...]                       # (B, H)  float32
    c = c_scr[...]                       # (B, H)  float32
    wh = wh_ref[...]                     # (H, 4H) loop invariant

    # Short fixed trip count -> fully unrolled static loop (LLO visibility).
    for step in range(tt):
        i = (tt - 1 - step) if reverse else step
        # preact = x_proj[t] + h @ Wh^T   (i2h + both biases already folded
        # into x_proj outside the kernel)
        preact = xp_ref[:, i, :] + jnp.dot(
            h.astype(wh.dtype), wh, preferred_element_type=jnp.float32)

        g_t = jnp.tanh(preact[:, 3 * H:])
        gates = jax.nn.sigmoid(preact[:, :3 * H])
        i_t = gates[:, :H]
        f_t = gates[:, H:2 * H]
        o_t = gates[:, 2 * H:]

        c_t = c * f_t + i_t * g_t
        h_t = o_t * jnp.tanh(c_t)

        # masked state update (cheap lerp form of h_t*m + h*(1-m))
        m_t = m_ref[:, i, :]             # (B, 1)
        h = h + m_t * (h_t - h)
        c = c + m_t * (c_t - c)

        h_out_ref[:, i, :] = h
        c_out_ref[:, i, :] = c

    h_scr[...] = h
    c_scr[...] = c


def _run_direction(x_proj, mask_bt1, wh_t, h0, c0, *, tt, reverse):
    """Run one direction.  All args already padded / batch-major.

    x_proj : (B, T_pad, 4H)   mask_bt1 : (B, T_pad, 1)
    wh_t   : (H, 4H)          h0, c0   : (B, H)
    """
    B, T_pad, G4 = x_proj.shape
    H = h0.shape[-1]
    num_blocks = T_pad // tt

    if reverse:
        def t_map(g):
            return (0, num_blocks - 1 - g, 0)
    else:
        def t_map(g):
            return (0, g, 0)

    kernel = functools.partial(_lstm_kernel, hidden_size=H, tt=tt,
                               reverse=reverse)

    # NOTE: wh/h0/c0 blocks have constant index_maps; they are small here so
    # double-buffering is harmless.  For very large H, single-buffer them
    # (pipeline_mode=pl.Buffered(1)) to stay within v7x's 64 MiB VMEM.
    h_mat, c_mat = pl.pallas_call(
        kernel,
        out_shape=(jax.ShapeDtypeStruct((B, T_pad, H), jnp.float32),
                   jax.ShapeDtypeStruct((B, T_pad, H), jnp.float32)),
        grid_spec=pltpu.PrefetchScalarGridSpec(
            num_scalar_prefetch=0,
            grid=(num_blocks,),
            in_specs=[
                pl.BlockSpec((B, tt, G4), t_map),          # x_proj time block
                pl.BlockSpec((B, tt, 1), t_map),           # mask time block
                pl.BlockSpec((H, G4), lambda g: (0, 0)),   # Wh^T (invariant)
                pl.BlockSpec((B, H), lambda g: (0, 0)),    # h0
                pl.BlockSpec((B, H), lambda g: (0, 0)),    # c0
            ],
            out_specs=[
                pl.BlockSpec((B, tt, H), t_map),
                pl.BlockSpec((B, tt, H), t_map),
            ],
            scratch_shapes=[pltpu.VMEM((B, H), jnp.float32),
                            pltpu.VMEM((B, H), jnp.float32)],
        ),
        compiler_params=pltpu.CompilerParams(
            dimension_semantics=("arbitrary",),            # sequential carry
            vmem_limit_bytes=64 * 1024 * 1024),
    )(x_proj, mask_bt1, wh_t, h0, c0)
    return h_mat, c_mat


def lstm_forward(params, x, s0, mask=None, bidirectional=False,
                 time_block=8, matmul_dtype=jnp.float32):
    """Mirror of ibp.LSTM.forward for plain (non-interval) tensor inputs."""
    h0, c0 = s0
    B, T, D = x.shape
    H_total = h0.shape[-1]
    H = H_total // 2 if bidirectional else H_total

    if mask is None:
        # Faithful to the reference: with mask=None, h/c are never updated in
        # the loop body, so every timestep's output is simply (h0, c0).
        h_mat = jnp.broadcast_to(h0[:, None, :], (B, T, H_total))
        c_mat = jnp.broadcast_to(c0[:, None, :], (B, T, H_total))
        return h_mat, c_mat

    # Lane/sublane-friendly padding.
    tt = max(8, (time_block // 8) * 8)
    B_pad = _round_up(B, 8)
    H_pad = _round_up(H, 128)
    T_pad = _round_up(T, tt)

    x_p = jnp.pad(x.astype(jnp.float32),
                  ((0, B_pad - B), (0, T_pad - T), (0, 0)))
    mask_p = jnp.pad(mask.astype(jnp.float32),
                     ((0, B_pad - B), (0, T_pad - T)))[..., None]  # (B,T,1)

    def prep_weights(w_i2h, b_i2h, w_h2h, b_h2h):
        # Pad each gate block from H to H_pad (zero rows/cols keep the padded
        # hidden lanes exactly zero through the recurrence).
        wi = jnp.pad(w_i2h.astype(jnp.float32).reshape(4, H, D),
                     ((0, 0), (0, H_pad - H), (0, 0)))
        wh = jnp.pad(w_h2h.astype(jnp.float32).reshape(4, H, H),
                     ((0, 0), (0, H_pad - H), (0, H_pad - H)))
        b = jnp.pad((b_i2h + b_h2h).astype(jnp.float32).reshape(4, H),
                    ((0, 0), (0, H_pad - H)))
        wi_t = wi.reshape(4 * H_pad, D).T                  # (D, 4*H_pad)
        wh_t = wh.reshape(4 * H_pad, H_pad).T              # (H_pad, 4*H_pad)
        return wi_t, wh_t.astype(matmul_dtype), b.reshape(4 * H_pad)

    def prep_state(h, c):
        pad = ((0, B_pad - B), (0, H_pad - H))
        return (jnp.pad(h.astype(jnp.float32), pad),
                jnp.pad(c.astype(jnp.float32), pad))

    def input_proj(wi_t, b):
        # Hoisted i2h: one big matmul with M = B_pad * T_pad.
        xp = jnp.einsum("btd,dg->btg",
                        x_p.astype(matmul_dtype), wi_t.astype(matmul_dtype),
                        preferred_element_type=jnp.float32)
        return xp + b[None, None, :]

    if bidirectional:
        h0_f, h0_b = h0[:, :H], h0[:, H:]
        c0_f, c0_b = c0[:, :H], c0[:, H:]
    else:
        h0_f, c0_f = h0, c0

    wi_t, wh_t, b = prep_weights(params["w_i2h"], params["b_i2h"],
                                 params["w_h2h"], params["b_h2h"])
    h0p, c0p = prep_state(h0_f, c0_f)
    h_f, c_f = _run_direction(input_proj(wi_t, b), mask_p, wh_t, h0p, c0p,
                              tt=tt, reverse=False)
    h_f = h_f[:B, :T, :H]
    c_f = c_f[:B, :T, :H]

    if bidirectional:
        # TODO(synk): on v7x the two independent directions could run on the
        # two TensorCores via core_map; here they are two sequential calls.
        wi_bt, wh_bt, bb = prep_weights(params["w_back_i2h"],
                                        params["b_back_i2h"],
                                        params["w_back_h2h"],
                                        params["b_back_h2h"])
        h0bp, c0bp = prep_state(h0_b, c0_b)
        h_b, c_b = _run_direction(input_proj(wi_bt, bb), mask_p, wh_bt,
                                  h0bp, c0bp, tt=tt, reverse=True)
        h_b = h_b[:B, :T, :H]
        c_b = c_b[:B, :T, :H]
        h_mat = jnp.concatenate([h_f, h_b], axis=-1)
        c_mat = jnp.concatenate([c_f, c_b], axis=-1)
    else:
        h_mat, c_mat = h_f, c_f

    return h_mat, c_mat


def lstm_reference(params, x, s0, mask, bidirectional=False):
    """Pure-JAX reference (f32 scan) for correctness checking."""
    h0, c0 = s0
    H_total = h0.shape[-1]
    H = H_total // 2 if bidirectional else H_total

    def run(Wi, bi, Wh, bh, h0d, c0d, xs, ms):
        def step(carry, inp):
            h, c = carry
            x_t, m_t = inp
            preact = x_t @ Wi.T + bi + h @ Wh.T + bh
            g = jnp.tanh(preact[:, 3 * H:])
            gates = jax.nn.sigmoid(preact[:, :3 * H])
            i = gates[:, :H]
            f = gates[:, H:2 * H]
            o = gates[:, 2 * H:]
            c_t = c * f + i * g
            h_t = o * jnp.tanh(c_t)
            m = m_t[:, None]
            h_n = h_t * m + h * (1.0 - m)
            c_n = c_t * m + c * (1.0 - m)
            return (h_n, c_n), (h_n, c_n)

        _, (hs, cs) = lax.scan(step, (h0d, c0d), (xs, ms))
        return hs, cs                                      # (T, B, H)

    xs = jnp.swapaxes(x, 0, 1)
    ms = jnp.swapaxes(mask, 0, 1)
    if bidirectional:
        h0f, h0b = h0[:, :H], h0[:, H:]
        c0f, c0b = c0[:, :H], c0[:, H:]
        hf, cf = run(params["w_i2h"], params["b_i2h"],
                     params["w_h2h"], params["b_h2h"], h0f, c0f, xs, ms)
        hb, cb = run(params["w_back_i2h"], params["b_back_i2h"],
                     params["w_back_h2h"], params["b_back_h2h"],
                     h0b, c0b, xs[::-1], ms[::-1])
        hs = jnp.concatenate([hf, hb[::-1]], axis=-1)
        cs = jnp.concatenate([cf, cb[::-1]], axis=-1)
    else:
        hs, cs = run(params["w_i2h"], params["b_i2h"],
                     params["w_h2h"], params["b_h2h"], h0, c0, xs, ms)
    return jnp.swapaxes(hs, 0, 1), jnp.swapaxes(cs, 0, 1)


# TODO(synk): IntervalBoundedTensor / DiscreteChoiceTensor / NormBallTensor
# input paths of ibp.Linear are not implemented; only the plain-tensor forward
# path (the standard LSTM recurrence) is kernelized here.

if __name__ == "__main__":
    B, T, D, H = 2, 12, 16, 32

    key = jax.random.PRNGKey(0)
    keys = jax.random.split(key, 16)

    def lin_init(kw, kb, out_f, in_f):
        bound = 1.0 / np.sqrt(in_f)            # nn.Linear default init
        w = jax.random.uniform(kw, (out_f, in_f), jnp.float32, -bound, bound)
        b = jax.random.uniform(kb, (out_f,), jnp.float32, -bound, bound)
        return w, b

    w_i2h, b_i2h = lin_init(keys[0], keys[1], 4 * H, D)
    w_h2h, b_h2h = lin_init(keys[2], keys[3], 4 * H, H)
    w_back_i2h, b_back_i2h = lin_init(keys[4], keys[5], 4 * H, D)
    w_back_h2h, b_back_h2h = lin_init(keys[6], keys[7], 4 * H, H)
    params = dict(w_i2h=w_i2h, b_i2h=b_i2h, w_h2h=w_h2h, b_h2h=b_h2h,
                  w_back_i2h=w_back_i2h, b_back_i2h=b_back_i2h,
                  w_back_h2h=w_back_h2h, b_back_h2h=b_back_h2h)

    x = jax.random.normal(keys[8], (B, T, D), jnp.float32)
    h0 = jax.random.normal(keys[9], (B, H), jnp.float32)
    c0 = jax.random.normal(keys[10], (B, H), jnp.float32)
    h0_bi = jax.random.normal(keys[11], (B, 2 * H), jnp.float32)
    c0_bi = jax.random.normal(keys[12], (B, 2 * H), jnp.float32)

    # 0/1 sequence mask with trailing padding on the second batch row.
    lengths = jnp.array([T, T - 3])
    mask = (jnp.arange(T)[None, :] < lengths[:, None]).astype(jnp.float32)

    # --- unidirectional ---
    h_mat, c_mat = lstm_forward(params, x, (h0, c0), mask=mask)
    jax.block_until_ready((h_mat, c_mat))
    h_ref, c_ref = lstm_reference(params, x, (h0, c0), mask)
    assert h_mat.shape == (B, T, H) and c_mat.shape == (B, T, H)
    assert np.allclose(np.asarray(h_mat), np.asarray(h_ref), atol=5e-5), \
        np.max(np.abs(np.asarray(h_mat) - np.asarray(h_ref)))
    assert np.allclose(np.asarray(c_mat), np.asarray(c_ref), atol=5e-5), \
        np.max(np.abs(np.asarray(c_mat) - np.asarray(c_ref)))

    # --- bidirectional (exercises reversed index_map path) ---
    hb_mat, cb_mat = lstm_forward(params, x, (h0_bi, c0_bi), mask=mask,
                                  bidirectional=True)
    jax.block_until_ready((hb_mat, cb_mat))
    hb_ref, cb_ref = lstm_reference(params, x, (h0_bi, c0_bi), mask,
                                    bidirectional=True)
    assert hb_mat.shape == (B, T, 2 * H) and cb_mat.shape == (B, T, 2 * H)
    assert np.allclose(np.asarray(hb_mat), np.asarray(hb_ref), atol=5e-5), \
        np.max(np.abs(np.asarray(hb_mat) - np.asarray(hb_ref)))
    assert np.allclose(np.asarray(cb_mat), np.asarray(cb_ref), atol=5e-5), \
        np.max(np.abs(np.asarray(cb_mat) - np.asarray(cb_ref)))

    # --- mask=None path (faithful to the reference: outputs == s0) ---
    hn, cn = lstm_forward(params, x, (h0, c0), mask=None)
    jax.block_until_ready((hn, cn))
    assert np.allclose(np.asarray(hn),
                       np.asarray(jnp.broadcast_to(h0[:, None, :], (B, T, H))))

    print("KERNEL_OK")
</pallas_src>

<mosaic_0001>
module attributes {stable_mosaic.version = 11 : i64} {
  func.func @_lstm_kernel(%arg0: i32, %arg1: memref<8x8x512xf32, #tpu.memory_space<vmem>>, %arg2: memref<8x8x1xf32, #tpu.memory_space<vmem>>, %arg3: memref<128x512xf32, #tpu.memory_space<vmem>>, %arg4: memref<8x128xf32, #tpu.memory_space<vmem>>, %arg5: memref<8x128xf32, #tpu.memory_space<vmem>>, %arg6: memref<8x8x128xf32, #tpu.memory_space<vmem>>, %arg7: memref<8x8x128xf32, #tpu.memory_space<vmem>>, %arg8: memref<8x128xf32, #tpu.memory_space<vmem>>, %arg9: memref<8x128xf32, #tpu.memory_space<vmem>>) attributes {dimension_semantics = [#tpu.dimension_semantics<arbitrary>], iteration_bounds = array<i64: 2>, scalar_prefetch = 0 : i64, scratch_operands = 2 : i64, tpu.core_type = #tpu.core_type<tc>, window_params = [{transform_indices = @transform_0, window_bounds = array<i64: 8, 8, 512>}, {transform_indices = @transform_1, window_bounds = array<i64: 8, 8, 1>}, {pipeline_mode = #tpu.pipeline_mode<synchronous>, transform_indices = @transform_2, window_bounds = array<i64: 128, 512>}, {pipeline_mode = #tpu.pipeline_mode<synchronous>, transform_indices = @transform_3, window_bounds = array<i64: 8, 128>}, {pipeline_mode = #tpu.pipeline_mode<synchronous>, transform_indices = @transform_4, window_bounds = array<i64: 8, 128>}, {transform_indices = @transform_5, window_bounds = array<i64: 8, 8, 128>}, {transform_indices = @transform_6, window_bounds = array<i64: 8, 8, 128>}]} {
    %c0_i32 = arith.constant 0 : i32
    %0 = arith.cmpi eq, %arg0, %c0_i32 : i32
    %1 = arith.extui %0 : i1 to i32
    %c0_i32_0 = arith.constant 0 : i32
    %2 = arith.cmpi ne, %1, %c0_i32_0 : i32
    scf.if %2 {
      %c0_114 = arith.constant 0 : index
      %c0_115 = arith.constant 0 : index
      %296 = vector.load %arg4[%c0_114, %c0_115] : memref<8x128xf32, #tpu.memory_space<vmem>>, vector<8x128xf32>
      %c0_116 = arith.constant 0 : index
      %c0_117 = arith.constant 0 : index
      %297 = vector.load %arg8[%c0_116, %c0_117] : memref<8x128xf32, #tpu.memory_space<vmem>>, vector<8x128xf32>
      tpu.vector_store %arg8[%c0_116, %c0_117], %296 {strides = array<i32>} : memref<8x128xf32, #tpu.memory_space<vmem>>, vector<8x128xf32>,
      %c0_118 = arith.constant 0 : index
      %c0_119 = arith.constant 0 : index
      %298 = vector.load %arg5[%c0_118, %c0_119] : memref<8x128xf32, #tpu.memory_space<vmem>>, vector<8x128xf32>
      %c0_120 = arith.constant 0 : index
      %c0_121 = arith.constant 0 : index
      %299 = vector.load %arg9[%c0_120, %c0_121] : memref<8x128xf32, #tpu.memory_space<vmem>>, vector<8x128xf32>
      tpu.vector_store %arg9[%c0_120, %c0_121], %298 {strides = array<i32>} : memref<8x128xf32, #tpu.memory_space<vmem>>, vector<8x128xf32>,
    } else {
    }
    %c0 = arith.constant 0 : index
    %c0_1 = arith.constant 0 : index
    %3 = vector.load %arg8[%c0, %c0_1] : memref<8x128xf32, #tpu.memory_space<vmem>>, vector<8x128xf32>
    %c0_2 = arith.constant 0 : index
    %c0_3 = arith.constant 0 : index
    %4 = vector.load %arg9[%c0_2, %c0_3] : memref<8x128xf32, #tpu.memory_space<vmem>>, vector<8x128xf32>
    %c0_4 = arith.constant 0 : index
    %c0_5 = arith.constant 0 : index
    %5 = vector.load %arg3[%c0_4, %c0_5] : memref<128x512xf32, #tpu.memory_space<vmem>>, vector<128x512xf32>
    %c0_6 = arith.constant 0 : index
    %c0_7 = arith.constant 0 : index
    %c0_8 = arith.constant 0 : index
    %6 = vector.load %arg1[%c0_6, %c0_7, %c0_8] : memref<8x8x512xf32, #tpu.memory_space<vmem>>, vector<8x1x512xf32>
    %7 = vector.shape_cast %6 : vector<8x1x512xf32> to vector<8x512xf32>
    %cst = arith.constant dense<0.000000e+00> : vector<8x512xf32>
    %8 = tpu.matmul %3, %5, %cst {dimension_numbers = #tpu.dot_dimension_numbers<[1], [0], [0], [1], [0, 0, 1, 1], [], []>} : vector<8x128xf32>, vector<128x512xf32>, vector<8x512xf32> -> vector<8x512xf32>
    %9 = arith.addf %7, %8 : vector<8x512xf32>
    %10 = vector.extract_strided_slice %9 {offsets = [0, 384], sizes = [8, 128], strides = [1, 1]} : vector<8x512xf32> to vector<8x128xf32>
    %11 = math.tanh %10 : vector<8x128xf32>
    %12 = vector.extract_strided_slice %9 {offsets = [0, 0], sizes = [8, 384], strides = [1, 1]} : vector<8x512xf32> to vector<8x384xf32>
    %13 = arith.negf %12 : vector<8x384xf32>
    %14 = math.exp %13 : vector<8x384xf32>
    %cst_9 = arith.constant 1.000000e+00 : f32
    %15 = vector.broadcast %cst_9 : f32 to vector<8x384xf32>
    %16 = arith.addf %15, %14 : vector<8x384xf32>
    %17 = arith.divf %15, %16 : vector<8x384xf32>
    %18 = vector.extract_strided_slice %17 {offsets = [0, 0], sizes = [8, 128], strides = [1, 1]} : vector<8x384xf32> to vector<8x128xf32>
    %19 = vector.extract_strided_slice %17 {offsets = [0, 128], sizes = [8, 128], strides = [1, 1]} : vector<8x384xf32> to vector<8x128xf32>
    %20 = vector.extract_strided_slice %17 {offsets = [0, 256], sizes = [8, 128], strides = [1, 1]} : vector<8x384xf32> to vector<8x128xf32>
    %21 = arith.mulf %4, %19 : vector<8x128xf32>
    %22 = arith.mulf %18, %11 : vector<8x128xf32>
    %23 = arith.addf %21, %22 : vector<8x128xf32>
    %24 = math.tanh %23 : vector<8x128xf32>
    %25 = arith.mulf %20, %24 : vector<8x128xf32>
    %c0_10 = arith.constant 0 : index
    %c0_11 = arith.constant 0 : index
    %c0_12 = arith.constant 0 : index
    %26 = vector.load %arg2[%c0_10, %c0_11, %c0_12] : memref<8x8x1xf32, #tpu.memory_space<vmem>>, vector<8x1x1xf32>
    %27 = vector.shape_cast %26 : vector<8x1x1xf32> to vector<8x1xf32>
    %28 = arith.subf %25, %3 : vector<8x128xf32>
    %29 = vector.broadcast %27 : vector<8x1xf32> to vector<8x128xf32>
    %30 = arith.mulf %29, %28 : vector<8x128xf32>
    %31 = arith.addf %3, %30 : vector<8x128xf32>
    %32 = arith.subf %23, %4 : vector<8x128xf32>
    %33 = vector.broadcast %27 : vector<8x1xf32> to vector<8x128xf32>
    %34 = arith.mulf %33, %32 : vector<8x128xf32>
    %35 = arith.addf %4, %34 : vector<8x128xf32>
    %c0_13 = arith.constant 0 : index
    %c0_14 = arith.constant 0 : index
    %c0_15 = arith.constant 0 : index
    %36 = vector.load %arg6[%c0_13, %c0_14, %c0_15] : memref<8x8x128xf32, #tpu.memory_space<vmem>>, vector<8x1x128xf32>
    %37 = vector.shape_cast %36 : vector<8x1x128xf32> to vector<8x128xf32>
    %38 = vector.shape_cast %31 : vector<8x128xf32> to vector<8x1x128xf32>
    tpu.vector_store %arg6[%c0_13, %c0_14, %c0_15], %38 {strides = array<i32>} : memref<8x8x128xf32, #tpu.memory_space<vmem>>, vector<8x1x128xf32>,
    %c0_16 = arith.constant 0 : index
    %c0_17 = arith.constant 0 : index
    %c0_18 = arith.constant 0 : index
    %39 = vector.load %arg7[%c0_16, %c0_17, %c0_18] : memref<8x8x128xf32, #tpu.memory_space<vmem>>, vector<8x1x128xf32>
    %40 = vector.shape_cast %39 : vector<8x1x128xf32> to vector<8x128xf32>
    %41 = vector.shape_cast %35 : vector<8x128xf32> to vector<8x1x128xf32>
    tpu.vector_store %arg7[%c0_16, %c0_17, %c0_18], %41 {strides = array<i32>} : memref<8x8x128xf32, #tpu.memory_space<vmem>>, vector<8x1x128xf32>,
    %c0_19 = arith.constant 0 : index
    %c1 = arith.constant 1 : index
    %c0_20 = arith.constant 0 : index
    %42 = vector.load %arg1[%c0_19, %c1, %c0_20] : memref<8x8x512xf32, #tpu.memory_space<vmem>>, vector<8x1x512xf32>
    %43 = vector.shape_cast %42 : vector<8x1x512xf32> to vector<8x512xf32>
    %cst_21 = arith.constant dense<0.000000e+00> : vector<8x512xf32>
    %44 = tpu.matmul %31, %5, %cst_21 {dimension_numbers = #tpu.dot_dimension_numbers<[1], [0], [0], [1], [0, 0, 1, 1], [], []>} : vector<8x128xf32>, vector<128x512xf32>, vector<8x512xf32> -> vector<8x512xf32>
    %45 = arith.addf %43, %44 : vector<8x512xf32>
    %46 = vector.extract_strided_slice %45 {offsets = [0, 384], sizes = [8, 128], strides = [1, 1]} : vector<8x512xf32> to vector<8x128xf32>
    %47 = math.tanh %46 : vector<8x128xf32>
    %48 = vector.extract_strided_slice %45 {offsets = [0, 0], sizes = [8, 384], strides = [1, 1]} : vector<8x512xf32> to vector<8x384xf32>
    %49 = arith.negf %48 : vector<8x384xf32>
    %50 = math.exp %49 : vector<8x384xf32>
    %cst_22 = arith.constant 1.000000e+00 : f32
    %51 = vector.broadcast %cst_22 : f32 to vector<8x384xf32>
    %52 = arith.addf %51, %50 : vector<8x384xf32>
    %53 = arith.divf %51, %52 : vector<8x384xf32>
    %54 = vector.extract_strided_slice %53 {offsets = [0, 0], sizes = [8, 128], strides = [1, 1]} : vector<8x384xf32> to vector<8x128xf32>
    %55 = vector.extract_strided_slice %53 {offsets = [0, 128], sizes = [8, 128], strides = [1, 1]} : vector<8x384xf32> to vector<8x128xf32>
    %56 = vector.extract_strided_slice %53 {offsets = [0, 256], sizes = [8, 128], strides = [1, 1]} : vector<8x384xf32> to vector<8x128xf32>
    %57 = arith.mulf %35, %55 : vector<8x128xf32>
    %58 = arith.mulf %54, %47 : vector<8x128xf32>
    %59 = arith.addf %57, %58 : vector<8x128xf32>
    %60 = math.tanh %59 : vector<8x128xf32>
    %61 = arith.mulf %56, %60 : vector<8x128xf32>
    %c0_23 = arith.constant 0 : index
    %c1_24 = arith.constant 1 : index
    %c0_25 = arith.constant 0 : index
    %62 = vector.load %arg2[%c0_23, %c1_24, %c0_25] : memref<8x8x1xf32, #tpu.memory_space<vmem>>, vector<8x1x1xf32>
    %63 = vector.shape_cast %62 : vector<8x1x1xf32> to vector<8x1xf32>
    %64 = arith.subf %61, %31 : vector<8x128xf32>
    %65 = vector.broadcast %63 : vector<8x1xf32> to vector<8x128xf32>
    %66 = arith.mulf %65, %64 : vector<8x128xf32>
    %67 = arith.addf %31, %66 : vector<8x128xf32>
    %68 = arith.subf %59, %35 : vector<8x128xf32>
    %69 = vector.broadcast %63 : vector<8x1xf32> to vector<8x128xf32>
    %70 = arith.mulf %69, %68 : vector<8x128xf32>
    %71 = arith.addf %35, %70 : vector<8x128xf32>
    %c0_26 = arith.constant 0 : index
    %c1_27 = arith.constant 1 : index
    %c0_28 = arith.constant 0 : index
    %72 = vector.load %arg6[%c0_26, %c1_27, %c0_28] : memref<8x8x128xf32, #tpu.memory_space<vmem>>, vector<8x1x128xf32>
    %73 = vector.shape_cast %72 : vector<8x1x128xf32> to vector<8x128xf32>
    %74 = vector.shape_cast %67 : vector<8x128xf32> to vector<8x1x128xf32>
    tpu.vector_store %arg6[%c0_26, %c1_27, %c0_28], %74 {strides = array<i32>} : memref<8x8x128xf32, #tpu.memory_space<vmem>>, vector<8x1x128xf32>,
    %c0_29 = arith.constant 0 : index
    %c1_30 = arith.constant 1 : index
    %c0_31 = arith.constant 0 : index
    %75 = vector.load %arg7[%c0_29, %c1_30, %c0_31] : memref<8x8x128xf32, #tpu.memory_space<vmem>>, vector<8x1x128xf32>
    %76 = vector.shape_cast %75 : vector<8x1x128xf32> to vector<8x128xf32>
    %77 = vector.shape_cast %71 : vector<8x128xf32> to vector<8x1x128xf32>
    tpu.vector_store %arg7[%c0_29, %c1_30, %c0_31], %77 {strides = array<i32>} : memref<8x8x128xf32, #tpu.memory_space<vmem>>, vector<8x1x128xf32>,
    %c0_32 = arith.constant 0 : index
    %c2 = arith.constant 2 : index
    %c0_33 = arith.constant 0 : index
    %78 = vector.load %arg1[%c0_32, %c2, %c0_33] : memref<8x8x512xf32, #tpu.memory_space<vmem>>, vector<8x1x512xf32>
    %79 = vector.shape_cast %78 : vector<8x1x512xf32> to vector<8x512xf32>
    %cst_34 = arith.constant dense<0.000000e+00> : vector<8x512xf32>
    %80 = tpu.matmul %67, %5, %cst_34 {dimension_numbers = #tpu.dot_dimension_numbers<[1], [0], [0], [1], [0, 0, 1, 1], [], []>} : vector<8x128xf32>, vector<128x512xf32>, vector<8x512xf32> -> vector<8x512xf32>
    %81 = arith.addf %79, %80 : vector<8x512xf32>
    %82 = vector.extract_strided_slice %81 {offsets = [0, 384], sizes = [8, 128], strides = [1, 1]} : vector<8x512xf32> to vector<8x128xf32>
    %83 = math.tanh %82 : vector<8x128xf32>
    %84 = vector.extract_strided_slice %81 {offsets = [0, 0], sizes = [8, 384], strides = [1, 1]} : vector<8x512xf32> to vector<8x384xf32>
    %85 = arith.negf %84 : vector<8x384xf32>
    %86 = math.exp %85 : vector<8x384xf32>
    %cst_35 = arith.constant 1.000000e+00 : f32
    %87 = vector.broadcast %cst_35 : f32 to vector<8x384xf32>
    %88 = arith.addf %87, %86 : vector<8x384xf32>
    %89 = arith.divf %87, %88 : vector<8x384xf32>
    %90 = vector.extract_strided_slice %89 {offsets = [0, 0], sizes = [8, 128], strides = [1, 1]} : vector<8x384xf32> to vector<8x128xf32>
    %91 = vector.extract_strided_slice %89 {offsets = [0, 128], sizes = [8, 128], strides = [1, 1]} : vector<8x384xf32> to vector<8x128xf32>
    %92 = vector.extract_strided_slice %89 {offsets = [0, 256], sizes = [8, 128], strides = [1, 1]} : vector<8x384xf32> to vector<8x128xf32>
    %93 = arith.mulf %71, %91 : vector<8x128xf32>
    %94 = arith.mulf %90, %83 : vector<8x128xf32>
    %95 = arith.addf %93, %94 : vector<8x128xf32>
    %96 = math.tanh %95 : vector<8x128xf32>
    %97 = arith.mulf %92, %96 : vector<8x128xf32>
    %c0_36 = arith.constant 0 : index
    %c2_37 = arith.constant 2 : index
    %c0_38 = arith.constant 0 : index
    %98 = vector.load %arg2[%c0_36, %c2_37, %c0_38] : memref<8x8x1xf32, #tpu.memory_space<vmem>>, vector<8x1x1xf32>
    %99 = vector.shape_cast %98 : vector<8x1x1xf32> to vector<8x1xf32>
    %100 = arith.subf %97, %67 : vector<8x128xf32>
    %101 = vector.broadcast %99 : vector<8x1xf32> to vector<8x128xf32>
    %102 = arith.mulf %101, %100 : vector<8x128xf32>
    %103 = arith.addf %67, %102 : vector<8x128xf32>
    %104 = arith.subf %95, %71 : vector<8x128xf32>
    %105 = vector.broadcast %99 : vector<8x1xf32> to vector<8x128xf32>
    %106 = arith.mulf %105, %104 : vector<8x128xf32>
    %107 = arith.addf %71, %106 : vector<8x128xf32>
    %c0_39 = arith.constant 0 : index
    %c2_40 = arith.constant 2 : index
    %c0_41 = arith.constant 0 : index
    %108 = vector.load %arg6[%c0_39, %c2_40, %c0_41] : memref<8x8x128xf32, #tpu.memory_space<vmem>>, vector<8x1x128xf32>
    %109 = vector.shape_cast %108 : vector<8x1x128xf32> to vector<8x128xf32>
    %110 = vector.shape_cast %103 : vector<8x128xf32> to vector<8x1x128xf32>
    tpu.vector_store %arg6[%c0_39, %c2_40, %c0_41], %110 {strides = array<i32>} : memref<8x8x128xf32, #tpu.memory_space<vmem>>, vector<8x1x128xf32>,
    %c0_42 = arith.constant 0 : index
    %c2_43 = arith.constant 2 : index
    %c0_44 = arith.constant 0 : index
    %111 = vector.load %arg7[%c0_42, %c2_43, %c0_44] : memref<8x8x128xf32, #tpu.memory_space<vmem>>, vector<8x1x128xf32>
    %112 = vector.shape_cast %111 : vector<8x1x128xf32> to vector<8x128xf32>
    %113 = vector.shape_cast %107 : vector<8x128xf32> to vector<8x1x128xf32>
    tpu.vector_store %arg7[%c0_42, %c2_43, %c0_44], %113 {strides = array<i32>} : memref<8x8x128xf32, #tpu.memory_space<vmem>>, vector<8x1x128xf32>,
    %c0_45 = arith.constant 0 : index
    %c3 = arith.constant 3 : index
    %c0_46 = arith.constant 0 : index
    %114 = vector.load %arg1[%c0_45, %c3, %c0_46] : memref<8x8x512xf32, #tpu.memory_space<vmem>>, vector<8x1x512xf32>
    %115 = vector.shape_cast %114 : vector<8x1x512xf32> to vector<8x512xf32>
    %cst_47 = arith.constant dense<0.000000e+00> : vector<8x512xf32>
    %116 = tpu.matmul %103, %5, %cst_47 {dimension_numbers = #tpu.dot_dimension_numbers<[1], [0], [0], [1], [0, 0, 1, 1], [], []>} : vector<8x128xf32>, vector<128x512xf32>, vector<8x512xf32> -> vector<8x512xf32>
    %117 = arith.addf %115, %116 : vector<8x512xf32>
    %118 = vector.extract_strided_slice %117 {offsets = [0, 384], sizes = [8, 128], strides = [1, 1]} : vector<8x512xf32> to vector<8x128xf32>
    %119 = math.tanh %118 : vector<8x128xf32>
    %120 = vector.extract_strided_slice %117 {offsets = [0, 0], sizes = [8, 384], strides = [1, 1]} : vector<8x512xf32> to vector<8x384xf32>
    %121 = arith.negf %120 : vector<8x384xf32>
    %122 = math.exp %121 : vector<8x384xf32>
    %cst_48 = arith.constant 1.000000e+00 : f32
    %123 = vector.broadcast %cst_48 : f32 to vector<8x384xf32>
    %124 = arith.addf %123, %122 : vector<8x384xf32>
    %125 = arith.divf %123, %124 : vector<8x384xf32>
    %126 = vector.extract_strided_slice %125 {offsets = [0, 0], sizes = [8, 128], strides = [1, 1]} : vector<8x384xf32> to vector<8x128xf32>
    %127 = vector.extract_strided_slice %125 {offsets = [0, 128], sizes = [8, 128], strides = [1, 1]} : vector<8x384xf32> to vector<8x128xf32>
    %128 = vector.extract_strided_slice %125 {offsets = [0, 256], sizes = [8, 128], strides = [1, 1]} : vector<8x384xf32> to vector<8x128xf32>
    %129 = arith.mulf %107, %127 : vector<8x128xf32>
    %130 = arith.mulf %126, %119 : vector<8x128xf32>
    %131 = arith.addf %129, %130 : vector<8x128xf32>
    %132 = math.tanh %131 : vector<8x128xf32>
    %133 = arith.mulf %128, %132 : vector<8x128xf32>
    %c0_49 = arith.constant 0 : index
    %c3_50 = arith.constant 3 : index
    %c0_51 = arith.constant 0 : index
    %134 = vector.load %arg2[%c0_49, %c3_50, %c0_51] : memref<8x8x1xf32, #tpu.memory_space<vmem>>, vector<8x1x1xf32>
    %135 = vector.shape_cast %134 : vector<8x1x1xf32> to vector<8x1xf32>
    %136 = arith.subf %133, %103 : vector<8x128xf32>
    %137 = vector.broadcast %135 : vector<8x1xf32> to vector<8x128xf32>
    %138 = arith.mulf %137, %136 : vector<8x128xf32>
    %139 = arith.addf %103, %138 : vector<8x128xf32>
    %140 = arith.subf %131, %107 : vector<8x128xf32>
    %141 = vector.broadcast %135 : vector<8x1xf32> to vector<8x128xf32>
    %142 = arith.mulf %141, %140 : vector<8x128xf32>
    %143 = arith.addf %107, %142 : vector<8x128xf32>
    %c0_52 = arith.constant 0 : index
    %c3_53 = arith.constant 3 : index
    %c0_54 = arith.constant 0 : index
    %144 = vector.load %arg6[%c0_52, %c3_53, %c0_54] : memref<8x8x128xf32, #tpu.memory_space<vmem>>, vector<8x1x128xf32>
    %145 = vector.shape_cast %144 : vector<8x1x128xf32> to vector<8x128xf32>
    %146 = vector.shape_cast %139 : vector<8x128xf32> to vector<8x1x128xf32>
    tpu.vector_store %arg6[%c0_52, %c3_53, %c0_54], %146 {strides = array<i32>} : memref<8x8x128xf32, #tpu.memory_space<vmem>>, vector<8x1x128xf32>,
    %c0_55 = arith.constant 0 : index
    %c3_56 = arith.constant 3 : index
    %c0_57 = arith.constant 0 : index
    %147 = vector.load %arg7[%c0_55, %c3_56, %c0_57] : memref<8x8x128xf32, #tpu.memory_space<vmem>>, vector<8x1x128xf32>
    %148 = vector.shape_cast %147 : vector<8x1x128xf32> to vector<8x128xf32>
    %149 = vector.shape_cast %143 : vector<8x128xf32> to vector<8x1x128xf32>
    tpu.vector_store %arg7[%c0_55, %c3_56, %c0_57], %149 {strides = array<i32>} : memref<8x8x128xf32, #tpu.memory_space<vmem>>, vector<8x1x128xf32>,
    %c0_58 = arith.constant 0 : index
    %c4 = arith.constant 4 : index
    %c0_59 = arith.constant 0 : index
    %150 = vector.load %arg1[%c0_58, %c4, %c0_59] : memref<8x8x512xf32, #tpu.memory_space<vmem>>, vector<8x1x512xf32>
    %151 = vector.shape_cast %150 : vector<8x1x512xf32> to vector<8x512xf32>
    %cst_60 = arith.constant dense<0.000000e+00> : vector<8x512xf32>
    %152 = tpu.matmul %139, %5, %cst_60 {dimension_numbers = #tpu.dot_dimension_numbers<[1], [0], [0], [1], [0, 0, 1, 1], [], []>} : vector<8x128xf32>, vector<128x512xf32>, vector<8x512xf32> -> vector<8x512xf32>
    %153 = arith.addf %151, %152 : vector<8x512xf32>
    %154 = vector.extract_strided_slice %153 {offsets = [0, 384], sizes = [8, 128], strides = [1, 1]} : vector<8x512xf32> to vector<8x128xf32>
    %155 = math.tanh %154 : vector<8x128xf32>
    %156 = vector.extract_strided_slice %153 {offsets = [0, 0], sizes = [8, 384], strides = [1, 1]} : vector<8x512xf32> to vector<8x384xf32>
    %157 = arith.negf %156 : vector<8x384xf32>
    %158 = math.exp %157 : vector<8x384xf32>
    %cst_61 = arith.constant 1.000000e+00 : f32
    %159 = vector.broadcast %cst_61 : f32 to vector<8x384xf32>
    %160 = arith.addf %159, %158 : vector<8x384xf32>
    %161 = arith.divf %159, %160 : vector<8x384xf32>
    %162 = vector.extract_strided_slice %161 {offsets = [0, 0], sizes = [8, 128], strides = [1, 1]} : vector<8x384xf32> to vector<8x128xf32>
    %163 = vector.extract_strided_slice %161 {offsets = [0, 128], sizes = [8, 128], strides = [1, 1]} : vector<8x384xf32> to vector<8x128xf32>
    %164 = vector.extract_strided_slice %161 {offsets = [0, 256], sizes = [8, 128], strides = [1, 1]} : vector<8x384xf32> to vector<8x128xf32>
    %165 = arith.mulf %143, %163 : vector<8x128xf32>
    %166 = arith.mulf %162, %155 : vector<8x128xf32>
    %167 = arith.addf %165, %166 : vector<8x128xf32>
    %168 = math.tanh %167 : vector<8x128xf32>
    %169 = arith.mulf %164, %168 : vector<8x128xf32>
    %c0_62 = arith.constant 0 : index
    %c4_63 = arith.constant 4 : index
    %c0_64 = arith.constant 0 : index
    %170 = vector.load %arg2[%c0_62, %c4_63, %c0_64] : memref<8x8x1xf32, #tpu.memory_space<vmem>>, vector<8x1x1xf32>
    %171 = vector.shape_cast %170 : vector<8x1x1xf32> to vector<8x1xf32>
    %172 = arith.subf %169, %139 : vector<8x128xf32>
    %173 = vector.broadcast %171 : vector<8x1xf32> to vector<8x128xf32>
    %174 = arith.mulf %173, %172 : vector<8x128xf32>
    %175 = arith.addf %139, %174 : vector<8x128xf32>
    %176 = arith.subf %167, %143 : vector<8x128xf32>
    %177 = vector.broadcast %171 : vector<8x1xf32> to vector<8x128xf32>
    %178 = arith.mulf %177, %176 : vector<8x128xf32>
    %179 = arith.addf %143, %178 : vector<8x128xf32>
    %c0_65 = arith.constant 0 : index
    %c4_66 = arith.constant 4 : index
    %c0_67 = arith.constant 0 : index
    %180 = vector.load %arg6[%c0_65, %c4_66, %c0_67] : memref<8x8x128xf32, #tpu.memory_space<vmem>>, vector<8x1x128xf32>
    %181 = vector.shape_cast %180 : vector<8x1x128xf32> to vector<8x128xf32>
    %182 = vector.shape_cast %175 : vector<8x128xf32> to vector<8x1x128xf32>
    tpu.vector_store %arg6[%c0_65, %c4_66, %c0_67], %182 {strides = array<i32>} : memref<8x8x128xf32, #tpu.memory_space<vmem>>, vector<8x1x128xf32>,
    %c0_68 = arith.constant 0 : index
    %c4_69 = arith.constant 4 : index
    %c0_70 = arith.constant 0 : index
    %183 = vector.load %arg7[%c0_68, %c4_69, %c0_70] : memref<8x8x128xf32, #tpu.memory_space<vmem>>, vector<8x1x128xf32>
    %184 = vector.shape_cast %183 : vector<8x1x128xf32> to vector<8x128xf32>
    %185 = vector.shape_cast %179 : vector<8x128xf32> to vector<8x1x128xf32>
    tpu.vector_store %arg7[%c0_68, %c4_69, %c0_70], %185 {strides = array<i32>} : memref<8x8x128xf32, #tpu.memory_space<vmem>>, vector<8x1x128xf32>,
    %c0_71 = arith.constant 0 : index
    %c5 = arith.constant 5 : index
    %c0_72 = arith.constant 0 : index
    %186 = vector.load %arg1[%c0_71, %c5, %c0_72] : memref<8x8x512xf32, #tpu.memory_space<vmem>>, vector<8x1x512xf32>
    %187 = vector.shape_cast %186 : vector<8x1x512xf32> to vector<8x512xf32>
    %cst_73 = arith.constant dense<0.000000e+00> : vector<8x512xf32>
    %188 = tpu.matmul %175, %5, %cst_73 {dimension_numbers = #tpu.dot_dimension_numbers<[1], [0], [0], [1], [0, 0, 1, 1], [], []>} : vector<8x128xf32>, vector<128x512xf32>, vector<8x512xf32> -> vector<8x512xf32>
    %189 = arith.addf %187, %188 : vector<8x512xf32>
    %190 = vector.extract_strided_slice %189 {offsets = [0, 384], sizes = [8, 128], strides = [1, 1]} : vector<8x512xf32> to vector<8x128xf32>
    %191 = math.tanh %190 : vector<8x128xf32>
    %192 = vector.extract_strided_slice %189 {offsets = [0, 0], sizes = [8, 384], strides = [1, 1]} : vector<8x512xf32> to vector<8x384xf32>
    %193 = arith.negf %192 : vector<8x384xf32>
    %194 = math.exp %193 : vector<8x384xf32>
    %cst_74 = arith.constant 1.000000e+00 : f32
    %195 = vector.broadcast %cst_74 : f32 to vector<8x384xf32>
    %196 = arith.addf %195, %194 : vector<8x384xf32>
    %197 = arith.divf %195, %196 : vector<8x384xf32>
    %198 = vector.extract_strided_slice %197 {offsets = [0, 0], sizes = [8, 128], strides = [1, 1]} : vector<8x384xf32> to vector<8x128xf32>
    %199 = vector.extract_strided_slice %197 {offsets = [0, 128], sizes = [8, 128], strides = [1, 1]} : vector<8x384xf32> to vector<8x128xf32>
    %200 = vector.extract_strided_slice %197 {offsets = [0, 256], sizes = [8, 128], strides = [1, 1]} : vector<8x384xf32> to vector<8x128xf32>
    %201 = arith.mulf %179, %199 : vector<8x128xf32>
    %202 = arith.mulf %198, %191 : vector<8x128xf32>
    %203 = arith.addf %201, %202 : vector<8x128xf32>
    %204 = math.tanh %203 : vector<8x128xf32>
    %205 = arith.mulf %200, %204 : vector<8x128xf32>
    %c0_75 = arith.constant 0 : index
    %c5_76 = arith.constant 5 : index
    %c0_77 = arith.constant 0 : index
    %206 = vector.load %arg2[%c0_75, %c5_76, %c0_77] : memref<8x8x1xf32, #tpu.memory_space<vmem>>, vector<8x1x1xf32>
    %207 = vector.shape_cast %206 : vector<8x1x1xf32> to vector<8x1xf32>
    %208 = arith.subf %205, %175 : vector<8x128xf32>
    %209 = vector.broadcast %207 : vector<8x1xf32> to vector<8x128xf32>
    %210 = arith.mulf %209, %208 : vector<8x128xf32>
    %211 = arith.addf %175, %210 : vector<8x128xf32>
    %212 = arith.subf %203, %179 : vector<8x128xf32>
    %213 = vector.broadcast %207 : vector<8x1xf32> to vector<8x128xf32>
    %214 = arith.mulf %213, %212 : vector<8x128xf32>
    %215 = arith.addf %179, %214 : vector<8x128xf32>
    %c0_78 = arith.constant 0 : index
    %c5_79 = arith.constant 5 : index
    %c0_80 = arith.constant 0 : index
    %216 = vector.load %arg6[%c0_78, %c5_79, %c0_80] : memref<8x8x128xf32, #tpu.memory_space<vmem>>, vector<8x1x128xf32>
    %217 = vector.shape_cast %216 : vector<8x1x128xf32> to vector<8x128xf32>
    %218 = vector.shape_cast %211 : vector<8x128xf32> to vector<8x1x128xf32>
    tpu.vector_store %arg6[%c0_78, %c5_79, %c0_80], %218 {strides = array<i32>} : memref<8x8x128xf32, #tpu.memory_space<vmem>>, vector<8x1x128xf32>,
    %c0_81 = arith.constant 0 : index
    %c5_82 = arith.constant 5 : index
    %c0_83 = arith.constant 0 : index
    %219 = vector.load %arg7[%c0_81, %c5_82, %c0_83] : memref<8x8x128xf32, #tpu.memory_space<vmem>>, vector<8x1x128xf32>
    %220 = vector.shape_cast %219 : vector<8x1x128xf32> to vector<8x128xf32>
    %221 = vector.shape_cast %215 : vector<8x128xf32> to vector<8x1x128xf32>
    tpu.vector_store %arg7[%c0_81, %c5_82, %c0_83], %221 {strides = array<i32>} : memref<8x8x128xf32, #tpu.memory_space<vmem>>, vector<8x1x128xf32>,
    %c0_84 = arith.constant 0 : index
    %c6 = arith.constant 6 : index
    %c0_85 = arith.constant 0 : index
    %222 = vector.load %arg1[%c0_84, %c6, %c0_85] : memref<8x8x512xf32, #tpu.memory_space<vmem>>, vector<8x1x512xf32>
    %223 = vector.shape_cast %222 : vector<8x1x512xf32> to vector<8x512xf32>
    %cst_86 = arith.constant dense<0.000000e+00> : vector<8x512xf32>
    %224 = tpu.matmul %211, %5, %cst_86 {dimension_numbers = #tpu.dot_dimension_numbers<[1], [0], [0], [1], [0, 0, 1, 1], [], []>} : vector<8x128xf32>, vector<128x512xf32>, vector<8x512xf32> -> vector<8x512xf32>
    %225 = arith.addf %223, %224 : vector<8x512xf32>
    %226 = vector.extract_strided_slice %225 {offsets = [0, 384], sizes = [8, 128], strides = [1, 1]} : vector<8x512xf32> to vector<8x128xf32>
    %227 = math.tanh %226 : vector<8x128xf32>
    %228 = vector.extract_strided_slice %225 {offsets = [0, 0], sizes = [8, 384], strides = [1, 1]} : vector<8x512xf32> to vector<8x384xf32>
    %229 = arith.negf %228 : vector<8x384xf32>
    %230 = math.exp %229 : vector<8x384xf32>
    %cst_87 = arith.constant 1.000000e+00 : f32
    %231 = vector.broadcast %cst_87 : f32 to vector<8x384xf32>
    %232 = arith.addf %231, %230 : vector<8x384xf32>
    %233 = arith.divf %231, %232 : vector<8x384xf32>
    %234 = vector.extract_strided_slice %233 {offsets = [0, 0], sizes = [8, 128], strides = [1, 1]} : vector<8x384xf32> to vector<8x128xf32>
    %235 = vector.extract_strided_slice %233 {offsets = [0, 128], sizes = [8, 128], strides = [1, 1]} : vector<8x384xf32> to vector<8x128xf32>
    %236 = vector.extract_strided_slice %233 {offsets = [0, 256], sizes = [8, 128], strides = [1, 1]} : vector<8x384xf32> to vector<8x128xf32>
    %237 = arith.mulf %215, %235 : vector<8x128xf32>
    %238 = arith.mulf %234, %227 : vector<8x128xf32>
    %239 = arith.addf %237, %238 : vector<8x128xf32>
    %240 = math.tanh %239 : vector<8x128xf32>
    %241 = arith.mulf %236, %240 : vector<8x128xf32>
    %c0_88 = arith.constant 0 : index
    %c6_89 = arith.constant 6 : index
    %c0_90 = arith.constant 0 : index
    %242 = vector.load %arg2[%c0_88, %c6_89, %c0_90] : memref<8x8x1xf32, #tpu.memory_space<vmem>>, vector<8x1x1xf32>
    %243 = vector.shape_cast %242 : vector<8x1x1xf32> to vector<8x1xf32>
    %244 = arith.subf %241, %211 : vector<8x128xf32>
    %245 = vector.broadcast %243 : vector<8x1xf32> to vector<8x128xf32>
    %246 = arith.mulf %245, %244 : vector<8x128xf32>
    %247 = arith.addf %211, %246 : vector<8x128xf32>
    %248 = arith.subf %239, %215 : vector<8x128xf32>
    %249 = vector.broadcast %243 : vector<8x1xf32> to vector<8x128xf32>
    %250 = arith.mulf %249, %248 : vector<8x128xf32>
    %251 = arith.addf %215, %250 : vector<8x128xf32>
    %c0_91 = arith.constant 0 : index
    %c6_92 = arith.constant 6 : index
    %c0_93 = arith.constant 0 : index
    %252 = vector.load %arg6[%c0_91, %c6_92, %c0_93] : memref<8x8x128xf32, #tpu.memory_space<vmem>>, vector<8x1x128xf32>
    %253 = vector.shape_cast %252 : vector<8x1x128xf32> to vector<8x128xf32>
    %254 = vector.shape_cast %247 : vector<8x128xf32> to vector<8x1x128xf32>
    tpu.vector_store %arg6[%c0_91, %c6_92, %c0_93], %254 {strides = array<i32>} : memref<8x8x128xf32, #tpu.memory_space<vmem>>, vector<8x1x128xf32>,
    %c0_94 = arith.constant 0 : index
    %c6_95 = arith.constant 6 : index
    %c0_96 = arith.constant 0 : index
    %255 = vector.load %arg7[%c0_94, %c6_95, %c0_96] : memref<8x8x128xf32, #tpu.memory_space<vmem>>, vector<8x1x128xf32>
    %256 = vector.shape_cast %255 : vector<8x1x128xf32> to vector<8x128xf32>
    %257 = vector.shape_cast %251 : vector<8x128xf32> to vector<8x1x128xf32>
    tpu.vector_store %arg7[%c0_94, %c6_95, %c0_96], %257 {strides = array<i32>} : memref<8x8x128xf32, #tpu.memory_space<vmem>>, vector<8x1x128xf32>,
    %c0_97 = arith.constant 0 : index
    %c7 = arith.constant 7 : index
    %c0_98 = arith.constant 0 : index
    %258 = vector.load %arg1[%c0_97, %c7, %c0_98] : memref<8x8x512xf32, #tpu.memory_space<vmem>>, vector<8x1x512xf32>
    %259 = vector.shape_cast %258 : vector<8x1x512xf32> to vector<8x512xf32>
    %cst_99 = arith.constant dense<0.000000e+00> : vector<8x512xf32>
    %260 = tpu.matmul %247, %5, %cst_99 {dimension_numbers = #tpu.dot_dimension_numbers<[1], [0], [0], [1], [0, 0, 1, 1], [], []>} : vector<8x128xf32>, vector<128x512xf32>, vector<8x512xf32> -> vector<8x512xf32>
    %261 = arith.addf %259, %260 : vector<8x512xf32>
    %262 = vector.extract_strided_slice %261 {offsets = [0, 384], sizes = [8, 128], strides = [1, 1]} : vector<8x512xf32> to vector<8x128xf32>
    %263 = math.tanh %262 : vector<8x128xf32>
    %264 = vector.extract_strided_slice %261 {offsets = [0, 0], sizes = [8, 384], strides = [1, 1]} : vector<8x512xf32> to vector<8x384xf32>
    %265 = arith.negf %264 : vector<8x384xf32>
    %266 = math.exp %265 : vector<8x384xf32>
    %cst_100 = arith.constant 1.000000e+00 : f32
    %267 = vector.broadcast %cst_100 : f32 to vector<8x384xf32>
    %268 = arith.addf %267, %266 : vector<8x384xf32>
    %269 = arith.divf %267, %268 : vector<8x384xf32>
    %270 = vector.extract_strided_slice %269 {offsets = [0, 0], sizes = [8, 128], strides = [1, 1]} : vector<8x384xf32> to vector<8x128xf32>
    %271 = vector.extract_strided_slice %269 {offsets = [0, 128], sizes = [8, 128], strides = [1, 1]} : vector<8x384xf32> to vector<8x128xf32>
    %272 = vector.extract_strided_slice %269 {offsets = [0, 256], sizes = [8, 128], strides = [1, 1]} : vector<8x384xf32> to vector<8x128xf32>
    %273 = arith.mulf %251, %271 : vector<8x128xf32>
    %274 = arith.mulf %270, %263 : vector<8x128xf32>
    %275 = arith.addf %273, %274 : vector<8x128xf32>
    %276 = math.tanh %275 : vector<8x128xf32>
    %277 = arith.mulf %272, %276 : vector<8x128xf32>
    %c0_101 = arith.constant 0 : index
    %c7_102 = arith.constant 7 : index
    %c0_103 = arith.constant 0 : index
    %278 = vector.load %arg2[%c0_101, %c7_102, %c0_103] : memref<8x8x1xf32, #tpu.memory_space<vmem>>, vector<8x1x1xf32>
    %279 = vector.shape_cast %278 : vector<8x1x1xf32> to vector<8x1xf32>
    %280 = arith.subf %277, %247 : vector<8x128xf32>
    %281 = vector.broadcast %279 : vector<8x1xf32> to vector<8x128xf32>
    %282 = arith.mulf %281, %280 : vector<8x128xf32>
    %283 = arith.addf %247, %282 : vector<8x128xf32>
    %284 = arith.subf %275, %251 : vector<8x128xf32>
    %285 = vector.broadcast %279 : vector<8x1xf32> to vector<8x128xf32>
    %286 = arith.mulf %285, %284 : vector<8x128xf32>
    %287 = arith.addf %251, %286 : vector<8x128xf32>
    %c0_104 = arith.constant 0 : index
    %c7_105 = arith.constant 7 : index
    %c0_106 = arith.constant 0 : index
    %288 = vector.load %arg6[%c0_104, %c7_105, %c0_106] : memref<8x8x128xf32, #tpu.memory_space<vmem>>, vector<8x1x128xf32>
    %289 = vector.shape_cast %288 : vector<8x1x128xf32> to vector<8x128xf32>
    %290 = vector.shape_cast %283 : vector<8x128xf32> to vector<8x1x128xf32>
    tpu.vector_store %arg6[%c0_104, %c7_105, %c0_106], %290 {strides = array<i32>} : memref<8x8x128xf32, #tpu.memory_space<vmem>>, vector<8x1x128xf32>,
    %c0_107 = arith.constant 0 : index
    %c7_108 = arith.constant 7 : index
    %c0_109 = arith.constant 0 : index
    %291 = vector.load %arg7[%c0_107, %c7_108, %c0_109] : memref<8x8x128xf32, #tpu.memory_space<vmem>>, vector<8x1x128xf32>
    %292 = vector.shape_cast %291 : vector<8x1x128xf32> to vector<8x128xf32>
    %293 = vector.shape_cast %287 : vector<8x128xf32> to vector<8x1x128xf32>
    tpu.vector_store %arg7[%c0_107, %c7_108, %c0_109], %293 {strides = array<i32>} : memref<8x8x128xf32, #tpu.memory_space<vmem>>, vector<8x1x128xf32>,
    %c0_110 = arith.constant 0 : index
    %c0_111 = arith.constant 0 : index
    %294 = vector.load %arg8[%c0_110, %c0_111] : memref<8x128xf32, #tpu.memory_space<vmem>>, vector<8x128xf32>
    tpu.vector_store %arg8[%c0_110, %c0_111], %283 {strides = array<i32>} : memref<8x128xf32, #tpu.memory_space<vmem>>, vector<8x128xf32>,
    %c0_112 = arith.constant 0 : index
    %c0_113 = arith.constant 0 : index
    %295 = vector.load %arg9[%c0_112, %c0_113] : memref<8x128xf32, #tpu.memory_space<vmem>>, vector<8x128xf32>
    tpu.vector_store %arg9[%c0_112, %c0_113], %287 {strides = array<i32>} : memref<8x128xf32, #tpu.memory_space<vmem>>, vector<8x128xf32>,
    return
  }
  func.func @transform_0(%arg0: i32) -> (i32, i32, i32) {
    %c0_i32 = arith.constant 0 : i32
    %c0_i32_0 = arith.constant 0 : i32
    %c0_i32_1 = arith.constant 0 : i32
    return %c0_i32, %arg0, %c0_i32_0 : i32, i32, i32
  }
  func.func @transform_1(%arg0: i32) -> (i32, i32, i32) {
    %c0_i32 = arith.constant 0 : i32
    %c0_i32_0 = arith.constant 0 : i32
    %c0_i32_1 = arith.constant 0 : i32
    return %c0_i32, %arg0, %c0_i32_0 : i32, i32, i32
  }
  func.func @transform_2(%arg0: i32) -> (i32, i32) {
    %c0_i32 = arith.constant 0 : i32
    %c0_i32_0 = arith.constant 0 : i32
    %c0_i32_1 = arith.constant 0 : i32
    return %c0_i32, %c0_i32_0 : i32, i32
  }
  func.func @transform_3(%arg0: i32) -> (i32, i32) {
    %c0_i32 = arith.constant 0 : i32
    %c0_i32_0 = arith.constant 0 : i32
    %c0_i32_1 = arith.constant 0 : i32
    return %c0_i32, %c0_i32_0 : i32, i32
  }
  func.func @transform_4(%arg0: i32) -> (i32, i32) {
    %c0_i32 = arith.constant 0 : i32
    %c0_i32_0 = arith.constant 0 : i32
    %c0_i32_1 = arith.constant 0 : i32
    return %c0_i32, %c0_i32_0 : i32, i32
  }
  func.func @transform_5(%arg0: i32) -> (i32, i32, i32) {
    %c0_i32 = arith.constant 0 : i32
    %c0_i32_0 = arith.constant 0 : i32
    %c0_i32_1 = arith.constant 0 : i32
    return %c0_i32, %arg0, %c0_i32_0 : i32, i32, i32
  }
  func.func @transform_6(%arg0: i32) -> (i32, i32, i32) {
    %c0_i32 = arith.constant 0 : i32
    %c0_i32_0 = arith.constant 0 : i32
    %c0_i32_1 = arith.constant 0 : i32
    return %c0_i32, %arg0, %c0_i32_0 : i32, i32, i32
  }
}

</mosaic_0001>

<bundles_post_ra>
// kernel: tpu_custom_call.1
= control target key start
LH: loop header
LB: loop body
LE: loop exit
PB: predicated region body
PF: predicated region fallthrough
CT: control target
= control target key end

     0   :  { %s9968_s0 = inlined_call_operand.hbm [shape: f32[8,16,512], index: 0, kind: input, shape index: {}]   ;;  %s9969_s1 = inlined_call_operand.vmem [shape: f32[8,16,1], index: 1, kind: input, shape index: {}]   ;;  %s9970_s2 = inlined_call_operand.hbm [shape: f32[128,512], index: 2, kind: input, shape index: {}]   ;;  %s9971_s3 = inlined_call_operand.vmem [shape: f32[8,128], index: 3, kind: input, shape index: {}]   ;;  %s9972_s4 = inlined_call_operand.vmem [shape: f32[8,128], index: 4, kind: input, shape index: {}]   ;;  %s9973_s5 = inlined_call_operand.hbm [shape: f32[8,16,128], index: 5, kind: output, shape index: {0}]   ;;  %s9974_s6 = inlined_call_operand.hbm [shape: f32[8,16,128], index: 6, kind: output, shape index: {1}]  }
   0x1   :  { %10116 = sst [smem:[#allocation67_spill]] %s9970_s2 }
   0x2   :  { %12 = vsyncpa [#allocation5], 0 }
   0x3   :  { %14 = vsyncpa [#allocation5 + $0x1], 0 }
   0x4   :  { %15 = vsyncpa [#allocation9], 0 }
   0x5   :  { %16 = vsyncpa [#allocation6], 0 }
   0x6   :  { %18 = vsyncpa [#allocation6 + $0x1], 0 }
   0x7   :  { %19 = vsyncpa [#allocation12], 0 }
   0x8   :  { %21 = vsyncpa [#allocation12 + $0x1], 0  ;;  %s6615_s21 = smov 0   ;;  %s6617_s22 = smov 0  }
   0x9   :  { %s6619_s23 = smov 0   ;;  %s6621_s24 = smov 0  }
   0xa LB: > { %10117 = sst [smem:[#allocation17_spill]] %s6564_s23  ;;  %s6636_s25 = sadd.s32 4294967295, %s6568_s24   ;;  %s6568_s24 = sphi %s6621_s24, %s10666_s24   ;;  %s6564_s23 = sphi %s6619_s23, %s10668_s23   ;;  %s6560_s22 = sphi %s6617_s22, %s10670_s22   ;;  %s6556_s21 = sphi %s6615_s21, %s10669_s21  }
   0xb   : > { %s5596_s26 = sadd.s32 4294967294, %s6568_s24   ;;  %s6640_s27 = sadd.s32 1, %s6568_s24  }
   0xc   : > { %10118 = sst [smem:[#allocation18_spill]] %s6640_s27  ;;  %s34_s28 = sadd.s32 1, %s6564_s23 }
   0xd   : > { %s31_s29 = ssub.s32 %s6568_s24, %s6640_s27  ;;  %p41_p0 = scmp.ne.s32.totalorder %s6564_s23, %s6560_s22 }
   0xe   : > { %p32_p1 = scmp.eq.s32.totalorder %s31_s29, 0  ;;  %p42_p2 = scmp.eq.s32.totalorder %s6568_s24, 0 }
   0xf   : > { %p47_p3 = scmp.ne.s32.totalorder %s6560_s22, %s6556_s21  ;;  %p48_p4 = scmp.eq.s32.totalorder %s6636_s25, 0 }
  0x10   : > { %s6652_s30 = scalar_select %p32_p1, %s6564_s23, %s34_s28  }
  0x11   : > { %p6654_p5 = por %p42_p2, %p41_p0  ;;  %p6660_p6 = por %p48_p4, %p47_p3 }
  0x12   : > { %10119 = sst [smem:[#allocation19_spill]] %s6652_s30  ;;  %p160_p7 = scmp.eq.s32.totalorder %s6636_s25, 1 }
  0x13   : > { %p166_p8 = scmp.eq.s32.totalorder %s5596_s26, 1  ;;  %p5597_p9 = scmp.ge.s32.totalorder %s6568_s24, 1 }
  0x14   : > { %p199_p10 = scmp.lt.s32.totalorder %s6568_s24, 3  ;;  %p6667_p11 = por %p160_p7, %p41_p0 }
  0x15   : > { %p6671_p12 = por %p166_p8, %p47_p3  ;;  %p5598_p1 = scmp.ne.s32.totalorder %s6636_s25, 0 }
  0x16   : > { %p6675_p13 = pnand %p5597_p9, %p199_p10  ;;  %s10125_s2 = sld [smem:[#allocation67_spill]] }
  0x17   : > { %s6570_s15 = smov [#allocation8]   ;;  %s6571_s17 = smov 512  }
  0x18   : > { %p5756_p2 = pneg %p6675_p13  ;;  %s212_s16 = sshll.u32 %s6570_s15, 4  ;;  %s213_s16 = int_to_ptr.vmem [resolvable:$true] %s212_s16 }
  0x19   : > { %s6572_s18 = smov 32   ;;  %p9978_p3 = scmp.ge.s32.totalorder %s6568_s24, 2 }
  0x1a   : > { %p5757_p0 = pnand %p5756_p2, %p48_p4  ;;  %s6691_s19 = sand.u32 (!%p9978_p3), 1, %s6564_s23  }
  0x1b   : > { %228 = sbr.rel (%p9978_p3) target bundleno = 57 (0x39), region = 28  ;;  %s5745_s20 = sshll.u32 (!%p9978_p3), %s6568_s24, 5 }
  0x1c   : > { %s210_s14 = sshll.u32 %s10125_s2, 4  ;;  %s5600_s26 = sshll.u32 (!%p9978_p3), %s6691_s19, 8  ;;  %s211_s14 = int_to_ptr.hbm [resolvable:$true] %s210_s14 }
  0x1d   : > { %5759 = dma.hbm_to_vmem [thread:$0]  (!%p5757_p0), %s211_s14, 8192, %s213_s16, [#allocation9], %s6571_s17, %s6571_s17, %s6572_s18  }
  0x1e   : > { %s241_s12 = scalar_lea.hbm (!%p9978_p3), %s9968_s0, %s5745_s20  ;;  %s236_s14 = scalar_lea.vmem (!%p9978_p3), [#allocation4], %s5600_s26 }
  0x1f   : > { %s242_s13 = sshll.u32 (!%p9978_p3), %s241_s12, 4  ;;  %s244_s15 = sshll.u32 (!%p9978_p3), %s236_s14, 4  ;;  %s243_s13 = int_to_ptr.hbm [resolvable:$true] %s242_s13  ;;  %s245_s15 = int_to_ptr.vmem [resolvable:$true] %s244_s15 }
  0x20   : > { %s233_s16 = scalar_lea.sflag [#allocation5], %s6691_s19  ;;  %s6438_s17 = sshra.s32 %s243_s13, 4  ;;  %s6439_s17 = int_to_ptr.hbm [resolvable:$true] %s6438_s17 }
  0x21   : > { %s6440_s18 = scalar_lea.hbm %s6439_s17, 256  ;;  %s6444_s23 = scalar_lea.hbm %s9968_s0, 512 }
  0x22   : > { %p6441_p7 = scmp.ne.s32.totalorder %s6439_s17, %s6440_s18  ;;  %p6445_p10 = scmp.lt.s32.totalorder %s6439_s17, %s9968_s0 }
  0x23   : > { %p6446_p2 = scmp.lt.s32.totalorder %s6444_s23, %s6440_s18 }
  0x24   : > { %p6442_p8 = pnand %p6441_p7, %p6654_p5 }
  0x25   : > { %p6447_p0 = por %p6446_p2, %p6445_p10 }
  0x26   : > { %p6443_p9 = pneg %p6442_p8 }
  0x28   : > { %p6448_p3 = pnand %p6447_p0, %p6443_p9 }
  0x2a   : > { %6451 = shalt.err (!%p6448_p3)
}
  0x2b   : > { %s6573_s20 = smov 1024   ;;  %s6574_s26 = smov 512  }
  0x2c   : > { %s6575_s29 = smov 32   ;;  %253 = sbr.rel (!%p6654_p5) target bundleno = 57 (0x39), region = 36 }
  0x2d   : > { %5748 = dma.hbm_to_vmem [thread:$0]  (%p6654_p5), %s243_s13, 4096, %s245_s15, %s233_s16, %s6573_s20, %s6574_s26, %s6575_s29  }
  0x2e   : > { %s5603_s2 = sshll.u32 (%p6654_p5), %s6691_s19, 6  ;;  %s5604_s30 = sshll.u32 (%p6654_p5), %s6568_s24, 3 }
  0x2f   : > { %s259_s23 = scalar_lea.vmem (%p6654_p5), %s9969_s1, %s5604_s30  ;;  %s257_s14 = scalar_lea.vmem (%p6654_p5), [#allocation7], %s5603_s2 }
  0x30   : > { %v302_v0 = vld [vmem:[%s259_s23] sm:$0xff] (%p6654_p5)  ;;  %v304_v1 = vld [vmem:[%s259_s23 + $0x10] sm:$0xff] (%p6654_p5) }
  0x31   : > { %v306_v2 = vld [vmem:[%s259_s23 + $0x20] sm:$0xff]  ;;  %303 = vst [vmem:[%s257_s14] sm:$0xff] %v302_v0  ;;  %v308_v3 = vld [vmem:[%s259_s23 + $0x30] sm:$0xff] }
  0x32   : > { %305 = vst [vmem:[%s257_s14 + $0x8] sm:$0xff] %v304_v1  ;;  %v310_v4 = vld [vmem:[%s259_s23 + $0x40] sm:$0xff]  ;;  %v312_v5 = vld [vmem:[%s259_s23 + $0x50] sm:$0xff] }
  0x33   : > { %307 = vst [vmem:[%s257_s14 + $0x10] sm:$0xff] %v306_v2  ;;  %v314_v6 = vld [vmem:[%s259_s23 + $0x60] sm:$0xff]  ;;  %v316_v7 = vld [vmem:[%s259_s23 + $0x70] sm:$0xff] }
  0x34   : > { %309 = vst [vmem:[%s257_s14 + $0x18] sm:$0xff] %v308_v3 }
  0x35   : > { %311 = vst [vmem:[%s257_s14 + $0x20] sm:$0xff] %v310_v4 }
  0x36   : > { %313 = vst [vmem:[%s257_s14 + $0x28] sm:$0xff] %v312_v5 }
  0x37   : > { %315 = vst [vmem:[%s257_s14 + $0x30] sm:$0xff] %v314_v6 }
  0x38   : > { %317 = vst [vmem:[%s257_s14 + $0x38] sm:$0xff] %v316_v7 }
  0x39 PF: > { %326 = sbr.rel (%p6675_p13) target bundleno = 2049 (0x801), region = 74 }
  0x3e   : > { %s6719_s7 = sand.u32 1, %s6560_s22  }
  0x3f   : > { %s5606_s19 = sshll.u32 %s6719_s7, 8  ;;  %s329_s13 = scalar_lea.sflag [#allocation5], %s6719_s7 }
  0x40   : > { %s6723_s15 = scalar_lea.vmem [#allocation4], %s5606_s19 }
  0x41   : > { %6539 = dma.done.wait (%p6660_p6), %s329_s13, 4096  }
  0x42   : > { %6541 = vsyncadd (%p6660_p6), %s329_s13, 4294963200  ;;  %s5607_s16 = sshll.u32 %s6719_s7, 6 }
  0x43   : > { %s6730_s11 = scalar_lea.vmem [#allocation7], %s5607_s16 }
  0x44   : > { %6543 = dma.done.wait (%p48_p4), [#allocation9], 8192  }
  0x45   : > { %6545 = vsyncadd (%p48_p4), [#allocation9], 4294959104  ;;  %s6736_s17 = scalar_lea.vmem [#allocation10], %s5607_s16  ;;  %s6738_s18 = scalar_lea.vmem [#allocation11], %s5607_s16 }
  0x46   : > { %386 = sbr.rel (%p5598_p1) target bundleno = 78 (0x4e), region = 90 }
  0x4b   : > { %v387_v8 = vld [vmem:[%s9971_s3] sm:$0xff] }
  0x4c   : > { %v389_v9 = vld [vmem:[%s9972_s4] sm:$0xff]  ;;  %388 = vst [vmem:[#allocation2] sm:$0xff] %v387_v8 }
  0x4d   : > { %390 = vst [vmem:[#allocation3] sm:$0xff] %v389_v9 }
  0x4e PF: > { %v6748_v10 = vld [vmem:[#allocation8 + $0x1f0] sm:$0xff]  ;;  %v6750_v11 = vld [vmem:[#allocation8 + $0x1f8] sm:$0xff]  ;;  %v910_v12 = vld [vmem:[%s6730_s11 + $0x20] sm:$0x1]  ;;  %v6576_v13 = vmov 0   ;;  %vm565_vm0 = vcmask 1041409  }
  0x4f   : > { %5814 = vset.pattern.permute.xlu2 %v6576_v13  ;;  %5813 = vset.pattern.permute.xlu1 %v6576_v13  ;;  %v907_v14 = vld [vmem:[%s6730_s11 + $0x8] sm:$0x1]  ;;  %v906_v15 = vld [vmem:[%s6730_s11] sm:$0x1]  ;;  %v6756_v16 = vld [vmem:[#allocation8 + $0x1d0] sm:$0xff]  ;;  %vm10005_vm1 = vcmask 1043459  }
  0x50   : > { %5812 = vset.pattern.permute.xlu0 %v6576_v13  ;;  %512 = vmatpush.msra.mxu2 %v6748_v10  ;;  %10126 = vst [vmem:[#allocation20_spill] sm:$0xff] %v6756_v16  ;;  %v6758_v17 = vld [vmem:[#allocation8 + $0x1d8] sm:$0xff]  ;;  %v6761_v18 = vld [vmem:[#allocation8 + $0x1e8] sm:$0xff]  ;;  %v6763_v19 = vld [vmem:[#allocation8 + $0x1b0] sm:$0xff]  ;;  %vm10006_vm2 = vcmask 1042434   ;;  %vm10004_vm3 = vcmask 1044484  }
  0x51   : > { %532 = vmatpush.msra.mxu3 %v6750_v11  ;;  %959 = vperm.xlu2 %5814, %v910_v12   ;;  %v6765_v20 = vld [vmem:[#allocation8 + $0x1b8] sm:$0xff]  ;;  %v6767_v21 = vld [vmem:[#allocation8 + $0x1e0] sm:$0xff]  ;;  %v6771_v22 = vld [vmem:[#allocation8 + $0x1c8] sm:$0xff]  ;;  %vm10003_vm4 = vcmask 1045509   ;;  %vm10002_vm5 = vcmask 1046534   ;;  %vm9998_vm6 = vcmask 1040384  }
  0x52   : > { %944 = vperm.xlu0 %5812, %v907_v14   ;;  %939 = vperm.xlu1 %5813, %v906_v15   ;;  %v6774_v23 = vld [vmem:[#allocation8 + $0x190] sm:$0xff]  ;;  %v6776_v24 = vld [vmem:[#allocation8 + $0x198] sm:$0xff]  ;;  %v6779_v25 = vld [vmem:[#allocation8 + $0x1c0] sm:$0xff]  ;;  %vm9996_vm7 = vcmask 1041408   ;;  %vm10001_vm8 = vcmask 1042433   ;;  %vm10000_vm9 = vcmask 1043458  }
  0x53   : > { %513 = vmatpush.msra.mxu2 %v6756_v16  ;;  %533 = vmatpush.msra.mxu3 %v6758_v17  ;;  %v6783_v26 = vld [vmem:[#allocation8 + $0x1a8] sm:$0xff]  ;;  %v6785_v27 = vld [vmem:[#allocation8 + $0x1a0] sm:$0xff]  ;;  %v6788_v28 = vld [vmem:[#allocation8 + $0x170] sm:$0xff]  ;;  %vm9997_vm10 = vcmask 1044483   ;;  %vm9999_vm11 = vcmask 1046528   ;;  %vm9995_vm12 = vcmask 1045508  }
  0x54   : > { %492 = vmatpush.msra.mxu1 %v6761_v18  ;;  %472 = vmatpush.msra.mxu0 %v6767_v21  ;;  %v6790_v29 = vld [vmem:[#allocation8 + $0x178] sm:$0xff]  ;;  %v911_v30 = vld [vmem:[%s6730_s11 + $0x28] sm:$0x1]  ;;  %v908_v31 = vld [vmem:[%s6730_s11 + $0x10] sm:$0x1]  ;;  %vm9994_vm13 = vcmask 1046533  }
  0x55   : > { %514 = vmatpush.msra.mxu2 %v6763_v19  ;;  %534 = vmatpush.msra.mxu3 %v6765_v20  ;;  %v909_v32 = vld [vmem:[%s6730_s11 + $0x18] sm:$0x1]  ;;  %v6799_v33 = vld [vmem:[#allocation8 + $0x150] sm:$0xff]  ;;  %v6806_v35 = vld [vmem:[#allocation8 + $0x188] sm:$0xff]  ;;  %vm9993_vm14 = vcmask 1045504   ;;  %vm9992_vm15 = vcmask 1046529  }
  0x56   : > { %493 = vmatpush.msra.mxu1 %v6771_v22  ;;  %473 = vmatpush.msra.mxu0 %v6779_v25  ;;  %v6804_v34 = vld [vmem:[#allocation8 + $0x158] sm:$0xff]  ;;  %v6808_v36 = vld [vmem:[#allocation8 + $0x130] sm:$0xff]  ;;  %v6810_v37 = vld [vmem:[#allocation8 + $0x180] sm:$0xff]  ;;  %s5741_s29 = sshll.u32 %s6636_s25, 3  ;;  %s5443_s25 = sshll.u32 %s6736_s17, 4  ;;  %s9908_s25 = int_to_ptr.vmem [resolvable:$true] %s5443_s25 }
  0x57   : > { %515 = vmatpush.msra.mxu2 %v6774_v23  ;;  %535 = vmatpush.msra.mxu3 %v6776_v24  ;;  %v6813_v38 = vld [vmem:[#allocation8 + $0x138] sm:$0xff]  ;;  %v6815_v39 = vld [vmem:[#allocation8 + $0x168] sm:$0xff]  ;;  %v6819_v40 = vld [vmem:[#allocation8 + $0x110] sm:$0xff]  ;;  %s5442_s12 = scalar_lea.hbm %s9973_s5, %s5741_s29  ;;  %s5458_s19 = scalar_lea.hbm %s9974_s6, %s5741_s29 }
  0x58   : > { %494 = vmatpush.msra.mxu1 %v6783_v26  ;;  %474 = vmatpush.msra.mxu0 %v6785_v27  ;;  %v6821_v41 = vld [vmem:[#allocation8 + $0x160] sm:$0xff]  ;;  %v6825_v42 = vld [vmem:[#allocation8 + $0x118] sm:$0xff]  ;;  %v6827_v43 = vld [vmem:[#allocation8 + $0x148] sm:$0xff]  ;;  %s5445_s27 = sshll.u32 %s5442_s12, 4  ;;  %s5459_s13 = sshll.u32 %s6738_s18, 4  ;;  %s9910_s27 = int_to_ptr.hbm [resolvable:$true] %s5445_s27  ;;  %s9917_s13 = int_to_ptr.vmem [resolvable:$true] %s5459_s13 }
  0x59   : > { %516 = vmatpush.msra.mxu2 %v6788_v28  ;;  %536 = vmatpush.msra.mxu3 %v6790_v29  ;;  %v6831_v44 = vld [vmem:[#allocation8 + $0xf0] sm:$0xff]  ;;  %v6833_v45 = vld [vmem:[#allocation8 + $0x140] sm:$0xff]  ;;  %v6837_v46 = vld [vmem:[#allocation8 + $0xf8] sm:$0xff]  ;;  %s5427_s16 = scalar_lea.sflag [#allocation6], %s6719_s7  ;;  %s6486_s20 = scalar_lea.hbm %s9973_s5, 128 }
  0x5a   : > { %964 = vperm.xlu2 %5814, %v911_v30   ;;  %949 = vperm.xlu0 %5812, %v908_v31   ;;  %v1540_v47 = vld [vmem:[%s6730_s11 + $0x9] sm:$0x1]  ;;  %v912_v48 = vld [vmem:[%s6730_s11 + $0x30] sm:$0x1]  ;;  %v913_v49 = vld [vmem:[%s6730_s11 + $0x38] sm:$0x1] }
  0x5b   : > { %954 = vperm.xlu1 %5813, %v909_v32   ;;  %517 = vmatpush.msra.mxu2 %v6799_v33  ;;  %v6846_v50 = vld [vmem:[#allocation8 + $0x128] sm:$0xff]  ;;  %v6848_v51 = vld [vmem:[#allocation8 + $0xd0] sm:$0xff]  ;;  %v6851_v52 = vld [vmem:[#allocation8 + $0xd8] sm:$0xff] }
  0x5c   : > { %537 = vmatpush.msra.mxu3 %v6804_v34  ;;  %495 = vmatpush.msra.mxu1 %v6806_v35  ;;  %v6853_v53 = vld [vmem:[#allocation8 + $0x120] sm:$0xff]  ;;  %v6855_v54 = vld [vmem:[#allocation8 + $0x108] sm:$0xff]  ;;  %v6857_v55 = vld [vmem:[#allocation8 + $0xb0] sm:$0xff] }
  0x5d   : > { %518 = vmatpush.msra.mxu2 %v6808_v36  ;;  %475 = vmatpush.msra.mxu0 %v6810_v37  ;;  %v6861_v56 = vld [vmem:[#allocation8 + $0xb8] sm:$0xff]  ;;  %v6863_v57 = vld [vmem:[#allocation8 + $0x100] sm:$0xff]  ;;  %v6867_v58 = vld [vmem:[#allocation8 + $0xe8] sm:$0xff] }
  0x5e   : > { %538 = vmatpush.msra.mxu3 %v6813_v38  ;;  %496 = vmatpush.msra.mxu1 %v6815_v39  ;;  %v6869_v59 = vld [vmem:[#allocation8 + $0x90] sm:$0xff]  ;;  %v6873_v60 = vld [vmem:[#allocation8 + $0x98] sm:$0xff]  ;;  %v6875_v61 = vld [vmem:[#allocation8 + $0xe0] sm:$0xff] }
  0x5f   : > { %519 = vmatpush.msra.mxu2 %v6819_v40  ;;  %476 = vmatpush.msra.mxu0 %v6821_v41  ;;  %v6879_v62 = vld [vmem:[#allocation8 + $0xc8] sm:$0xff]  ;;  %v6881_v63 = vld [vmem:[#allocation8 + $0x70] sm:$0xff]  ;;  %v6885_v0 = vld [vmem:[#allocation8 + $0x78] sm:$0xff] }
  0x60   : > { %539 = vmatpush.msra.mxu3 %v6825_v42  ;;  %497 = vmatpush.msra.mxu1 %v6827_v43  ;;  %v1542_v1 = vld [vmem:[%s6730_s11 + $0x19] sm:$0x1]  ;;  %v1541_v2 = vld [vmem:[%s6730_s11 + $0x11] sm:$0x1]  ;;  %v1539_v3 = vld [vmem:[%s6730_s11 + $0x1] sm:$0x1] }
  0x61   : > { %520 = vmatpush.msra.mxu2 %v6831_v44  ;;  %477 = vmatpush.msra.mxu0 %v6833_v45  ;;  %v6894_v4 = vld [vmem:[#allocation8 + $0xc0] sm:$0xff]  ;;  %v6896_v5 = vld [vmem:[#allocation8 + $0xa8] sm:$0xff]  ;;  %v6899_v6 = vld [vmem:[#allocation8 + $0x50] sm:$0xff] }
  0x62   : > { %540 = vmatpush.msra.mxu3 %v6837_v46  ;;  %1562 = vperm.xlu2 %5814, %v1540_v47   ;;  %10127 = vst [vmem:[#allocation21_spill] sm:$0xff] %v6899_v6  ;;  %v6901_v7 = vld [vmem:[#allocation8 + $0x58] sm:$0xff]  ;;  %v6903_v8 = vld [vmem:[#allocation8 + $0xa0] sm:$0xff]  ;;  %v6905_v9 = vld [vmem:[#allocation8 + $0x88] sm:$0xff] }
  0x63   : > { %969 = vperm.xlu0 %5812, %v912_v48   ;;  %974 = vperm.xlu1 %5813, %v913_v49   ;;  %10128 = vst [vmem:[#allocation22_spill] sm:$0xff] %v6901_v7  ;;  %v6909_v12 = vld [vmem:[#allocation8 + $0x30] sm:$0xff]  ;;  %v6911_v13 = vld [vmem:[#allocation8 + $0x38] sm:$0xff]  ;;  %v6915_v14 = vld [vmem:[#allocation8 + $0x80] sm:$0xff] }
  0x64   : > { %498 = vmatpush.msra.mxu1 %v6846_v50  ;;  %521 = vmatpush.msra.mxu2 %v6848_v51  ;;  %10129 = vst [vmem:[#allocation23_spill] sm:$0xff] %v6909_v12  ;;  %v6917_v15 = vld [vmem:[#allocation8 + $0x68] sm:$0xff]  ;;  %v6921_v30 = vld [vmem:[#allocation8 + $0x10] sm:$0xff]  ;;  %v6923_v31 = vld [vmem:[#allocation8 + $0x18] sm:$0xff] }
  0x65   : > { %541 = vmatpush.msra.mxu3 %v6851_v52  ;;  %478 = vmatpush.msra.mxu0 %v6853_v53  ;;  %10130 = vst [vmem:[#allocation24_spill] sm:$0xff] %v6911_v13  ;;  %v391_v32 = vld [vmem:[#allocation2] sm:$0xff]  ;;  %v6929_v47 = vld [vmem:[#allocation8 + $0x60] sm:$0xff]  ;;  %v6931_v48 = vld [vmem:[#allocation8 + $0x48] sm:$0xff] }
  0x66   : > { %499 = vmatpush.msra.mxu1 %v6855_v54  ;;  %522 = vmatpush.msra.mxu2 %v6857_v55  ;;  %10131 = vst [vmem:[#allocation25_spill] sm:$0xff] %v6921_v30  ;;  %v1545_v49 = vld [vmem:[%s6730_s11 + $0x31] sm:$0x1] }
  0x67   : > { %542 = vmatpush.msra.mxu3 %v6861_v56  ;;  %479 = vmatpush.msra.mxu0 %v6863_v57  ;;  %10132 = vst [vmem:[#allocation26_spill] sm:$0xff] %v6923_v31 }
  0x68   : > { %500 = vmatpush.msra.mxu1 %v6867_v58  ;;  %523 = vmatpush.msra.mxu2 %v6869_v59  ;;  %10133 = vst [vmem:[#allocation27_spill] sm:$0xff] %v6931_v48 }
  0x69   : > { %543 = vmatpush.msra.mxu3 %v6873_v60  ;;  %480 = vmatpush.msra.mxu0 %v6875_v61 }
  0x6a   : > { %501 = vmatpush.msra.mxu1 %v6879_v62  ;;  %524 = vmatpush.msra.mxu2 %v6881_v63 }
  0x6b   : > { %544 = vmatpush.msra.mxu3 %v6885_v0  ;;  %1572 = vperm.xlu2 %5814, %v1542_v1   ;;  %v1543_v1 = vld [vmem:[%s6730_s11 + $0x21] sm:$0x1] }
  0x6c   : > { %1567 = vperm.xlu0 %5812, %v1541_v2   ;;  %1557 = vperm.xlu1 %5813, %v1539_v3   ;;  %v1544_v2 = vld [vmem:[%s6730_s11 + $0x29] sm:$0x1]  ;;  %v6938_v3 = vld [vmem:[#allocation8 + $0x40] sm:$0xff] }
  0x6d   : > { %481 = vmatpush.msra.mxu0 %v6894_v4  ;;  %502 = vmatpush.msra.mxu1 %v6896_v5 }
  0x6e   : > { %525 = vmatpush.msra.mxu2 %v6899_v6  ;;  %545 = vmatpush.msra.mxu3 %v6901_v7 }
  0x6f   : > { %482 = vmatpush.msra.mxu0 %v6903_v8  ;;  %503 = vmatpush.msra.mxu1 %v6905_v9 }
  0x70   : > { %526 = vmatpush.msra.mxu2 %v6909_v12  ;;  %546 = vmatpush.msra.mxu3 %v6911_v13  ;;  %v6942_v13 = vld [vmem:[#allocation8 + $0x28] sm:$0xff]  ;;  %v6950_v12 = vld [vmem:[#allocation8] sm:$0xff] }
  0x71   : > { %483 = vmatpush.msra.mxu0 %v6915_v14  ;;  %504 = vmatpush.msra.mxu1 %v6917_v15 }
  0x72   : > { %527 = vmatpush.msra.mxu2 %v6921_v30  ;;  %547 = vmatpush.msra.mxu3 %v6923_v31  ;;  %v6944_v30 = vld [vmem:[#allocation8 + $0x20] sm:$0xff]  ;;  %v6947_v31 = vld [vmem:[#allocation8 + $0x8] sm:$0xff] }
  0x73   : > { %528 = vmatmul.f32.vlgmr.msra.gmra.mxu2 %v391_v32  ;;  %548 = vmatmul.f32.vlgmr.msra.gmra.mxu3 %v391_v32  ;;  %10134 = vst [vmem:[#allocation28_spill] sm:$0xff] %v6944_v30 }
  0x74   : > { %484 = vmatpush.msra.mxu0 %v6929_v47  ;;  %505 = vmatpush.msra.mxu1 %v6931_v48 }
  0x75   : > { %1587 = vperm.xlu2 %5814, %v1545_v49   ;;  %1577 = vperm.xlu0 %5812, %v1543_v1   ;;  %v2158_v49 = vld [vmem:[%s6730_s11 + $0x12] sm:$0x1]  ;;  %v1546_v1 = vld [vmem:[%s6730_s11 + $0x39] sm:$0x1] }
  0x76   : > { %1582 = vperm.xlu1 %5813, %v1544_v2   ;;  %485 = vmatpush.msra.mxu0 %v6938_v3  ;;  %v2157_v2 = vld [vmem:[%s6730_s11 + $0xa] sm:$0x1] }
  0x77   : > { %506 = vmatpush.msra.mxu1 %v6942_v13  ;;  %1161 = vmatpush.msrb.mxu2 %v6748_v10 }
  0x78   : > { %486 = vmatpush.msra.mxu0 %v6944_v30  ;;  %1181 = vmatpush.msrb.mxu3 %v6750_v11 }
  0x79   : > { %507 = vmatpush.msra.mxu1 %v6947_v31  ;;  %1162 = vmatpush.msrb.mxu2 %v6756_v16  ;;  %v2156_v16 = vld [vmem:[%s6730_s11 + $0x2] sm:$0x1] }
  0x7a   : > { %508 = vmatmul.f32.vlgmr.msra.gmra.mxu1 %v391_v32  ;;  %487 = vmatpush.msra.mxu0 %v6950_v12 }
  0x7b   : > { %488 = vmatmul.f32.vlgmr.msra.gmra.mxu0 %v391_v32  ;;  %1141 = vmatpush.msrb.mxu1 %v6761_v18  ;;  %v2160_v32 = vld [vmem:[%s6730_s11 + $0x22] sm:$0x1] }
  0x7c   : > { %1121 = vmatpush.msrb.mxu0 %v6767_v21  ;;  %1182 = vmatpush.msrb.mxu3 %v6758_v17 }
  0x7d   : > { %2184 = vperm.xlu2 %5814, %v2158_v49   ;;  %1592 = vperm.xlu0 %5812, %v1546_v1   ;;  %v2159_v49 = vld [vmem:[%s6730_s11 + $0x1a] sm:$0x1] }
  0x7e   : > { %2179 = vperm.xlu1 %5813, %v2157_v2   ;;  %1122 = vmatpush.msrb.mxu0 %v6779_v25  ;;  %v2163_v1 = vld [vmem:[%s6730_s11 + $0x3a] sm:$0x1]  ;;  %v2161_v2 = vld [vmem:[%s6730_s11 + $0x2a] sm:$0x1] }
  0x7f   : > { %1142 = vmatpush.msrb.mxu1 %v6771_v22  ;;  %1163 = vmatpush.msrb.mxu2 %v6763_v19 }
  0x80   : > { %1123 = vmatpush.msrb.mxu0 %v6785_v27  ;;  %1183 = vmatpush.msrb.mxu3 %v6765_v20 }
  0x81   : > { %1143 = vmatpush.msrb.mxu1 %v6783_v26  ;;  %1164 = vmatpush.msrb.mxu2 %v6774_v23 }
  0x82   : > { %1124 = vmatpush.msrb.mxu0 %v6810_v37  ;;  %1184 = vmatpush.msrb.mxu3 %v6776_v24 }
  0x83   : > { %1144 = vmatpush.msrb.mxu1 %v6806_v35  ;;  %1165 = vmatpush.msrb.mxu2 %v6788_v28 }
  0x84   : > { %1125 = vmatpush.msrb.mxu0 %v6821_v41  ;;  %1185 = vmatpush.msrb.mxu3 %v6790_v29 }
  0x85   : > { %2194 = vperm.xlu2 %5814, %v2160_v32   ;;  %2174 = vperm.xlu0 %5812, %v2156_v16   ;;  %v2162_v16 = vld [vmem:[%s6730_s11 + $0x32] sm:$0x1]  ;;  %v2773_v32 = vld [vmem:[%s6730_s11 + $0x3] sm:$0x1] }
  0x86   : > { %2189 = vperm.xlu1 %5813, %v2159_v49   ;;  %1145 = vmatpush.msrb.mxu1 %v6815_v39  ;;  %v2774_v49 = vld [vmem:[%s6730_s11 + $0xb] sm:$0x1] }
  0x87   : > { %1126 = vmatpush.msrb.mxu0 %v6833_v45  ;;  %1166 = vmatpush.msrb.mxu2 %v6799_v33 }
  0x88   : > { %1146 = vmatpush.msrb.mxu1 %v6827_v43  ;;  %1186 = vmatpush.msrb.mxu3 %v6804_v34 }
  0x89   : > { %1127 = vmatpush.msrb.mxu0 %v6853_v53  ;;  %1167 = vmatpush.msrb.mxu2 %v6808_v36 }
  0x8a   : > { %1147 = vmatpush.msrb.mxu1 %v6846_v50  ;;  %1187 = vmatpush.msrb.mxu3 %v6813_v38 }
  0x8b   : > { %1128 = vmatpush.msrb.mxu0 %v6863_v57  ;;  %1168 = vmatpush.msrb.mxu2 %v6819_v40 }
  0x8c   : > { %1148 = vmatpush.msrb.mxu1 %v6855_v54  ;;  %1188 = vmatpush.msrb.mxu3 %v6825_v42 }
  0x8d   : > { %2209 = vperm.xlu2 %5814, %v2163_v1   ;;  %2199 = vperm.xlu0 %5812, %v2161_v2   ;;  %v2775_v1 = vld [vmem:[%s6730_s11 + $0x13] sm:$0x1]  ;;  %v2778_v2 = vld [vmem:[%s6730_s11 + $0x2b] sm:$0x1] }
  0x8e   : > { %2204 = vperm.xlu1 %5813, %v2162_v16   ;;  %1129 = vmatpush.msrb.mxu0 %v6875_v61  ;;  %v2776_v16 = vld [vmem:[%s6730_s11 + $0x1b] sm:$0x1] }
  0x8f   : > { %1149 = vmatpush.msrb.mxu1 %v6867_v58  ;;  %1169 = vmatpush.msrb.mxu2 %v6831_v44 }
  0x90   : > { %1189 = vmatpush.msrb.mxu3 %v6837_v46  ;;  %1130 = vmatpush.msrb.mxu0 %v6894_v4 }
  0x91   : > { %1150 = vmatpush.msrb.mxu1 %v6879_v62  ;;  %1170 = vmatpush.msrb.mxu2 %v6848_v51 }
  0x92   : > { %1190 = vmatpush.msrb.mxu3 %v6851_v52  ;;  %1131 = vmatpush.msrb.mxu0 %v6903_v8 }
  0x93   : > { %1151 = vmatpush.msrb.mxu1 %v6896_v5  ;;  %1171 = vmatpush.msrb.mxu2 %v6857_v55 }
  0x94   : > { %1191 = vmatpush.msrb.mxu3 %v6861_v56  ;;  %1132 = vmatpush.msrb.mxu0 %v6915_v14 }
  0x95   : > { %2791 = vperm.xlu2 %5814, %v2773_v32   ;;  %2796 = vperm.xlu0 %5812, %v2774_v49   ;;  %v2777_v32 = vld [vmem:[%s6730_s11 + $0x23] sm:$0x1]  ;;  %v10135_v49 = vld [vmem:[#allocation23_spill] sm:$0xff] }
  0x96   : > { %2801 = vperm.xlu1 %5813, %v2775_v1   ;;  %1152 = vmatpush.msrb.mxu1 %v6905_v9  ;;  %v10136_v1 = vld [vmem:[#allocation24_spill] sm:$0xff] }
  0x97   : > { %1172 = vmatpush.msrb.mxu2 %v6869_v59  ;;  %1192 = vmatpush.msrb.mxu3 %v6873_v60 }
  0x98   : > { %1133 = vmatpush.msrb.mxu0 %v6929_v47  ;;  %1153 = vmatpush.msrb.mxu1 %v6917_v15 }
  0x99   : > { %1173 = vmatpush.msrb.mxu2 %v6881_v63  ;;  %1193 = vmatpush.msrb.mxu3 %v6885_v0 }
  0x9a   : > { %1134 = vmatpush.msrb.mxu0 %v6938_v3  ;;  %1154 = vmatpush.msrb.mxu1 %v6931_v48  ;;  %v10137_v48 = vld [vmem:[#allocation25_spill] sm:$0xff] }
  0x9b   : > { %1174 = vmatpush.msrb.mxu2 %v6899_v6  ;;  %1194 = vmatpush.msrb.mxu3 %v6901_v7  ;;  %v10138_v6 = vld [vmem:[#allocation26_spill] sm:$0xff] }
  0x9c   : > { %1135 = vmatpush.msrb.mxu0 %v6944_v30  ;;  %1155 = vmatpush.msrb.mxu1 %v6942_v13  ;;  %v3391_v30 = vld [vmem:[%s6730_s11 + $0xc] sm:$0x1]  ;;  %v2779_v7 = vld [vmem:[%s6730_s11 + $0x33] sm:$0x1] }
  0x9d   : > { %2816 = vperm.xlu2 %5814, %v2778_v2   ;;  %2806 = vperm.xlu0 %5812, %v2776_v16   ;;  %v2780_v2 = vld [vmem:[%s6730_s11 + $0x3b] sm:$0x1]  ;;  %v10139_v16 = vld [vmem:[#allocation20_spill] sm:$0xff] }
  0x9e   : > { %2811 = vperm.xlu1 %5813, %v2777_v32   ;;  %1175 = vmatpush.msrb.mxu2 %v10135_v49 }
  0x9f   : > { %1195 = vmatpush.msrb.mxu3 %v10136_v1  ;;  %1136 = vmatpush.msrb.mxu0 %v6950_v12 }
  0xa0   : > { %1156 = vmatpush.msrb.mxu1 %v6947_v31  ;;  %1176 = vmatpush.msrb.mxu2 %v10137_v48 }
  0xa1   : > { %1196 = vmatpush.msrb.mxu3 %v10138_v6  ;;  %1738 = vmatpush.msra.mxu0 %v6767_v21  ;;  %v4009_v21 = vld [vmem:[%s6730_s11 + $0x15] sm:$0x1] }
  0xa2   : > { %1758 = vmatpush.msra.mxu1 %v6761_v18  ;;  %1778 = vmatpush.msra.mxu2 %v6748_v10  ;;  %v3393_v10 = vld [vmem:[%s6730_s11 + $0x1c] sm:$0x1]  ;;  %v3396_v18 = vld [vmem:[%s6730_s11 + $0x34] sm:$0x1] }
  0xa3   : > { %1798 = vmatpush.msra.mxu3 %v6750_v11  ;;  %1739 = vmatpush.msra.mxu0 %v6779_v25  ;;  %v3392_v11 = vld [vmem:[%s6730_s11 + $0x14] sm:$0x1]  ;;  %v4007_v25 = vld [vmem:[%s6730_s11 + $0x5] sm:$0x1] }
  0xa4   : > { %1759 = vmatpush.msra.mxu1 %v6771_v22  ;;  %1779 = vmatpush.msra.mxu2 %v10139_v16  ;;  %v3397_v22 = vld [vmem:[%s6730_s11 + $0x3c] sm:$0x1] }
  0xa5   : > { %3413 = vperm.xlu2 %5814, %v3391_v30   ;;  %2821 = vperm.xlu0 %5812, %v2779_v7  }
  0xa6   : > { %2826 = vperm.xlu1 %5813, %v2780_v2   ;;  %1799 = vmatpush.msra.mxu3 %v6758_v17  ;;  %v3390_v17 = vld [vmem:[%s6730_s11 + $0x4] sm:$0x1]  ;;  %v5612_v2 = vld [vmem:[%s6723_s15 + $0x20] ss:$8 sm:$0xf] }
  0xa7   : > { %1740 = vmatpush.msra.mxu0 %v6785_v27  ;;  %1760 = vmatpush.msra.mxu1 %v6783_v26  ;;  %v10140_v26 = vld [vmem:[#allocation27_spill] sm:$0xff]  ;;  %v10141_v27 = vld [vmem:[#allocation21_spill] sm:$0xff] }
  0xa8   : > { %1780 = vmatpush.msra.mxu2 %v6763_v19  ;;  %1800 = vmatpush.msra.mxu3 %v6765_v20  ;;  %v3394_v19 = vld [vmem:[%s6730_s11 + $0x24] sm:$0x1]  ;;  %v3395_v20 = vld [vmem:[%s6730_s11 + $0x2c] sm:$0x1] }
  0xa9   : > { %1741 = vmatpush.msra.mxu0 %v6810_v37  ;;  %1761 = vmatpush.msra.mxu1 %v6806_v35  ;;  %v4012_v35 = vld [vmem:[%s6730_s11 + $0x2d] sm:$0x1]  ;;  %v4624_v37 = vld [vmem:[%s6730_s11 + $0x6] sm:$0x1] }
  0xaa   : > { %1781 = vmatpush.msra.mxu2 %v6774_v23  ;;  %1801 = vmatpush.msra.mxu3 %v6776_v24  ;;  %v4008_v23 = vld [vmem:[%s6730_s11 + $0xd] sm:$0x1]  ;;  %v4011_v24 = vld [vmem:[%s6730_s11 + $0x25] sm:$0x1] }
  0xab   : > { %1742 = vmatpush.msra.mxu0 %v6821_v41  ;;  %1762 = vmatpush.msra.mxu1 %v6815_v39  ;;  %v4626_v39 = vld [vmem:[%s6730_s11 + $0x16] sm:$0x1]  ;;  %v4627_v41 = vld [vmem:[%s6730_s11 + $0x1e] sm:$0x1] }
  0xac   : > { %1782 = vmatpush.msra.mxu2 %v6788_v28  ;;  %1802 = vmatpush.msra.mxu3 %v6790_v29  ;;  %v4010_v28 = vld [vmem:[%s6730_s11 + $0x1d] sm:$0x1]  ;;  %v10142_v29 = vld [vmem:[#allocation22_spill] sm:$0xff] }
  0xad   : > { %3423 = vperm.xlu2 %5814, %v3393_v10   ;;  %3418 = vperm.xlu0 %5812, %v3392_v11  }
  0xae   : > { %3408 = vperm.xlu1 %5813, %v3390_v17   ;;  %1743 = vmatpush.msra.mxu0 %v6833_v45  ;;  %v4631_v45 = vld [vmem:[%s6730_s11 + $0x3e] sm:$0x1] }
  0xaf   : > { %1763 = vmatpush.msra.mxu1 %v6827_v43  ;;  %1783 = vmatpush.msra.mxu2 %v6799_v33  ;;  %v10143_v33 = vld [vmem:[#allocation28_spill] sm:$0xff]  ;;  %v5242_v43 = vld [vmem:[%s6730_s11 + $0xf] sm:$0x1] }
  0xb0   : > { %1803 = vmatpush.msra.mxu3 %v6804_v34  ;;  %1744 = vmatpush.msra.mxu0 %v6853_v53  ;;  %v4014_v34 = vld [vmem:[%s6730_s11 + $0x3d] sm:$0x1]  ;;  %v5245_v53 = vld [vmem:[%s6730_s11 + $0x27] sm:$0x1] }
  0xb1   : > { %1764 = vmatpush.msra.mxu1 %v6846_v50  ;;  %1784 = vmatpush.msra.mxu2 %v6808_v36  ;;  %v4013_v36 = vld [vmem:[%s6730_s11 + $0x35] sm:$0x1]  ;;  %v5243_v50 = vld [vmem:[%s6730_s11 + $0x17] sm:$0x1] }
  0xb2   : > { %1804 = vmatpush.msra.mxu3 %v6813_v38  ;;  %1745 = vmatpush.msra.mxu0 %v6863_v57  ;;  %v4625_v38 = vld [vmem:[%s6730_s11 + $0xe] sm:$0x1] }
  0xb3   : > { %1765 = vmatpush.msra.mxu1 %v6855_v54  ;;  %1785 = vmatpush.msra.mxu2 %v6819_v40  ;;  %v4629_v40 = vld [vmem:[%s6730_s11 + $0x2e] sm:$0x1]  ;;  %v5246_v54 = vld [vmem:[%s6730_s11 + $0x2f] sm:$0x1] }
  0xb4   : > { %1805 = vmatpush.msra.mxu3 %v6825_v42  ;;  %1746 = vmatpush.msra.mxu0 %v6875_v61  ;;  %v4628_v42 = vld [vmem:[%s6730_s11 + $0x26] sm:$0x1] }
  0xb5   : > { %3438 = vperm.xlu2 %5814, %v3396_v18   ;;  %3428 = vperm.xlu0 %5812, %v3394_v19   ;;  %v5613_v18 = vld [vmem:[%s6723_s15 + $0x40] ss:$8 sm:$0xf] }
  0xb6   : > { %3433 = vperm.xlu1 %5813, %v3395_v20   ;;  %1766 = vmatpush.msra.mxu1 %v6867_v58  ;;  %v5248_v20 = vld [vmem:[%s6730_s11 + $0x3f] sm:$0x1] }
  0xb7   : > { %1786 = vmatpush.msra.mxu2 %v6831_v44  ;;  %1806 = vmatpush.msra.mxu3 %v6837_v46  ;;  %v4630_v44 = vld [vmem:[%s6730_s11 + $0x36] sm:$0x1]  ;;  %v5244_v46 = vld [vmem:[%s6730_s11 + $0x1f] sm:$0x1] }
  0xb8   : > { %1747 = vmatpush.msra.mxu0 %v6894_v4  ;;  %1767 = vmatpush.msra.mxu1 %v6879_v62 }
  0xb9   : > { %1787 = vmatpush.msra.mxu2 %v6848_v51  ;;  %1807 = vmatpush.msra.mxu3 %v6851_v52  ;;  %v5241_v51 = vld [vmem:[%s6730_s11 + $0x7] sm:$0x1]  ;;  %v5247_v52 = vld [vmem:[%s6730_s11 + $0x37] sm:$0x1]  ;;  %s6480_s11 = sshra.s32 %s9910_s27, 4  ;;  %s6481_s11 = int_to_ptr.hbm [resolvable:$true] %s6480_s11 }
  0xba   : > { %1748 = vmatpush.msra.mxu0 %v6903_v8  ;;  %1768 = vmatpush.msra.mxu1 %v6896_v5  ;;  %p6487_p13 = scmp.lt.s32.totalorder %s6481_s11, %s9973_s5 }
  0xbb   : > { %1788 = vmatpush.msra.mxu2 %v6857_v55  ;;  %1808 = vmatpush.msra.mxu3 %v6861_v56 }
  0xbc   : > { %1749 = vmatpush.msra.mxu0 %v6915_v14  ;;  %1769 = vmatpush.msra.mxu1 %v6905_v9 }
  0xbd   : > { %4035 = vperm.xlu2 %5814, %v4009_v21   ;;  %3443 = vperm.xlu0 %5812, %v3397_v22   ;;  %v5614_v21 = vld [vmem:[%s6723_s15 + $0x60] ss:$8 sm:$0xf] }
  0xbe   : > { %4030 = vperm.xlu1 %5813, %v4008_v23   ;;  %1789 = vmatpush.msra.mxu2 %v6869_v59 }
  0xbf   : > { %1809 = vmatpush.msra.mxu3 %v6873_v60  ;;  %1750 = vmatpush.msra.mxu0 %v6929_v47 }
  0xc0   : > { %1770 = vmatpush.msra.mxu1 %v6917_v15  ;;  %1790 = vmatpush.msra.mxu2 %v6881_v63 }
  0xc1   : > { %1810 = vmatpush.msra.mxu3 %v6885_v0  ;;  %1751 = vmatpush.msra.mxu0 %v6938_v3 }
  0xc2   : > { %1771 = vmatpush.msra.mxu1 %v10140_v26  ;;  %1791 = vmatpush.msra.mxu2 %v10141_v27 }
  0xc3   : > { %1811 = vmatpush.msra.mxu3 %v10142_v29  ;;  %1752 = vmatpush.msra.mxu0 %v10143_v33  ;;  %v5616_v29 = vld [vmem:[%s6723_s15 + $0xa0] ss:$8 sm:$0xf] }
  0xc4   : > { %1772 = vmatpush.msra.mxu1 %v6942_v13  ;;  %1792 = vmatpush.msra.mxu2 %v10135_v49 }
  0xc5   : > { %4045 = vperm.xlu2 %5814, %v4011_v24   ;;  %4025 = vperm.xlu0 %5812, %v4007_v25   ;;  %v5615_v25 = vld [vmem:[%s6723_s15 + $0x80] ss:$8 sm:$0xf] }
  0xc6   : > { %4040 = vperm.xlu1 %5813, %v4010_v28   ;;  %1812 = vmatpush.msra.mxu3 %v10136_v1 }
  0xc7   : > { %1753 = vmatpush.msra.mxu0 %v6950_v12  ;;  %1773 = vmatpush.msra.mxu1 %v6947_v31 }
  0xc8   : > { %1793 = vmatpush.msra.mxu2 %v10137_v48  ;;  %1813 = vmatpush.msra.mxu3 %v10138_v6  ;;  %v457_v48 = vld [vmem:[%s6723_s15] ss:$8 sm:$0xf] }
  0xcd   : > { %4060 = vperm.xlu2 %5814, %v4014_v34   ;;  %4050 = vperm.xlu0 %5812, %v4012_v35  }
  0xce   : > { %4055 = vperm.xlu1 %5813, %v4013_v36   ;;  %v5617_v36 = vld [vmem:[%s6723_s15 + $0xc0] ss:$8 sm:$0xf] }
  0xd5   : > { %4642 = vperm.xlu2 %5814, %v4624_v37   ;;  %4647 = vperm.xlu0 %5812, %v4625_v38  }
  0xd6   : > { %4652 = vperm.xlu1 %5813, %v4626_v39  }
  0xdd   : > { %4667 = vperm.xlu2 %5814, %v4629_v40   ;;  %4657 = vperm.xlu0 %5812, %v4627_v41   ;;  %v5618_v40 = vld [vmem:[%s6723_s15 + $0xe0] ss:$8 sm:$0xf] }
  0xde   : > { %4662 = vperm.xlu1 %5813, %v4628_v42  }
  0xe5   : > { %5264 = vperm.xlu2 %5814, %v5242_v43   ;;  %4672 = vperm.xlu0 %5812, %v4630_v44  }
  0xe6   : > { %4677 = vperm.xlu1 %5813, %v4631_v45  }
  0xed   : > { %5274 = vperm.xlu2 %5814, %v5244_v46   ;;  %5269 = vperm.xlu0 %5812, %v5243_v50  }
  0xee   : > { %5259 = vperm.xlu1 %5813, %v5241_v51  }
  0xf5   : > { %5289 = vperm.xlu2 %5814, %v5247_v52   ;;  %5279 = vperm.xlu0 %5812, %v5245_v53  }
  0xf6   : > { %5284 = vperm.xlu1 %5813, %v5246_v54   ;;  %v529_v55 = vpop.f32.mrf.mxu2  ;;  %v549_v56 = vpop.f32.mrf.mxu3 }
  0xf7   : > { %v509_v57 = vpop.f32.mrf.mxu1  ;;  %v557_v58 = vrot.slane %v529_v55, 6  ;;  %v558_v59 = vrot.slane %v549_v56, 5 }
  0xf8   : > { %v556_v60 = vrot.slane %v509_v57, 7  ;;  %v489_v61 = vpop.f32.mrf.mxu0 }
  0xf9   : > { %v568_v63 = vsel %vm10005_vm1, %v557_v58, %v558_v59  ;;  %v574_v4 = vsel %vm10004_vm3, %v557_v58, %v558_v59  ;;  %v562_v6 = vsel %vm10006_vm2, %v557_v58, %v558_v59  ;;  %v580_v8 = vsel %vm10003_vm4, %v557_v58, %v558_v59 }
  0xfa   : > { %v566_v62 = vsel %vm565_vm0, %v489_v61, %v556_v60  ;;  %v572_v0 = vsel %vm10006_vm2, %v489_v61, %v556_v60  ;;  %v560_v5 = vsel %vm9998_vm6, %v489_v61, %v556_v60  ;;  %v578_v7 = vsel %vm10005_vm1, %v489_v61, %v556_v60 }
  0xfb   : > { %v570_v9 = vsel %vm10001_vm8, %v566_v62, %v568_v63  ;;  %v584_v12 = vsel %vm10004_vm3, %v489_v61, %v556_v60  ;;  %v586_v13 = vsel %vm10002_vm5, %v557_v58, %v558_v59  ;;  %v576_v14 = vsel %vm10000_vm9, %v572_v0, %v574_v4 }
  0xfc   : > { %v590_v15 = vsel %vm10003_vm4, %v489_v61, %v556_v60  ;;  %v592_v30 = vsel %vm9999_vm11, %v558_v59, %v557_v58  ;;  %v564_v31 = vsel %vm9996_vm7, %v560_v5, %v562_v6  ;;  %v582_v47 = vsel %vm9997_vm10, %v578_v7, %v580_v8 }
  0xfd   : > { %v571_v3 = vrot.slane %v570_v9, 1  ;;  %v588_v32 = vsel %vm9995_vm12, %v584_v12, %v586_v13  ;;  %v596_v49 = vsel %vm10002_vm5, %v489_v61, %v556_v60  ;;  %v597_v1 = vsel %vm9998_vm6, %v557_v58, %v558_v59  ;;  %5294 = vperm.xlu0 %5812, %v5248_v20  }
  0xfe   : > { %v577_v16 = vrot.slane %v576_v14, 2  ;;  %v594_v10 = vsel %vm9994_vm13, %v590_v15, %v592_v30  ;;  %v601_v11 = vsel %vm9999_vm11, %v556_v60, %v489_v61  ;;  %v602_v17 = vsel %vm565_vm0, %v557_v58, %v558_v59 }
  0xff   : > { %v583_v19 = vrot.slane %v582_v47, 3  ;;  %v589_v22 = vrot.slane %v588_v32, 4  ;;  %v599_v23 = vsel %vm9993_vm14, %v597_v1, %v596_v49  ;;  %v7159_v24 = vadd.f32 %v564_v31, %v457_v48 }
 0x100   : > { %v595_v26 = vrot.slane %v594_v10, 5  ;;  %v604_v27 = vsel %vm9992_vm15, %v602_v17, %v601_v11  ;;  %v7163_v28 = vadd.f32 %v5612_v2, %v571_v3  ;;  %v7166_v33 = vadd.f32 %v5613_v18, %v577_v16 }
 0x101   : > { %v600_v34 = vrot.slane %v599_v23, 6  ;;  %v7168_v35 = vadd.f32 %v5614_v21, %v583_v19  ;;  %v605_v37 = vrot.slane %v604_v27, 7  ;;  %v7171_v38 = vadd.f32 %v5615_v25, %v589_v22 }
 0x102   : > { %v5619_v39 = vmul.f32 -1.442695, %v7159_v24  ;;  %v7175_v41 = vadd.f32 %v5616_v29, %v595_v26  ;;  %v5620_v42 = vmul.f32 -1.442695, %v7163_v28  ;;  %v5621_v43 = vmul.f32 -1.442695, %v7166_v33 }
 0x103   : > { %v7179_v44 = vadd.f32 %v5617_v36, %v600_v34  ;;  %v5622_v45 = vmul.f32 -1.442695, %v7168_v35  ;;  %v7182_v46 = vadd.f32 %v5618_v40, %v605_v37  ;;  %v5623_v50 = vmul.f32 -1.442695, %v7171_v38 }
 0x104   : > { %5815 = vpow2.f32 %v5619_v39  ;;  %v5624_v51 = vmul.f32 -1.442695, %v7175_v41  ;;  %v631_v34 = vrot.slane %v7163_v28, 3 }
 0x105   : > { %5817 = vpow2.f32 %v5620_v42  ;;  %v5625_v52 = vmul.f32 -1.442695, %v7179_v44  ;;  %v5626_v53 = vmul.f32 -1.442695, %v7182_v46  ;;  %v636_v28 = vrot.slane %v7179_v44, 3 }
 0x106   : > { %5819 = vpow2.f32 %v5621_v43 }
 0x107   : > { %5821 = vpow2.f32 %v5622_v45 }
 0x108   : > { %5823 = vpow2.f32 %v5623_v50 }
 0x109   : > { %5825 = vpow2.f32 %v5624_v51 }
 0x10a   : > { %v5816_v54 = vpop.eup %5815  ;;  %5827 = vpow2.f32 %v5625_v52 }
 0x10b   : > { %v5818_v55 = vpop.eup %5817  ;;  %v678_v56 = vadd.f32 1.0, %v5816_v54  ;;  %5829 = vpow2.f32 %v5626_v53 }
 0x10c   : > { %v5820_v57 = vpop.eup %5819  ;;  %v7188_v58 = vadd.f32 1.0, %v5818_v55 }
 0x10d   : > { %v5822_v59 = vpop.eup %5821  ;;  %v7190_v60 = vadd.f32 1.0, %v5820_v57  ;;  %5831 = vrcp.f32 %v678_v56  ;;  %v695_v4 = vand.u32 2147483647, %v678_v56  ;;  %v697_v5 = vand.u32 2147483648, %v678_v56 }
 0x10e   : > { %v5824_v61 = vpop.eup %5823  ;;  %v7192_v62 = vadd.f32 1.0, %v5822_v59  ;;  %5833 = vrcp.f32 %v7188_v58  ;;  %v710_v7 = vand.u32 2147483647, %v7188_v58  ;;  %v712_v12 = vand.u32 2147483648, %v7188_v58 }
 0x10f   : > { %v5826_v63 = vpop.eup %5825  ;;  %v7195_v0 = vadd.f32 1.0, %v5824_v61  ;;  %5835 = vrcp.f32 %v7190_v60  ;;  %vm691_vm15 = vweird.f32 %v678_v56  ;;  %vm706_vm14 = vweird.f32 %v7188_v58 }
 0x110   : > { %v5828_v6 = vpop.eup %5827  ;;  %v7199_v9 = vadd.f32 1.0, %v5826_v63  ;;  %5837 = vrcp.f32 %v7192_v62  ;;  %v725_v14 = vand.u32 2147483647, %v7190_v60  ;;  %vm7206_vm13 = vcmp.eq.f32.partialorder %v695_v4, 8.507059e+37 }
 0x111   : > { %v5830_v8 = vpop.eup %5829  ;;  %5839 = vrcp.f32 %v7195_v0  ;;  %v698_v47 = vor.u32 1.1754944e-38, %v697_v5  ;;  %v727_v48 = vand.u32 2147483648, %v7190_v60  ;;  %v7211_v3 = vadd.f32 1.0, %v5828_v6  ;;  %v7321_v5 = vpop.permute.xlu0 %944 }
 0x112   : > { %vm7214_vm12 = vcmp.eq.f32.partialorder %v710_v7, 8.507059e+37  ;;  %vm721_vm7 = vweird.f32 %v7190_v60  ;;  %v740_v1 = vand.u32 2147483647, %v7192_v62  ;;  %v7220_v16 = vadd.f32 1.0, %v5830_v8 }
 0x113   : > { %v5832_v13 = vpop.eup %5831  ;;  %v713_v11 = vor.u32 1.1754944e-38, %v712_v12  ;;  %5841 = vrcp.f32 %v7199_v9  ;;  %vm7224_vm6 = vcmp.eq.f32.partialorder %v725_v14, 8.507059e+37  ;;  %vm736_vm11 = vweird.f32 %v7192_v62 }
 0x114   : > { %v5834_v15 = vpop.eup %5833  ;;  %v687_v30 = vmul.f32 %v5832_v13, %v678_v56  ;;  %vm692_vm10 = vweird.f32 %v5832_v13  ;;  %v742_v20 = vand.u32 2147483648, %v7192_v62  ;;  %v728_v23 = vor.u32 1.1754944e-38, %v727_v48 }
 0x115   : > { %v702_v32 = vmul.f32 %v5834_v15, %v7188_v58  ;;  %v5836_v2 = vpop.eup %5835  ;;  %vm707_vm9 = vweird.f32 %v5834_v15  ;;  %vm751_vm8 = vweird.f32 %v7195_v0  ;;  %vm7232_vm5 = vcmp.eq.f32.partialorder %v740_v1, 8.507059e+37  ;;  %vm693_vm4 = vmor %vm691_vm15, %vm692_vm10 }
 0x116   : > { %v688_v10 = vsub.f32 1.0, %v687_v30  ;;  %v717_v18 = vmul.f32 %v5836_v2, %v7190_v60  ;;  %v5838_v21 = vpop.eup %5837  ;;  %v755_v39 = vand.u32 2147483647, %v7195_v0  ;;  %v757_v40 = vand.u32 2147483648, %v7195_v0  ;;  %vm708_vm1 = vmor %vm706_vm14, %vm707_vm9 }
 0x117   : > { %v703_v17 = vsub.f32 1.0, %v702_v32  ;;  %v5840_v25 = vpop.eup %5839  ;;  %v732_v29 = vmul.f32 %v5838_v21, %v7192_v62  ;;  %vm722_vm3 = vweird.f32 %v5836_v2  ;;  %vm737_vm2 = vweird.f32 %v5838_v21 }
 0x118   : > { %v689_v22 = vmul.f32 %v5832_v13, %v688_v10  ;;  %v718_v27 = vsub.f32 1.0, %v717_v18  ;;  %v747_v37 = vmul.f32 %v5840_v25, %v7195_v0  ;;  %5843 = vrcp.f32 %v7211_v3 }
 0x119   : > { %v704_v26 = vmul.f32 %v5834_v15, %v703_v17  ;;  %v733_v45 = vsub.f32 1.0, %v732_v29  ;;  %v5842_v50 = vpop.eup %5841  ;;  %vm752_vm9 = vweird.f32 %v5840_v25  ;;  %v743_v4 = vor.u32 1.1754944e-38, %v742_v20 }
 0x11a   : > { %v690_v36 = vadd.f32 %v5832_v13, %v689_v22  ;;  %v719_v43 = vmul.f32 %v5836_v2, %v718_v27  ;;  %v748_v52 = vsub.f32 1.0, %v747_v37  ;;  %v762_v59 = vmul.f32 %v5842_v50, %v7199_v9 }
 0x11b   : > { %v705_v42 = vadd.f32 %v5834_v15, %v704_v26  ;;  %v734_v56 = vmul.f32 %v5838_v21, %v733_v45  ;;  %vm7257_vm10 = vcmp.eq.f32.partialorder %v755_v39, 8.507059e+37  ;;  %v758_v7 = vor.u32 1.1754944e-38, %v757_v40 }
 0x11c   : > { %v694_v51 = vsel %vm693_vm4, %v5832_v13, %v690_v36  ;;  %v720_v55 = vadd.f32 %v5836_v2, %v719_v43  ;;  %vm723_vm4 = vmor %vm721_vm7, %vm722_vm3  ;;  %v749_v58 = vmul.f32 %v5840_v25, %v748_v52  ;;  %v763_v8 = vsub.f32 1.0, %v762_v59 }
 0x11d   : > { %v7247_v53 = vsel %vm7206_vm13, %v698_v47, %v694_v51  ;;  %v709_v54 = vsel %vm708_vm1, %v5834_v15, %v705_v42  ;;  %v735_v63 = vadd.f32 %v5838_v21, %v734_v56  ;;  %vm738_vm1 = vmor %vm736_vm11, %vm737_vm2  ;;  %v770_v13 = vand.u32 2147483647, %v7199_v9 }
 0x11e   : > { %v7251_v57 = vsel %vm7214_vm12, %v713_v11, %v709_v54  ;;  %814 = vst [vmem:[#allocation1] ss:$9 sm:$0xff] %v7247_v53  ;;  %v724_v61 = vsel %vm723_vm4, %v5836_v2, %v720_v55  ;;  %v750_v60 = vadd.f32 %v5840_v25, %v749_v58  ;;  %vm753_vm3 = vmor %vm751_vm8, %vm752_vm9  ;;  %v772_v14 = vand.u32 2147483648, %v7199_v9  ;;  %v5844_v15 = vpop.eup %5843 }
 0x11f   : > { %816 = vst [vmem:[#allocation1 + $0x1] ss:$9 sm:$0xff] %v7251_v57  ;;  %v7264_v6 = vsel %vm7224_vm6, %v728_v23, %v724_v61  ;;  %v739_v12 = vsel %vm738_vm1, %v5838_v21, %v735_v63  ;;  %5845 = vrcp.f32 %v7220_v16  ;;  %v764_v31 = vmul.f32 %v5842_v50, %v763_v8 }
 0x120   : > { %818 = vst [vmem:[#allocation1 + $0x2] ss:$9 sm:$0xff] %v7264_v6  ;;  %v7277_v62 = vsel %vm7232_vm5, %v743_v4, %v739_v12  ;;  %v754_v30 = vsel %vm753_vm3, %v5840_v25, %v750_v60  ;;  %vm767_vm2 = vweird.f32 %v5842_v50  ;;  %v777_v47 = vmul.f32 %v5844_v15, %v7211_v3  ;;  %v7319_v4 = vld [vmem:[#allocation3] sm:$0xff]  ;;  %v7323_v60 = vpop.permute.xlu1 %939 }
 0x121   : > { %v7281_v0 = vsel %vm7257_vm10, %v758_v7, %v754_v30  ;;  %820 = vst [vmem:[#allocation1 + $0x3] ss:$9 sm:$0xff] %v7277_v62  ;;  %v765_v48 = vadd.f32 %v5842_v50, %v764_v31  ;;  %vm766_vm6 = vweird.f32 %v7199_v9  ;;  %v773_v32 = vor.u32 1.1754944e-38, %v772_v14 }
 0x122   : > { %822 = vst [vmem:[#allocation1 + $0x4] ss:$9 sm:$0xff] %v7281_v0  ;;  %vm768_vm7 = vmor %vm766_vm6, %vm767_vm2  ;;  %v778_v49 = vsub.f32 1.0, %v777_v47  ;;  %vm771_vm5 = vcmp.eq.f32.partialorder %v770_v13, 8.507059e+37  ;;  %v787_v2 = vand.u32 2147483648, %v7211_v3  ;;  %vm782_vm8 = vweird.f32 %v5844_v15 }
 0x123   : > { %v769_v1 = vsel %vm768_vm7, %v5842_v50, %v765_v48  ;;  %v785_v18 = vand.u32 2147483647, %v7211_v3  ;;  %vm781_vm11 = vweird.f32 %v7211_v3  ;;  %v802_v23 = vand.u32 2147483648, %v7220_v16 }
 0x124   : > { %v7288_v11 = vsel %vm771_vm5, %v773_v32, %v769_v1  ;;  %v779_v17 = vmul.f32 %v5844_v15, %v778_v49  ;;  %vm783_vm12 = vmor %vm781_vm11, %vm782_vm8  ;;  %v788_v20 = vor.u32 1.1754944e-38, %v787_v2  ;;  %v800_v27 = vand.u32 2147483647, %v7220_v16 }
 0x125   : > { %v5846_v10 = vpop.eup %5845  ;;  %824 = vst [vmem:[#allocation1 + $0x5] ss:$9 sm:$0xff] %v7288_v11  ;;  %vm786_vm13 = vcmp.eq.f32.partialorder %v785_v18, 8.507059e+37  ;;  %v630_v29 = vrot.slane %v7159_v24, 3  ;;  %vm796_vm15 = vweird.f32 %v7220_v16  ;;  %v632_v36 = vrot.slane %v7166_v33, 3 }
 0x126   : > { %v792_v19 = vmul.f32 %v5846_v10, %v7220_v16  ;;  %v780_v9 = vadd.f32 %v5844_v15, %v779_v17  ;;  %vm797_vm14 = vweird.f32 %v5846_v10  ;;  %v803_v37 = vor.u32 1.1754944e-38, %v802_v23 }
 0x127   : > { %vm798_vm4 = vmor %vm796_vm15, %vm797_vm14  ;;  %v633_v39 = vrot.slane %v7168_v35, 3  ;;  %vm801_vm9 = vcmp.eq.f32.partialorder %v800_v27, 8.507059e+37  ;;  %v634_v42 = vrot.slane %v7171_v38, 3  ;;  %5847 = vtanh.f32 %v630_v29 }
 0x128   : > { %v793_v21 = vsub.f32 1.0, %v792_v19  ;;  %v784_v22 = vsel %vm783_vm12, %v5844_v15, %v780_v9  ;;  %v635_v24 = vrot.slane %v7175_v41, 3  ;;  %5849 = vtanh.f32 %v631_v34  ;;  %v950_v19 = vpop.permute.xlu0 %949  ;;  %v955_v9 = vpop.permute.xlu1 %954 }
 0x129   : > { %v7295_v25 = vsel %vm786_vm13, %v788_v20, %v784_v22  ;;  %5851 = vtanh.f32 %v632_v36  ;;  %v637_v33 = vrot.slane %v7182_v46, 3  ;;  %v867_v13 = vrot.slane %v7247_v53, 2 }
 0x12a   : > { %v794_v26 = vmul.f32 %v5846_v10, %v793_v21  ;;  %826 = vst [vmem:[#allocation1 + $0x6] ss:$9 sm:$0xff] %v7295_v25  ;;  %5853 = vtanh.f32 %v633_v39  ;;  %v868_v15 = vrot.slane %v7251_v57, 2  ;;  %v869_v30 = vrot.slane %v7264_v6, 2 }
 0x12b   : > { %5855 = vtanh.f32 %v634_v42  ;;  %v870_v31 = vrot.slane %v7277_v62, 2  ;;  %v871_v47 = vrot.slane %v7281_v0, 2  ;;  %v872_v48 = vrot.slane %v7288_v11, 2 }
 0x12c   : > { %v795_v3 = vadd.f32 %v5846_v10, %v794_v26  ;;  %5857 = vtanh.f32 %v635_v24  ;;  %v873_v32 = vrot.slane %v7295_v25, 2  ;;  %vm10059_vm10 = vcmask 1047559  }
 0x12d   : > { %v5848_v35 = vpop.eup %5847  ;;  %5859 = vtanh.f32 %v636_v28  ;;  %vm10154_vm1 = vcmask 1042434   ;;  %vm10156_vm2 = vcmask 1043459   ;;  %vm10158_vm7 = vcmask 1044484  }
 0x12e   : > { %v799_v40 = vsel %vm798_vm4, %v5846_v10, %v795_v3  ;;  %v5850_v16 = vpop.eup %5849  ;;  %5861 = vtanh.f32 %v637_v33  ;;  %v832_v38 = vmul.f32 %v5848_v35, %v7247_v53  ;;  %v960_v53 = vpop.permute.xlu2 %959  ;;  %v7339_v10 = vld [vmem:[#allocation2] sm:$0xff]  ;;  %vm10155_vm3 = vmmov %vm10154_vm1  ;;  %vm10160_vm8 = vcmask 1045509  }
 0x12f   : > { %v7305_v43 = vsel %vm801_vm9, %v803_v37, %v799_v40  ;;  %v5852_v45 = vpop.eup %5851  ;;  %v833_v41 = vmul.f32 %v5850_v16, %v7251_v57  ;;  %v915_v57 = vrot.slane %v7339_v10, 1  ;;  %v920_v17 = vrot.slane %v7339_v10, 6  ;;  %vm10157_vm6 = vmmov %vm10156_vm2 }
 0x130   : > { %828 = vst [vmem:[#allocation1 + $0x7] ss:$9 sm:$0xff] %v7305_v43  ;;  %v5854_v51 = vpop.eup %5853  ;;  %v834_v52 = vmul.f32 %v5852_v45, %v7264_v6  ;;  %v874_v2 = vrot.slane %v7305_v43, 2  ;;  %v916_v6 = vrot.slane %v7339_v10, 2  ;;  %v921_v18 = vrot.slane %v7339_v10, 7  ;;  %vm10159_vm5 = vmmov %vm10158_vm7 }
 0x131   : > { %v5856_v44 = vpop.eup %5855  ;;  %v835_v46 = vmul.f32 %v5854_v51, %v7277_v62  ;;  %v917_v62 = vrot.slane %v7339_v10, 3  ;;  %vm10161_vm11 = vmmov %vm10160_vm8  ;;  %vm10162_vm12 = vcmask 1046534  }
 0x132   : > { %v5858_v54 = vpop.eup %5857  ;;  %v836_v55 = vmul.f32 %v5856_v44, %v7281_v0  ;;  %v918_v0 = vrot.slane %v7339_v10, 4  ;;  %vm10163_vm13 = vmmov %vm10162_vm12 }
 0x133   : > { %v5860_v56 = vpop.eup %5859  ;;  %v837_v58 = vmul.f32 %v5858_v54, %v7288_v11  ;;  %v919_v11 = vrot.slane %v7339_v10, 5  ;;  %vm10211_vm14 = vmmov %vm10156_vm2 }
 0x134   : > { %v5862_v59 = vpop.eup %5861  ;;  %v838_v61 = vmul.f32 %v5860_v56, %v7295_v25  ;;  %vm10212_vm15 = vmmov %vm10159_vm5 }
 0x135   : > { %v839_v63 = vmul.f32 %v5862_v59, %v7305_v43  ;;  %vm10213_vm4 = vmmov %vm10160_vm8 }
 0x136   : > { %v965_v59 = vpop.permute.xlu2 %964  ;;  %vm10214_vm9 = vmmov %vm10154_vm1 }
 0x137   : > { %v829_v50 = vld [vmem:[#allocation1 + $0x9] sm:$0xff] }
 0x138   : > { %848 = vst [vmem:[#allocation1] ss:$9 sm:$0xff] %v832_v38  ;;  %v831_v7 = vmul.f32 %v829_v50, %v7319_v4 }
 0x139   : > { %850 = vst [vmem:[#allocation1 + $0x1] ss:$9 sm:$0xff] %v833_v41 }
 0x13a   : > { %852 = vst [vmem:[#allocation1 + $0x2] ss:$9 sm:$0xff] %v834_v52 }
 0x13b   : > { %854 = vst [vmem:[#allocation1 + $0x3] ss:$9 sm:$0xff] %v835_v46 }
 0x13c   : > { %856 = vst [vmem:[#allocation1 + $0x4] ss:$9 sm:$0xff] %v836_v55 }
 0x13d   : > { %858 = vst [vmem:[#allocation1 + $0x5] ss:$9 sm:$0xff] %v837_v58 }
 0x13e   : > { %860 = vst [vmem:[#allocation1 + $0x6] ss:$9 sm:$0xff] %v838_v61 }
 0x13f   : > { %862 = vst [vmem:[#allocation1 + $0x7] ss:$9 sm:$0xff] %v839_v63 }
 0x146   : > { %v863_v8 = vld [vmem:[#allocation1] sm:$0xff] }
 0x147   : > { %v865_v12 = vadd.f32 %v863_v8, %v831_v7 }
 0x149   : > { %5863 = vtanh.f32 %v865_v12  ;;  %v7328_v14 = vsub.f32 %v865_v12, %v7319_v4 }
 0x14b   : > { %v1012_v49 = vrot.slane %v7328_v14, 1  ;;  %v1013_v1 = vrot.slane %v7328_v14, 2  ;;  %v1014_v20 = vrot.slane %v7328_v14, 3  ;;  %v1015_v21 = vrot.slane %v7328_v14, 4 }
 0x14c   : > { %v1016_v22 = vrot.slane %v7328_v14, 5  ;;  %v1017_v23 = vrot.slane %v7328_v14, 6  ;;  %v1018_v26 = vrot.slane %v7328_v14, 7  ;;  %v1027_v27 = vmul.f32 %v7328_v14, %v7323_v60 }
 0x14d   : > { %v1028_v29 = vmul.f32 %v1012_v49, %v7321_v5  ;;  %v1029_v34 = vmul.f32 %v1013_v1, %v950_v19  ;;  %v1030_v56 = vmul.f32 %v1014_v20, %v955_v9 }
 0x14e   : > { %v1032_v14 = vmul.f32 %v1016_v22, %v965_v59 }
 0x14f   : > { %v5864_v25 = vpop.eup %5863  ;;  %v1043_v58 = vrot.slane %v1028_v29, 7 }
 0x150   : > { %v884_v3 = vrot.slane %v5864_v25, 1  ;;  %v885_v36 = vrot.slane %v5864_v25, 2  ;;  %v886_v37 = vrot.slane %v5864_v25, 3  ;;  %v887_v39 = vrot.slane %v5864_v25, 4 }
 0x151   : > { %v888_v40 = vrot.slane %v5864_v25, 5  ;;  %v889_v42 = vrot.slane %v5864_v25, 6  ;;  %v890_v43 = vrot.slane %v5864_v25, 7  ;;  %v898_v24 = vmul.f32 %v5864_v25, %v867_v13 }
 0x152   : > { %v899_v28 = vmul.f32 %v884_v3, %v868_v15  ;;  %v900_v33 = vmul.f32 %v885_v36, %v869_v30  ;;  %v901_v35 = vmul.f32 %v886_v37, %v870_v31  ;;  %v902_v16 = vmul.f32 %v887_v39, %v871_v47  ;;  %v970_v30 = vpop.permute.xlu0 %969  ;;  %v975_v31 = vpop.permute.xlu1 %974 }
 0x153   : > { %v903_v38 = vmul.f32 %v888_v40, %v872_v48  ;;  %v904_v45 = vmul.f32 %v889_v42, %v873_v32  ;;  %v905_v50 = vmul.f32 %v890_v43, %v874_v2  ;;  %v929_v41 = vsub.f32 %v898_v24, %v7339_v10 }
 0x154   : > { %v930_v51 = vsub.f32 %v899_v28, %v915_v57  ;;  %v931_v52 = vsub.f32 %v900_v33, %v916_v6  ;;  %v932_v44 = vsub.f32 %v901_v35, %v917_v62  ;;  %v933_v46 = vsub.f32 %v902_v16, %v918_v0  ;;  %v7396_v16 = vld [vmem:[#allocation8 + $0x1e8] sm:$0xff] }
 0x155   : > { %v934_v54 = vsub.f32 %v903_v38, %v919_v11  ;;  %v935_v55 = vsub.f32 %v904_v45, %v920_v17  ;;  %v936_v61 = vsub.f32 %v905_v50, %v921_v18  ;;  %v1031_v13 = vmul.f32 %v1015_v21, %v960_v53  ;;  %v7401_v45 = vld [vmem:[#allocation8 + $0x1f0] sm:$0xff]  ;;  %v7404_v50 = vld [vmem:[#allocation8 + $0x1f8] sm:$0xff] }
 0x156   : > { %v978_v63 = vmul.f32 %v7321_v5, %v930_v51  ;;  %v979_v7 = vmul.f32 %v950_v19, %v931_v52  ;;  %v980_v8 = vmul.f32 %v955_v9, %v932_v44  ;;  %v981_v12 = vmul.f32 %v960_v53, %v933_v46  ;;  %v7409_v51 = vld [vmem:[#allocation8 + $0x1c0] sm:$0xff]  ;;  %v7412_v52 = vld [vmem:[#allocation8 + $0x1c8] sm:$0xff]  ;;  %v7417_v46 = vld [vmem:[#allocation8 + $0x1d0] sm:$0xff] }
 0x157   : > { %v1045_v15 = vrot.slane %v1029_v34, 6  ;;  %v977_v47 = vmul.f32 %v7323_v60, %v929_v41  ;;  %v982_v48 = vmul.f32 %v965_v59, %v934_v54  ;;  %v983_v1 = vmul.f32 %v970_v30, %v935_v55  ;;  %v7420_v54 = vld [vmem:[#allocation8 + $0x1d8] sm:$0xff] }
 0x158   : > { %v993_v32 = vrot.slane %v978_v63, 7  ;;  %v995_v49 = vrot.slane %v979_v7, 6  ;;  %v1033_v2 = vmul.f32 %v1017_v23, %v970_v30  ;;  %v1034_v57 = vmul.f32 %v1018_v26, %v975_v31  ;;  %v7436_v63 = vld [vmem:[#allocation8 + $0x1b8] sm:$0xff] }
 0x159   : > { %v1047_v6 = vrot.slane %v1030_v56, 5  ;;  %v984_v62 = vmul.f32 %v975_v31, %v936_v61  ;;  %v997_v0 = vrot.slane %v980_v8, 5  ;;  %v1044_v11 = vsel %vm565_vm0, %v1043_v58, %v1027_v27  ;;  %v7425_v56 = vld [vmem:[#allocation8 + $0x1a0] sm:$0xff]  ;;  %v7428_v58 = vld [vmem:[#allocation8 + $0x1a8] sm:$0xff]  ;;  %v7433_v61 = vld [vmem:[#allocation8 + $0x1b0] sm:$0xff] }
 0x15a   : > { %v994_v5 = vsel %vm565_vm0, %v993_v32, %v977_v47  ;;  %v999_v17 = vrot.slane %v981_v12, 4  ;;  %v1049_v18 = vrot.slane %v1031_v13, 4  ;;  %v1046_v19 = vsel %vm10155_vm3, %v1045_v15, %v1044_v11  ;;  %v7441_v8 = vld [vmem:[#allocation8 + $0x180] sm:$0xff]  ;;  %v7444_v12 = vld [vmem:[#allocation8 + $0x188] sm:$0xff]  ;;  %v7454_v15 = vld [vmem:[#allocation8 + $0x198] sm:$0xff] }
 0x15b   : > { %v996_v53 = vsel %vm10154_vm1, %v995_v49, %v994_v5  ;;  %v1001_v9 = vrot.slane %v982_v48, 3  ;;  %v1051_v20 = vrot.slane %v1032_v14, 3  ;;  %v1048_v21 = vsel %vm10157_vm6, %v1047_v6, %v1046_v19  ;;  %v7451_v14 = vld [vmem:[#allocation8 + $0x190] sm:$0xff]  ;;  %v7461_v31 = vld [vmem:[#allocation8 + $0x160] sm:$0xff]  ;;  %v7464_v47 = vld [vmem:[#allocation8 + $0x168] sm:$0xff] }
 0x15c   : > { %v998_v60 = vsel %vm10156_vm2, %v997_v0, %v996_v53  ;;  %v1003_v23 = vrot.slane %v983_v1, 2  ;;  %v1053_v25 = vrot.slane %v1033_v2, 2  ;;  %v1050_v26 = vsel %vm10159_vm5, %v1049_v18, %v1048_v21  ;;  %10164 = vst [vmem:[#allocation23_spill] sm:$0xff] %v7464_v47  ;;  %v7471_v32 = vld [vmem:[#allocation8 + $0x170] sm:$0xff]  ;;  %v7474_v49 = vld [vmem:[#allocation8 + $0x178] sm:$0xff]  ;;  %v7480_v1 = vld [vmem:[#allocation8 + $0x140] sm:$0xff] }
 0x15d   : > { %v1000_v22 = vsel %vm10158_vm7, %v999_v17, %v998_v60  ;;  %v1005_v29 = vrot.slane %v984_v62, 1  ;;  %v1055_v34 = vrot.slane %v1034_v57, 1  ;;  %v1052_v3 = vsel %vm10161_vm11, %v1051_v20, %v1050_v26  ;;  %10165 = vst [vmem:[#allocation24_spill] sm:$0xff] %v7471_v32  ;;  %v7483_v2 = vld [vmem:[#allocation8 + $0x148] sm:$0xff]  ;;  %v7489_v57 = vld [vmem:[#allocation8 + $0x150] sm:$0xff]  ;;  %v7492_v6 = vld [vmem:[#allocation8 + $0x158] sm:$0xff] }
 0x15e   : > { %v1002_v27 = vsel %vm10160_vm8, %v1001_v9, %v1000_v22  ;;  %v1054_v37 = vsel %vm10163_vm13, %v1053_v25, %v1052_v3  ;;  %10166 = vst [vmem:[#allocation25_spill] sm:$0xff] %v7474_v49  ;;  %v7498_v62 = vld [vmem:[#allocation8 + $0x120] sm:$0xff]  ;;  %v7501_v5 = vld [vmem:[#allocation8 + $0x128] sm:$0xff]  ;;  %v7507_v0 = vld [vmem:[#allocation8 + $0x130] sm:$0xff]  ;;  %vm10215_vm3 = vcmask 1042433   ;;  %vm10217_vm7 = vcmask 1043458  }
 0x15f   : > { %v1004_v36 = vsel %vm10162_vm12, %v1003_v23, %v1002_v27  ;;  %v1056_v40 = vsel %vm10059_vm10, %v1055_v34, %v1054_v37  ;;  %10167 = vst [vmem:[#allocation26_spill] sm:$0xff] %v7480_v1  ;;  %v7510_v11 = vld [vmem:[#allocation8 + $0x138] sm:$0xff]  ;;  %v7513_v53 = vld [vmem:[#allocation8 + $0x100] sm:$0xff]  ;;  %v7516_v17 = vld [vmem:[#allocation8 + $0x108] sm:$0xff]  ;;  %vm10218_vm5 = vcmask 1046528   ;;  %vm10219_vm8 = vcmask 1040384  }
 0x160   : > { %v1007_v39 = vsel %vm10059_vm10, %v1005_v29, %v1004_v36  ;;  %v7377_v43 = vadd.f32 %v1056_v40, %v7319_v4  ;;  %10168 = vst [vmem:[#allocation20_spill] sm:$0xff] %v7483_v2  ;;  %v7519_v18 = vld [vmem:[#allocation8 + $0x110] sm:$0xff]  ;;  %v7522_v19 = vld [vmem:[#allocation8 + $0x118] sm:$0xff]  ;;  %v7525_v60 = vld [vmem:[#allocation8 + $0xe0] sm:$0xff]  ;;  %vm10222_vm13 = vcmask 1044483  }
 0x161   : > { %v7374_v42 = vadd.f32 %v7339_v10, %v1007_v39  ;;  %v7393_v10 = vld [vmem:[#allocation8 + $0x1e0] sm:$0xff]  ;;  %10169 = vst [vmem:[#allocation27_spill] sm:$0xff] %v7489_v57  ;;  %v7528_v9 = vld [vmem:[#allocation8 + $0xe8] sm:$0xff]  ;;  %v7531_v20 = vld [vmem:[#allocation8 + $0xf0] sm:$0xff] }
 0x162   : > { %v1083_v24 = vrot.slane %v7377_v43, 1  ;;  %v1084_v28 = vrot.slane %v7377_v43, 2  ;;  %v1085_v33 = vrot.slane %v7377_v43, 3  ;;  %v1086_v35 = vrot.slane %v7377_v43, 4  ;;  %1097 = vst [vmem:[%s6738_s18] sm:$0x1] %v7377_v43  ;;  %v7534_v21 = vld [vmem:[#allocation8 + $0xf8] sm:$0xff]  ;;  %vm10216_vm2 = vmmov %vm10162_vm12 }
 0x163   : > { %1074 = vst [vmem:[%s6736_s17] sm:$0x1] %v7374_v42  ;;  %1137 = vmatmul.f32.vlgmr.msrb.gmra.mxu0 %v7374_v42  ;;  %1157 = vmatmul.f32.vlgmr.msrb.gmra.mxu1 %v7374_v42  ;;  %v1087_v4 = vrot.slane %v7377_v43, 5  ;;  %v1088_v38 = vrot.slane %v7377_v43, 6  ;;  %v1089_v41 = vrot.slane %v7377_v43, 7  ;;  %v10013_v44 = vrot.slane %v7374_v42, 1  ;;  %v7537_v22 = vld [vmem:[#allocation8 + $0xc0] sm:$0xff]  ;;  %vm10220_vm11 = vmmov %vm10212_vm15 }
 0x164   : > { %1177 = vmatmul.f32.vlgmr.msrb.gmra.mxu2 %v7374_v42  ;;  %1197 = vmatmul.f32.vlgmr.msrb.gmra.mxu3 %v7374_v42  ;;  %1098 = vst [vmem:[%s6738_s18 + $0x8] sm:$0x1] %v1083_v24  ;;  %v10012_v55 = vrot.slane %v7374_v42, 2  ;;  %v10011_v59 = vrot.slane %v7374_v42, 3  ;;  %v10010_v7 = vrot.slane %v7374_v42, 4  ;;  %v10009_v13 = vrot.slane %v7374_v42, 5  ;;  %vm10221_vm12 = vmmov %vm10213_vm4 }
 0x165   : > { %2355 = vmatpush.msrb.mxu0 %v7393_v10  ;;  %2375 = vmatpush.msrb.mxu1 %v7396_v16  ;;  %1099 = vst [vmem:[%s6738_s18 + $0x10] sm:$0x1] %v1084_v28  ;;  %v10008_v30 = vrot.slane %v7374_v42, 6  ;;  %v10007_v48 = vrot.slane %v7374_v42, 7  ;;  %v7540_v23 = vld [vmem:[#allocation8 + $0xc8] sm:$0xff]  ;;  %v7543_v25 = vld [vmem:[#allocation8 + $0xd0] sm:$0xff] }
 0x166   : > { %2395 = vmatpush.msrb.mxu2 %v7401_v45  ;;  %2415 = vmatpush.msrb.mxu3 %v7404_v50  ;;  %1100 = vst [vmem:[%s6738_s18 + $0x18] sm:$0x1] %v1085_v33  ;;  %v7546_v26 = vld [vmem:[#allocation8 + $0xd8] sm:$0xff]  ;;  %v7549_v27 = vld [vmem:[#allocation8 + $0xa0] sm:$0xff]  ;;  %v7552_v29 = vld [vmem:[#allocation8 + $0xa8] sm:$0xff] }
 0x167   : > { %2356 = vmatpush.msrb.mxu0 %v7409_v51  ;;  %2376 = vmatpush.msrb.mxu1 %v7412_v52  ;;  %1101 = vst [vmem:[%s6738_s18 + $0x20] sm:$0x1] %v1086_v35  ;;  %v7555_v34 = vld [vmem:[#allocation8 + $0xb0] sm:$0xff]  ;;  %v7558_v3 = vld [vmem:[#allocation8 + $0xb8] sm:$0xff]  ;;  %v7561_v36 = vld [vmem:[#allocation8 + $0x80] sm:$0xff] }
 0x168   : > { %2396 = vmatpush.msrb.mxu2 %v7417_v46  ;;  %2416 = vmatpush.msrb.mxu3 %v7420_v54  ;;  %1102 = vst [vmem:[%s6738_s18 + $0x28] sm:$0x1] %v1087_v4  ;;  %v7564_v37 = vld [vmem:[#allocation8 + $0x88] sm:$0xff]  ;;  %v7567_v39 = vld [vmem:[#allocation8 + $0x90] sm:$0xff]  ;;  %v7570_v40 = vld [vmem:[#allocation8 + $0x98] sm:$0xff] }
 0x169   : > { %2357 = vmatpush.msrb.mxu0 %v7425_v56  ;;  %2377 = vmatpush.msrb.mxu1 %v7428_v58  ;;  %1103 = vst [vmem:[%s6738_s18 + $0x30] sm:$0x1] %v1088_v38  ;;  %v7573_v24 = vld [vmem:[#allocation8 + $0x60] sm:$0xff]  ;;  %v7576_v28 = vld [vmem:[#allocation8 + $0x68] sm:$0xff]  ;;  %v7579_v33 = vld [vmem:[#allocation8 + $0x70] sm:$0xff] }
 0x16a   : > { %2397 = vmatpush.msrb.mxu2 %v7433_v61  ;;  %2417 = vmatpush.msrb.mxu3 %v7436_v63  ;;  %1104 = vst [vmem:[%s6738_s18 + $0x38] sm:$0x1] %v1089_v41  ;;  %v7582_v35 = vld [vmem:[#allocation8 + $0x78] sm:$0xff]  ;;  %v7585_v4 = vld [vmem:[#allocation8 + $0x40] sm:$0xff]  ;;  %v7588_v38 = vld [vmem:[#allocation8 + $0x48] sm:$0xff] }
 0x16b   : > { %2358 = vmatpush.msrb.mxu0 %v7441_v8  ;;  %2378 = vmatpush.msrb.mxu1 %v7444_v12  ;;  %1075 = vst [vmem:[%s6736_s17 + $0x8] sm:$0x1] %v10013_v44  ;;  %v7591_v41 = vld [vmem:[#allocation8 + $0x50] sm:$0xff]  ;;  %v7612_v44 = vld [vmem:[#allocation8 + $0x8] sm:$0xff] }
 0x16c   : > { %2398 = vmatpush.msrb.mxu2 %v7451_v14  ;;  %2418 = vmatpush.msrb.mxu3 %v7454_v15  ;;  %1076 = vst [vmem:[%s6736_s17 + $0x10] sm:$0x1] %v10012_v55  ;;  %v7609_v55 = vld [vmem:[#allocation8] sm:$0xff] }
 0x16d   : > { %2359 = vmatpush.msrb.mxu0 %v7461_v31  ;;  %2379 = vmatpush.msrb.mxu1 %v7464_v47  ;;  %1077 = vst [vmem:[%s6736_s17 + $0x18] sm:$0x1] %v10011_v59  ;;  %v7606_v59 = vld [vmem:[#allocation8 + $0x38] sm:$0xff] }
 0x16e   : > { %2399 = vmatpush.msrb.mxu2 %v7471_v32  ;;  %2419 = vmatpush.msrb.mxu3 %v7474_v49  ;;  %1078 = vst [vmem:[%s6736_s17 + $0x20] sm:$0x1] %v10010_v7  ;;  %v7603_v7 = vld [vmem:[#allocation8 + $0x30] sm:$0xff] }
 0x16f   : > { %2360 = vmatpush.msrb.mxu0 %v7480_v1  ;;  %2380 = vmatpush.msrb.mxu1 %v7483_v2  ;;  %1079 = vst [vmem:[%s6736_s17 + $0x28] sm:$0x1] %v10009_v13  ;;  %v7600_v13 = vld [vmem:[#allocation8 + $0x28] sm:$0xff] }
 0x170   : > { %2400 = vmatpush.msrb.mxu2 %v7489_v57  ;;  %10170 = vst [vmem:[#allocation21_spill] sm:$0xff] %v7492_v6  ;;  %2420 = vmatpush.msrb.mxu3 %v7492_v6 }
 0x171   : > { %1080 = vst [vmem:[%s6736_s17 + $0x30] sm:$0x1] %v10008_v30  ;;  %2361 = vmatpush.msrb.mxu0 %v7498_v62  ;;  %2381 = vmatpush.msrb.mxu1 %v7501_v5  ;;  %v7597_v30 = vld [vmem:[#allocation8 + $0x20] sm:$0xff] }
 0x172   : > { %10171 = vst [vmem:[#allocation22_spill] sm:$0xff] %v7498_v62  ;;  %2401 = vmatpush.msrb.mxu2 %v7507_v0  ;;  %2421 = vmatpush.msrb.mxu3 %v7510_v11 }
 0x173   : > { %10172 = vst [vmem:[#allocation28_spill] sm:$0xff] %v7501_v5  ;;  %2362 = vmatpush.msrb.mxu0 %v7513_v53  ;;  %2382 = vmatpush.msrb.mxu1 %v7516_v17 }
 0x174   : > { %1081 = vst [vmem:[%s6736_s17 + $0x38] sm:$0x1] %v10007_v48  ;;  %2402 = vmatpush.msrb.mxu2 %v7519_v18  ;;  %2422 = vmatpush.msrb.mxu3 %v7522_v19  ;;  %v7594_v48 = vld [vmem:[#allocation8 + $0x58] sm:$0xff] }
 0x175   : > { %10173 = vst [vmem:[#allocation29_spill] sm:$0xff] %v7507_v0  ;;  %2363 = vmatpush.msrb.mxu0 %v7525_v60  ;;  %2383 = vmatpush.msrb.mxu1 %v7528_v9 }
 0x176   : > { %10174 = vst [vmem:[#allocation30_spill] sm:$0xff] %v7510_v11  ;;  %2403 = vmatpush.msrb.mxu2 %v7531_v20  ;;  %2423 = vmatpush.msrb.mxu3 %v7534_v21 }
 0x177   : > { %10175 = vst [vmem:[#allocation31_spill] sm:$0xff] %v7513_v53  ;;  %2364 = vmatpush.msrb.mxu0 %v7537_v22  ;;  %2384 = vmatpush.msrb.mxu1 %v7540_v23 }
 0x178   : > { %10176 = vst [vmem:[#allocation32_spill] sm:$0xff] %v7516_v17  ;;  %2404 = vmatpush.msrb.mxu2 %v7543_v25  ;;  %2424 = vmatpush.msrb.mxu3 %v7546_v26 }
 0x179   : > { %10177 = vst [vmem:[#allocation33_spill] sm:$0xff] %v7519_v18  ;;  %2365 = vmatpush.msrb.mxu0 %v7549_v27  ;;  %2385 = vmatpush.msrb.mxu1 %v7552_v29 }
 0x17a   : > { %10178 = vst [vmem:[#allocation34_spill] sm:$0xff] %v7522_v19  ;;  %2405 = vmatpush.msrb.mxu2 %v7555_v34  ;;  %2425 = vmatpush.msrb.mxu3 %v7558_v3 }
 0x17b   : > { %10179 = vst [vmem:[#allocation35_spill] sm:$0xff] %v7525_v60  ;;  %2366 = vmatpush.msrb.mxu0 %v7561_v36  ;;  %2386 = vmatpush.msrb.mxu1 %v7564_v37 }
 0x17c   : > { %10180 = vst [vmem:[#allocation36_spill] sm:$0xff] %v7528_v9  ;;  %2406 = vmatpush.msrb.mxu2 %v7567_v39  ;;  %2426 = vmatpush.msrb.mxu3 %v7570_v40 }
 0x17d   : > { %10181 = vst [vmem:[#allocation37_spill] sm:$0xff] %v7531_v20  ;;  %2367 = vmatpush.msrb.mxu0 %v7573_v24  ;;  %2387 = vmatpush.msrb.mxu1 %v7576_v28 }
 0x17e   : > { %10182 = vst [vmem:[#allocation38_spill] sm:$0xff] %v7534_v21  ;;  %2407 = vmatpush.msrb.mxu2 %v7579_v33  ;;  %2427 = vmatpush.msrb.mxu3 %v7582_v35 }
 0x17f   : > { %10183 = vst [vmem:[#allocation39_spill] sm:$0xff] %v7537_v22  ;;  %2368 = vmatpush.msrb.mxu0 %v7585_v4  ;;  %2388 = vmatpush.msrb.mxu1 %v7588_v38  ;;  %v5631_v22 = vld [vmem:[%s6723_s15 + $0x81] ss:$8 sm:$0xf] }
 0x180   : > { %10184 = vst [vmem:[#allocation40_spill] sm:$0xff] %v7540_v23  ;;  %2408 = vmatpush.msrb.mxu2 %v7591_v41  ;;  %2428 = vmatpush.msrb.mxu3 %v7594_v48 }
 0x181   : > { %10185 = vst [vmem:[#allocation41_spill] sm:$0xff] %v7543_v25  ;;  %2369 = vmatpush.msrb.mxu0 %v7597_v30  ;;  %2389 = vmatpush.msrb.mxu1 %v7600_v13 }
 0x182   : > { %10186 = vst [vmem:[#allocation42_spill] sm:$0xff] %v7546_v26  ;;  %2409 = vmatpush.msrb.mxu2 %v7603_v7  ;;  %2429 = vmatpush.msrb.mxu3 %v7606_v59 }
 0x183   : > { %10187 = vst [vmem:[#allocation43_spill] sm:$0xff] %v7549_v27  ;;  %2370 = vmatpush.msrb.mxu0 %v7609_v55  ;;  %2390 = vmatpush.msrb.mxu1 %v7612_v44 }
 0x184   : > { %10188 = vst [vmem:[#allocation44_spill] sm:$0xff] %v7552_v29 }
 0x185   : > { %10189 = vst [vmem:[#allocation45_spill] sm:$0xff] %v7555_v34  ;;  %v5627_v34 = vld [vmem:[%s6723_s15 + $0x1] ss:$8 sm:$0xf] }
 0x186   : > { %10190 = vst [vmem:[#allocation46_spill] sm:$0xff] %v7558_v3 }
 0x187   : > { %10191 = vst [vmem:[#allocation47_spill] sm:$0xff] %v7561_v36 }
 0x188   : > { %10192 = vst [vmem:[#allocation48_spill] sm:$0xff] %v7564_v37 }
 0x189   : > { %10193 = vst [vmem:[#allocation49_spill] sm:$0xff] %v7567_v39 }
 0x18a   : > { %10194 = vst [vmem:[#allocation50_spill] sm:$0xff] %v7570_v40 }
 0x18b   : > { %10195 = vst [vmem:[#allocation51_spill] sm:$0xff] %v7573_v24 }
 0x18c   : > { %10196 = vst [vmem:[#allocation52_spill] sm:$0xff] %v7576_v28 }
 0x18d   : > { %10197 = vst [vmem:[#allocation53_spill] sm:$0xff] %v7579_v33 }
 0x18e   : > { %10198 = vst [vmem:[#allocation54_spill] sm:$0xff] %v7582_v35 }
 0x18f   : > { %10199 = vst [vmem:[#allocation55_spill] sm:$0xff] %v7585_v4 }
 0x190   : > { %10200 = vst [vmem:[#allocation56_spill] sm:$0xff] %v7588_v38 }
 0x191   : > { %10201 = vst [vmem:[#allocation57_spill] sm:$0xff] %v7591_v41 }
 0x192   : > { %10202 = vst [vmem:[#allocation58_spill] sm:$0xff] %v7594_v48 }
 0x193   : > { %10203 = vst [vmem:[#allocation59_spill] sm:$0xff] %v7597_v30  ;;  %v7615_v30 = vld [vmem:[#allocation8 + $0x10] sm:$0xff] }
 0x194   : > { %10204 = vst [vmem:[#allocation60_spill] sm:$0xff] %v7600_v13  ;;  %2410 = vmatpush.msrb.mxu2 %v7615_v30  ;;  %v7618_v13 = vld [vmem:[#allocation8 + $0x18] sm:$0xff] }
 0x195   : > { %10205 = vst [vmem:[#allocation61_spill] sm:$0xff] %v7603_v7  ;;  %2430 = vmatpush.msrb.mxu3 %v7618_v13 }
 0x196   : > { %10206 = vst [vmem:[#allocation62_spill] sm:$0xff] %v7606_v59 }
 0x197   : > { %10207 = vst [vmem:[#allocation63_spill] sm:$0xff] %v7609_v55 }
 0x198   : > { %10208 = vst [vmem:[#allocation64_spill] sm:$0xff] %v7612_v44 }
 0x199   : > { %10209 = vst [vmem:[#allocation65_spill] sm:$0xff] %v7615_v30 }
 0x19a   : > { %10210 = vst [vmem:[#allocation66_spill] sm:$0xff] %v7618_v13 }
 0x1e0   : > { %v1158_v7 = vpop.f32.mrf.mxu1  ;;  %v1138_v35 = vpop.f32.mrf.mxu0 }
 0x1e1   : > { %v1205_v59 = vrot.slane %v1158_v7, 7 }
 0x1e3   : > { %v1211_v33 = vsel %vm565_vm0, %v1138_v35, %v1205_v59  ;;  %v1215_v28 = vsel %vm10214_vm9, %v1138_v35, %v1205_v59  ;;  %v1208_v39 = vsel %vm10219_vm8, %v1138_v35, %v1205_v59  ;;  %v1223_v37 = vsel %vm10220_vm11, %v1138_v35, %v1205_v59 }
 0x1e4   : > { %v1227_v36 = vsel %vm10221_vm12, %v1138_v35, %v1205_v59  ;;  %vm10226_vm9 = vcmask 1046533  }
 0x1e7   : > { %v1178_v48 = vpop.f32.mrf.mxu2  ;;  %v1198_v41 = vpop.f32.mrf.mxu3 }
 0x1e8   : > { %v1206_v38 = vrot.slane %v1178_v48, 6  ;;  %v1207_v4 = vrot.slane %v1198_v41, 5  ;;  %v1219_v48 = vsel %vm10157_vm6, %v1138_v35, %v1205_v59  ;;  %vm10230_vm6 = vcmask 1046529  }
 0x1ea   : > { %v1212_v55 = vsel %vm10211_vm14, %v1206_v38, %v1207_v4  ;;  %v1216_v44 = vsel %vm10212_vm15, %v1206_v38, %v1207_v4  ;;  %v1220_v30 = vsel %vm10213_vm4, %v1206_v38, %v1207_v4  ;;  %v1209_v13 = vsel %vm10154_vm1, %v1206_v38, %v1207_v4  ;;  %vm10225_vm4 = vmmov %vm10219_vm8 }
 0x1eb   : > { %v1213_v24 = vsel %vm10215_vm3, %v1211_v33, %v1212_v55  ;;  %v1224_v7 = vsel %vm10216_vm2, %v1206_v38, %v1207_v4  ;;  %v1217_v41 = vsel %vm10217_vm7, %v1215_v28, %v1216_v44  ;;  %v1228_v40 = vsel %vm10218_vm5, %v1207_v4, %v1206_v38  ;;  %v5628_v28 = vld [vmem:[%s6723_s15 + $0x21] ss:$8 sm:$0xf]  ;;  %vm10227_vm1 = vmmov %vm10216_vm2 }
 0x1ec   : > { %v1221_v3 = vsel %vm10222_vm13, %v1219_v48, %v1220_v30  ;;  %vm10223_vm14 = vcmask 1041408   ;;  %v1214_v33 = vrot.slane %v1213_v24, 1  ;;  %vm10224_vm15 = vcmask 1045508   ;;  %v5629_v30 = vld [vmem:[%s6723_s15 + $0x41] ss:$8 sm:$0xf]  ;;  %vm10228_vm3 = vmmov %vm10218_vm5 }
 0x1ed   : > { %v1210_v55 = vsel %vm10223_vm14, %v1208_v39, %v1209_v13  ;;  %v1225_v29 = vsel %vm10224_vm15, %v1223_v37, %v1224_v7  ;;  %v1232_v44 = vsel %vm10225_vm4, %v1206_v38, %v1207_v4  ;;  %v1218_v27 = vrot.slane %v1217_v41, 2  ;;  %v5630_v39 = vld [vmem:[%s6723_s15 + $0x61] ss:$8 sm:$0xf] }
 0x1ee   : > { %v1229_v26 = vsel %vm10226_vm9, %v1227_v36, %v1228_v40  ;;  %v1236_v25 = vsel %vm565_vm0, %v1206_v38, %v1207_v4  ;;  %v1231_v23 = vsel %vm10227_vm1, %v1138_v35, %v1205_v59  ;;  %v1222_v48 = vrot.slane %v1221_v3, 3  ;;  %v5632_v4 = vld [vmem:[%s6723_s15 + $0xa1] ss:$8 sm:$0xf] }
 0x1ef   : > { %v1235_v13 = vsel %vm10228_vm3, %v1205_v59, %v1138_v35  ;;  %v1226_v24 = vrot.slane %v1225_v29, 4  ;;  %vm10229_vm2 = vcmask 1045504   ;;  %v7648_v7 = vadd.f32 %v5627_v34, %v1210_v55  ;;  %v5633_v59 = vld [vmem:[%s6723_s15 + $0xc1] ss:$8 sm:$0xf] }
 0x1f0   : > { %v1233_v37 = vsel %vm10229_vm2, %v1232_v44, %v1231_v23  ;;  %v1230_v41 = vrot.slane %v1229_v26, 5  ;;  %v1237_v36 = vsel %vm10230_vm6, %v1236_v25, %v1235_v13  ;;  %v7652_v40 = vadd.f32 %v5628_v28, %v1214_v33  ;;  %v5634_v29 = vld [vmem:[%s6723_s15 + $0xe1] ss:$8 sm:$0xf] }
 0x1f1   : > { %v7655_v38 = vadd.f32 %v5629_v30, %v1218_v27  ;;  %v1234_v21 = vrot.slane %v1233_v37, 6  ;;  %v7657_v3 = vadd.f32 %v5630_v39, %v1222_v48  ;;  %v1238_v35 = vrot.slane %v1237_v36, 7 }
 0x1f2   : > { %v7660_v20 = vadd.f32 %v5631_v22, %v1226_v24  ;;  %v5635_v23 = vmul.f32 -1.442695, %v7648_v7  ;;  %v7664_v34 = vadd.f32 %v5632_v4, %v1230_v41  ;;  %v5636_v26 = vmul.f32 -1.442695, %v7652_v40 }
 0x1f3   : > { %v5637_v25 = vmul.f32 -1.442695, %v7655_v38  ;;  %v7668_v55 = vadd.f32 %v5633_v59, %v1234_v21  ;;  %v5638_v27 = vmul.f32 -1.442695, %v7657_v3  ;;  %v7671_v33 = vadd.f32 %v5634_v29, %v1238_v35 }
 0x1f4   : > { %5865 = vpow2.f32 %v5635_v23  ;;  %v5639_v44 = vmul.f32 -1.442695, %v7660_v20  ;;  %v5640_v22 = vmul.f32 -1.442695, %v7664_v34 }
 0x1f5   : > { %5867 = vpow2.f32 %v5636_v26  ;;  %v5641_v28 = vmul.f32 -1.442695, %v7668_v55  ;;  %v5642_v30 = vmul.f32 -1.442695, %v7671_v33 }
 0x1f6   : > { %5869 = vpow2.f32 %v5637_v25 }
 0x1f7   : > { %5871 = vpow2.f32 %v5638_v27 }
 0x1f8   : > { %5873 = vpow2.f32 %v5639_v44 }
 0x1f9   : > { %5875 = vpow2.f32 %v5640_v22 }
 0x1fa   : > { %v5866_v21 = vpop.eup %5865  ;;  %5877 = vpow2.f32 %v5641_v28 }
 0x1fb   : > { %v5868_v48 = vpop.eup %5867  ;;  %v1311_v13 = vadd.f32 1.0, %v5866_v21  ;;  %5879 = vpow2.f32 %v5642_v30 }
 0x1fc   : > { %v5870_v39 = vpop.eup %5869  ;;  %v7677_v24 = vadd.f32 1.0, %v5868_v48 }
 0x1fd   : > { %v5872_v37 = vpop.eup %5871  ;;  %v7679_v41 = vadd.f32 1.0, %v5870_v39  ;;  %5881 = vrcp.f32 %v1311_v13  ;;  %v1328_v23 = vand.u32 2147483647, %v1311_v13  ;;  %v1330_v29 = vand.u32 2147483648, %v1311_v13 }
 0x1fe   : > { %v5874_v36 = vpop.eup %5873  ;;  %v7681_v4 = vadd.f32 1.0, %v5872_v37  ;;  %5883 = vrcp.f32 %v7677_v24  ;;  %v1343_v25 = vand.u32 2147483647, %v7677_v24  ;;  %v1345_v22 = vand.u32 2147483648, %v7677_v24 }
 0x1ff   : > { %v5876_v59 = vpop.eup %5875  ;;  %v7684_v35 = vadd.f32 1.0, %v5874_v36  ;;  %5885 = vrcp.f32 %v7679_v41  ;;  %vm1324_vm7 = vweird.f32 %v1311_v13  ;;  %vm1339_vm5 = vweird.f32 %v7677_v24 }
 0x200   : > { %v5878_v26 = vpop.eup %5877  ;;  %v7688_v44 = vadd.f32 1.0, %v5876_v59  ;;  %5887 = vrcp.f32 %v7681_v4  ;;  %v1358_v30 = vand.u32 2147483647, %v7679_v41  ;;  %vm7695_vm8 = vcmp.eq.f32.partialorder %v1328_v23, 8.507059e+37 }
 0x201   : > { %v5880_v27 = vpop.eup %5879  ;;  %5889 = vrcp.f32 %v7684_v35  ;;  %v1331_v37 = vor.u32 1.1754944e-38, %v1330_v29  ;;  %v1360_v36 = vand.u32 2147483648, %v7679_v41  ;;  %v7700_v59 = vadd.f32 1.0, %v5878_v26 }
 0x202   : > { %vm7703_vm11 = vcmp.eq.f32.partialorder %v1343_v25, 8.507059e+37  ;;  %vm1354_vm12 = vweird.f32 %v7679_v41  ;;  %v1373_v19 = vand.u32 2147483647, %v7681_v4  ;;  %v7709_v23 = vadd.f32 1.0, %v5880_v27 }
 0x203   : > { %v5882_v28 = vpop.eup %5881  ;;  %v1346_v53 = vor.u32 1.1754944e-38, %v1345_v22  ;;  %5891 = vrcp.f32 %v7688_v44  ;;  %vm7713_vm14 = vcmp.eq.f32.partialorder %v1358_v30, 8.507059e+37  ;;  %vm1369_vm15 = vweird.f32 %v7681_v4 }
 0x204   : > { %v5884_v21 = vpop.eup %5883  ;;  %v1320_v48 = vmul.f32 %v5882_v28, %v1311_v13  ;;  %vm1325_vm13 = vweird.f32 %v5882_v28  ;;  %v1375_v11 = vand.u32 2147483648, %v7681_v4  ;;  %v1361_v27 = vor.u32 1.1754944e-38, %v1360_v36 }
 0x205   : > { %v1335_v9 = vmul.f32 %v5884_v21, %v7677_v24  ;;  %v5886_v18 = vpop.eup %5885  ;;  %vm1340_vm4 = vweird.f32 %v5884_v21  ;;  %vm1384_vm9 = vweird.f32 %v7684_v35  ;;  %vm7721_vm1 = vcmp.eq.f32.partialorder %v1373_v19, 8.507059e+37  ;;  %vm1326_vm3 = vmor %vm1324_vm7, %vm1325_vm13 }
 0x206   : > { %v1321_v17 = vsub.f32 1.0, %v1320_v48  ;;  %v1350_v26 = vmul.f32 %v5886_v18, %v7679_v41  ;;  %v5888_v0 = vpop.eup %5887  ;;  %v1388_v2 = vand.u32 2147483647, %v7684_v35  ;;  %vm1355_vm2 = vweird.f32 %v5886_v18  ;;  %vm1341_vm6 = vmor %vm1339_vm5, %vm1340_vm4 }
 0x207   : > { %v1336_v29 = vsub.f32 1.0, %v1335_v9  ;;  %v5890_v22 = vpop.eup %5889  ;;  %v1365_v9 = vmul.f32 %v5888_v0, %v7681_v4  ;;  %vm1370_vm10 = vweird.f32 %v5888_v0  ;;  %5893 = vrcp.f32 %v7700_v59  ;;  %vm1356_vm7 = vmor %vm1354_vm12, %vm1355_vm2 }
 0x208   : > { %v1322_v5 = vmul.f32 %v5882_v28, %v1321_v17  ;;  %v1351_v62 = vsub.f32 1.0, %v1350_v26  ;;  %v1380_v57 = vmul.f32 %v5890_v22, %v7684_v35  ;;  %v1390_v17 = vand.u32 2147483648, %v7684_v35 }
 0x209   : > { %v1337_v48 = vmul.f32 %v5884_v21, %v1336_v29  ;;  %v1366_v29 = vsub.f32 1.0, %v1365_v9  ;;  %v5892_v26 = vpop.eup %5891  ;;  %vm1385_vm5 = vweird.f32 %v5890_v22  ;;  %5895 = vrcp.f32 %v7709_v23 }
 0x20a   : > { %v1323_v6 = vadd.f32 %v5882_v28, %v1322_v5  ;;  %v1352_v1 = vmul.f32 %v5886_v18, %v1351_v62  ;;  %v1381_v5 = vsub.f32 1.0, %v1380_v57  ;;  %v1395_v57 = vmul.f32 %v5892_v26, %v7688_v44  ;;  %vm1386_vm12 = vmor %vm1384_vm9, %vm1385_vm5 }
 0x20b   : > { %v1338_v36 = vadd.f32 %v5884_v21, %v1337_v48  ;;  %v1367_v48 = vmul.f32 %v5888_v0, %v1366_v29  ;;  %v1391_v60 = vor.u32 1.1754944e-38, %v1390_v17  ;;  %vm1399_vm13 = vweird.f32 %v7688_v44 }
 0x20c   : > { %v1327_v49 = vsel %vm1326_vm3, %v5882_v28, %v1323_v6  ;;  %v1353_v32 = vadd.f32 %v5886_v18, %v1352_v1  ;;  %v1382_v6 = vmul.f32 %v5890_v22, %v1381_v5  ;;  %v1396_v41 = vsub.f32 1.0, %v1395_v57 }
 0x20d   : > { %v7736_v19 = vsel %vm7695_vm8, %v1331_v37, %v1327_v49  ;;  %v1342_v13 = vsel %vm1341_vm6, %v5884_v21, %v1338_v36  ;;  %v1368_v28 = vadd.f32 %v5888_v0, %v1367_v48  ;;  %v1376_v49 = vor.u32 1.1754944e-38, %v1375_v11 }
 0x20e   : > { %v7740_v62 = vsel %vm7703_vm11, %v1346_v53, %v1342_v13  ;;  %1447 = vst [vmem:[#allocation1] ss:$9 sm:$0xff] %v7736_v19  ;;  %v1357_v24 = vsel %vm1356_vm7, %v5886_v18, %v1353_v32  ;;  %vm7746_vm8 = vcmp.eq.f32.partialorder %v1388_v2, 8.507059e+37  ;;  %vm1371_vm11 = vmor %vm1369_vm15, %vm1370_vm10  ;;  %v1383_v53 = vadd.f32 %v5890_v22, %v1382_v6  ;;  %v5894_v18 = vpop.eup %5893 }
 0x20f   : > { %1449 = vst [vmem:[#allocation1 + $0x1] ss:$9 sm:$0xff] %v7740_v62  ;;  %v7753_v1 = vsel %vm7713_vm14, %v1361_v27, %v1357_v24  ;;  %v1372_v32 = vsel %vm1371_vm11, %v5888_v0, %v1368_v28  ;;  %v1403_v2 = vand.u32 2147483647, %v7688_v44  ;;  %v1405_v11 = vand.u32 2147483648, %v7688_v44  ;;  %v5896_v17 = vpop.eup %5895 }
 0x210   : > { %1451 = vst [vmem:[#allocation1 + $0x2] ss:$9 sm:$0xff] %v7753_v1  ;;  %v7766_v4 = vsel %vm7721_vm1, %v1376_v49, %v1372_v32  ;;  %v1387_v39 = vsel %vm1386_vm12, %v5890_v22, %v1383_v53  ;;  %v1397_v37 = vmul.f32 %v5892_v26, %v1396_v41  ;;  %vm1400_vm10 = vweird.f32 %v5892_v26 }
 0x211   : > { %v7770_v0 = vsel %vm7746_vm8, %v1391_v60, %v1387_v39  ;;  %v1410_v35 = vmul.f32 %v5894_v18, %v7700_v59  ;;  %1453 = vst [vmem:[#allocation1 + $0x3] ss:$9 sm:$0xff] %v7766_v4  ;;  %vm1401_vm14 = vmor %vm1399_vm13, %vm1400_vm10  ;;  %v1406_v27 = vor.u32 1.1754944e-38, %v1405_v11  ;;  %vm1404_vm15 = vcmp.eq.f32.partialorder %v1403_v2, 8.507059e+37 }
 0x212   : > { %v1398_v25 = vadd.f32 %v5892_v26, %v1397_v37  ;;  %1455 = vst [vmem:[#allocation1 + $0x4] ss:$9 sm:$0xff] %v7770_v0  ;;  %v1420_v22 = vand.u32 2147483648, %v7700_v59  ;;  %vm1415_vm4 = vweird.f32 %v5894_v18  ;;  %v1418_v5 = vand.u32 2147483647, %v7700_v59 }
 0x213   : > { %v1411_v9 = vsub.f32 1.0, %v1410_v35  ;;  %v1425_v13 = vmul.f32 %v5896_v17, %v7709_v23  ;;  %vm1414_vm9 = vweird.f32 %v7700_v59  ;;  %v1435_v57 = vand.u32 2147483648, %v7709_v23 }
 0x214   : > { %v1402_v30 = vsel %vm1401_vm14, %v5892_v26, %v1398_v25  ;;  %vm1416_vm1 = vmor %vm1414_vm9, %vm1415_vm4  ;;  %v1421_v48 = vor.u32 1.1754944e-38, %v1420_v22  ;;  %vm1419_vm3 = vcmp.eq.f32.partialorder %v1418_v5, 8.507059e+37  ;;  %vm1430_vm2 = vweird.f32 %v5896_v17 }
 0x215   : > { %v7777_v36 = vsel %vm1404_vm15, %v1406_v27, %v1402_v30  ;;  %v1412_v29 = vmul.f32 %v5894_v18, %v1411_v9  ;;  %v1426_v26 = vsub.f32 1.0, %v1425_v13  ;;  %v1433_v49 = vand.u32 2147483647, %v7709_v23  ;;  %v1563_v13 = vpop.permute.xlu2 %1562 }
 0x216   : > { %1457 = vst [vmem:[#allocation1 + $0x5] ss:$9 sm:$0xff] %v7777_v36  ;;  %v1263_v21 = vrot.slane %v7648_v7, 3  ;;  %v1264_v53 = vrot.slane %v7652_v40, 3  ;;  %vm1429_vm6 = vweird.f32 %v7709_v23  ;;  %v1265_v60 = vrot.slane %v7655_v38, 3 }
 0x217   : > { %v1413_v44 = vadd.f32 %v5894_v18, %v1412_v29  ;;  %v1427_v28 = vmul.f32 %v5896_v17, %v1426_v26  ;;  %vm1431_vm7 = vmor %vm1429_vm6, %vm1430_vm2  ;;  %v1436_v41 = vor.u32 1.1754944e-38, %v1435_v57  ;;  %v1266_v32 = vrot.slane %v7657_v3, 3 }
 0x218   : > { %vm1434_vm5 = vcmp.eq.f32.partialorder %v1433_v49, 8.507059e+37  ;;  %v1267_v11 = vrot.slane %v7660_v20, 3  ;;  %5897 = vtanh.f32 %v1263_v21  ;;  %v1268_v7 = vrot.slane %v7664_v34, 3 }
 0x219   : > { %v1417_v6 = vsel %vm1416_vm1, %v5894_v18, %v1413_v44  ;;  %v1428_v59 = vadd.f32 %v5896_v17, %v1427_v28  ;;  %5899 = vtanh.f32 %v1264_v53  ;;  %v1269_v40 = vrot.slane %v7668_v55, 3  ;;  %v1568_v44 = vpop.permute.xlu0 %1567 }
 0x21a   : > { %v7784_v24 = vsel %vm1419_vm3, %v1421_v48, %v1417_v6  ;;  %5901 = vtanh.f32 %v1265_v60  ;;  %v1270_v38 = vrot.slane %v7671_v33, 3  ;;  %v7808_v48 = vpop.permute.xlu1 %1557  ;;  %v1500_v49 = vrot.slane %v7736_v19, 2 }
 0x21b   : > { %1459 = vst [vmem:[#allocation1 + $0x6] ss:$9 sm:$0xff] %v7784_v24  ;;  %v1432_v2 = vsel %vm1431_vm7, %v5896_v17, %v1428_v59  ;;  %5903 = vtanh.f32 %v1266_v32  ;;  %v1501_v21 = vrot.slane %v7740_v62, 2  ;;  %vm10248_vm8 = vcmask 1042434  }
 0x21c   : > { %v7794_v18 = vsel %vm1434_vm5, %v1436_v41, %v1432_v2  ;;  %5905 = vtanh.f32 %v1267_v11  ;;  %v1502_v11 = vrot.slane %v7753_v1, 2  ;;  %vm10249_vm11 = vcmask 1043459   ;;  %vm10250_vm12 = vmmov %vm10248_vm8 }
 0x21d   : > { %1461 = vst [vmem:[#allocation1 + $0x7] ss:$9 sm:$0xff] %v7794_v18  ;;  %5907 = vtanh.f32 %v1268_v7  ;;  %v1573_v53 = vpop.permute.xlu2 %1572  ;;  %v1503_v7 = vrot.slane %v7766_v4, 2  ;;  %vm10251_vm10 = vcmask 1044484   ;;  %vm10252_vm13 = vmmov %vm10249_vm11  ;;  %vm10253_vm14 = vcmask 1045509  }
 0x21e   : > { %v5898_v3 = vpop.eup %5897  ;;  %5909 = vtanh.f32 %v1269_v40  ;;  %v1504_v40 = vrot.slane %v7770_v0, 2  ;;  %vm10254_vm15 = vmmov %vm10251_vm10  ;;  %vm10255_vm4 = vcmask 1046534   ;;  %vm10257_vm1 = vcmask 1047559  }
 0x21f   : > { %v5900_v23 = vpop.eup %5899  ;;  %5911 = vtanh.f32 %v1270_v38  ;;  %v1465_v20 = vmul.f32 %v5898_v3, %v7736_v19  ;;  %v1505_v3 = vrot.slane %v7777_v36, 2  ;;  %v1507_v19 = vrot.slane %v7794_v18, 2  ;;  %vm10256_vm9 = vmmov %vm10253_vm14 }
 0x220   : > { %v5902_v39 = vpop.eup %5901  ;;  %v1466_v34 = vmul.f32 %v5900_v23, %v7740_v62  ;;  %v1506_v23 = vrot.slane %v7784_v24, 2  ;;  %vm10258_vm3 = vmmov %vm10255_vm4 }
 0x221   : > { %v5904_v35 = vpop.eup %5903  ;;  %v1467_v25 = vmul.f32 %v5902_v39, %v7753_v1  ;;  %v1578_v2 = vpop.permute.xlu0 %1577  ;;  %vm10259_vm2 = vmmov %vm10257_vm1 }
 0x222   : > { %v5906_v55 = vpop.eup %5905  ;;  %v1468_v33 = vmul.f32 %v5904_v35, %v7766_v4  ;;  %vm10307_vm6 = vmmov %vm10249_vm11 }
 0x223   : > { %v5908_v27 = vpop.eup %5907  ;;  %v1469_v9 = vmul.f32 %v5906_v55, %v7770_v0  ;;  %vm10308_vm7 = vmmov %vm10251_vm10 }
 0x224   : > { %v1462_v37 = vld [vmem:[#allocation1 + $0x9] sm:$0xff]  ;;  %v5910_v30 = vpop.eup %5909  ;;  %v1470_v22 = vmul.f32 %v5908_v27, %v7777_v36  ;;  %vm10309_vm5 = vmmov %vm10256_vm9 }
 0x225   : > { %1481 = vst [vmem:[#allocation1] ss:$9 sm:$0xff] %v1465_v20  ;;  %v5912_v17 = vpop.eup %5911  ;;  %v1471_v29 = vmul.f32 %v5910_v30, %v7784_v24  ;;  %v1464_v26 = vmul.f32 %v1462_v37, %v7377_v43  ;;  %v1583_v20 = vpop.permute.xlu1 %1582 }
 0x226   : > { %1483 = vst [vmem:[#allocation1 + $0x1] ss:$9 sm:$0xff] %v1466_v34  ;;  %v1472_v5 = vmul.f32 %v5912_v17, %v7794_v18 }
 0x227   : > { %1485 = vst [vmem:[#allocation1 + $0x2] ss:$9 sm:$0xff] %v1467_v25 }
 0x228   : > { %1487 = vst [vmem:[#allocation1 + $0x3] ss:$9 sm:$0xff] %v1468_v33 }
 0x229   : > { %1489 = vst [vmem:[#allocation1 + $0x4] ss:$9 sm:$0xff] %v1469_v9 }
 0x22a   : > { %1491 = vst [vmem:[#allocation1 + $0x5] ss:$9 sm:$0xff] %v1470_v22 }
 0x22b   : > { %1493 = vst [vmem:[#allocation1 + $0x6] ss:$9 sm:$0xff] %v1471_v29 }
 0x22c   : > { %1495 = vst [vmem:[#allocation1 + $0x7] ss:$9 sm:$0xff] %v1472_v5 }
 0x233   : > { %v1496_v6 = vld [vmem:[#allocation1] sm:$0xff] }
 0x234   : > { %v1498_v57 = vadd.f32 %v1496_v6, %v1464_v26 }
 0x236   : > { %5913 = vtanh.f32 %v1498_v57  ;;  %v1627_v28 = vsub.f32 %v1498_v57, %v7377_v43 }
 0x238   : > { %v1629_v59 = vrot.slane %v1627_v28, 1  ;;  %v1630_v60 = vrot.slane %v1627_v28, 2  ;;  %v1631_v41 = vrot.slane %v1627_v28, 3  ;;  %v1632_v32 = vrot.slane %v1627_v28, 4 }
 0x239   : > { %v1633_v38 = vrot.slane %v1627_v28, 5  ;;  %v1634_v39 = vrot.slane %v1627_v28, 6  ;;  %v1635_v37 = vrot.slane %v1627_v28, 7  ;;  %v1644_v34 = vmul.f32 %v1627_v28, %v7808_v48 }
 0x23a   : > { %v1645_v62 = vmul.f32 %v1629_v59, %v1563_v13  ;;  %v1646_v35 = vmul.f32 %v1630_v60, %v1568_v44  ;;  %v1647_v1 = vmul.f32 %v1631_v41, %v1573_v53  ;;  %v1648_v55 = vmul.f32 %v1632_v32, %v1578_v2 }
 0x23b   : > { %v1649_v4 = vmul.f32 %v1633_v38, %v1583_v20  ;;  %v10241_v60 = vrot.slane %v7374_v42, 1  ;;  %v10242_v32 = vrot.slane %v7374_v42, 2 }
 0x23c   : > { %v5914_v25 = vpop.eup %5913  ;;  %v1660_v33 = vrot.slane %v1645_v62, 7  ;;  %v10243_v62 = vrot.slane %v7374_v42, 3 }
 0x23d   : > { %v1517_v0 = vrot.slane %v5914_v25, 1  ;;  %v1518_v27 = vrot.slane %v5914_v25, 2  ;;  %v1519_v9 = vrot.slane %v5914_v25, 3  ;;  %v1520_v36 = vrot.slane %v5914_v25, 4 }
 0x23e   : > { %v1521_v30 = vrot.slane %v5914_v25, 5  ;;  %v1522_v24 = vrot.slane %v5914_v25, 6  ;;  %v1523_v22 = vrot.slane %v5914_v25, 7  ;;  %v1531_v18 = vmul.f32 %v5914_v25, %v1500_v49 }
 0x23f   : > { %v1532_v17 = vmul.f32 %v1517_v0, %v1501_v21  ;;  %v1533_v29 = vmul.f32 %v1518_v27, %v1502_v11  ;;  %v1534_v5 = vmul.f32 %v1519_v9, %v1503_v7  ;;  %v1535_v26 = vmul.f32 %v1520_v36, %v1504_v40  ;;  %v1588_v11 = vpop.permute.xlu2 %1587  ;;  %v1593_v27 = vpop.permute.xlu0 %1592 }
 0x240   : > { %v1536_v6 = vmul.f32 %v1521_v30, %v1505_v3  ;;  %v1537_v57 = vmul.f32 %v1522_v24, %v1506_v23  ;;  %v1538_v28 = vmul.f32 %v1523_v22, %v1507_v19  ;;  %v1547_v59 = vsub.f32 %v1531_v18, %v7374_v42 }
 0x241   : > { %v1548_v41 = vsub.f32 %v1532_v17, %v10241_v60  ;;  %v1549_v38 = vsub.f32 %v1533_v29, %v10242_v32  ;;  %v1550_v47 = vsub.f32 %v1534_v5, %v10243_v62  ;;  %v10244_v49 = vrot.slane %v7374_v42, 4 }
 0x242   : > { %v10245_v7 = vrot.slane %v7374_v42, 5  ;;  %v10246_v3 = vrot.slane %v7374_v42, 6  ;;  %v10247_v19 = vrot.slane %v7374_v42, 7  ;;  %v1662_v0 = vrot.slane %v1646_v35, 6 }
 0x243   : > { %v1551_v21 = vsub.f32 %v1535_v26, %v10244_v49  ;;  %v1596_v9 = vmul.f32 %v1563_v13, %v1548_v41  ;;  %v1597_v36 = vmul.f32 %v1568_v44, %v1549_v38  ;;  %v1598_v30 = vmul.f32 %v1573_v53, %v1550_v47 }
 0x244   : > { %v1552_v40 = vsub.f32 %v1536_v6, %v10245_v7  ;;  %v1553_v23 = vsub.f32 %v1537_v57, %v10246_v3  ;;  %v1554_v25 = vsub.f32 %v1538_v28, %v10247_v19  ;;  %v1650_v24 = vmul.f32 %v1634_v39, %v1588_v11 }
 0x245   : > { %v1599_v22 = vmul.f32 %v1578_v2, %v1551_v21  ;;  %v1651_v18 = vmul.f32 %v1635_v37, %v1593_v27  ;;  %v1661_v17 = vsel %vm565_vm0, %v1660_v33, %v1644_v34  ;;  %v1664_v29 = vrot.slane %v1647_v1, 5 }
 0x246   : > { %v1595_v5 = vmul.f32 %v7808_v48, %v1547_v59  ;;  %v1600_v26 = vmul.f32 %v1583_v20, %v1552_v40  ;;  %v1611_v6 = vrot.slane %v1596_v9, 7  ;;  %v1613_v60 = vrot.slane %v1597_v36, 6  ;;  %v10272_v9 = vld [vmem:[#allocation32_spill] sm:$0xff]  ;;  %v10273_v36 = vld [vmem:[#allocation33_spill] sm:$0xff] }
 0x247   : > { %v1601_v57 = vmul.f32 %v1588_v11, %v1553_v23  ;;  %v1602_v32 = vmul.f32 %v1593_v27, %v1554_v25  ;;  %v1663_v28 = vsel %vm10248_vm8, %v1662_v0, %v1661_v17  ;;  %v1666_v35 = vrot.slane %v1648_v55, 4  ;;  %v10271_v27 = vld [vmem:[#allocation31_spill] sm:$0xff]  ;;  %v10278_v17 = vld [vmem:[#allocation38_spill] sm:$0xff] }
 0x248   : > { %v1612_v13 = vsel %vm565_vm0, %v1611_v6, %v1595_v5  ;;  %v1615_v44 = vrot.slane %v1598_v30, 5  ;;  %v1665_v47 = vsel %vm10249_vm11, %v1664_v29, %v1663_v28  ;;  %v1668_v53 = vrot.slane %v1649_v4, 3  ;;  %v10274_v30 = vld [vmem:[#allocation34_spill] sm:$0xff]  ;;  %v10279_v29 = vld [vmem:[#allocation39_spill] sm:$0xff]  ;;  %v10280_v5 = vld [vmem:[#allocation40_spill] sm:$0xff] }
 0x249   : > { %v1614_v2 = vsel %vm10250_vm12, %v1613_v60, %v1612_v13  ;;  %v1617_v39 = vrot.slane %v1599_v22, 4  ;;  %v1667_v37 = vsel %vm10251_vm10, %v1666_v35, %v1665_v47  ;;  %v1670_v48 = vrot.slane %v1650_v24, 2  ;;  %v10275_v24 = vld [vmem:[#allocation35_spill] sm:$0xff]  ;;  %v10276_v22 = vld [vmem:[#allocation36_spill] sm:$0xff]  ;;  %v10282_v6 = vld [vmem:[#allocation42_spill] sm:$0xff] }
 0x24a   : > { %v1616_v20 = vsel %vm10252_vm13, %v1615_v44, %v1614_v2  ;;  %v1619_v34 = vrot.slane %v1600_v26, 3  ;;  %v1669_v1 = vsel %vm10253_vm14, %v1668_v53, %v1667_v37  ;;  %v1672_v55 = vrot.slane %v1651_v18, 1  ;;  %v10277_v18 = vld [vmem:[#allocation37_spill] sm:$0xff]  ;;  %v10283_v60 = vld [vmem:[#allocation43_spill] sm:$0xff]  ;;  %v10286_v28 = vld [vmem:[#allocation46_spill] sm:$0xff] }
 0x24b   : > { %v1618_v33 = vsel %vm10254_vm15, %v1617_v39, %v1616_v20  ;;  %v1621_v59 = vrot.slane %v1601_v57, 2  ;;  %v1671_v41 = vsel %vm10255_vm4, %v1670_v48, %v1669_v1  ;;  %v1623_v38 = vrot.slane %v1602_v32, 1  ;;  %v10281_v26 = vld [vmem:[#allocation41_spill] sm:$0xff]  ;;  %v10284_v57 = vld [vmem:[#allocation44_spill] sm:$0xff]  ;;  %v10287_v35 = vld [vmem:[#allocation47_spill] sm:$0xff] }
 0x24c   : > { %v1620_v4 = vsel %vm10256_vm9, %v1619_v34, %v1618_v33  ;;  %v1673_v62 = vsel %vm10257_vm1, %v1672_v55, %v1671_v41  ;;  %v10285_v32 = vld [vmem:[#allocation45_spill] sm:$0xff]  ;;  %v10288_v13 = vld [vmem:[#allocation48_spill] sm:$0xff]  ;;  %v10290_v47 = vld [vmem:[#allocation50_spill] sm:$0xff]  ;;  %vm10311_vm12 = vcmask 1042433   ;;  %vm10314_vm14 = vcmask 1043458  }
 0x24d   : > { %v1622_v49 = vsel %vm10258_vm3, %v1621_v59, %v1620_v4  ;;  %v7851_v21 = vadd.f32 %v1673_v62, %v7377_v43  ;;  %v10289_v44 = vld [vmem:[#allocation49_spill] sm:$0xff]  ;;  %v10291_v53 = vld [vmem:[#allocation51_spill] sm:$0xff]  ;;  %v10292_v2 = vld [vmem:[#allocation52_spill] sm:$0xff]  ;;  %vm10315_vm15 = vcmask 1046528   ;;  %vm10316_vm4 = vcmask 1040384  }
 0x24e   : > { %v1624_v11 = vsel %vm10259_vm2, %v1623_v38, %v1622_v49  ;;  %v10293_v39 = vld [vmem:[#allocation53_spill] sm:$0xff]  ;;  %v10294_v37 = vld [vmem:[#allocation54_spill] sm:$0xff]  ;;  %v10295_v48 = vld [vmem:[#allocation55_spill] sm:$0xff]  ;;  %vm10320_vm2 = vcmask 1041408  }
 0x24f   : > { %v7855_v7 = vadd.f32 %v1624_v11, %v7374_v42  ;;  %v1700_v40 = vrot.slane %v7851_v21, 1  ;;  %v1701_v3 = vrot.slane %v7851_v21, 2  ;;  %1714 = vst [vmem:[%s6738_s18 + $0x1] sm:$0x1] %v7851_v21  ;;  %v1702_v23 = vrot.slane %v7851_v21, 3  ;;  %v10296_v20 = vld [vmem:[#allocation56_spill] sm:$0xff]  ;;  %vm10310_vm11 = vmmov %vm10248_vm8 }
 0x250   : > { %v1703_v43 = vrot.slane %v7851_v21, 4  ;;  %v1704_v42 = vrot.slane %v7851_v21, 5  ;;  %v1705_v19 = vrot.slane %v7851_v21, 6  ;;  %v1706_v25 = vrot.slane %v7851_v21, 7  ;;  %v10297_v34 = vld [vmem:[#allocation57_spill] sm:$0xff]  ;;  %v10298_v1 = vld [vmem:[#allocation58_spill] sm:$0xff]  ;;  %vm10312_vm10 = vmmov %vm10258_vm3 }
 0x251   : > { %1691 = vst [vmem:[%s6736_s17 + $0x1] sm:$0x1] %v7855_v7  ;;  %1754 = vmatmul.f32.vlgmr.msra.gmra.mxu0 %v7855_v7  ;;  %1774 = vmatmul.f32.vlgmr.msra.gmra.mxu1 %v7855_v7  ;;  %v1677_v0 = vrot.slane %v7855_v7, 1  ;;  %v10299_v55 = vld [vmem:[#allocation59_spill] sm:$0xff]  ;;  %v10300_v33 = vld [vmem:[#allocation60_spill] sm:$0xff]  ;;  %v10301_v59 = vld [vmem:[#allocation61_spill] sm:$0xff] }
 0x252   : > { %1715 = vst [vmem:[%s6738_s18 + $0x9] sm:$0x1] %v1700_v40  ;;  %1794 = vmatmul.f32.vlgmr.msra.gmra.mxu2 %v7855_v7  ;;  %1814 = vmatmul.f32.vlgmr.msra.gmra.mxu3 %v7855_v7  ;;  %v10302_v41 = vld [vmem:[#allocation62_spill] sm:$0xff]  ;;  %v10303_v4 = vld [vmem:[#allocation63_spill] sm:$0xff]  ;;  %v10304_v38 = vld [vmem:[#allocation64_spill] sm:$0xff]  ;;  %vm10319_vm3 = vcmask 1044483  }
 0x253   : > { %1716 = vst [vmem:[%s6738_s18 + $0x11] sm:$0x1] %v1701_v3  ;;  %2972 = vmatpush.msra.mxu0 %v7393_v10  ;;  %2992 = vmatpush.msra.mxu1 %v7396_v16  ;;  %v1678_v10 = vrot.slane %v7855_v7, 2  ;;  %v1679_v16 = vrot.slane %v7855_v7, 3  ;;  %v10305_v62 = vld [vmem:[#allocation65_spill] sm:$0xff]  ;;  %v10306_v49 = vld [vmem:[#allocation66_spill] sm:$0xff]  ;;  %vm10313_vm13 = vmmov %vm10307_vm6 }
 0x254   : > { %1717 = vst [vmem:[%s6738_s18 + $0x19] sm:$0x1] %v1702_v23  ;;  %3012 = vmatpush.msra.mxu2 %v7401_v45  ;;  %3032 = vmatpush.msra.mxu3 %v7404_v50  ;;  %v1680_v45 = vrot.slane %v7855_v7, 4  ;;  %v1681_v50 = vrot.slane %v7855_v7, 5  ;;  %vm10317_vm9 = vmmov %vm10308_vm7 }
 0x255   : > { %1718 = vst [vmem:[%s6738_s18 + $0x21] sm:$0x1] %v1703_v43  ;;  %2973 = vmatpush.msra.mxu0 %v7409_v51  ;;  %2993 = vmatpush.msra.mxu1 %v7412_v52  ;;  %v1682_v51 = vrot.slane %v7855_v7, 6  ;;  %v1683_v52 = vrot.slane %v7855_v7, 7  ;;  %vm10318_vm1 = vmmov %vm10309_vm5 }
 0x256   : > { %1719 = vst [vmem:[%s6738_s18 + $0x29] sm:$0x1] %v1704_v42  ;;  %3013 = vmatpush.msra.mxu2 %v7417_v46  ;;  %3033 = vmatpush.msra.mxu3 %v7420_v54  ;;  %v10260_v46 = vld [vmem:[#allocation23_spill] sm:$0xff]  ;;  %v10261_v54 = vld [vmem:[#allocation24_spill] sm:$0xff] }
 0x257   : > { %1720 = vst [vmem:[%s6738_s18 + $0x31] sm:$0x1] %v1705_v19  ;;  %2974 = vmatpush.msra.mxu0 %v7425_v56  ;;  %2994 = vmatpush.msra.mxu1 %v7428_v58  ;;  %v10262_v56 = vld [vmem:[#allocation25_spill] sm:$0xff]  ;;  %v10263_v58 = vld [vmem:[#allocation26_spill] sm:$0xff] }
 0x258   : > { %1721 = vst [vmem:[%s6738_s18 + $0x39] sm:$0x1] %v1706_v25  ;;  %3014 = vmatpush.msra.mxu2 %v7433_v61  ;;  %3034 = vmatpush.msra.mxu3 %v7436_v63  ;;  %v10264_v61 = vld [vmem:[#allocation20_spill] sm:$0xff]  ;;  %v10265_v63 = vld [vmem:[#allocation27_spill] sm:$0xff] }
 0x259   : > { %1692 = vst [vmem:[%s6736_s17 + $0x9] sm:$0x1] %v1677_v0  ;;  %2975 = vmatpush.msra.mxu0 %v7441_v8  ;;  %2995 = vmatpush.msra.mxu1 %v7444_v12  ;;  %v10266_v8 = vld [vmem:[#allocation21_spill] sm:$0xff]  ;;  %v10267_v12 = vld [vmem:[#allocation22_spill] sm:$0xff] }
 0x25a   : > { %1693 = vst [vmem:[%s6736_s17 + $0x11] sm:$0x1] %v1678_v10  ;;  %3015 = vmatpush.msra.mxu2 %v7451_v14  ;;  %3035 = vmatpush.msra.mxu3 %v7454_v15  ;;  %v10268_v14 = vld [vmem:[#allocation28_spill] sm:$0xff]  ;;  %v10269_v15 = vld [vmem:[#allocation29_spill] sm:$0xff] }
 0x25b   : > { %1694 = vst [vmem:[%s6736_s17 + $0x19] sm:$0x1] %v1679_v16  ;;  %2976 = vmatpush.msra.mxu0 %v7461_v31  ;;  %2996 = vmatpush.msra.mxu1 %v10260_v46  ;;  %v10270_v31 = vld [vmem:[#allocation30_spill] sm:$0xff] }
 0x25c   : > { %1695 = vst [vmem:[%s6736_s17 + $0x21] sm:$0x1] %v1680_v45  ;;  %3016 = vmatpush.msra.mxu2 %v10261_v54  ;;  %3036 = vmatpush.msra.mxu3 %v10262_v56 }
 0x25d   : > { %1696 = vst [vmem:[%s6736_s17 + $0x29] sm:$0x1] %v1681_v50  ;;  %2977 = vmatpush.msra.mxu0 %v10263_v58  ;;  %2997 = vmatpush.msra.mxu1 %v10264_v61 }
 0x25e   : > { %1697 = vst [vmem:[%s6736_s17 + $0x31] sm:$0x1] %v1682_v51  ;;  %3017 = vmatpush.msra.mxu2 %v10265_v63  ;;  %3037 = vmatpush.msra.mxu3 %v10266_v8 }
 0x25f   : > { %1698 = vst [vmem:[%s6736_s17 + $0x39] sm:$0x1] %v1683_v52  ;;  %2978 = vmatpush.msra.mxu0 %v10267_v12  ;;  %2998 = vmatpush.msra.mxu1 %v10268_v14 }
 0x260   : > { %3018 = vmatpush.msra.mxu2 %v10269_v15  ;;  %3038 = vmatpush.msra.mxu3 %v10270_v31 }
 0x261   : > { %2979 = vmatpush.msra.mxu0 %v10271_v27  ;;  %2999 = vmatpush.msra.mxu1 %v10272_v9 }
 0x262   : > { %3019 = vmatpush.msra.mxu2 %v10273_v36  ;;  %3039 = vmatpush.msra.mxu3 %v10274_v30  ;;  %v5643_v30 = vld [vmem:[%s6723_s15 + $0x2] ss:$8 sm:$0xf] }
 0x263   : > { %2980 = vmatpush.msra.mxu0 %v10275_v24  ;;  %3000 = vmatpush.msra.mxu1 %v10276_v22 }
 0x264   : > { %3020 = vmatpush.msra.mxu2 %v10277_v18  ;;  %3040 = vmatpush.msra.mxu3 %v10278_v17 }
 0x265   : > { %2981 = vmatpush.msra.mxu0 %v10279_v29  ;;  %3001 = vmatpush.msra.mxu1 %v10280_v5  ;;  %v5644_v29 = vld [vmem:[%s6723_s15 + $0x22] ss:$8 sm:$0xf] }
 0x266   : > { %3021 = vmatpush.msra.mxu2 %v10281_v26  ;;  %3041 = vmatpush.msra.mxu3 %v10282_v6 }
 0x267   : > { %2982 = vmatpush.msra.mxu0 %v10283_v60  ;;  %3002 = vmatpush.msra.mxu1 %v10284_v57  ;;  %v5645_v57 = vld [vmem:[%s6723_s15 + $0x42] ss:$8 sm:$0xf] }
 0x268   : > { %3022 = vmatpush.msra.mxu2 %v10285_v32  ;;  %3042 = vmatpush.msra.mxu3 %v10286_v28 }
 0x269   : > { %2983 = vmatpush.msra.mxu0 %v10287_v35  ;;  %3003 = vmatpush.msra.mxu1 %v10288_v13  ;;  %v5646_v35 = vld [vmem:[%s6723_s15 + $0x62] ss:$8 sm:$0xf] }
 0x26a   : > { %3023 = vmatpush.msra.mxu2 %v10289_v44  ;;  %3043 = vmatpush.msra.mxu3 %v10290_v47 }
 0x26b   : > { %2984 = vmatpush.msra.mxu0 %v10291_v53  ;;  %3004 = vmatpush.msra.mxu1 %v10292_v2  ;;  %v5647_v53 = vld [vmem:[%s6723_s15 + $0x82] ss:$8 sm:$0xf] }
 0x26c   : > { %3024 = vmatpush.msra.mxu2 %v10293_v39  ;;  %3044 = vmatpush.msra.mxu3 %v10294_v37 }
 0x26d   : > { %2985 = vmatpush.msra.mxu0 %v10295_v48  ;;  %3005 = vmatpush.msra.mxu1 %v10296_v20  ;;  %v5648_v48 = vld [vmem:[%s6723_s15 + $0xa2] ss:$8 sm:$0xf] }
 0x26e   : > { %3025 = vmatpush.msra.mxu2 %v10297_v34  ;;  %3045 = vmatpush.msra.mxu3 %v10298_v1 }
 0x26f   : > { %2986 = vmatpush.msra.mxu0 %v10299_v55  ;;  %3006 = vmatpush.msra.mxu1 %v10300_v33  ;;  %v5649_v55 = vld [vmem:[%s6723_s15 + $0xc2] ss:$8 sm:$0xf] }
 0x270   : > { %3026 = vmatpush.msra.mxu2 %v10301_v59  ;;  %3046 = vmatpush.msra.mxu3 %v10302_v41 }
 0x271   : > { %2987 = vmatpush.msra.mxu0 %v10303_v4  ;;  %3007 = vmatpush.msra.mxu1 %v10304_v38  ;;  %v5650_v4 = vld [vmem:[%s6723_s15 + $0xe2] ss:$8 sm:$0xf] }
 0x272   : > { %3027 = vmatpush.msra.mxu2 %v10305_v62  ;;  %3047 = vmatpush.msra.mxu3 %v10306_v49 }
 0x2ce   : > { %v1775_v11 = vpop.f32.mrf.mxu1  ;;  %v1755_v25 = vpop.f32.mrf.mxu0 }
 0x2cf   : > { %v1822_v23 = vrot.slane %v1775_v11, 7 }
 0x2d1   : > { %v1828_v54 = vsel %vm565_vm0, %v1755_v25, %v1822_v23  ;;  %v1832_v58 = vsel %vm10248_vm8, %v1755_v25, %v1822_v23  ;;  %v1836_v12 = vsel %vm10313_vm13, %v1755_v25, %v1822_v23  ;;  %v1825_v31 = vsel %vm10316_vm4, %v1755_v25, %v1822_v23  ;;  %vm10324_vm8 = vmmov %vm10312_vm10 }
 0x2d2   : > { %v1840_v27 = vsel %vm10317_vm9, %v1755_v25, %v1822_v23  ;;  %v1844_v9 = vsel %vm10318_vm1, %v1755_v25, %v1822_v23  ;;  %v1848_v60 = vsel %vm10324_vm8, %v1755_v25, %v1822_v23 }
 0x2d5   : > { %v1795_v40 = vpop.f32.mrf.mxu2  ;;  %v1815_v3 = vpop.f32.mrf.mxu3 }
 0x2d6   : > { %v1823_v43 = vrot.slane %v1795_v40, 6  ;;  %v1824_v42 = vrot.slane %v1815_v3, 5 }
 0x2d8   : > { %v1829_v19 = vsel %vm10307_vm6, %v1823_v43, %v1824_v42  ;;  %v1833_v46 = vsel %vm10308_vm7, %v1823_v43, %v1824_v42  ;;  %v1837_v56 = vsel %vm10309_vm5, %v1823_v43, %v1824_v42  ;;  %v1826_v61 = vsel %vm10310_vm11, %v1823_v43, %v1824_v42  ;;  %vm10322_vm7 = vmmov %vm10316_vm4 }
 0x2d9   : > { %v1830_v63 = vsel %vm10311_vm12, %v1828_v54, %v1829_v19  ;;  %v1841_v8 = vsel %vm10312_vm10, %v1823_v43, %v1824_v42  ;;  %v1834_v14 = vsel %vm10314_vm14, %v1832_v58, %v1833_v46  ;;  %v1845_v15 = vsel %vm10315_vm15, %v1824_v42, %v1823_v43  ;;  %vm10325_vm11 = vmmov %vm10315_vm15 }
 0x2da   : > { %v1838_v36 = vsel %vm10319_vm3, %v1836_v12, %v1837_v56  ;;  %v1827_v24 = vsel %vm10320_vm2, %v1825_v31, %v1826_v61  ;;  %v1831_v22 = vrot.slane %v1830_v63, 1  ;;  %vm10321_vm6 = vcmask 1045508  }
 0x2db   : > { %v1842_v18 = vsel %vm10321_vm6, %v1840_v27, %v1841_v8  ;;  %v1849_v17 = vsel %vm10322_vm7, %v1823_v43, %v1824_v42  ;;  %v1835_v5 = vrot.slane %v1834_v14, 2  ;;  %vm10323_vm5 = vcmask 1046533  }
 0x2dc   : > { %v1846_v26 = vsel %vm10323_vm5, %v1844_v9, %v1845_v15  ;;  %v1853_v6 = vsel %vm565_vm0, %v1823_v43, %v1824_v42  ;;  %v1839_v32 = vrot.slane %v1838_v36, 3  ;;  %v1852_v28 = vsel %vm10325_vm11, %v1822_v23, %v1755_v25 }
 0x2dd   : > { %v1843_v13 = vrot.slane %v1842_v18, 4  ;;  %vm10326_vm12 = vcmask 1045504   ;;  %v7998_v47 = vadd.f32 %v5643_v30, %v1827_v24  ;;  %v1847_v2 = vrot.slane %v1846_v26, 5 }
 0x2de   : > { %v1850_v44 = vsel %vm10326_vm12, %v1849_v17, %v1848_v60  ;;  %vm10327_vm10 = vcmask 1046529   ;;  %v8002_v37 = vadd.f32 %v5644_v29, %v1831_v22  ;;  %v8005_v20 = vadd.f32 %v5645_v57, %v1835_v5 }
 0x2df   : > { %v1854_v39 = vsel %vm10327_vm10, %v1853_v6, %v1852_v28  ;;  %v1851_v34 = vrot.slane %v1850_v44, 6  ;;  %v8007_v1 = vadd.f32 %v5646_v35, %v1839_v32  ;;  %v8010_v59 = vadd.f32 %v5647_v53, %v1843_v13 }
 0x2e0   : > { %v1855_v33 = vrot.slane %v1854_v39, 7  ;;  %v5651_v41 = vmul.f32 -1.442695, %v7998_v47  ;;  %v8014_v38 = vadd.f32 %v5648_v48, %v1847_v2  ;;  %v5652_v62 = vmul.f32 -1.442695, %v8002_v37 }
 0x2e1   : > { %v5653_v49 = vmul.f32 -1.442695, %v8005_v20  ;;  %v8018_v11 = vadd.f32 %v5649_v55, %v1851_v34  ;;  %v5654_v40 = vmul.f32 -1.442695, %v8007_v1  ;;  %v5655_v23 = vmul.f32 -1.442695, %v8010_v59 }
 0x2e2   : > { %v8021_v3 = vadd.f32 %v5650_v4, %v1855_v33  ;;  %5915 = vpow2.f32 %v5651_v41  ;;  %v5656_v43 = vmul.f32 -1.442695, %v8014_v38 }
 0x2e3   : > { %5917 = vpow2.f32 %v5652_v62  ;;  %v5657_v42 = vmul.f32 -1.442695, %v8018_v11 }
 0x2e4   : > { %5919 = vpow2.f32 %v5653_v49  ;;  %v5658_v19 = vmul.f32 -1.442695, %v8021_v3 }
 0x2e5   : > { %5921 = vpow2.f32 %v5654_v40 }
 0x2e6   : > { %5923 = vpow2.f32 %v5655_v23 }
 0x2e7   : > { %5925 = vpow2.f32 %v5656_v43 }
 0x2e8   : > { %v5916_v25 = vpop.eup %5915  ;;  %5927 = vpow2.f32 %v5657_v42 }
 0x2e9   : > { %v5918_v46 = vpop.eup %5917  ;;  %v1928_v54 = vadd.f32 1.0, %v5916_v25  ;;  %5929 = vpow2.f32 %v5658_v19 }
 0x2ea   : > { %v5920_v56 = vpop.eup %5919  ;;  %v8027_v58 = vadd.f32 1.0, %v5918_v46 }
 0x2eb   : > { %v5922_v61 = vpop.eup %5921  ;;  %v8029_v63 = vadd.f32 1.0, %v5920_v56  ;;  %5931 = vrcp.f32 %v1928_v54  ;;  %v1945_v31 = vand.u32 2147483647, %v1928_v54  ;;  %v1947_v27 = vand.u32 2147483648, %v1928_v54 }
 0x2ec   : > { %v5924_v8 = vpop.eup %5923  ;;  %v8031_v12 = vadd.f32 1.0, %v5922_v61  ;;  %5933 = vrcp.f32 %v8027_v58  ;;  %v1960_v36 = vand.u32 2147483647, %v8027_v58  ;;  %v1962_v22 = vand.u32 2147483648, %v8027_v58 }
 0x2ed   : > { %v5926_v14 = vpop.eup %5925  ;;  %v8034_v15 = vadd.f32 1.0, %v5924_v8  ;;  %5935 = vrcp.f32 %v8029_v63  ;;  %vm1941_vm13 = vweird.f32 %v1928_v54  ;;  %vm1956_vm14 = vweird.f32 %v8027_v58 }
 0x2ee   : > { %v5928_v9 = vpop.eup %5927  ;;  %v8038_v24 = vadd.f32 1.0, %v5926_v14  ;;  %5937 = vrcp.f32 %v8031_v12  ;;  %v1975_v17 = vand.u32 2147483647, %v8029_v63  ;;  %vm8045_vm15 = vcmp.eq.f32.partialorder %v1945_v31, 8.507059e+37 }
 0x2ef   : > { %v5930_v30 = vpop.eup %5929  ;;  %5939 = vrcp.f32 %v8034_v15  ;;  %v1948_v6 = vor.u32 1.1754944e-38, %v1947_v27  ;;  %v1977_v60 = vand.u32 2147483648, %v8029_v63  ;;  %v8050_v57 = vadd.f32 1.0, %v5928_v9 }
 0x2f0   : > { %vm8053_vm4 = vcmp.eq.f32.partialorder %v1960_v36, 8.507059e+37  ;;  %vm1971_vm9 = vweird.f32 %v8029_v63  ;;  %v1990_v35 = vand.u32 2147483647, %v8031_v12  ;;  %v8059_v44 = vadd.f32 1.0, %v5930_v30 }
 0x2f1   : > { %v5932_v18 = vpop.eup %5931  ;;  %v1963_v2 = vor.u32 1.1754944e-38, %v1962_v22  ;;  %5941 = vrcp.f32 %v8038_v24  ;;  %vm8063_vm3 = vcmp.eq.f32.partialorder %v1975_v17, 8.507059e+37  ;;  %vm1986_vm2 = vweird.f32 %v8031_v12 }
 0x2f2   : > { %v5934_v29 = vpop.eup %5933  ;;  %v1937_v5 = vmul.f32 %v5932_v18, %v1928_v54  ;;  %vm1942_vm1 = vweird.f32 %v5932_v18  ;;  %v1992_v55 = vand.u32 2147483648, %v8031_v12  ;;  %v1978_v4 = vor.u32 1.1754944e-38, %v1977_v60 }
 0x2f3   : > { %v1952_v32 = vmul.f32 %v5934_v29, %v8027_v58  ;;  %v5936_v13 = vpop.eup %5935  ;;  %vm1957_vm6 = vweird.f32 %v5934_v29  ;;  %vm2001_vm7 = vweird.f32 %v8034_v15  ;;  %vm8071_vm5 = vcmp.eq.f32.partialorder %v1990_v35, 8.507059e+37  ;;  %vm1943_vm8 = vmor %vm1941_vm13, %vm1942_vm1 }
 0x2f4   : > { %v1938_v53 = vsub.f32 1.0, %v1937_v5  ;;  %v1967_v48 = vmul.f32 %v5936_v13, %v8029_v63  ;;  %v5938_v33 = vpop.eup %5937  ;;  %v2005_v25 = vand.u32 2147483647, %v8034_v15  ;;  %v2007_v46 = vand.u32 2147483648, %v8034_v15  ;;  %vm1958_vm12 = vmor %vm1956_vm14, %vm1957_vm6 }
 0x2f5   : > { %v1953_v39 = vsub.f32 1.0, %v1952_v32  ;;  %v5940_v62 = vpop.eup %5939  ;;  %v1982_v23 = vmul.f32 %v5938_v33, %v8031_v12  ;;  %vm1972_vm11 = vweird.f32 %v5936_v13  ;;  %vm1987_vm10 = vweird.f32 %v5938_v33 }
 0x2f6   : > { %v1939_v41 = vmul.f32 %v5932_v18, %v1938_v53  ;;  %v1968_v40 = vsub.f32 1.0, %v1967_v48  ;;  %v1997_v19 = vmul.f32 %v5940_v62, %v8034_v15  ;;  %5943 = vrcp.f32 %v8050_v57  ;;  %vm1973_vm13 = vmor %vm1971_vm9, %vm1972_vm11 }
 0x2f7   : > { %v1954_v49 = vmul.f32 %v5934_v29, %v1953_v39  ;;  %v1983_v8 = vsub.f32 1.0, %v1982_v23  ;;  %v5942_v14 = vpop.eup %5941  ;;  %vm2002_vm14 = vweird.f32 %v5940_v62  ;;  %v1993_v26 = vor.u32 1.1754944e-38, %v1992_v55 }
 0x2f8   : > { %v1940_v42 = vadd.f32 %v5932_v18, %v1939_v41  ;;  %v1969_v61 = vmul.f32 %v5936_v13, %v1968_v40  ;;  %v1998_v27 = vsub.f32 1.0, %v1997_v19  ;;  %v2008_v60 = vor.u32 1.1754944e-38, %v2007_v46  ;;  %vm2003_vm9 = vmor %vm2001_vm7, %vm2002_vm14 }
 0x2f9   : > { %v1955_v56 = vadd.f32 %v5934_v29, %v1954_v49  ;;  %v1984_v30 = vmul.f32 %v5938_v33, %v1983_v8  ;;  %v2020_v35 = vand.u32 2147483647, %v8038_v24  ;;  %5945 = vrcp.f32 %v8059_v44 }
 0x2fa   : > { %v1944_v31 = vsel %vm1943_vm8, %v5932_v18, %v1940_v42  ;;  %v1970_v36 = vadd.f32 %v5936_v13, %v1969_v61  ;;  %v1999_v58 = vmul.f32 %v5940_v62, %v1998_v27  ;;  %v2012_v18 = vmul.f32 %v5942_v14, %v8038_v24 }
 0x2fb   : > { %v8086_v9 = vsel %vm8045_vm15, %v1948_v6, %v1944_v31  ;;  %v1959_v54 = vsel %vm1958_vm12, %v5934_v29, %v1955_v56  ;;  %v1985_v5 = vadd.f32 %v5938_v33, %v1984_v30  ;;  %vm8096_vm15 = vcmp.eq.f32.partialorder %v2005_v25, 8.507059e+37 }
 0x2fc   : > { %v8090_v22 = vsel %vm8053_vm4, %v1963_v2, %v1959_v54  ;;  %2064 = vst [vmem:[#allocation1] ss:$9 sm:$0xff] %v8086_v9  ;;  %v1974_v17 = vsel %vm1973_vm13, %v5936_v13, %v1970_v36  ;;  %vm1988_vm4 = vmor %vm1986_vm2, %vm1987_vm10  ;;  %v2000_v63 = vadd.f32 %v5940_v62, %v1999_v58  ;;  %v2013_v32 = vsub.f32 1.0, %v2012_v18  ;;  %v5944_v53 = vpop.eup %5943 }
 0x2fd   : > { %2066 = vst [vmem:[#allocation1 + $0x1] ss:$9 sm:$0xff] %v8090_v22  ;;  %v8103_v6 = vsel %vm8063_vm3, %v1978_v4, %v1974_v17  ;;  %v1989_v28 = vsel %vm1988_vm4, %v5938_v33, %v1985_v5  ;;  %v2022_v13 = vand.u32 2147483648, %v8038_v24  ;;  %vm2017_vm1 = vweird.f32 %v5942_v14 }
 0x2fe   : > { %2068 = vst [vmem:[#allocation1 + $0x2] ss:$9 sm:$0xff] %v8103_v6  ;;  %v8116_v12 = vsel %vm8071_vm5, %v1993_v26, %v1989_v28  ;;  %v2004_v2 = vsel %vm2003_vm9, %v5940_v62, %v2000_v63  ;;  %v2014_v39 = vmul.f32 %v5942_v14, %v2013_v32  ;;  %v2027_v48 = vmul.f32 %v5944_v53, %v8050_v57 }
 0x2ff   : > { %v8120_v15 = vsel %vm8096_vm15, %v2008_v60, %v2004_v2  ;;  %2070 = vst [vmem:[#allocation1 + $0x3] ss:$9 sm:$0xff] %v8116_v12  ;;  %vm2016_vm3 = vweird.f32 %v8038_v24  ;;  %v2023_v55 = vor.u32 1.1754944e-38, %v2022_v13  ;;  %vm2021_vm6 = vcmp.eq.f32.partialorder %v2020_v35, 8.507059e+37  ;;  %v5946_v62 = vpop.eup %5945  ;;  %v2180_v2 = vpop.permute.xlu1 %2179 }
 0x300   : > { %v2015_v34 = vadd.f32 %v5942_v14, %v2014_v39  ;;  %2072 = vst [vmem:[#allocation1 + $0x4] ss:$9 sm:$0xff] %v8120_v15  ;;  %vm2018_vm2 = vmor %vm2016_vm3, %vm2017_vm1  ;;  %v2028_v33 = vsub.f32 1.0, %v2027_v48  ;;  %v2037_v4 = vand.u32 2147483648, %v8050_v57  ;;  %vm2032_vm7 = vweird.f32 %v5944_v53  ;;  %v2185_v39 = vpop.permute.xlu2 %2184  ;;  %v8158_v48 = vpop.permute.xlu0 %2174 }
 0x301   : > { %v2035_v23 = vand.u32 2147483647, %v8050_v57  ;;  %v2042_v43 = vmul.f32 %v5946_v62, %v8059_v44  ;;  %vm2031_vm5 = vweird.f32 %v8050_v57  ;;  %v2052_v46 = vand.u32 2147483648, %v8059_v44 }
 0x302   : > { %v2019_v41 = vsel %vm2018_vm2, %v5942_v14, %v2015_v34  ;;  %v2029_v40 = vmul.f32 %v5944_v53, %v2028_v33  ;;  %vm2033_vm8 = vmor %vm2031_vm5, %vm2032_vm7  ;;  %v2038_v42 = vor.u32 1.1754944e-38, %v2037_v4  ;;  %vm2047_vm12 = vweird.f32 %v5946_v62 }
 0x303   : > { %v8127_v49 = vsel %vm2021_vm6, %v2023_v55, %v2019_v41  ;;  %v2043_v19 = vsub.f32 1.0, %v2042_v43  ;;  %vm2036_vm11 = vcmp.eq.f32.partialorder %v2035_v23, 8.507059e+37  ;;  %v2050_v8 = vand.u32 2147483647, %v8059_v44 }
 0x304   : > { %2074 = vst [vmem:[#allocation1 + $0x5] ss:$9 sm:$0xff] %v8127_v49  ;;  %v2030_v24 = vadd.f32 %v5944_v53, %v2029_v40  ;;  %v1880_v14 = vrot.slane %v7998_v47, 3  ;;  %v1881_v31 = vrot.slane %v8002_v37, 3  ;;  %vm2046_vm10 = vweird.f32 %v8059_v44 }
 0x305   : > { %v2044_v61 = vmul.f32 %v5946_v62, %v2043_v19  ;;  %v1882_v27 = vrot.slane %v8005_v20, 3  ;;  %vm2048_vm13 = vmor %vm2046_vm10, %vm2047_vm12  ;;  %v2053_v54 = vor.u32 1.1754944e-38, %v2052_v46  ;;  %v1883_v36 = vrot.slane %v8007_v1, 3 }
 0x306   : > { %v2034_v25 = vsel %vm2033_vm8, %v5944_v53, %v2030_v24  ;;  %vm2051_vm14 = vcmp.eq.f32.partialorder %v2050_v8, 8.507059e+37  ;;  %v1884_v58 = vrot.slane %v8010_v59, 3  ;;  %5947 = vtanh.f32 %v1880_v14 }
 0x307   : > { %v8134_v56 = vsel %vm2036_vm11, %v2038_v42, %v2034_v25  ;;  %v2045_v57 = vadd.f32 %v5946_v62, %v2044_v61  ;;  %v1885_v47 = vrot.slane %v8014_v38, 3  ;;  %5949 = vtanh.f32 %v1881_v31  ;;  %v2190_v40 = vpop.permute.xlu1 %2189 }
 0x308   : > { %2076 = vst [vmem:[#allocation1 + $0x6] ss:$9 sm:$0xff] %v8134_v56  ;;  %v1886_v37 = vrot.slane %v8018_v11, 3  ;;  %5951 = vtanh.f32 %v1882_v27  ;;  %v1887_v20 = vrot.slane %v8021_v3, 3  ;;  %v2117_v4 = vrot.slane %v8086_v9, 2  ;;  %v2195_v19 = vpop.permute.xlu2 %2194 }
 0x309   : > { %v2049_v30 = vsel %vm2048_vm13, %v5946_v62, %v2045_v57  ;;  %5953 = vtanh.f32 %v1883_v36  ;;  %v2118_v62 = vrot.slane %v8090_v22, 2  ;;  %v2119_v25 = vrot.slane %v8103_v6, 2  ;;  %v2200_v57 = vpop.permute.xlu0 %2199 }
 0x30a   : > { %v8144_v18 = vsel %vm2051_vm14, %v2053_v54, %v2049_v30  ;;  %5955 = vtanh.f32 %v1884_v58  ;;  %v2120_v46 = vrot.slane %v8116_v12, 2  ;;  %v2121_v61 = vrot.slane %v8120_v15, 2 }
 0x30b   : > { %2078 = vst [vmem:[#allocation1 + $0x7] ss:$9 sm:$0xff] %v8144_v18  ;;  %5957 = vtanh.f32 %v1885_v47  ;;  %v2122_v14 = vrot.slane %v8127_v49, 2  ;;  %v2123_v31 = vrot.slane %v8134_v56, 2  ;;  %vm10338_vm15 = vcmask 1042434  }
 0x30c   : > { %v5948_v1 = vpop.eup %5947  ;;  %5959 = vtanh.f32 %v1886_v37  ;;  %vm10339_vm4 = vcmask 1043459   ;;  %vm10340_vm9 = vmmov %vm10338_vm15  ;;  %vm10341_vm1 = vcmask 1044484   ;;  %vm10343_vm2 = vcmask 1045509  }
 0x30d   : > { %v5950_v44 = vpop.eup %5949  ;;  %5961 = vtanh.f32 %v1887_v20  ;;  %v2082_v59 = vmul.f32 %v5948_v1, %v8086_v9  ;;  %v2124_v9 = vrot.slane %v8144_v18, 2  ;;  %vm10342_vm3 = vmmov %vm10339_vm4  ;;  %vm10345_vm7 = vcmask 1046534  }
 0x30e   : > { %v5952_v17 = vpop.eup %5951  ;;  %v2083_v38 = vmul.f32 %v5950_v44, %v8090_v22  ;;  %vm10344_vm6 = vmmov %vm10341_vm1  ;;  %vm10347_vm8 = vcmask 1047559  }
 0x30f   : > { %v5954_v26 = vpop.eup %5953  ;;  %v2084_v29 = vmul.f32 %v5952_v17, %v8103_v6  ;;  %vm10346_vm5 = vmmov %vm10343_vm2 }
 0x310   : > { %v5956_v11 = vpop.eup %5955  ;;  %v2085_v3 = vmul.f32 %v5954_v26, %v8116_v12  ;;  %vm10348_vm11 = vmmov %vm10345_vm7 }
 0x311   : > { %v5958_v63 = vpop.eup %5957  ;;  %v2086_v60 = vmul.f32 %v5956_v11, %v8120_v15  ;;  %vm10349_vm12 = vmmov %vm10347_vm8 }
 0x312   : > { %v2079_v5 = vld [vmem:[#allocation1 + $0x9] sm:$0xff]  ;;  %v5960_v32 = vpop.eup %5959  ;;  %v2087_v28 = vmul.f32 %v5958_v63, %v8127_v49  ;;  %vm10397_vm10 = vmmov %vm10342_vm3 }
 0x313   : > { %2098 = vst [vmem:[#allocation1] ss:$9 sm:$0xff] %v2082_v59  ;;  %v5962_v35 = vpop.eup %5961  ;;  %v2088_v13 = vmul.f32 %v5960_v32, %v8134_v56  ;;  %v2081_v34 = vmul.f32 %v2079_v5, %v7851_v21  ;;  %vm10398_vm13 = vmmov %vm10341_vm1 }
 0x314   : > { %2100 = vst [vmem:[#allocation1 + $0x1] ss:$9 sm:$0xff] %v2083_v38  ;;  %v2089_v53 = vmul.f32 %v5962_v35, %v8144_v18  ;;  %vm10399_vm14 = vmmov %vm10343_vm2 }
 0x315   : > { %2102 = vst [vmem:[#allocation1 + $0x2] ss:$9 sm:$0xff] %v2084_v29 }
 0x316   : > { %2104 = vst [vmem:[#allocation1 + $0x3] ss:$9 sm:$0xff] %v2085_v3 }
 0x317   : > { %2106 = vst [vmem:[#allocation1 + $0x4] ss:$9 sm:$0xff] %v2086_v60 }
 0x318   : > { %2108 = vst [vmem:[#allocation1 + $0x5] ss:$9 sm:$0xff] %v2087_v28 }
 0x319   : > { %2110 = vst [vmem:[#allocation1 + $0x6] ss:$9 sm:$0xff] %v2088_v13  ;;  %v2205_v13 = vpop.permute.xlu1 %2204 }
 0x31a   : > { %2112 = vst [vmem:[#allocation1 + $0x7] ss:$9 sm:$0xff] %v2089_v53 }
 0x321   : > { %v2113_v55 = vld [vmem:[#allocation1] sm:$0xff] }
 0x322   : > { %v2115_v33 = vadd.f32 %v2113_v55, %v2081_v34 }
 0x324   : > { %5963 = vtanh.f32 %v2115_v33  ;;  %v2244_v41 = vsub.f32 %v2115_v33, %v7851_v21  ;;  %v2210_v33 = vpop.permute.xlu2 %2209 }
 0x326   : > { %v2246_v23 = vrot.slane %v2244_v41, 1  ;;  %v2247_v43 = vrot.slane %v2244_v41, 2  ;;  %v2248_v24 = vrot.slane %v2244_v41, 3  ;;  %v2249_v42 = vrot.slane %v2244_v41, 4 }
 0x327   : > { %v2250_v8 = vrot.slane %v2244_v41, 5  ;;  %v2251_v27 = vrot.slane %v2244_v41, 6  ;;  %v2252_v54 = vrot.slane %v2244_v41, 7  ;;  %v2261_v36 = vmul.f32 %v2244_v41, %v8158_v48 }
 0x328   : > { %v2262_v22 = vmul.f32 %v2246_v23, %v2180_v2  ;;  %v2263_v30 = vmul.f32 %v2247_v43, %v2185_v39  ;;  %v2264_v6 = vmul.f32 %v2248_v24, %v2190_v40  ;;  %v2265_v47 = vmul.f32 %v2249_v42, %v2195_v19 }
 0x329   : > { %v2266_v12 = vmul.f32 %v2250_v8, %v2200_v57  ;;  %v2268_v23 = vmul.f32 %v2252_v54, %v2210_v33 }
 0x32a   : > { %v5964_v58 = vpop.eup %5963  ;;  %v2277_v37 = vrot.slane %v2262_v22, 7  ;;  %v2281_v43 = vrot.slane %v2264_v6, 5 }
 0x32b   : > { %v2134_v15 = vrot.slane %v5964_v58, 1  ;;  %v2135_v20 = vrot.slane %v5964_v58, 2  ;;  %v2136_v1 = vrot.slane %v5964_v58, 3  ;;  %v2137_v49 = vrot.slane %v5964_v58, 4 }
 0x32c   : > { %v2138_v44 = vrot.slane %v5964_v58, 5  ;;  %v2139_v56 = vrot.slane %v5964_v58, 6  ;;  %v2140_v59 = vrot.slane %v5964_v58, 7  ;;  %v2148_v18 = vmul.f32 %v5964_v58, %v2117_v4 }
 0x32d   : > { %v2149_v17 = vmul.f32 %v2134_v15, %v2118_v62  ;;  %v2150_v5 = vmul.f32 %v2135_v20, %v2119_v25  ;;  %v2151_v38 = vmul.f32 %v2136_v1, %v2120_v46  ;;  %v2152_v26 = vmul.f32 %v2137_v49, %v2121_v61 }
 0x32e   : > { %v2153_v29 = vmul.f32 %v2138_v44, %v2122_v14  ;;  %v2154_v11 = vmul.f32 %v2139_v56, %v2123_v31  ;;  %v2155_v3 = vmul.f32 %v2140_v59, %v2124_v9  ;;  %v2164_v63 = vsub.f32 %v2148_v18, %v7855_v7  ;;  %v8223_v59 = vld [vmem:[#allocation8 + $0x1e0] sm:$0xff]  ;;  %v8226_v18 = vld [vmem:[#allocation8 + $0x1e8] sm:$0xff] }
 0x32f   : > { %v2165_v60 = vsub.f32 %v2149_v17, %v1677_v0  ;;  %v2166_v32 = vsub.f32 %v2150_v5, %v1678_v10  ;;  %v2167_v28 = vsub.f32 %v2151_v38, %v1679_v16  ;;  %v2168_v35 = vsub.f32 %v2152_v26, %v1680_v45  ;;  %v8231_v5 = vld [vmem:[#allocation8 + $0x1f0] sm:$0xff]  ;;  %v8234_v38 = vld [vmem:[#allocation8 + $0x1f8] sm:$0xff] }
 0x330   : > { %v2169_v53 = vsub.f32 %v2153_v29, %v1681_v50  ;;  %v2170_v34 = vsub.f32 %v2154_v11, %v1682_v51  ;;  %v2171_v55 = vsub.f32 %v2155_v3, %v1683_v52  ;;  %v2279_v0 = vrot.slane %v2263_v30, 6  ;;  %v8239_v29 = vld [vmem:[#allocation8 + $0x1c0] sm:$0xff]  ;;  %v8242_v11 = vld [vmem:[#allocation8 + $0x1c8] sm:$0xff] }
 0x331   : > { %v2213_v41 = vmul.f32 %v2180_v2, %v2165_v60  ;;  %v2214_v10 = vmul.f32 %v2185_v39, %v2166_v32  ;;  %v2215_v4 = vmul.f32 %v2190_v40, %v2167_v28  ;;  %v2267_v62 = vmul.f32 %v2251_v27, %v2205_v13  ;;  %v8250_v60 = vld [vmem:[#allocation8 + $0x1d8] sm:$0xff]  ;;  %v8255_v28 = vld [vmem:[#allocation8 + $0x1a0] sm:$0xff] }
 0x332   : > { %v2216_v16 = vmul.f32 %v2195_v19, %v2168_v35  ;;  %v2278_v45 = vsel %vm565_vm0, %v2277_v37, %v2261_v36  ;;  %v2212_v24 = vmul.f32 %v8158_v48, %v2164_v63  ;;  %v2217_v50 = vmul.f32 %v2200_v57, %v2169_v53  ;;  %v8247_v63 = vld [vmem:[#allocation8 + $0x1d0] sm:$0xff]  ;;  %v8258_v35 = vld [vmem:[#allocation8 + $0x1a8] sm:$0xff] }
 0x333   : > { %v2228_v42 = vrot.slane %v2213_v41, 7  ;;  %v2230_v25 = vrot.slane %v2214_v10, 6  ;;  %v2218_v51 = vmul.f32 %v2205_v13, %v2170_v34  ;;  %v2219_v46 = vmul.f32 %v2210_v33, %v2171_v55  ;;  %v8263_v53 = vld [vmem:[#allocation8 + $0x1b0] sm:$0xff]  ;;  %v8266_v34 = vld [vmem:[#allocation8 + $0x1b8] sm:$0xff]  ;;  %v8276_v33 = vld [vmem:[#allocation8 + $0x188] sm:$0xff] }
 0x334   : > { %v2280_v52 = vsel %vm10338_vm15, %v2279_v0, %v2278_v45  ;;  %v2283_v61 = vrot.slane %v2265_v47, 4  ;;  %v2232_v39 = vrot.slane %v2215_v4, 5  ;;  %v2285_v19 = vrot.slane %v2266_v12, 3  ;;  %v8273_v0 = vld [vmem:[#allocation8 + $0x180] sm:$0xff]  ;;  %v8283_v10 = vld [vmem:[#allocation8 + $0x190] sm:$0xff]  ;;  %v8286_v4 = vld [vmem:[#allocation8 + $0x198] sm:$0xff] }
 0x335   : > { %v2229_v2 = vsel %vm565_vm0, %v2228_v42, %v2212_v24  ;;  %v2282_v40 = vsel %vm10339_vm4, %v2281_v43, %v2280_v52  ;;  %v2234_v14 = vrot.slane %v2216_v16, 4  ;;  %v2287_v48 = vrot.slane %v2267_v62, 2  ;;  %v8293_v16 = vld [vmem:[#allocation8 + $0x160] sm:$0xff]  ;;  %v8302_v45 = vld [vmem:[#allocation8 + $0x170] sm:$0xff]  ;;  %v8305_v43 = vld [vmem:[#allocation8 + $0x178] sm:$0xff] }
 0x336   : > { %v2231_v8 = vsel %vm10340_vm9, %v2230_v25, %v2229_v2  ;;  %v2284_v31 = vsel %vm10341_vm1, %v2283_v61, %v2282_v40  ;;  %v2236_v22 = vrot.slane %v2217_v50, 3  ;;  %v2289_v27 = vrot.slane %v2268_v23, 1  ;;  %v8296_v23 = vld [vmem:[#allocation8 + $0x168] sm:$0xff]  ;;  %10351 = vst [vmem:[#allocation24_spill] sm:$0xff] %v8302_v45  ;;  %v8311_v24 = vld [vmem:[#allocation8 + $0x140] sm:$0xff]  ;;  %v8320_v42 = vld [vmem:[#allocation8 + $0x150] sm:$0xff] }
 0x337   : > { %v2233_v9 = vsel %vm10342_vm3, %v2232_v39, %v2231_v8  ;;  %v2286_v57 = vsel %vm10343_vm2, %v2285_v19, %v2284_v31  ;;  %v2238_v36 = vrot.slane %v2218_v51, 2  ;;  %v2240_v6 = vrot.slane %v2219_v46, 1  ;;  %10350 = vst [vmem:[#allocation23_spill] sm:$0xff] %v8296_v23  ;;  %v8314_v50 = vld [vmem:[#allocation8 + $0x148] sm:$0xff]  ;;  %v8323_v25 = vld [vmem:[#allocation8 + $0x158] sm:$0xff]  ;;  %v8329_v51 = vld [vmem:[#allocation8 + $0x120] sm:$0xff] }
 0x338   : > { %v2235_v54 = vsel %vm10344_vm6, %v2234_v14, %v2233_v9  ;;  %v2288_v30 = vsel %vm10345_vm7, %v2287_v48, %v2286_v57  ;;  %10352 = vst [vmem:[#allocation25_spill] sm:$0xff] %v8305_v43  ;;  %v8332_v46 = vld [vmem:[#allocation8 + $0x128] sm:$0xff]  ;;  %v8335_v52 = vld [vmem:[#allocation8 + $0x130] sm:$0xff]  ;;  %v8338_v61 = vld [vmem:[#allocation8 + $0x138] sm:$0xff]  ;;  %vm10404_vm2 = vcmask 1043458   ;;  %vm10405_vm6 = vcmask 1046528  }
 0x339   : > { %v2237_v58 = vsel %vm10346_vm5, %v2236_v22, %v2235_v54  ;;  %v2290_v47 = vsel %vm10347_vm8, %v2289_v27, %v2288_v30  ;;  %10353 = vst [vmem:[#allocation26_spill] sm:$0xff] %v8311_v24  ;;  %v8341_v2 = vld [vmem:[#allocation8 + $0x100] sm:$0xff]  ;;  %v8344_v39 = vld [vmem:[#allocation8 + $0x108] sm:$0xff]  ;;  %v8347_v40 = vld [vmem:[#allocation8 + $0x110] sm:$0xff] }
 0x33a   : > { %v2239_v12 = vsel %vm10348_vm11, %v2238_v36, %v2237_v58  ;;  %v8201_v37 = vadd.f32 %v2290_v47, %v7851_v21  ;;  %10354 = vst [vmem:[#allocation20_spill] sm:$0xff] %v8314_v50  ;;  %v8350_v19 = vld [vmem:[#allocation8 + $0x118] sm:$0xff]  ;;  %v8353_v8 = vld [vmem:[#allocation8 + $0xe0] sm:$0xff]  ;;  %v8356_v14 = vld [vmem:[#allocation8 + $0xe8] sm:$0xff]  ;;  %vm10409_vm11 = vcmask 1044483  }
 0x33b   : > { %v2241_v15 = vsel %vm10349_vm12, %v2240_v6, %v2239_v12  ;;  %10355 = vst [vmem:[#allocation27_spill] sm:$0xff] %v8320_v42  ;;  %v8359_v31 = vld [vmem:[#allocation8 + $0xf0] sm:$0xff]  ;;  %v8362_v48 = vld [vmem:[#allocation8 + $0xf8] sm:$0xff]  ;;  %v8365_v9 = vld [vmem:[#allocation8 + $0xc0] sm:$0xff]  ;;  %vm10410_vm12 = vcmask 1041408  }
 0x33c   : > { %v8205_v20 = vadd.f32 %v2241_v15, %v7855_v7  ;;  %v2317_v1 = vrot.slane %v8201_v37, 1  ;;  %v2318_v49 = vrot.slane %v8201_v37, 2  ;;  %2331 = vst [vmem:[%s6738_s18 + $0x2] sm:$0x1] %v8201_v37  ;;  %v2319_v44 = vrot.slane %v8201_v37, 3  ;;  %v8368_v22 = vld [vmem:[#allocation8 + $0xc8] sm:$0xff]  ;;  %vm10400_vm15 = vmmov %vm10340_vm9 }
 0x33d   : > { %v2320_v21 = vrot.slane %v8201_v37, 4  ;;  %v2321_v7 = vrot.slane %v8201_v37, 5  ;;  %v2322_v56 = vrot.slane %v8201_v37, 6  ;;  %v2323_v17 = vrot.slane %v8201_v37, 7  ;;  %10356 = vst [vmem:[#allocation21_spill] sm:$0xff] %v8323_v25  ;;  %v8371_v57 = vld [vmem:[#allocation8 + $0xd0] sm:$0xff]  ;;  %vm10401_vm4 = vmmov %vm10340_vm9 }
 0x33e   : > { %2308 = vst [vmem:[%s6736_s17 + $0x2] sm:$0x1] %v8205_v20  ;;  %2371 = vmatmul.f32.vlgmr.msrb.gmra.mxu0 %v8205_v20  ;;  %2391 = vmatmul.f32.vlgmr.msrb.gmra.mxu1 %v8205_v20  ;;  %v10068_v26 = vrot.slane %v8205_v20, 1  ;;  %v10067_v3 = vrot.slane %v8205_v20, 2  ;;  %v10066_v32 = vrot.slane %v8205_v20, 3  ;;  %v10065_v13 = vrot.slane %v8205_v20, 4  ;;  %vm10403_vm1 = vmmov %vm10345_vm7 }
 0x33f   : > { %2332 = vst [vmem:[%s6738_s18 + $0xa] sm:$0x1] %v2317_v1  ;;  %2411 = vmatmul.f32.vlgmr.msrb.gmra.mxu2 %v8205_v20  ;;  %2431 = vmatmul.f32.vlgmr.msrb.gmra.mxu3 %v8205_v20  ;;  %v10064_v55 = vrot.slane %v8205_v20, 5  ;;  %v10063_v41 = vrot.slane %v8205_v20, 6  ;;  %v10062_v62 = vrot.slane %v8205_v20, 7  ;;  %v8374_v27 = vld [vmem:[#allocation8 + $0xd8] sm:$0xff]  ;;  %vm10407_vm5 = vmmov %vm10398_vm13 }
 0x340   : > { %2333 = vst [vmem:[%s6738_s18 + $0x12] sm:$0x1] %v2318_v49  ;;  %3589 = vmatpush.msrb.mxu0 %v8223_v59  ;;  %3609 = vmatpush.msrb.mxu1 %v8226_v18  ;;  %v8377_v54 = vld [vmem:[#allocation8 + $0xa0] sm:$0xff]  ;;  %v8380_v36 = vld [vmem:[#allocation8 + $0xa8] sm:$0xff]  ;;  %v8383_v30 = vld [vmem:[#allocation8 + $0xb0] sm:$0xff]  ;;  %vm10402_vm9 = vcmask 1042433  }
 0x341   : > { %2334 = vst [vmem:[%s6738_s18 + $0x1a] sm:$0x1] %v2319_v44  ;;  %3629 = vmatpush.msrb.mxu2 %v8231_v5  ;;  %3649 = vmatpush.msrb.mxu3 %v8234_v38  ;;  %v8386_v58 = vld [vmem:[#allocation8 + $0xb8] sm:$0xff]  ;;  %v8389_v6 = vld [vmem:[#allocation8 + $0x80] sm:$0xff]  ;;  %v8392_v47 = vld [vmem:[#allocation8 + $0x88] sm:$0xff]  ;;  %vm10406_vm7 = vcmask 1040384  }
 0x342   : > { %2335 = vst [vmem:[%s6738_s18 + $0x22] sm:$0x1] %v2320_v21  ;;  %3590 = vmatpush.msrb.mxu0 %v8239_v29  ;;  %3610 = vmatpush.msrb.mxu1 %v8242_v11  ;;  %v8395_v12 = vld [vmem:[#allocation8 + $0x90] sm:$0xff]  ;;  %v8398_v15 = vld [vmem:[#allocation8 + $0x98] sm:$0xff]  ;;  %v8401_v1 = vld [vmem:[#allocation8 + $0x60] sm:$0xff] }
 0x343   : > { %2336 = vst [vmem:[%s6738_s18 + $0x2a] sm:$0x1] %v2321_v7  ;;  %3630 = vmatpush.msrb.mxu2 %v8247_v63  ;;  %3650 = vmatpush.msrb.mxu3 %v8250_v60  ;;  %v8404_v49 = vld [vmem:[#allocation8 + $0x68] sm:$0xff]  ;;  %v8407_v44 = vld [vmem:[#allocation8 + $0x70] sm:$0xff]  ;;  %v8410_v21 = vld [vmem:[#allocation8 + $0x78] sm:$0xff] }
 0x344   : > { %2337 = vst [vmem:[%s6738_s18 + $0x32] sm:$0x1] %v2322_v56  ;;  %3591 = vmatpush.msrb.mxu0 %v8255_v28  ;;  %3611 = vmatpush.msrb.mxu1 %v8258_v35  ;;  %v8413_v7 = vld [vmem:[#allocation8 + $0x40] sm:$0xff]  ;;  %v8416_v56 = vld [vmem:[#allocation8 + $0x48] sm:$0xff]  ;;  %vm10408_vm8 = vmmov %vm10399_vm14 }
 0x345   : > { %2338 = vst [vmem:[%s6738_s18 + $0x3a] sm:$0x1] %v2323_v17  ;;  %3631 = vmatpush.msrb.mxu2 %v8263_v53  ;;  %3651 = vmatpush.msrb.mxu3 %v8266_v34  ;;  %v8419_v17 = vld [vmem:[#allocation8 + $0x50] sm:$0xff] }
 0x346   : > { %2309 = vst [vmem:[%s6736_s17 + $0xa] sm:$0x1] %v10068_v26  ;;  %3592 = vmatpush.msrb.mxu0 %v8273_v0  ;;  %3612 = vmatpush.msrb.mxu1 %v8276_v33  ;;  %v8440_v26 = vld [vmem:[#allocation8 + $0x8] sm:$0xff] }
 0x347   : > { %2310 = vst [vmem:[%s6736_s17 + $0x12] sm:$0x1] %v10067_v3  ;;  %3632 = vmatpush.msrb.mxu2 %v8283_v10  ;;  %3652 = vmatpush.msrb.mxu3 %v8286_v4  ;;  %v8437_v3 = vld [vmem:[#allocation8] sm:$0xff] }
 0x348   : > { %2311 = vst [vmem:[%s6736_s17 + $0x1a] sm:$0x1] %v10066_v32  ;;  %3593 = vmatpush.msrb.mxu0 %v8293_v16  ;;  %3613 = vmatpush.msrb.mxu1 %v8296_v23  ;;  %v8434_v32 = vld [vmem:[#allocation8 + $0x38] sm:$0xff] }
 0x349   : > { %2312 = vst [vmem:[%s6736_s17 + $0x22] sm:$0x1] %v10065_v13  ;;  %3633 = vmatpush.msrb.mxu2 %v8302_v45  ;;  %3653 = vmatpush.msrb.mxu3 %v8305_v43  ;;  %v8431_v13 = vld [vmem:[#allocation8 + $0x30] sm:$0xff] }
 0x34a   : > { %2313 = vst [vmem:[%s6736_s17 + $0x2a] sm:$0x1] %v10064_v55  ;;  %3594 = vmatpush.msrb.mxu0 %v8311_v24  ;;  %3614 = vmatpush.msrb.mxu1 %v8314_v50  ;;  %v8428_v55 = vld [vmem:[#allocation8 + $0x28] sm:$0xff] }
 0x34b   : > { %2314 = vst [vmem:[%s6736_s17 + $0x32] sm:$0x1] %v10063_v41  ;;  %3634 = vmatpush.msrb.mxu2 %v8320_v42  ;;  %3654 = vmatpush.msrb.mxu3 %v8323_v25  ;;  %v8425_v41 = vld [vmem:[#allocation8 + $0x20] sm:$0xff] }
 0x34c   : > { %2315 = vst [vmem:[%s6736_s17 + $0x3a] sm:$0x1] %v10062_v62  ;;  %3595 = vmatpush.msrb.mxu0 %v8329_v51  ;;  %3615 = vmatpush.msrb.mxu1 %v8332_v46  ;;  %v8422_v62 = vld [vmem:[#allocation8 + $0x58] sm:$0xff] }
 0x34d   : > { %10357 = vst [vmem:[#allocation22_spill] sm:$0xff] %v8329_v51  ;;  %3635 = vmatpush.msrb.mxu2 %v8335_v52  ;;  %3655 = vmatpush.msrb.mxu3 %v8338_v61 }
 0x34e   : > { %10358 = vst [vmem:[#allocation28_spill] sm:$0xff] %v8332_v46  ;;  %3596 = vmatpush.msrb.mxu0 %v8341_v2  ;;  %3616 = vmatpush.msrb.mxu1 %v8344_v39 }
 0x34f   : > { %10359 = vst [vmem:[#allocation29_spill] sm:$0xff] %v8335_v52  ;;  %3636 = vmatpush.msrb.mxu2 %v8347_v40  ;;  %3656 = vmatpush.msrb.mxu3 %v8350_v19 }
 0x350   : > { %10360 = vst [vmem:[#allocation30_spill] sm:$0xff] %v8338_v61  ;;  %3597 = vmatpush.msrb.mxu0 %v8353_v8  ;;  %3617 = vmatpush.msrb.mxu1 %v8356_v14 }
 0x351   : > { %10361 = vst [vmem:[#allocation31_spill] sm:$0xff] %v8341_v2  ;;  %3637 = vmatpush.msrb.mxu2 %v8359_v31  ;;  %3657 = vmatpush.msrb.mxu3 %v8362_v48 }
 0x352   : > { %10362 = vst [vmem:[#allocation32_spill] sm:$0xff] %v8344_v39  ;;  %3598 = vmatpush.msrb.mxu0 %v8365_v9  ;;  %3618 = vmatpush.msrb.mxu1 %v8368_v22 }
 0x353   : > { %10363 = vst [vmem:[#allocation33_spill] sm:$0xff] %v8347_v40  ;;  %3638 = vmatpush.msrb.mxu2 %v8371_v57  ;;  %3658 = vmatpush.msrb.mxu3 %v8374_v27 }
 0x354   : > { %10364 = vst [vmem:[#allocation34_spill] sm:$0xff] %v8350_v19  ;;  %3599 = vmatpush.msrb.mxu0 %v8377_v54  ;;  %3619 = vmatpush.msrb.mxu1 %v8380_v36 }
 0x355   : > { %10365 = vst [vmem:[#allocation35_spill] sm:$0xff] %v8353_v8  ;;  %3639 = vmatpush.msrb.mxu2 %v8383_v30  ;;  %3659 = vmatpush.msrb.mxu3 %v8386_v58 }
 0x356   : > { %10366 = vst [vmem:[#allocation36_spill] sm:$0xff] %v8356_v14  ;;  %3600 = vmatpush.msrb.mxu0 %v8389_v6  ;;  %3620 = vmatpush.msrb.mxu1 %v8392_v47 }
 0x357   : > { %10367 = vst [vmem:[#allocation37_spill] sm:$0xff] %v8359_v31  ;;  %3640 = vmatpush.msrb.mxu2 %v8395_v12  ;;  %3660 = vmatpush.msrb.mxu3 %v8398_v15 }
 0x358   : > { %10368 = vst [vmem:[#allocation38_spill] sm:$0xff] %v8362_v48  ;;  %3601 = vmatpush.msrb.mxu0 %v8401_v1  ;;  %3621 = vmatpush.msrb.mxu1 %v8404_v49 }
 0x359   : > { %10369 = vst [vmem:[#allocation39_spill] sm:$0xff] %v8365_v9  ;;  %3641 = vmatpush.msrb.mxu2 %v8407_v44  ;;  %3661 = vmatpush.msrb.mxu3 %v8410_v21  ;;  %v5663_v9 = vld [vmem:[%s6723_s15 + $0x83] ss:$8 sm:$0xf] }
 0x35a   : > { %10370 = vst [vmem:[#allocation40_spill] sm:$0xff] %v8368_v22  ;;  %3602 = vmatpush.msrb.mxu0 %v8413_v7  ;;  %3622 = vmatpush.msrb.mxu1 %v8416_v56 }
 0x35b   : > { %10371 = vst [vmem:[#allocation41_spill] sm:$0xff] %v8371_v57  ;;  %3642 = vmatpush.msrb.mxu2 %v8419_v17  ;;  %3662 = vmatpush.msrb.mxu3 %v8422_v62 }
 0x35c   : > { %10372 = vst [vmem:[#allocation42_spill] sm:$0xff] %v8374_v27  ;;  %3603 = vmatpush.msrb.mxu0 %v8425_v41  ;;  %3623 = vmatpush.msrb.mxu1 %v8428_v55 }
 0x35d   : > { %10373 = vst [vmem:[#allocation43_spill] sm:$0xff] %v8377_v54  ;;  %3643 = vmatpush.msrb.mxu2 %v8431_v13  ;;  %3663 = vmatpush.msrb.mxu3 %v8434_v32 }
 0x35e   : > { %10374 = vst [vmem:[#allocation44_spill] sm:$0xff] %v8380_v36  ;;  %3604 = vmatpush.msrb.mxu0 %v8437_v3  ;;  %3624 = vmatpush.msrb.mxu1 %v8440_v26 }
 0x35f   : > { %10375 = vst [vmem:[#allocation45_spill] sm:$0xff] %v8383_v30  ;;  %v5659_v30 = vld [vmem:[%s6723_s15 + $0x3] ss:$8 sm:$0xf] }
 0x360   : > { %10376 = vst [vmem:[#allocation46_spill] sm:$0xff] %v8386_v58 }
 0x361   : > { %10377 = vst [vmem:[#allocation47_spill] sm:$0xff] %v8389_v6 }
 0x362   : > { %10378 = vst [vmem:[#allocation48_spill] sm:$0xff] %v8392_v47 }
 0x363   : > { %10379 = vst [vmem:[#allocation49_spill] sm:$0xff] %v8395_v12 }
 0x364   : > { %10380 = vst [vmem:[#allocation50_spill] sm:$0xff] %v8398_v15 }
 0x365   : > { %10381 = vst [vmem:[#allocation51_spill] sm:$0xff] %v8401_v1 }
 0x366   : > { %10382 = vst [vmem:[#allocation52_spill] sm:$0xff] %v8404_v49 }
 0x367   : > { %10383 = vst [vmem:[#allocation53_spill] sm:$0xff] %v8407_v44 }
 0x368   : > { %10384 = vst [vmem:[#allocation54_spill] sm:$0xff] %v8410_v21 }
 0x369   : > { %10385 = vst [vmem:[#allocation55_spill] sm:$0xff] %v8413_v7 }
 0x36a   : > { %10386 = vst [vmem:[#allocation56_spill] sm:$0xff] %v8416_v56 }
 0x36b   : > { %10387 = vst [vmem:[#allocation57_spill] sm:$0xff] %v8419_v17 }
 0x36c   : > { %10388 = vst [vmem:[#allocation58_spill] sm:$0xff] %v8422_v62 }
 0x36d   : > { %10389 = vst [vmem:[#allocation59_spill] sm:$0xff] %v8425_v41  ;;  %v8443_v41 = vld [vmem:[#allocation8 + $0x10] sm:$0xff] }
 0x36e   : > { %10390 = vst [vmem:[#allocation60_spill] sm:$0xff] %v8428_v55  ;;  %3644 = vmatpush.msrb.mxu2 %v8443_v41  ;;  %v8446_v55 = vld [vmem:[#allocation8 + $0x18] sm:$0xff] }
 0x36f   : > { %10391 = vst [vmem:[#allocation61_spill] sm:$0xff] %v8431_v13  ;;  %3664 = vmatpush.msrb.mxu3 %v8446_v55 }
 0x370   : > { %10392 = vst [vmem:[#allocation62_spill] sm:$0xff] %v8434_v32 }
 0x371   : > { %10393 = vst [vmem:[#allocation63_spill] sm:$0xff] %v8437_v3 }
 0x372   : > { %10394 = vst [vmem:[#allocation64_spill] sm:$0xff] %v8440_v26 }
 0x373   : > { %10395 = vst [vmem:[#allocation65_spill] sm:$0xff] %v8443_v41 }
 0x374   : > { %10396 = vst [vmem:[#allocation66_spill] sm:$0xff] %v8446_v55 }
 0x3bb   : > { %v2392_v13 = vpop.f32.mrf.mxu1  ;;  %v2372_v21 = vpop.f32.mrf.mxu0 }
 0x3bc   : > { %v2439_v32 = vrot.slane %v2392_v13, 7 }
 0x3be   : > { %v2445_v44 = vsel %vm565_vm0, %v2372_v21, %v2439_v32  ;;  %v2449_v49 = vsel %vm10400_vm15, %v2372_v21, %v2439_v32  ;;  %v2442_v12 = vsel %vm10406_vm7, %v2372_v21, %v2439_v32  ;;  %v2457_v47 = vsel %vm10407_vm5, %v2372_v21, %v2439_v32  ;;  %vm10414_vm15 = vmmov %vm10403_vm1 }
 0x3bf   : > { %v2461_v6 = vsel %vm10408_vm8, %v2372_v21, %v2439_v32  ;;  %v2465_v22 = vsel %vm10414_vm15, %v2372_v21, %v2439_v32 }
 0x3c2   : > { %v2412_v62 = vpop.f32.mrf.mxu2  ;;  %v2432_v17 = vpop.f32.mrf.mxu3 }
 0x3c3   : > { %v2440_v56 = vrot.slane %v2412_v62, 6  ;;  %v2441_v7 = vrot.slane %v2432_v17, 5  ;;  %v2453_v62 = vsel %vm10342_vm3, %v2372_v21, %v2439_v32 }
 0x3c5   : > { %v2446_v3 = vsel %vm10397_vm10, %v2440_v56, %v2441_v7  ;;  %v2450_v26 = vsel %vm10398_vm13, %v2440_v56, %v2441_v7  ;;  %v2454_v41 = vsel %vm10399_vm14, %v2440_v56, %v2441_v7  ;;  %v2443_v55 = vsel %vm10401_vm4, %v2440_v56, %v2441_v7  ;;  %vm10412_vm13 = vmmov %vm10406_vm7 }
 0x3c6   : > { %v2447_v1 = vsel %vm10402_vm9, %v2445_v44, %v2446_v3  ;;  %v2458_v13 = vsel %vm10403_vm1, %v2440_v56, %v2441_v7  ;;  %v2451_v17 = vsel %vm10404_vm2, %v2449_v49, %v2450_v26  ;;  %v2462_v15 = vsel %vm10405_vm6, %v2441_v7, %v2440_v56  ;;  %v5660_v49 = vld [vmem:[%s6723_s15 + $0x23] ss:$8 sm:$0xf]  ;;  %vm10415_vm4 = vmmov %vm10405_vm6 }
 0x3c7   : > { %v2455_v58 = vsel %vm10409_vm11, %v2453_v62, %v2454_v41  ;;  %v2444_v3 = vsel %vm10410_vm12, %v2442_v12, %v2443_v55  ;;  %v2448_v44 = vrot.slane %v2447_v1, 1  ;;  %vm10411_vm10 = vcmask 1045508   ;;  %v5661_v41 = vld [vmem:[%s6723_s15 + $0x43] ss:$8 sm:$0xf] }
 0x3c8   : > { %v2459_v36 = vsel %vm10411_vm10, %v2457_v47, %v2458_v13  ;;  %v2466_v26 = vsel %vm10412_vm13, %v2440_v56, %v2441_v7  ;;  %v2452_v54 = vrot.slane %v2451_v17, 2  ;;  %vm10413_vm14 = vcmask 1046533   ;;  %v5662_v12 = vld [vmem:[%s6723_s15 + $0x63] ss:$8 sm:$0xf] }
 0x3c9   : > { %v2463_v27 = vsel %vm10413_vm14, %v2461_v6, %v2462_v15  ;;  %v2470_v57 = vsel %vm565_vm0, %v2440_v56, %v2441_v7  ;;  %v2456_v62 = vrot.slane %v2455_v58, 3  ;;  %v2469_v55 = vsel %vm10415_vm4, %v2439_v32, %v2372_v21  ;;  %v5664_v7 = vld [vmem:[%s6723_s15 + $0xa3] ss:$8 sm:$0xf] }
 0x3ca   : > { %v2460_v1 = vrot.slane %v2459_v36, 4  ;;  %vm10416_vm9 = vcmask 1045504   ;;  %v8476_v13 = vadd.f32 %v5659_v30, %v2444_v3  ;;  %v2464_v17 = vrot.slane %v2463_v27, 5  ;;  %v5665_v32 = vld [vmem:[%s6723_s15 + $0xc3] ss:$8 sm:$0xf] }
 0x3cb   : > { %v2467_v47 = vsel %vm10416_vm9, %v2466_v26, %v2465_v22  ;;  %vm10417_vm1 = vcmask 1046529   ;;  %v8480_v15 = vadd.f32 %v5660_v49, %v2448_v44  ;;  %v8483_v56 = vadd.f32 %v5661_v41, %v2452_v54  ;;  %v5666_v36 = vld [vmem:[%s6723_s15 + $0xe3] ss:$8 sm:$0xf] }
 0x3cc   : > { %v2471_v6 = vsel %vm10417_vm1, %v2470_v57, %v2469_v55  ;;  %v2468_v48 = vrot.slane %v2467_v47, 6  ;;  %v8485_v58 = vadd.f32 %v5662_v12, %v2456_v62  ;;  %v8488_v31 = vadd.f32 %v5663_v9, %v2460_v1 }
 0x3cd   : > { %v2472_v21 = vrot.slane %v2471_v6, 7  ;;  %v5667_v22 = vmul.f32 -1.442695, %v8476_v13  ;;  %v8492_v30 = vadd.f32 %v5664_v7, %v2464_v17  ;;  %v5668_v27 = vmul.f32 -1.442695, %v8480_v15 }
 0x3ce   : > { %v5669_v57 = vmul.f32 -1.442695, %v8483_v56  ;;  %v8496_v3 = vadd.f32 %v5665_v32, %v2468_v48  ;;  %v5670_v54 = vmul.f32 -1.442695, %v8485_v58  ;;  %v5671_v26 = vmul.f32 -1.442695, %v8488_v31 }
 0x3cf   : > { %v8499_v44 = vadd.f32 %v5666_v36, %v2472_v21  ;;  %5965 = vpow2.f32 %v5667_v22  ;;  %v5672_v9 = vmul.f32 -1.442695, %v8492_v30 }
 0x3d0   : > { %5967 = vpow2.f32 %v5668_v27  ;;  %v5673_v49 = vmul.f32 -1.442695, %v8496_v3 }
 0x3d1   : > { %5969 = vpow2.f32 %v5669_v57  ;;  %v5674_v41 = vmul.f32 -1.442695, %v8499_v44 }
 0x3d2   : > { %5971 = vpow2.f32 %v5670_v54 }
 0x3d3   : > { %5973 = vpow2.f32 %v5671_v26 }
 0x3d4   : > { %5975 = vpow2.f32 %v5672_v9 }
 0x3d5   : > { %v5966_v48 = vpop.eup %5965  ;;  %5977 = vpow2.f32 %v5673_v49 }
 0x3d6   : > { %v5968_v62 = vpop.eup %5967  ;;  %v2545_v55 = vadd.f32 1.0, %v5966_v48  ;;  %5979 = vpow2.f32 %v5674_v41 }
 0x3d7   : > { %v5970_v12 = vpop.eup %5969  ;;  %v8505_v1 = vadd.f32 1.0, %v5968_v62 }
 0x3d8   : > { %v5972_v47 = vpop.eup %5971  ;;  %v8507_v17 = vadd.f32 1.0, %v5970_v12  ;;  %5981 = vrcp.f32 %v2545_v55  ;;  %v2562_v22 = vand.u32 2147483647, %v2545_v55  ;;  %v2564_v36 = vand.u32 2147483648, %v2545_v55 }
 0x3d9   : > { %v5974_v6 = vpop.eup %5973  ;;  %v8509_v7 = vadd.f32 1.0, %v5972_v47  ;;  %5983 = vrcp.f32 %v8505_v1  ;;  %v2577_v57 = vand.u32 2147483647, %v8505_v1  ;;  %v2579_v9 = vand.u32 2147483648, %v8505_v1 }
 0x3da   : > { %v5976_v32 = vpop.eup %5975  ;;  %v8512_v21 = vadd.f32 1.0, %v5974_v6  ;;  %5985 = vrcp.f32 %v8507_v17  ;;  %vm2558_vm3 = vweird.f32 %v2545_v55  ;;  %vm2573_vm2 = vweird.f32 %v8505_v1 }
 0x3db   : > { %v5978_v27 = vpop.eup %5977  ;;  %v8516_v26 = vadd.f32 1.0, %v5976_v32  ;;  %5987 = vrcp.f32 %v8509_v7  ;;  %v2592_v41 = vand.u32 2147483647, %v8507_v17  ;;  %vm8523_vm6 = vcmp.eq.f32.partialorder %v2562_v22, 8.507059e+37 }
 0x3dc   : > { %v5980_v54 = vpop.eup %5979  ;;  %5989 = vrcp.f32 %v8512_v21  ;;  %v2565_v47 = vor.u32 1.1754944e-38, %v2564_v36  ;;  %v2594_v6 = vand.u32 2147483648, %v8507_v17  ;;  %v8528_v32 = vadd.f32 1.0, %v5978_v27 }
 0x3dd   : > { %vm8531_vm7 = vcmp.eq.f32.partialorder %v2577_v57, 8.507059e+37  ;;  %vm2588_vm5 = vweird.f32 %v8507_v17  ;;  %v2607_v19 = vand.u32 2147483647, %v8509_v7  ;;  %v8537_v22 = vadd.f32 1.0, %v5980_v54 }
 0x3de   : > { %v5982_v49 = vpop.eup %5981  ;;  %v2580_v2 = vor.u32 1.1754944e-38, %v2579_v9  ;;  %5991 = vrcp.f32 %v8516_v26  ;;  %vm8541_vm11 = vcmp.eq.f32.partialorder %v2592_v41, 8.507059e+37  ;;  %vm2603_vm12 = vweird.f32 %v8509_v7 }
 0x3df   : > { %v5984_v48 = vpop.eup %5983  ;;  %v2554_v62 = vmul.f32 %v5982_v49, %v2545_v55  ;;  %vm2559_vm8 = vweird.f32 %v5982_v49  ;;  %v2609_v61 = vand.u32 2147483648, %v8509_v7  ;;  %v2595_v54 = vor.u32 1.1754944e-38, %v2594_v6 }
 0x3e0   : > { %v2569_v14 = vmul.f32 %v5984_v48, %v8505_v1  ;;  %v5986_v40 = vpop.eup %5985  ;;  %vm2574_vm10 = vweird.f32 %v5984_v48  ;;  %vm2618_vm13 = vweird.f32 %v8512_v21  ;;  %vm8549_vm14 = vcmp.eq.f32.partialorder %v2607_v19, 8.507059e+37  ;;  %vm2560_vm15 = vmor %vm2558_vm3, %vm2559_vm8 }
 0x3e1   : > { %v2555_v39 = vsub.f32 1.0, %v2554_v62  ;;  %v2584_v27 = vmul.f32 %v5986_v40, %v8507_v17  ;;  %v5988_v52 = vpop.eup %5987  ;;  %v2622_v50 = vand.u32 2147483647, %v8512_v21  ;;  %vm2589_vm4 = vweird.f32 %v5986_v40  ;;  %vm2575_vm9 = vmor %vm2573_vm2, %vm2574_vm10 }
 0x3e2   : > { %v2570_v36 = vsub.f32 1.0, %v2569_v14  ;;  %v5990_v9 = vpop.eup %5989  ;;  %v2599_v14 = vmul.f32 %v5988_v52, %v8509_v7  ;;  %vm2604_vm1 = vweird.f32 %v5988_v52  ;;  %5993 = vrcp.f32 %v8528_v32  ;;  %vm2590_vm3 = vmor %vm2588_vm5, %vm2589_vm4 }
 0x3e3   : > { %v2556_v46 = vmul.f32 %v5982_v49, %v2555_v39  ;;  %v2585_v51 = vsub.f32 1.0, %v2584_v27  ;;  %v2614_v42 = vmul.f32 %v5990_v9, %v8512_v21  ;;  %v2624_v39 = vand.u32 2147483648, %v8512_v21 }
 0x3e4   : > { %v2571_v62 = vmul.f32 %v5984_v48, %v2570_v36  ;;  %v2600_v36 = vsub.f32 1.0, %v2599_v14  ;;  %v5992_v27 = vpop.eup %5991  ;;  %vm2619_vm2 = vweird.f32 %v5990_v9  ;;  %5995 = vrcp.f32 %v8537_v22 }
 0x3e5   : > { %v2557_v25 = vadd.f32 %v5982_v49, %v2556_v46  ;;  %v2586_v24 = vmul.f32 %v5986_v40, %v2585_v51  ;;  %v2615_v46 = vsub.f32 1.0, %v2614_v42  ;;  %v2629_v42 = vmul.f32 %v5992_v27, %v8516_v26  ;;  %vm2620_vm5 = vmor %vm2618_vm13, %vm2619_vm2 }
 0x3e6   : > { %v2572_v6 = vadd.f32 %v5984_v48, %v2571_v62  ;;  %v2601_v62 = vmul.f32 %v5988_v52, %v2600_v36  ;;  %v2625_v8 = vor.u32 1.1754944e-38, %v2624_v39  ;;  %vm2634_vm8 = vweird.f32 %v5992_v27 }
 0x3e7   : > { %v2561_v43 = vsel %vm2560_vm15, %v5982_v49, %v2557_v25  ;;  %v2587_v45 = vadd.f32 %v5986_v40, %v2586_v24  ;;  %v2616_v25 = vmul.f32 %v5990_v9, %v2615_v46  ;;  %v2630_v17 = vsub.f32 1.0, %v2629_v42 }
 0x3e8   : > { %v8564_v19 = vsel %vm8523_vm6, %v2565_v47, %v2561_v43  ;;  %v2576_v55 = vsel %vm2575_vm9, %v5984_v48, %v2572_v6  ;;  %v2602_v49 = vadd.f32 %v5988_v52, %v2601_v62  ;;  %v2610_v43 = vor.u32 1.1754944e-38, %v2609_v61 }
 0x3e9   : > { %v8568_v51 = vsel %vm8531_vm7, %v2580_v2, %v2576_v55  ;;  %2681 = vst [vmem:[#allocation1] ss:$9 sm:$0xff] %v8564_v19  ;;  %v2591_v1 = vsel %vm2590_vm3, %v5986_v40, %v2587_v45  ;;  %vm8574_vm6 = vcmp.eq.f32.partialorder %v2622_v50, 8.507059e+37  ;;  %vm2605_vm7 = vmor %vm2603_vm12, %vm2604_vm1  ;;  %v2617_v2 = vadd.f32 %v5990_v9, %v2616_v25  ;;  %v5994_v40 = vpop.eup %5993 }
 0x3ea   : > { %2683 = vst [vmem:[#allocation1 + $0x1] ss:$9 sm:$0xff] %v8568_v51  ;;  %v8581_v24 = vsel %vm8541_vm11, %v2595_v54, %v2591_v1  ;;  %v2606_v45 = vsel %vm2605_vm7, %v5988_v52, %v2602_v49  ;;  %v2637_v50 = vand.u32 2147483647, %v8516_v26  ;;  %v2639_v61 = vand.u32 2147483648, %v8516_v26  ;;  %v5996_v39 = vpop.eup %5995 }
 0x3eb   : > { %2685 = vst [vmem:[#allocation1 + $0x2] ss:$9 sm:$0xff] %v8581_v24  ;;  %v8594_v7 = vsel %vm8549_vm14, %v2610_v43, %v2606_v45  ;;  %v2621_v12 = vsel %vm2620_vm5, %v5990_v9, %v2617_v2  ;;  %v2631_v47 = vmul.f32 %v5992_v27, %v2630_v17  ;;  %v2644_v21 = vmul.f32 %v5994_v40, %v8528_v32 }
 0x3ec   : > { %v8598_v52 = vsel %vm8574_vm6, %v2625_v8, %v2621_v12  ;;  %2687 = vst [vmem:[#allocation1 + $0x3] ss:$9 sm:$0xff] %v8594_v7  ;;  %vm2633_vm11 = vweird.f32 %v8516_v26  ;;  %v2640_v54 = vor.u32 1.1754944e-38, %v2639_v61  ;;  %vm2638_vm10 = vcmp.eq.f32.partialorder %v2637_v50, 8.507059e+37 }
 0x3ed   : > { %v2632_v57 = vadd.f32 %v5992_v27, %v2631_v47  ;;  %2689 = vst [vmem:[#allocation1 + $0x4] ss:$9 sm:$0xff] %v8598_v52  ;;  %vm2635_vm12 = vmor %vm2633_vm11, %vm2634_vm8  ;;  %v2645_v14 = vsub.f32 1.0, %v2644_v21  ;;  %v2654_v9 = vand.u32 2147483648, %v8528_v32  ;;  %vm2649_vm13 = vweird.f32 %v5994_v40 }
 0x3ee   : > { %v2652_v46 = vand.u32 2147483647, %v8528_v32  ;;  %v2659_v55 = vmul.f32 %v5996_v39, %v8537_v22  ;;  %vm2648_vm14 = vweird.f32 %v8528_v32  ;;  %v2669_v42 = vand.u32 2147483648, %v8537_v22 }
 0x3ef   : > { %v2636_v41 = vsel %vm2635_vm12, %v5992_v27, %v2632_v57  ;;  %v2646_v36 = vmul.f32 %v5994_v40, %v2645_v14  ;;  %vm2650_vm15 = vmor %vm2648_vm14, %vm2649_vm13  ;;  %v2655_v62 = vor.u32 1.1754944e-38, %v2654_v9  ;;  %vm2664_vm9 = vweird.f32 %v5996_v39 }
 0x3f0   : > { %v8605_v6 = vsel %vm2638_vm10, %v2640_v54, %v2636_v41  ;;  %v2660_v27 = vsub.f32 1.0, %v2659_v55  ;;  %vm2653_vm4 = vcmp.eq.f32.partialorder %v2652_v46, 8.507059e+37  ;;  %v2667_v43 = vand.u32 2147483647, %v8537_v22  ;;  %v2797_v55 = vpop.permute.xlu0 %2796 }
 0x3f1   : > { %2691 = vst [vmem:[#allocation1 + $0x5] ss:$9 sm:$0xff] %v8605_v6  ;;  %v2647_v26 = vadd.f32 %v5994_v40, %v2646_v36  ;;  %v2497_v48 = vrot.slane %v8476_v13, 3  ;;  %v2498_v2 = vrot.slane %v8480_v15, 3  ;;  %vm2663_vm1 = vweird.f32 %v8537_v22 }
 0x3f2   : > { %v2661_v49 = vmul.f32 %v5996_v39, %v2660_v27  ;;  %v2499_v8 = vrot.slane %v8483_v56, 3  ;;  %vm2665_vm3 = vmor %vm2663_vm1, %vm2664_vm9  ;;  %v2670_v17 = vor.u32 1.1754944e-38, %v2669_v42  ;;  %v2500_v45 = vrot.slane %v8485_v58, 3 }
 0x3f3   : > { %v2651_v25 = vsel %vm2650_vm15, %v5994_v40, %v2647_v26  ;;  %vm2668_vm2 = vcmp.eq.f32.partialorder %v2667_v43, 8.507059e+37  ;;  %v2501_v61 = vrot.slane %v8488_v31, 3  ;;  %5997 = vtanh.f32 %v2497_v48  ;;  %v2802_v26 = vpop.permute.xlu1 %2801 }
 0x3f4   : > { %v8612_v1 = vsel %vm2653_vm4, %v2655_v62, %v2651_v25  ;;  %v2662_v32 = vadd.f32 %v5996_v39, %v2661_v49  ;;  %v2502_v13 = vrot.slane %v8492_v30, 3  ;;  %5999 = vtanh.f32 %v2498_v2  ;;  %v8636_v62 = vpop.permute.xlu2 %2791 }
 0x3f5   : > { %2693 = vst [vmem:[#allocation1 + $0x6] ss:$9 sm:$0xff] %v8612_v1  ;;  %v2503_v15 = vrot.slane %v8496_v3, 3  ;;  %6001 = vtanh.f32 %v2499_v8  ;;  %v2504_v56 = vrot.slane %v8499_v44, 3  ;;  %v2734_v43 = vrot.slane %v8564_v19, 2 }
 0x3f6   : > { %v2666_v50 = vsel %vm2665_vm3, %v5996_v39, %v2662_v32  ;;  %6003 = vtanh.f32 %v2500_v45  ;;  %v2735_v48 = vrot.slane %v8568_v51, 2  ;;  %vm10435_vm6 = vcmask 1042434  }
 0x3f7   : > { %v8622_v40 = vsel %vm2668_vm2, %v2670_v17, %v2666_v50  ;;  %6005 = vtanh.f32 %v2501_v61  ;;  %v2736_v61 = vrot.slane %v8581_v24, 2  ;;  %vm10436_vm7 = vcmask 1043459   ;;  %vm10437_vm5 = vmmov %vm10435_vm6 }
 0x3f8   : > { %2695 = vst [vmem:[#allocation1 + $0x7] ss:$9 sm:$0xff] %v8622_v40  ;;  %6007 = vtanh.f32 %v2502_v13  ;;  %v2807_v2 = vpop.permute.xlu0 %2806  ;;  %v2737_v13 = vrot.slane %v8594_v7, 2  ;;  %vm10438_vm8 = vcmask 1044484   ;;  %vm10439_vm11 = vmmov %vm10436_vm7  ;;  %vm10440_vm12 = vcmask 1045509  }
 0x3f9   : > { %v5998_v58 = vpop.eup %5997  ;;  %6009 = vtanh.f32 %v2503_v15  ;;  %v2738_v15 = vrot.slane %v8598_v52, 2  ;;  %vm10441_vm10 = vmmov %vm10438_vm8  ;;  %vm10442_vm13 = vcmask 1046534   ;;  %vm10444_vm15 = vcmask 1047559  }
 0x3fa   : > { %v6000_v22 = vpop.eup %5999  ;;  %6011 = vtanh.f32 %v2504_v56  ;;  %v2699_v31 = vmul.f32 %v5998_v58, %v8564_v19  ;;  %v2739_v58 = vrot.slane %v8605_v6, 2  ;;  %v2741_v19 = vrot.slane %v8622_v40, 2  ;;  %vm10443_vm14 = vmmov %vm10440_vm12 }
 0x3fb   : > { %v6002_v12 = vpop.eup %6001  ;;  %v2700_v30 = vmul.f32 %v6000_v22, %v8568_v51  ;;  %v2812_v50 = vpop.permute.xlu1 %2811  ;;  %v2740_v22 = vrot.slane %v8612_v1, 2  ;;  %vm10445_vm4 = vmmov %vm10442_vm13 }
 0x3fc   : > { %v6004_v21 = vpop.eup %6003  ;;  %v2701_v57 = vmul.f32 %v6002_v12, %v8581_v24  ;;  %vm10446_vm9 = vmmov %vm10444_vm15 }
 0x3fd   : > { %v6006_v3 = vpop.eup %6005  ;;  %v2702_v44 = vmul.f32 %v6004_v21, %v8594_v7  ;;  %vm10494_vm1 = vmmov %vm10436_vm7 }
 0x3fe   : > { %v6008_v54 = vpop.eup %6007  ;;  %v2703_v14 = vmul.f32 %v6006_v3, %v8598_v52  ;;  %vm10495_vm3 = vmmov %vm10438_vm8 }
 0x3ff   : > { %v2696_v47 = vld [vmem:[#allocation1 + $0x9] sm:$0xff]  ;;  %v6010_v41 = vpop.eup %6009  ;;  %v2704_v9 = vmul.f32 %v6008_v54, %v8605_v6  ;;  %vm10496_vm2 = vmmov %vm10440_vm12 }
 0x400   : > { %2715 = vst [vmem:[#allocation1] ss:$9 sm:$0xff] %v2699_v31  ;;  %v6012_v39 = vpop.eup %6011  ;;  %v2705_v36 = vmul.f32 %v6010_v41, %v8612_v1  ;;  %v2698_v27 = vmul.f32 %v2696_v47, %v8201_v37  ;;  %v2817_v31 = vpop.permute.xlu2 %2816 }
 0x401   : > { %2717 = vst [vmem:[#allocation1 + $0x1] ss:$9 sm:$0xff] %v2700_v30  ;;  %v2706_v46 = vmul.f32 %v6012_v39, %v8622_v40 }
 0x402   : > { %2719 = vst [vmem:[#allocation1 + $0x2] ss:$9 sm:$0xff] %v2701_v57 }
 0x403   : > { %2721 = vst [vmem:[#allocation1 + $0x3] ss:$9 sm:$0xff] %v2702_v44 }
 0x404   : > { %2723 = vst [vmem:[#allocation1 + $0x4] ss:$9 sm:$0xff] %v2703_v14 }
 0x405   : > { %2725 = vst [vmem:[#allocation1 + $0x5] ss:$9 sm:$0xff] %v2704_v9 }
 0x406   : > { %2727 = vst [vmem:[#allocation1 + $0x6] ss:$9 sm:$0xff] %v2705_v36 }
 0x407   : > { %2729 = vst [vmem:[#allocation1 + $0x7] ss:$9 sm:$0xff] %v2706_v46 }
 0x40e   : > { %v2730_v25 = vld [vmem:[#allocation1] sm:$0xff] }
 0x40f   : > { %v2732_v42 = vadd.f32 %v2730_v25, %v2698_v27 }
 0x411   : > { %6013 = vtanh.f32 %v2732_v42  ;;  %v2861_v49 = vsub.f32 %v2732_v42, %v8201_v37 }
 0x413   : > { %v2863_v32 = vrot.slane %v2861_v49, 1  ;;  %v2864_v8 = vrot.slane %v2861_v49, 2  ;;  %v2865_v17 = vrot.slane %v2861_v49, 3  ;;  %v2866_v45 = vrot.slane %v2861_v49, 4 }
 0x414   : > { %v2867_v56 = vrot.slane %v2861_v49, 5  ;;  %v2868_v12 = vrot.slane %v2861_v49, 6  ;;  %v2869_v47 = vrot.slane %v2861_v49, 7  ;;  %v2878_v30 = vmul.f32 %v2861_v49, %v8636_v62 }
 0x415   : > { %v2879_v51 = vmul.f32 %v2863_v32, %v2797_v55  ;;  %v2880_v21 = vmul.f32 %v2864_v8, %v2802_v26  ;;  %v2881_v24 = vmul.f32 %v2865_v17, %v2807_v2  ;;  %v2882_v3 = vmul.f32 %v2866_v45, %v2812_v50 }
 0x416   : > { %v2883_v7 = vmul.f32 %v2867_v56, %v2817_v31  ;;  %v10428_v8 = vrot.slane %v8205_v20, 1  ;;  %v10429_v45 = vrot.slane %v8205_v20, 2 }
 0x417   : > { %v6014_v57 = vpop.eup %6013  ;;  %v2894_v44 = vrot.slane %v2879_v51, 7  ;;  %v10430_v51 = vrot.slane %v8205_v20, 3 }
 0x418   : > { %v2751_v52 = vrot.slane %v6014_v57, 1  ;;  %v2752_v54 = vrot.slane %v6014_v57, 2  ;;  %v2753_v14 = vrot.slane %v6014_v57, 3  ;;  %v2754_v6 = vrot.slane %v6014_v57, 4 }
 0x419   : > { %v2755_v41 = vrot.slane %v6014_v57, 5  ;;  %v2756_v1 = vrot.slane %v6014_v57, 6  ;;  %v2757_v9 = vrot.slane %v6014_v57, 7  ;;  %v2765_v40 = vmul.f32 %v6014_v57, %v2734_v43 }
 0x41a   : > { %v2766_v39 = vmul.f32 %v2751_v52, %v2735_v48  ;;  %v2767_v36 = vmul.f32 %v2752_v54, %v2736_v61  ;;  %v2768_v46 = vmul.f32 %v2753_v14, %v2737_v13  ;;  %v2769_v27 = vmul.f32 %v2754_v6, %v2738_v15  ;;  %v2822_v61 = vpop.permute.xlu0 %2821  ;;  %v2827_v54 = vpop.permute.xlu1 %2826 }
 0x41b   : > { %v2770_v25 = vmul.f32 %v2755_v41, %v2739_v58  ;;  %v2771_v42 = vmul.f32 %v2756_v1, %v2740_v22  ;;  %v2772_v49 = vmul.f32 %v2757_v9, %v2741_v19  ;;  %v2781_v32 = vsub.f32 %v2765_v40, %v8205_v20 }
 0x41c   : > { %v2782_v17 = vsub.f32 %v2766_v39, %v10428_v8  ;;  %v2783_v56 = vsub.f32 %v2767_v36, %v10429_v45  ;;  %v2784_v23 = vsub.f32 %v2768_v46, %v10430_v51  ;;  %v10431_v43 = vrot.slane %v8205_v20, 4 }
 0x41d   : > { %v10432_v13 = vrot.slane %v8205_v20, 5  ;;  %v10433_v58 = vrot.slane %v8205_v20, 6  ;;  %v10434_v19 = vrot.slane %v8205_v20, 7  ;;  %v2896_v52 = vrot.slane %v2880_v21, 6 }
 0x41e   : > { %v2785_v48 = vsub.f32 %v2769_v27, %v10431_v43  ;;  %v2830_v14 = vmul.f32 %v2797_v55, %v2782_v17  ;;  %v2831_v6 = vmul.f32 %v2802_v26, %v2783_v56  ;;  %v2832_v41 = vmul.f32 %v2807_v2, %v2784_v23 }
 0x41f   : > { %v2786_v15 = vsub.f32 %v2770_v25, %v10432_v13  ;;  %v2787_v22 = vsub.f32 %v2771_v42, %v10433_v58  ;;  %v2788_v57 = vsub.f32 %v2772_v49, %v10434_v19  ;;  %v2884_v1 = vmul.f32 %v2868_v12, %v2822_v61 }
 0x420   : > { %v2833_v9 = vmul.f32 %v2812_v50, %v2785_v48  ;;  %v2885_v40 = vmul.f32 %v2869_v47, %v2827_v54  ;;  %v2895_v39 = vsel %vm565_vm0, %v2894_v44, %v2878_v30  ;;  %v2898_v36 = vrot.slane %v2881_v24, 5 }
 0x421   : > { %v2829_v46 = vmul.f32 %v8636_v62, %v2781_v32  ;;  %v2834_v27 = vmul.f32 %v2817_v31, %v2786_v15  ;;  %v2845_v25 = vrot.slane %v2830_v14, 7  ;;  %v2847_v8 = vrot.slane %v2831_v6, 6  ;;  %v10459_v14 = vld [vmem:[#allocation32_spill] sm:$0xff]  ;;  %v10460_v6 = vld [vmem:[#allocation33_spill] sm:$0xff] }
 0x422   : > { %v2835_v42 = vmul.f32 %v2822_v61, %v2787_v22  ;;  %v2836_v45 = vmul.f32 %v2827_v54, %v2788_v57  ;;  %v2897_v49 = vsel %vm10435_vm6, %v2896_v52, %v2895_v39  ;;  %v2900_v21 = vrot.slane %v2882_v3, 4  ;;  %v10458_v54 = vld [vmem:[#allocation31_spill] sm:$0xff]  ;;  %v10465_v39 = vld [vmem:[#allocation38_spill] sm:$0xff]  ;;  %vm10497_vm6 = vmmov %vm10437_vm5 }
 0x423   : > { %v2846_v55 = vsel %vm565_vm0, %v2845_v25, %v2829_v46  ;;  %v2849_v26 = vrot.slane %v2832_v41, 5  ;;  %v2899_v23 = vsel %vm10436_vm7, %v2898_v36, %v2897_v49  ;;  %v2902_v2 = vrot.slane %v2883_v7, 3  ;;  %v10461_v41 = vld [vmem:[#allocation34_spill] sm:$0xff]  ;;  %v10466_v36 = vld [vmem:[#allocation39_spill] sm:$0xff]  ;;  %v10467_v46 = vld [vmem:[#allocation40_spill] sm:$0xff] }
 0x424   : > { %v2848_v50 = vsel %vm10437_vm5, %v2847_v8, %v2846_v55  ;;  %v2851_v12 = vrot.slane %v2833_v9, 4  ;;  %v2901_v47 = vsel %vm10438_vm8, %v2900_v21, %v2899_v23  ;;  %v2904_v62 = vrot.slane %v2884_v1, 2  ;;  %v10462_v1 = vld [vmem:[#allocation35_spill] sm:$0xff]  ;;  %v10463_v9 = vld [vmem:[#allocation36_spill] sm:$0xff]  ;;  %v10469_v25 = vld [vmem:[#allocation42_spill] sm:$0xff] }
 0x425   : > { %v2850_v31 = vsel %vm10439_vm11, %v2849_v26, %v2848_v50  ;;  %v2853_v30 = vrot.slane %v2834_v27, 3  ;;  %v2903_v24 = vsel %vm10440_vm12, %v2902_v2, %v2901_v47  ;;  %v2906_v3 = vrot.slane %v2885_v40, 1  ;;  %v10464_v40 = vld [vmem:[#allocation37_spill] sm:$0xff]  ;;  %v10470_v8 = vld [vmem:[#allocation43_spill] sm:$0xff]  ;;  %v10473_v49 = vld [vmem:[#allocation46_spill] sm:$0xff] }
 0x426   : > { %v2852_v44 = vsel %vm10441_vm10, %v2851_v12, %v2850_v31  ;;  %v2855_v32 = vrot.slane %v2835_v42, 2  ;;  %v2905_v17 = vsel %vm10442_vm13, %v2904_v62, %v2903_v24  ;;  %v2857_v56 = vrot.slane %v2836_v45, 1  ;;  %v10468_v27 = vld [vmem:[#allocation41_spill] sm:$0xff]  ;;  %v10471_v42 = vld [vmem:[#allocation44_spill] sm:$0xff]  ;;  %v10474_v21 = vld [vmem:[#allocation47_spill] sm:$0xff] }
 0x427   : > { %v2854_v7 = vsel %vm10443_vm14, %v2853_v30, %v2852_v44  ;;  %v2907_v51 = vsel %vm10444_vm15, %v2906_v3, %v2905_v17  ;;  %v10472_v45 = vld [vmem:[#allocation45_spill] sm:$0xff]  ;;  %v10475_v55 = vld [vmem:[#allocation48_spill] sm:$0xff]  ;;  %v10477_v23 = vld [vmem:[#allocation50_spill] sm:$0xff]  ;;  %vm10502_vm12 = vcmask 1043458   ;;  %vm10503_vm10 = vcmask 1046528  }
 0x428   : > { %v2856_v43 = vsel %vm10445_vm4, %v2855_v32, %v2854_v7  ;;  %v8679_v48 = vadd.f32 %v2907_v51, %v8201_v37  ;;  %v10476_v26 = vld [vmem:[#allocation49_spill] sm:$0xff]  ;;  %v10478_v2 = vld [vmem:[#allocation51_spill] sm:$0xff]  ;;  %v10479_v50 = vld [vmem:[#allocation52_spill] sm:$0xff]  ;;  %vm10504_vm13 = vcmask 1040384  }
 0x429   : > { %v2858_v61 = vsel %vm10446_vm9, %v2857_v56, %v2856_v43  ;;  %v10480_v12 = vld [vmem:[#allocation53_spill] sm:$0xff]  ;;  %v10481_v47 = vld [vmem:[#allocation54_spill] sm:$0xff]  ;;  %v10482_v62 = vld [vmem:[#allocation55_spill] sm:$0xff]  ;;  %vm10508_vm9 = vcmask 1041408  }
 0x42a   : > { %v8683_v13 = vadd.f32 %v2858_v61, %v8205_v20  ;;  %v2934_v15 = vrot.slane %v8679_v48, 1  ;;  %v2935_v58 = vrot.slane %v8679_v48, 2  ;;  %2948 = vst [vmem:[%s6738_s18 + $0x3] sm:$0x1] %v8679_v48  ;;  %v2936_v22 = vrot.slane %v8679_v48, 3  ;;  %v10483_v31 = vld [vmem:[#allocation56_spill] sm:$0xff]  ;;  %vm10498_vm7 = vmmov %vm10437_vm5 }
 0x42b   : > { %v2937_v37 = vrot.slane %v8679_v48, 4  ;;  %v2938_v20 = vrot.slane %v8679_v48, 5  ;;  %v2939_v19 = vrot.slane %v8679_v48, 6  ;;  %v2940_v57 = vrot.slane %v8679_v48, 7  ;;  %v10484_v30 = vld [vmem:[#allocation57_spill] sm:$0xff]  ;;  %v10485_v24 = vld [vmem:[#allocation58_spill] sm:$0xff]  ;;  %vm10500_vm8 = vmmov %vm10445_vm4 }
 0x42c   : > { %2925 = vst [vmem:[%s6736_s17 + $0x3] sm:$0x1] %v8683_v13  ;;  %2988 = vmatmul.f32.vlgmr.msra.gmra.mxu0 %v8683_v13  ;;  %3008 = vmatmul.f32.vlgmr.msra.gmra.mxu1 %v8683_v13  ;;  %v2911_v52 = vrot.slane %v8683_v13, 1  ;;  %v10486_v3 = vld [vmem:[#allocation59_spill] sm:$0xff]  ;;  %v10487_v44 = vld [vmem:[#allocation60_spill] sm:$0xff]  ;;  %v10488_v32 = vld [vmem:[#allocation61_spill] sm:$0xff] }
 0x42d   : > { %2949 = vst [vmem:[%s6738_s18 + $0xb] sm:$0x1] %v2934_v15  ;;  %3028 = vmatmul.f32.vlgmr.msra.gmra.mxu2 %v8683_v13  ;;  %3048 = vmatmul.f32.vlgmr.msra.gmra.mxu3 %v8683_v13  ;;  %v10489_v17 = vld [vmem:[#allocation62_spill] sm:$0xff]  ;;  %v10490_v7 = vld [vmem:[#allocation63_spill] sm:$0xff]  ;;  %v10491_v56 = vld [vmem:[#allocation64_spill] sm:$0xff]  ;;  %vm10499_vm5 = vcmask 1042433  }
 0x42e   : > { %2950 = vst [vmem:[%s6738_s18 + $0x13] sm:$0x1] %v2935_v58  ;;  %4206 = vmatpush.msra.mxu0 %v8223_v59  ;;  %4226 = vmatpush.msra.mxu1 %v8226_v18  ;;  %v2912_v59 = vrot.slane %v8683_v13, 2  ;;  %v2913_v18 = vrot.slane %v8683_v13, 3  ;;  %v10492_v51 = vld [vmem:[#allocation65_spill] sm:$0xff]  ;;  %v10493_v43 = vld [vmem:[#allocation66_spill] sm:$0xff]  ;;  %vm10501_vm11 = vmmov %vm10494_vm1 }
 0x42f   : > { %2951 = vst [vmem:[%s6738_s18 + $0x1b] sm:$0x1] %v2936_v22  ;;  %4246 = vmatpush.msra.mxu2 %v8231_v5  ;;  %4266 = vmatpush.msra.mxu3 %v8234_v38  ;;  %v2914_v5 = vrot.slane %v8683_v13, 4  ;;  %v2915_v38 = vrot.slane %v8683_v13, 5  ;;  %vm10505_vm14 = vmmov %vm10495_vm3  ;;  %vm10507_vm4 = vcmask 1044483  }
 0x430   : > { %2952 = vst [vmem:[%s6738_s18 + $0x23] sm:$0x1] %v2937_v37  ;;  %4207 = vmatpush.msra.mxu0 %v8239_v29  ;;  %4227 = vmatpush.msra.mxu1 %v8242_v11  ;;  %v2916_v29 = vrot.slane %v8683_v13, 6  ;;  %v2917_v11 = vrot.slane %v8683_v13, 7  ;;  %vm10506_vm15 = vmmov %vm10496_vm2 }
 0x431   : > { %2953 = vst [vmem:[%s6738_s18 + $0x2b] sm:$0x1] %v2938_v20  ;;  %4247 = vmatpush.msra.mxu2 %v8247_v63  ;;  %4267 = vmatpush.msra.mxu3 %v8250_v60  ;;  %v10447_v63 = vld [vmem:[#allocation23_spill] sm:$0xff]  ;;  %v10448_v60 = vld [vmem:[#allocation24_spill] sm:$0xff] }
 0x432   : > { %2954 = vst [vmem:[%s6738_s18 + $0x33] sm:$0x1] %v2939_v19  ;;  %4208 = vmatpush.msra.mxu0 %v8255_v28  ;;  %4228 = vmatpush.msra.mxu1 %v8258_v35  ;;  %v10449_v28 = vld [vmem:[#allocation25_spill] sm:$0xff]  ;;  %v10450_v35 = vld [vmem:[#allocation26_spill] sm:$0xff] }
 0x433   : > { %2955 = vst [vmem:[%s6738_s18 + $0x3b] sm:$0x1] %v2940_v57  ;;  %4248 = vmatpush.msra.mxu2 %v8263_v53  ;;  %4268 = vmatpush.msra.mxu3 %v8266_v34  ;;  %v10451_v53 = vld [vmem:[#allocation20_spill] sm:$0xff]  ;;  %v10452_v34 = vld [vmem:[#allocation27_spill] sm:$0xff] }
 0x434   : > { %2926 = vst [vmem:[%s6736_s17 + $0xb] sm:$0x1] %v2911_v52  ;;  %4209 = vmatpush.msra.mxu0 %v8273_v0  ;;  %4229 = vmatpush.msra.mxu1 %v8276_v33  ;;  %v10453_v0 = vld [vmem:[#allocation21_spill] sm:$0xff]  ;;  %v10454_v33 = vld [vmem:[#allocation22_spill] sm:$0xff] }
 0x435   : > { %2927 = vst [vmem:[%s6736_s17 + $0x13] sm:$0x1] %v2912_v59  ;;  %4249 = vmatpush.msra.mxu2 %v8283_v10  ;;  %4269 = vmatpush.msra.mxu3 %v8286_v4  ;;  %v10455_v10 = vld [vmem:[#allocation28_spill] sm:$0xff]  ;;  %v10456_v4 = vld [vmem:[#allocation29_spill] sm:$0xff] }
 0x436   : > { %2928 = vst [vmem:[%s6736_s17 + $0x1b] sm:$0x1] %v2913_v18  ;;  %4210 = vmatpush.msra.mxu0 %v8293_v16  ;;  %4230 = vmatpush.msra.mxu1 %v10447_v63  ;;  %v10457_v16 = vld [vmem:[#allocation30_spill] sm:$0xff] }
 0x437   : > { %2929 = vst [vmem:[%s6736_s17 + $0x23] sm:$0x1] %v2914_v5  ;;  %4250 = vmatpush.msra.mxu2 %v10448_v60  ;;  %4270 = vmatpush.msra.mxu3 %v10449_v28 }
 0x438   : > { %2930 = vst [vmem:[%s6736_s17 + $0x2b] sm:$0x1] %v2915_v38  ;;  %4211 = vmatpush.msra.mxu0 %v10450_v35  ;;  %4231 = vmatpush.msra.mxu1 %v10451_v53 }
 0x439   : > { %2931 = vst [vmem:[%s6736_s17 + $0x33] sm:$0x1] %v2916_v29  ;;  %4251 = vmatpush.msra.mxu2 %v10452_v34  ;;  %4271 = vmatpush.msra.mxu3 %v10453_v0 }
 0x43a   : > { %2932 = vst [vmem:[%s6736_s17 + $0x3b] sm:$0x1] %v2917_v11  ;;  %4212 = vmatpush.msra.mxu0 %v10454_v33  ;;  %4232 = vmatpush.msra.mxu1 %v10455_v10 }
 0x43b   : > { %4252 = vmatpush.msra.mxu2 %v10456_v4  ;;  %4272 = vmatpush.msra.mxu3 %v10457_v16 }
 0x43c   : > { %4213 = vmatpush.msra.mxu0 %v10458_v54  ;;  %4233 = vmatpush.msra.mxu1 %v10459_v14 }
 0x43d   : > { %4253 = vmatpush.msra.mxu2 %v10460_v6  ;;  %4273 = vmatpush.msra.mxu3 %v10461_v41  ;;  %v5675_v41 = vld [vmem:[%s6723_s15 + $0x4] ss:$8 sm:$0xf] }
 0x43e   : > { %4214 = vmatpush.msra.mxu0 %v10462_v1  ;;  %4234 = vmatpush.msra.mxu1 %v10463_v9 }
 0x43f   : > { %4254 = vmatpush.msra.mxu2 %v10464_v40  ;;  %4274 = vmatpush.msra.mxu3 %v10465_v39 }
 0x440   : > { %4215 = vmatpush.msra.mxu0 %v10466_v36  ;;  %4235 = vmatpush.msra.mxu1 %v10467_v46  ;;  %v5676_v36 = vld [vmem:[%s6723_s15 + $0x24] ss:$8 sm:$0xf] }
 0x441   : > { %4255 = vmatpush.msra.mxu2 %v10468_v27  ;;  %4275 = vmatpush.msra.mxu3 %v10469_v25 }
 0x442   : > { %4216 = vmatpush.msra.mxu0 %v10470_v8  ;;  %4236 = vmatpush.msra.mxu1 %v10471_v42  ;;  %v5677_v42 = vld [vmem:[%s6723_s15 + $0x44] ss:$8 sm:$0xf] }
 0x443   : > { %4256 = vmatpush.msra.mxu2 %v10472_v45  ;;  %4276 = vmatpush.msra.mxu3 %v10473_v49 }
 0x444   : > { %4217 = vmatpush.msra.mxu0 %v10474_v21  ;;  %4237 = vmatpush.msra.mxu1 %v10475_v55  ;;  %v5678_v21 = vld [vmem:[%s6723_s15 + $0x64] ss:$8 sm:$0xf] }
 0x445   : > { %4257 = vmatpush.msra.mxu2 %v10476_v26  ;;  %4277 = vmatpush.msra.mxu3 %v10477_v23 }
 0x446   : > { %4218 = vmatpush.msra.mxu0 %v10478_v2  ;;  %4238 = vmatpush.msra.mxu1 %v10479_v50  ;;  %v5679_v2 = vld [vmem:[%s6723_s15 + $0x84] ss:$8 sm:$0xf] }
 0x447   : > { %4258 = vmatpush.msra.mxu2 %v10480_v12  ;;  %4278 = vmatpush.msra.mxu3 %v10481_v47 }
 0x448   : > { %4219 = vmatpush.msra.mxu0 %v10482_v62  ;;  %4239 = vmatpush.msra.mxu1 %v10483_v31  ;;  %v5680_v62 = vld [vmem:[%s6723_s15 + $0xa4] ss:$8 sm:$0xf] }
 0x449   : > { %4259 = vmatpush.msra.mxu2 %v10484_v30  ;;  %4279 = vmatpush.msra.mxu3 %v10485_v24 }
 0x44a   : > { %4220 = vmatpush.msra.mxu0 %v10486_v3  ;;  %4240 = vmatpush.msra.mxu1 %v10487_v44  ;;  %v5681_v3 = vld [vmem:[%s6723_s15 + $0xc4] ss:$8 sm:$0xf] }
 0x44b   : > { %4260 = vmatpush.msra.mxu2 %v10488_v32  ;;  %4280 = vmatpush.msra.mxu3 %v10489_v17 }
 0x44c   : > { %4221 = vmatpush.msra.mxu0 %v10490_v7  ;;  %4241 = vmatpush.msra.mxu1 %v10491_v56  ;;  %v5682_v7 = vld [vmem:[%s6723_s15 + $0xe4] ss:$8 sm:$0xf] }
 0x44d   : > { %4261 = vmatpush.msra.mxu2 %v10492_v51  ;;  %4281 = vmatpush.msra.mxu3 %v10493_v43 }
 0x4a9   : > { %v3009_v61 = vpop.f32.mrf.mxu1  ;;  %v2989_v57 = vpop.f32.mrf.mxu0 }
 0x4aa   : > { %v3056_v22 = vrot.slane %v3009_v61, 7 }
 0x4ac   : > { %v3062_v60 = vsel %vm565_vm0, %v2989_v57, %v3056_v22  ;;  %v3066_v35 = vsel %vm10497_vm6, %v2989_v57, %v3056_v22  ;;  %v3070_v33 = vsel %vm10501_vm11, %v2989_v57, %v3056_v22  ;;  %v3059_v16 = vsel %vm10504_vm13, %v2989_v57, %v3056_v22  ;;  %vm10512_vm6 = vmmov %vm10500_vm8 }
 0x4ad   : > { %v3074_v54 = vsel %vm10505_vm14, %v2989_v57, %v3056_v22  ;;  %v3078_v14 = vsel %vm10506_vm15, %v2989_v57, %v3056_v22  ;;  %v3082_v8 = vsel %vm10512_vm6, %v2989_v57, %v3056_v22 }
 0x4b0   : > { %v3029_v15 = vpop.f32.mrf.mxu2  ;;  %v3049_v58 = vpop.f32.mrf.mxu3 }
 0x4b1   : > { %v3057_v37 = vrot.slane %v3029_v15, 6  ;;  %v3058_v20 = vrot.slane %v3049_v58, 5 }
 0x4b3   : > { %v3063_v19 = vsel %vm10494_vm1, %v3057_v37, %v3058_v20  ;;  %v3067_v63 = vsel %vm10495_vm3, %v3057_v37, %v3058_v20  ;;  %v3071_v28 = vsel %vm10496_vm2, %v3057_v37, %v3058_v20  ;;  %v3060_v53 = vsel %vm10498_vm7, %v3057_v37, %v3058_v20  ;;  %vm10510_vm3 = vmmov %vm10504_vm13 }
 0x4b4   : > { %v3064_v34 = vsel %vm10499_vm5, %v3062_v60, %v3063_v19  ;;  %v3075_v0 = vsel %vm10500_vm8, %v3057_v37, %v3058_v20  ;;  %v3068_v10 = vsel %vm10502_vm12, %v3066_v35, %v3067_v63  ;;  %v3079_v4 = vsel %vm10503_vm10, %v3058_v20, %v3057_v37  ;;  %vm10513_vm7 = vmmov %vm10503_vm10 }
 0x4b5   : > { %v3072_v6 = vsel %vm10507_vm4, %v3070_v33, %v3071_v28  ;;  %v3061_v1 = vsel %vm10508_vm9, %v3059_v16, %v3060_v53  ;;  %v3065_v9 = vrot.slane %v3064_v34, 1  ;;  %vm10509_vm1 = vcmask 1045508  }
 0x4b6   : > { %v3076_v40 = vsel %vm10509_vm1, %v3074_v54, %v3075_v0  ;;  %v3083_v39 = vsel %vm10510_vm3, %v3057_v37, %v3058_v20  ;;  %v3069_v46 = vrot.slane %v3068_v10, 2  ;;  %vm10511_vm2 = vcmask 1046533  }
 0x4b7   : > { %v3080_v27 = vsel %vm10511_vm2, %v3078_v14, %v3079_v4  ;;  %v3087_v25 = vsel %vm565_vm0, %v3057_v37, %v3058_v20  ;;  %v3073_v45 = vrot.slane %v3072_v6, 3  ;;  %v3086_v49 = vsel %vm10513_vm7, %v3056_v22, %v2989_v57 }
 0x4b8   : > { %v3077_v55 = vrot.slane %v3076_v40, 4  ;;  %vm10514_vm5 = vcmask 1045504   ;;  %v8826_v23 = vadd.f32 %v5675_v41, %v3061_v1  ;;  %v3081_v50 = vrot.slane %v3080_v27, 5 }
 0x4b9   : > { %v3084_v26 = vsel %vm10514_vm5, %v3083_v39, %v3082_v8  ;;  %vm10515_vm8 = vcmask 1046529   ;;  %v8830_v47 = vadd.f32 %v5676_v36, %v3065_v9  ;;  %v8833_v31 = vadd.f32 %v5677_v42, %v3069_v46 }
 0x4ba   : > { %v3088_v12 = vsel %vm10515_vm8, %v3087_v25, %v3086_v49  ;;  %v3085_v30 = vrot.slane %v3084_v26, 6  ;;  %v8835_v24 = vadd.f32 %v5678_v21, %v3073_v45  ;;  %v8838_v32 = vadd.f32 %v5679_v2, %v3077_v55 }
 0x4bb   : > { %v3089_v44 = vrot.slane %v3088_v12, 7  ;;  %v5683_v17 = vmul.f32 -1.442695, %v8826_v23  ;;  %v8842_v56 = vadd.f32 %v5680_v62, %v3081_v50  ;;  %v5684_v51 = vmul.f32 -1.442695, %v8830_v47 }
 0x4bc   : > { %v5685_v43 = vmul.f32 -1.442695, %v8833_v31  ;;  %v8846_v61 = vadd.f32 %v5681_v3, %v3085_v30  ;;  %v5686_v15 = vmul.f32 -1.442695, %v8835_v24  ;;  %v5687_v22 = vmul.f32 -1.442695, %v8838_v32 }
 0x4bd   : > { %v8849_v58 = vadd.f32 %v5682_v7, %v3089_v44  ;;  %6015 = vpow2.f32 %v5683_v17  ;;  %v5688_v37 = vmul.f32 -1.442695, %v8842_v56 }
 0x4be   : > { %6017 = vpow2.f32 %v5684_v51  ;;  %v5689_v20 = vmul.f32 -1.442695, %v8846_v61 }
 0x4bf   : > { %6019 = vpow2.f32 %v5685_v43  ;;  %v5690_v19 = vmul.f32 -1.442695, %v8849_v58 }
 0x4c0   : > { %6021 = vpow2.f32 %v5686_v15 }
 0x4c1   : > { %6023 = vpow2.f32 %v5687_v22 }
 0x4c2   : > { %6025 = vpow2.f32 %v5688_v37 }
 0x4c3   : > { %v6016_v57 = vpop.eup %6015  ;;  %6027 = vpow2.f32 %v5689_v20 }
 0x4c4   : > { %v6018_v63 = vpop.eup %6017  ;;  %v3162_v60 = vadd.f32 1.0, %v6016_v57  ;;  %6029 = vpow2.f32 %v5690_v19 }
 0x4c5   : > { %v6020_v28 = vpop.eup %6019  ;;  %v8855_v35 = vadd.f32 1.0, %v6018_v63 }
 0x4c6   : > { %v6022_v53 = vpop.eup %6021  ;;  %v8857_v34 = vadd.f32 1.0, %v6020_v28  ;;  %6031 = vrcp.f32 %v3162_v60  ;;  %v3179_v16 = vand.u32 2147483647, %v3162_v60  ;;  %v3181_v54 = vand.u32 2147483648, %v3162_v60 }
 0x4c7   : > { %v6024_v0 = vpop.eup %6023  ;;  %v8859_v33 = vadd.f32 1.0, %v6022_v53  ;;  %6033 = vrcp.f32 %v8855_v35  ;;  %v3194_v6 = vand.u32 2147483647, %v8855_v35  ;;  %v3196_v9 = vand.u32 2147483648, %v8855_v35 }
 0x4c8   : > { %v6026_v10 = vpop.eup %6025  ;;  %v8862_v4 = vadd.f32 1.0, %v6024_v0  ;;  %6035 = vrcp.f32 %v8857_v34  ;;  %vm3175_vm11 = vweird.f32 %v3162_v60  ;;  %vm3190_vm12 = vweird.f32 %v8855_v35 }
 0x4c9   : > { %v6028_v14 = vpop.eup %6027  ;;  %v8866_v1 = vadd.f32 1.0, %v6026_v10  ;;  %6037 = vrcp.f32 %v8859_v33  ;;  %v3209_v39 = vand.u32 2147483647, %v8857_v34  ;;  %vm8873_vm10 = vcmp.eq.f32.partialorder %v3179_v16, 8.507059e+37 }
 0x4ca   : > { %v6030_v41 = vpop.eup %6029  ;;  %6039 = vrcp.f32 %v8862_v4  ;;  %v3182_v25 = vor.u32 1.1754944e-38, %v3181_v54  ;;  %v3211_v8 = vand.u32 2147483648, %v8857_v34  ;;  %v8878_v42 = vadd.f32 1.0, %v6028_v14 }
 0x4cb   : > { %vm8881_vm13 = vcmp.eq.f32.partialorder %v3194_v6, 8.507059e+37  ;;  %vm3205_vm14 = vweird.f32 %v8857_v34  ;;  %v3224_v21 = vand.u32 2147483647, %v8859_v33  ;;  %v8887_v26 = vadd.f32 1.0, %v6030_v41 }
 0x4cc   : > { %v6032_v40 = vpop.eup %6031  ;;  %v3197_v50 = vor.u32 1.1754944e-38, %v3196_v9  ;;  %6041 = vrcp.f32 %v8866_v1  ;;  %vm8891_vm4 = vcmp.eq.f32.partialorder %v3209_v39, 8.507059e+37  ;;  %vm3220_vm9 = vweird.f32 %v8859_v33 }
 0x4cd   : > { %v6034_v36 = vpop.eup %6033  ;;  %v3171_v46 = vmul.f32 %v6032_v40, %v3162_v60  ;;  %vm3176_vm15 = vweird.f32 %v6032_v40  ;;  %v3226_v3 = vand.u32 2147483648, %v8859_v33  ;;  %v3212_v7 = vor.u32 1.1754944e-38, %v3211_v8 }
 0x4ce   : > { %v3186_v45 = vmul.f32 %v6034_v36, %v8855_v35  ;;  %v6036_v55 = vpop.eup %6035  ;;  %vm3191_vm1 = vweird.f32 %v6034_v36  ;;  %vm3235_vm3 = vweird.f32 %v8862_v4  ;;  %vm8899_vm2 = vcmp.eq.f32.partialorder %v3224_v21, 8.507059e+37  ;;  %vm3177_vm6 = vmor %vm3175_vm11, %vm3176_vm15 }
 0x4cf   : > { %v3172_v2 = vsub.f32 1.0, %v3171_v46  ;;  %v3201_v62 = vmul.f32 %v6036_v55, %v8857_v34  ;;  %v6038_v44 = vpop.eup %6037  ;;  %v3239_v57 = vand.u32 2147483647, %v8862_v4  ;;  %v3241_v63 = vand.u32 2147483648, %v8862_v4  ;;  %vm3192_vm5 = vmor %vm3190_vm12, %vm3191_vm1 }
 0x4d0   : > { %v3187_v12 = vsub.f32 1.0, %v3186_v45  ;;  %v6040_v51 = vpop.eup %6039  ;;  %v3216_v22 = vmul.f32 %v6038_v44, %v8859_v33  ;;  %vm3206_vm7 = vweird.f32 %v6036_v55  ;;  %vm3221_vm8 = vweird.f32 %v6038_v44 }
 0x4d1   : > { %v3173_v17 = vmul.f32 %v6032_v40, %v3172_v2  ;;  %v3202_v15 = vsub.f32 1.0, %v3201_v62  ;;  %v3231_v19 = vmul.f32 %v6040_v51, %v8862_v4  ;;  %6043 = vrcp.f32 %v8878_v42  ;;  %vm3207_vm11 = vmor %vm3205_vm14, %vm3206_vm7 }
 0x4d2   : > { %v3188_v43 = vmul.f32 %v6034_v36, %v3187_v12  ;;  %v3217_v0 = vsub.f32 1.0, %v3216_v22  ;;  %v6042_v10 = vpop.eup %6041  ;;  %vm3236_vm12 = vweird.f32 %v6040_v51  ;;  %v3227_v27 = vor.u32 1.1754944e-38, %v3226_v3 }
 0x4d3   : > { %v3174_v20 = vadd.f32 %v6032_v40, %v3173_v17  ;;  %v3203_v53 = vmul.f32 %v6036_v55, %v3202_v15  ;;  %v3232_v54 = vsub.f32 1.0, %v3231_v19  ;;  %v3242_v8 = vor.u32 1.1754944e-38, %v3241_v63  ;;  %vm3237_vm14 = vmor %vm3235_vm3, %vm3236_vm12 }
 0x4d4   : > { %v3189_v28 = vadd.f32 %v6034_v36, %v3188_v43  ;;  %v3218_v41 = vmul.f32 %v6038_v44, %v3217_v0  ;;  %v3254_v21 = vand.u32 2147483647, %v8866_v1  ;;  %6045 = vrcp.f32 %v8887_v26 }
 0x4d5   : > { %v3178_v16 = vsel %vm3177_vm6, %v6032_v40, %v3174_v20  ;;  %v3204_v6 = vadd.f32 %v6036_v55, %v3203_v53  ;;  %v3233_v35 = vmul.f32 %v6040_v51, %v3232_v54  ;;  %v3246_v40 = vmul.f32 %v6042_v10, %v8866_v1 }
 0x4d6   : > { %v8914_v14 = vsel %vm8873_vm10, %v3182_v25, %v3178_v16  ;;  %v3193_v60 = vsel %vm3192_vm5, %v6034_v36, %v3189_v28  ;;  %v3219_v46 = vadd.f32 %v6038_v44, %v3218_v41  ;;  %vm8924_vm10 = vcmp.eq.f32.partialorder %v3239_v57, 8.507059e+37 }
 0x4d7   : > { %v8918_v9 = vsel %vm8881_vm13, %v3197_v50, %v3193_v60  ;;  %3298 = vst [vmem:[#allocation1] ss:$9 sm:$0xff] %v8914_v14  ;;  %v3208_v39 = vsel %vm3207_vm11, %v6036_v55, %v3204_v6  ;;  %vm3222_vm13 = vmor %vm3220_vm9, %vm3221_vm8  ;;  %v3234_v34 = vadd.f32 %v6040_v51, %v3233_v35  ;;  %v3247_v45 = vsub.f32 1.0, %v3246_v40  ;;  %v6044_v2 = vpop.eup %6043 }
 0x4d8   : > { %3300 = vst [vmem:[#allocation1 + $0x1] ss:$9 sm:$0xff] %v8918_v9  ;;  %v8931_v25 = vsel %vm8891_vm4, %v3212_v7, %v3208_v39  ;;  %v3223_v49 = vsel %vm3222_vm13, %v6038_v44, %v3219_v46  ;;  %v3256_v55 = vand.u32 2147483648, %v8866_v1  ;;  %vm3251_vm15 = vweird.f32 %v6042_v10 }
 0x4d9   : > { %3302 = vst [vmem:[#allocation1 + $0x2] ss:$9 sm:$0xff] %v8931_v25  ;;  %v8944_v33 = vsel %vm8899_vm2, %v3227_v27, %v3223_v49  ;;  %v3238_v50 = vsel %vm3237_vm14, %v6040_v51, %v3234_v34  ;;  %v3248_v12 = vmul.f32 %v6042_v10, %v3247_v45  ;;  %v3261_v62 = vmul.f32 %v6044_v2, %v8878_v42 }
 0x4da   : > { %v8948_v4 = vsel %vm8924_vm10, %v3242_v8, %v3238_v50  ;;  %3304 = vst [vmem:[#allocation1 + $0x3] ss:$9 sm:$0xff] %v8944_v33  ;;  %vm3250_vm4 = vweird.f32 %v8866_v1  ;;  %v3257_v3 = vor.u32 1.1754944e-38, %v3256_v55  ;;  %vm3255_vm1 = vcmp.eq.f32.partialorder %v3254_v21, 8.507059e+37  ;;  %v6046_v51 = vpop.eup %6045  ;;  %v3414_v50 = vpop.permute.xlu2 %3413 }
 0x4db   : > { %v3249_v30 = vadd.f32 %v6042_v10, %v3248_v12  ;;  %3306 = vst [vmem:[#allocation1 + $0x4] ss:$9 sm:$0xff] %v8948_v4  ;;  %vm3252_vm9 = vmor %vm3250_vm4, %vm3251_vm15  ;;  %v3262_v44 = vsub.f32 1.0, %v3261_v62  ;;  %v3271_v7 = vand.u32 2147483648, %v8878_v42  ;;  %vm3266_vm3 = vweird.f32 %v6044_v2  ;;  %v3419_v12 = vpop.permute.xlu0 %3418  ;;  %v8986_v62 = vpop.permute.xlu1 %3408 }
 0x4dc   : > { %v3269_v22 = vand.u32 2147483647, %v8878_v42  ;;  %v3276_v37 = vmul.f32 %v6046_v51, %v8887_v26  ;;  %vm3265_vm2 = vweird.f32 %v8878_v42  ;;  %v3286_v63 = vand.u32 2147483648, %v8887_v26 }
 0x4dd   : > { %v3253_v17 = vsel %vm3252_vm9, %v6042_v10, %v3249_v30  ;;  %v3263_v15 = vmul.f32 %v6044_v2, %v3262_v44  ;;  %vm3267_vm6 = vmor %vm3265_vm2, %vm3266_vm3  ;;  %v3272_v20 = vor.u32 1.1754944e-38, %v3271_v7  ;;  %vm3281_vm5 = vweird.f32 %v6046_v51 }
 0x4de   : > { %v8955_v43 = vsel %vm3255_vm1, %v3257_v3, %v3253_v17  ;;  %v3277_v19 = vsub.f32 1.0, %v3276_v37  ;;  %vm3270_vm7 = vcmp.eq.f32.partialorder %v3269_v22, 8.507059e+37  ;;  %v3284_v0 = vand.u32 2147483647, %v8887_v26 }
 0x4df   : > { %3308 = vst [vmem:[#allocation1 + $0x5] ss:$9 sm:$0xff] %v8955_v43  ;;  %v3264_v1 = vadd.f32 %v6044_v2, %v3263_v15  ;;  %v3114_v10 = vrot.slane %v8826_v23, 3  ;;  %v3115_v16 = vrot.slane %v8830_v47, 3  ;;  %vm3280_vm8 = vweird.f32 %v8887_v26 }
 0x4e0   : > { %v3278_v53 = vmul.f32 %v6046_v51, %v3277_v19  ;;  %v3116_v54 = vrot.slane %v8833_v31, 3  ;;  %vm3282_vm11 = vmor %vm3280_vm8, %vm3281_vm5  ;;  %v3287_v60 = vor.u32 1.1754944e-38, %v3286_v63  ;;  %v3117_v6 = vrot.slane %v8835_v24, 3 }
 0x4e1   : > { %v3268_v57 = vsel %vm3267_vm6, %v6044_v2, %v3264_v1  ;;  %vm3285_vm12 = vcmp.eq.f32.partialorder %v3284_v0, 8.507059e+37  ;;  %v3118_v35 = vrot.slane %v8838_v32, 3  ;;  %6047 = vtanh.f32 %v3114_v10 }
 0x4e2   : > { %v8962_v28 = vsel %vm3270_vm7, %v3272_v20, %v3268_v57  ;;  %v3279_v42 = vadd.f32 %v6046_v51, %v3278_v53  ;;  %v3119_v23 = vrot.slane %v8842_v56, 3  ;;  %6049 = vtanh.f32 %v3115_v16  ;;  %v3424_v15 = vpop.permute.xlu2 %3423 }
 0x4e3   : > { %3310 = vst [vmem:[#allocation1 + $0x6] ss:$9 sm:$0xff] %v8962_v28  ;;  %v3120_v47 = vrot.slane %v8846_v61, 3  ;;  %6051 = vtanh.f32 %v3116_v54  ;;  %v3121_v31 = vrot.slane %v8849_v58, 3  ;;  %v3351_v7 = vrot.slane %v8914_v14, 2  ;;  %v3429_v19 = vpop.permute.xlu0 %3428 }
 0x4e4   : > { %v3283_v41 = vsel %vm3282_vm11, %v6046_v51, %v3279_v42  ;;  %6053 = vtanh.f32 %v3117_v6  ;;  %v3352_v51 = vrot.slane %v8918_v9, 2  ;;  %v3353_v57 = vrot.slane %v8931_v25, 2  ;;  %v3434_v42 = vpop.permute.xlu1 %3433 }
 0x4e5   : > { %v8972_v40 = vsel %vm3285_vm12, %v3287_v60, %v3283_v41  ;;  %6055 = vtanh.f32 %v3118_v35  ;;  %v3354_v63 = vrot.slane %v8944_v33, 2  ;;  %v3355_v53 = vrot.slane %v8948_v4, 2 }
 0x4e6   : > { %3312 = vst [vmem:[#allocation1 + $0x7] ss:$9 sm:$0xff] %v8972_v40  ;;  %6057 = vtanh.f32 %v3119_v23  ;;  %v3356_v10 = vrot.slane %v8955_v43, 2  ;;  %v3357_v16 = vrot.slane %v8962_v28, 2  ;;  %vm10526_vm10 = vcmask 1042434  }
 0x4e7   : > { %v6048_v24 = vpop.eup %6047  ;;  %6059 = vtanh.f32 %v3120_v47  ;;  %vm10527_vm13 = vcmask 1043459   ;;  %vm10528_vm14 = vmmov %vm10526_vm10  ;;  %vm10529_vm15 = vcmask 1044484   ;;  %vm10531_vm9 = vcmask 1045509  }
 0x4e8   : > { %v6050_v26 = vpop.eup %6049  ;;  %6061 = vtanh.f32 %v3121_v31  ;;  %v3316_v32 = vmul.f32 %v6048_v24, %v8914_v14  ;;  %v3358_v14 = vrot.slane %v8972_v40, 2  ;;  %vm10530_vm4 = vmmov %vm10527_vm13  ;;  %vm10533_vm3 = vcmask 1046534  }
 0x4e9   : > { %v6052_v39 = vpop.eup %6051  ;;  %v3317_v56 = vmul.f32 %v6050_v26, %v8918_v9  ;;  %vm10532_vm1 = vmmov %vm10529_vm15  ;;  %vm10535_vm6 = vcmask 1047559  }
 0x4ea   : > { %v6054_v27 = vpop.eup %6053  ;;  %v3318_v36 = vmul.f32 %v6052_v39, %v8931_v25  ;;  %vm10534_vm2 = vmmov %vm10531_vm9 }
 0x4eb   : > { %v6056_v61 = vpop.eup %6055  ;;  %v3319_v58 = vmul.f32 %v6054_v27, %v8944_v33  ;;  %vm10536_vm7 = vmmov %vm10533_vm3 }
 0x4ec   : > { %v6058_v34 = vpop.eup %6057  ;;  %v3320_v8 = vmul.f32 %v6056_v61, %v8948_v4  ;;  %vm10537_vm5 = vmmov %vm10535_vm6 }
 0x4ed   : > { %v3313_v46 = vld [vmem:[#allocation1 + $0x9] sm:$0xff]  ;;  %v6060_v45 = vpop.eup %6059  ;;  %v3321_v49 = vmul.f32 %v6058_v34, %v8955_v43  ;;  %vm10538_vm8 = vmmov %vm10530_vm4 }
 0x4ee   : > { %3332 = vst [vmem:[#allocation1] ss:$9 sm:$0xff] %v3316_v32  ;;  %v6062_v21 = vpop.eup %6061  ;;  %v3322_v55 = vmul.f32 %v6060_v45, %v8962_v28  ;;  %v3315_v30 = vmul.f32 %v3313_v46, %v8679_v48  ;;  %vm10539_vm11 = vmmov %vm10532_vm1 }
 0x4ef   : > { %3334 = vst [vmem:[#allocation1 + $0x1] ss:$9 sm:$0xff] %v3317_v56  ;;  %v3323_v2 = vmul.f32 %v6062_v21, %v8972_v40  ;;  %vm10540_vm12 = vmmov %vm10534_vm2 }
 0x4f0   : > { %3336 = vst [vmem:[#allocation1 + $0x2] ss:$9 sm:$0xff] %v3318_v36 }
 0x4f1   : > { %3338 = vst [vmem:[#allocation1 + $0x3] ss:$9 sm:$0xff] %v3319_v58 }
 0x4f2   : > { %3340 = vst [vmem:[#allocation1 + $0x4] ss:$9 sm:$0xff] %v3320_v8 }
 0x4f3   : > { %3342 = vst [vmem:[#allocation1 + $0x5] ss:$9 sm:$0xff] %v3321_v49 }
 0x4f4   : > { %3344 = vst [vmem:[#allocation1 + $0x6] ss:$9 sm:$0xff] %v3322_v55  ;;  %v3439_v55 = vpop.permute.xlu2 %3438 }
 0x4f5   : > { %3346 = vst [vmem:[#allocation1 + $0x7] ss:$9 sm:$0xff] %v3323_v2 }
 0x4fc   : > { %v3347_v3 = vld [vmem:[#allocation1] sm:$0xff] }
 0x4fd   : > { %v3349_v44 = vadd.f32 %v3347_v3, %v3315_v30 }
 0x4ff   : > { %6063 = vtanh.f32 %v3349_v44  ;;  %v3478_v17 = vsub.f32 %v3349_v44, %v8679_v48  ;;  %v3444_v44 = vpop.permute.xlu0 %3443 }
 0x501   : > { %v3480_v22 = vrot.slane %v3478_v17, 1  ;;  %v3481_v37 = vrot.slane %v3478_v17, 2  ;;  %v3482_v1 = vrot.slane %v3478_v17, 3  ;;  %v3483_v20 = vrot.slane %v3478_v17, 4 }
 0x502   : > { %v3484_v0 = vrot.slane %v3478_v17, 5  ;;  %v3485_v54 = vrot.slane %v3478_v17, 6  ;;  %v3486_v60 = vrot.slane %v3478_v17, 7  ;;  %v3495_v6 = vmul.f32 %v3478_v17, %v8986_v62 }
 0x503   : > { %v3496_v9 = vmul.f32 %v3480_v22, %v3414_v50  ;;  %v3497_v41 = vmul.f32 %v3481_v37, %v3419_v12  ;;  %v3498_v25 = vmul.f32 %v3482_v1, %v3424_v15  ;;  %v3499_v23 = vmul.f32 %v3483_v20, %v3429_v19 }
 0x504   : > { %v3500_v33 = vmul.f32 %v3484_v0, %v3434_v42  ;;  %v3502_v22 = vmul.f32 %v3486_v60, %v3444_v44 }
 0x505   : > { %v6064_v35 = vpop.eup %6063  ;;  %v3511_v47 = vrot.slane %v3496_v9, 7  ;;  %v3515_v37 = vrot.slane %v3498_v25, 5 }
 0x506   : > { %v3368_v4 = vrot.slane %v6064_v35, 1  ;;  %v3369_v31 = vrot.slane %v6064_v35, 2  ;;  %v3370_v24 = vrot.slane %v6064_v35, 3  ;;  %v3371_v43 = vrot.slane %v6064_v35, 4 }
 0x507   : > { %v3372_v26 = vrot.slane %v6064_v35, 5  ;;  %v3373_v28 = vrot.slane %v6064_v35, 6  ;;  %v3374_v32 = vrot.slane %v6064_v35, 7  ;;  %v3382_v40 = vmul.f32 %v6064_v35, %v3351_v7 }
 0x508   : > { %v3383_v39 = vmul.f32 %v3368_v4, %v3352_v51  ;;  %v3384_v46 = vmul.f32 %v3369_v31, %v3353_v57  ;;  %v3385_v56 = vmul.f32 %v3370_v24, %v3354_v63  ;;  %v3386_v27 = vmul.f32 %v3371_v43, %v3355_v53 }
 0x509   : > { %v3387_v36 = vmul.f32 %v3372_v26, %v3356_v10  ;;  %v3388_v61 = vmul.f32 %v3373_v28, %v3357_v16  ;;  %v3389_v58 = vmul.f32 %v3374_v32, %v3358_v14  ;;  %v3398_v34 = vsub.f32 %v3382_v40, %v8683_v13  ;;  %v6344_v32 = vld [vmem:[#allocation8 + $0x1e0] sm:$0xff]  ;;  %v6345_v40 = vld [vmem:[#allocation8 + $0x1e8] sm:$0xff] }
 0x50a   : > { %v3399_v8 = vsub.f32 %v3383_v39, %v2911_v52  ;;  %v3400_v45 = vsub.f32 %v3384_v46, %v2912_v59  ;;  %v3401_v49 = vsub.f32 %v3385_v56, %v2913_v18  ;;  %v3402_v21 = vsub.f32 %v3386_v27, %v2914_v5  ;;  %v6346_v46 = vld [vmem:[#allocation8 + $0x1f0] sm:$0xff]  ;;  %v6347_v56 = vld [vmem:[#allocation8 + $0x1f8] sm:$0xff] }
 0x50b   : > { %v3403_v2 = vsub.f32 %v3387_v36, %v2915_v38  ;;  %v3404_v30 = vsub.f32 %v3388_v61, %v2916_v29  ;;  %v3405_v3 = vsub.f32 %v3389_v58, %v2917_v11  ;;  %v3513_v52 = vrot.slane %v3497_v41, 6  ;;  %v6348_v36 = vld [vmem:[#allocation8 + $0x1c0] sm:$0xff]  ;;  %v6349_v61 = vld [vmem:[#allocation8 + $0x1c8] sm:$0xff] }
 0x50c   : > { %v3447_v17 = vmul.f32 %v3414_v50, %v3399_v8  ;;  %v3448_v59 = vmul.f32 %v3419_v12, %v3400_v45  ;;  %v3449_v7 = vmul.f32 %v3424_v15, %v3401_v49  ;;  %v3501_v51 = vmul.f32 %v3485_v54, %v3439_v55  ;;  %v6351_v8 = vld [vmem:[#allocation8 + $0x1d8] sm:$0xff]  ;;  %v6352_v49 = vld [vmem:[#allocation8 + $0x1a0] sm:$0xff] }
 0x50d   : > { %v3450_v18 = vmul.f32 %v3429_v19, %v3402_v21  ;;  %v3512_v5 = vsel %vm565_vm0, %v3511_v47, %v3495_v6  ;;  %v3446_v1 = vmul.f32 %v8986_v62, %v3398_v34  ;;  %v3451_v38 = vmul.f32 %v3434_v42, %v3403_v2  ;;  %v6350_v34 = vld [vmem:[#allocation8 + $0x1d0] sm:$0xff]  ;;  %v6353_v21 = vld [vmem:[#allocation8 + $0x1a8] sm:$0xff] }
 0x50e   : > { %v3462_v20 = vrot.slane %v3447_v17, 7  ;;  %v3464_v57 = vrot.slane %v3448_v59, 6  ;;  %v3452_v29 = vmul.f32 %v3439_v55, %v3404_v30  ;;  %v3453_v63 = vmul.f32 %v3444_v44, %v3405_v3  ;;  %v6354_v2 = vld [vmem:[#allocation8 + $0x1b0] sm:$0xff]  ;;  %v6355_v30 = vld [vmem:[#allocation8 + $0x1b8] sm:$0xff]  ;;  %v6357_v44 = vld [vmem:[#allocation8 + $0x188] sm:$0xff] }
 0x50f   : > { %v3514_v11 = vsel %vm10526_vm10, %v3513_v52, %v3512_v5  ;;  %v3517_v53 = vrot.slane %v3499_v23, 4  ;;  %v3466_v12 = vrot.slane %v3449_v7, 5  ;;  %v3519_v19 = vrot.slane %v3500_v33, 3  ;;  %v6356_v52 = vld [vmem:[#allocation8 + $0x180] sm:$0xff]  ;;  %v6358_v59 = vld [vmem:[#allocation8 + $0x190] sm:$0xff]  ;;  %v6359_v7 = vld [vmem:[#allocation8 + $0x198] sm:$0xff] }
 0x510   : > { %v3463_v50 = vsel %vm565_vm0, %v3462_v20, %v3446_v1  ;;  %v3516_v15 = vsel %vm10527_vm13, %v3515_v37, %v3514_v11  ;;  %v3468_v10 = vrot.slane %v3450_v18, 4  ;;  %v3521_v62 = vrot.slane %v3501_v51, 2  ;;  %v6360_v18 = vld [vmem:[#allocation8 + $0x160] sm:$0xff]  ;;  %v6362_v5 = vld [vmem:[#allocation8 + $0x170] sm:$0xff]  ;;  %v6363_v37 = vld [vmem:[#allocation8 + $0x178] sm:$0xff] }
 0x511   : > { %v3465_v0 = vsel %vm10528_vm14, %v3464_v57, %v3463_v50  ;;  %v3518_v16 = vsel %vm10529_vm15, %v3517_v53, %v3516_v15  ;;  %v3470_v9 = vrot.slane %v3451_v38, 3  ;;  %v3523_v54 = vrot.slane %v3502_v22, 1  ;;  %v6361_v22 = vld [vmem:[#allocation8 + $0x168] sm:$0xff]  ;;  %v6364_v1 = vld [vmem:[#allocation8 + $0x140] sm:$0xff]  ;;  %v6366_v20 = vld [vmem:[#allocation8 + $0x150] sm:$0xff] }
 0x512   : > { %v3467_v14 = vsel %vm10530_vm4, %v3466_v12, %v3465_v0  ;;  %v3520_v42 = vsel %vm10531_vm9, %v3519_v19, %v3518_v16  ;;  %v3472_v6 = vrot.slane %v3452_v29, 2  ;;  %v3474_v25 = vrot.slane %v3453_v63, 1  ;;  %v6365_v38 = vld [vmem:[#allocation8 + $0x148] sm:$0xff]  ;;  %v6367_v57 = vld [vmem:[#allocation8 + $0x158] sm:$0xff]  ;;  %v6368_v29 = vld [vmem:[#allocation8 + $0x120] sm:$0xff] }
 0x513   : > { %v3469_v60 = vsel %vm10532_vm1, %v3468_v10, %v3467_v14  ;;  %v3522_v41 = vsel %vm10533_vm3, %v3521_v62, %v3520_v42  ;;  %v6369_v63 = vld [vmem:[#allocation8 + $0x128] sm:$0xff]  ;;  %v6370_v11 = vld [vmem:[#allocation8 + $0x130] sm:$0xff]  ;;  %v6371_v53 = vld [vmem:[#allocation8 + $0x138] sm:$0xff]  ;;  %vm10542_vm14 = vcmask 1042433   ;;  %vm10544_vm9 = vcmask 1043458  }
 0x514   : > { %v3471_v35 = vsel %vm10534_vm2, %v3470_v9, %v3469_v60  ;;  %v3524_v23 = vsel %vm10535_vm6, %v3523_v54, %v3522_v41  ;;  %v6372_v50 = vld [vmem:[#allocation8 + $0x100] sm:$0xff]  ;;  %v6373_v12 = vld [vmem:[#allocation8 + $0x108] sm:$0xff]  ;;  %v6374_v15 = vld [vmem:[#allocation8 + $0x110] sm:$0xff]  ;;  %vm10545_vm1 = vcmask 1046528  }
 0x515   : > { %v3473_v33 = vsel %vm10536_vm7, %v3472_v6, %v3471_v35  ;;  %v9029_v47 = vadd.f32 %v3524_v23, %v8679_v48  ;;  %v6375_v19 = vld [vmem:[#allocation8 + $0x118] sm:$0xff]  ;;  %v6376_v0 = vld [vmem:[#allocation8 + $0xe0] sm:$0xff]  ;;  %v6377_v10 = vld [vmem:[#allocation8 + $0xe8] sm:$0xff]  ;;  %vm10549_vm7 = vcmask 1044483  }
 0x516   : > { %v3475_v4 = vsel %vm10537_vm5, %v3474_v25, %v3473_v33  ;;  %v6378_v16 = vld [vmem:[#allocation8 + $0xf0] sm:$0xff]  ;;  %v6379_v62 = vld [vmem:[#allocation8 + $0xf8] sm:$0xff]  ;;  %v6380_v14 = vld [vmem:[#allocation8 + $0xc0] sm:$0xff]  ;;  %vm10550_vm5 = vcmask 1041408  }
 0x517   : > { %v9033_v31 = vadd.f32 %v3475_v4, %v8683_v13  ;;  %v3551_v24 = vrot.slane %v9029_v47, 1  ;;  %v3552_v43 = vrot.slane %v9029_v47, 2  ;;  %3565 = vst [vmem:[%s6738_s18 + $0x4] sm:$0x1] %v9029_v47  ;;  %v3553_v26 = vrot.slane %v9029_v47, 3  ;;  %v6381_v9 = vld [vmem:[#allocation8 + $0xc8] sm:$0xff]  ;;  %vm10541_vm13 = vmmov %vm10526_vm10 }
 0x518   : > { %v3554_v48 = vrot.slane %v9029_v47, 4  ;;  %v3555_v13 = vrot.slane %v9029_v47, 5  ;;  %v3556_v28 = vrot.slane %v9029_v47, 6  ;;  %v3557_v39 = vrot.slane %v9029_v47, 7  ;;  %v6382_v42 = vld [vmem:[#allocation8 + $0xd0] sm:$0xff]  ;;  %v6383_v54 = vld [vmem:[#allocation8 + $0xd8] sm:$0xff]  ;;  %vm10543_vm15 = vmmov %vm10533_vm3 }
 0x519   : > { %3542 = vst [vmem:[%s6736_s17 + $0x4] sm:$0x1] %v9033_v31  ;;  %3605 = vmatmul.f32.vlgmr.msrb.gmra.mxu0 %v9033_v31  ;;  %3625 = vmatmul.f32.vlgmr.msrb.gmra.mxu1 %v9033_v31  ;;  %v3528_v27 = vrot.slane %v9033_v31, 1  ;;  %v3529_v58 = vrot.slane %v9033_v31, 2  ;;  %v3530_v45 = vrot.slane %v9033_v31, 3  ;;  %v3531_v55 = vrot.slane %v9033_v31, 4  ;;  %vm10547_vm2 = vmmov %vm10539_vm11 }
 0x51a   : > { %3566 = vst [vmem:[%s6738_s18 + $0xc] sm:$0x1] %v3551_v24  ;;  %3645 = vmatmul.f32.vlgmr.msrb.gmra.mxu2 %v9033_v31  ;;  %3665 = vmatmul.f32.vlgmr.msrb.gmra.mxu3 %v9033_v31  ;;  %v3532_v3 = vrot.slane %v9033_v31, 5  ;;  %v3533_v17 = vrot.slane %v9033_v31, 6  ;;  %v3534_v51 = vrot.slane %v9033_v31, 7  ;;  %v6384_v60 = vld [vmem:[#allocation8 + $0xa0] sm:$0xff]  ;;  %vm10548_vm6 = vmmov %vm10540_vm12 }
 0x51b   : > { %3567 = vst [vmem:[%s6738_s18 + $0x14] sm:$0x1] %v3552_v43  ;;  %4823 = vmatpush.msrb.mxu0 %v6344_v32  ;;  %4843 = vmatpush.msrb.mxu1 %v6345_v40  ;;  %v6385_v6 = vld [vmem:[#allocation8 + $0xa8] sm:$0xff]  ;;  %v6386_v41 = vld [vmem:[#allocation8 + $0xb0] sm:$0xff]  ;;  %v6387_v35 = vld [vmem:[#allocation8 + $0xb8] sm:$0xff]  ;;  %vm10546_vm3 = vcmask 1040384  }
 0x51c   : > { %3568 = vst [vmem:[%s6738_s18 + $0x1c] sm:$0x1] %v3553_v26  ;;  %4863 = vmatpush.msrb.mxu2 %v6346_v46  ;;  %4883 = vmatpush.msrb.mxu3 %v6347_v56  ;;  %v6388_v25 = vld [vmem:[#allocation8 + $0x80] sm:$0xff]  ;;  %v6389_v23 = vld [vmem:[#allocation8 + $0x88] sm:$0xff]  ;;  %v6390_v33 = vld [vmem:[#allocation8 + $0x90] sm:$0xff] }
 0x51d   : > { %3569 = vst [vmem:[%s6738_s18 + $0x24] sm:$0x1] %v3554_v48  ;;  %4824 = vmatpush.msrb.mxu0 %v6348_v36  ;;  %4844 = vmatpush.msrb.mxu1 %v6349_v61  ;;  %v6391_v4 = vld [vmem:[#allocation8 + $0x98] sm:$0xff]  ;;  %v6392_v24 = vld [vmem:[#allocation8 + $0x60] sm:$0xff]  ;;  %v6393_v43 = vld [vmem:[#allocation8 + $0x68] sm:$0xff] }
 0x51e   : > { %3570 = vst [vmem:[%s6738_s18 + $0x2c] sm:$0x1] %v3555_v13  ;;  %4864 = vmatpush.msrb.mxu2 %v6350_v34  ;;  %4884 = vmatpush.msrb.mxu3 %v6351_v8  ;;  %v6394_v26 = vld [vmem:[#allocation8 + $0x70] sm:$0xff]  ;;  %v6395_v48 = vld [vmem:[#allocation8 + $0x78] sm:$0xff]  ;;  %v6396_v13 = vld [vmem:[#allocation8 + $0x40] sm:$0xff] }
 0x51f   : > { %3571 = vst [vmem:[%s6738_s18 + $0x34] sm:$0x1] %v3556_v28  ;;  %4825 = vmatpush.msrb.mxu0 %v6352_v49  ;;  %4845 = vmatpush.msrb.mxu1 %v6353_v21  ;;  %v6397_v28 = vld [vmem:[#allocation8 + $0x48] sm:$0xff]  ;;  %v6398_v32 = vld [vmem:[#allocation8 + $0x50] sm:$0xff]  ;;  %v6399_v40 = vld [vmem:[#allocation8 + $0x58] sm:$0xff] }
 0x520   : > { %3572 = vst [vmem:[%s6738_s18 + $0x3c] sm:$0x1] %v3557_v39  ;;  %4865 = vmatpush.msrb.mxu2 %v6354_v2  ;;  %4885 = vmatpush.msrb.mxu3 %v6355_v30  ;;  %v6400_v39 = vld [vmem:[#allocation8 + $0x20] sm:$0xff]  ;;  %v6401_v46 = vld [vmem:[#allocation8 + $0x28] sm:$0xff]  ;;  %v6402_v56 = vld [vmem:[#allocation8 + $0x30] sm:$0xff] }
 0x521   : > { %3543 = vst [vmem:[%s6736_s17 + $0xc] sm:$0x1] %v3528_v27  ;;  %4826 = vmatpush.msrb.mxu0 %v6356_v52  ;;  %4846 = vmatpush.msrb.mxu1 %v6357_v44  ;;  %v6403_v36 = vld [vmem:[#allocation8 + $0x38] sm:$0xff]  ;;  %v6404_v61 = vld [vmem:[#allocation8] sm:$0xff]  ;;  %v6405_v34 = vld [vmem:[#allocation8 + $0x8] sm:$0xff] }
 0x522   : > { %3544 = vst [vmem:[%s6736_s17 + $0x14] sm:$0x1] %v3529_v58  ;;  %4866 = vmatpush.msrb.mxu2 %v6358_v59  ;;  %4886 = vmatpush.msrb.mxu3 %v6359_v7  ;;  %v6406_v8 = vld [vmem:[#allocation8 + $0x10] sm:$0xff]  ;;  %v6407_v49 = vld [vmem:[#allocation8 + $0x18] sm:$0xff] }
 0x523   : > { %3545 = vst [vmem:[%s6736_s17 + $0x1c] sm:$0x1] %v3530_v45  ;;  %4827 = vmatpush.msrb.mxu0 %v6360_v18  ;;  %4847 = vmatpush.msrb.mxu1 %v6361_v22 }
 0x524   : > { %3546 = vst [vmem:[%s6736_s17 + $0x24] sm:$0x1] %v3531_v55  ;;  %4867 = vmatpush.msrb.mxu2 %v6362_v5  ;;  %4887 = vmatpush.msrb.mxu3 %v6363_v37 }
 0x525   : > { %3547 = vst [vmem:[%s6736_s17 + $0x2c] sm:$0x1] %v3532_v3  ;;  %4828 = vmatpush.msrb.mxu0 %v6364_v1  ;;  %4848 = vmatpush.msrb.mxu1 %v6365_v38 }
 0x526   : > { %3548 = vst [vmem:[%s6736_s17 + $0x34] sm:$0x1] %v3533_v17  ;;  %4868 = vmatpush.msrb.mxu2 %v6366_v20  ;;  %4888 = vmatpush.msrb.mxu3 %v6367_v57 }
 0x527   : > { %3549 = vst [vmem:[%s6736_s17 + $0x3c] sm:$0x1] %v3534_v51  ;;  %4829 = vmatpush.msrb.mxu0 %v6368_v29  ;;  %4849 = vmatpush.msrb.mxu1 %v6369_v63 }
 0x528   : > { %4869 = vmatpush.msrb.mxu2 %v6370_v11  ;;  %4889 = vmatpush.msrb.mxu3 %v6371_v53 }
 0x529   : > { %4830 = vmatpush.msrb.mxu0 %v6372_v50  ;;  %4850 = vmatpush.msrb.mxu1 %v6373_v12 }
 0x52a   : > { %4870 = vmatpush.msrb.mxu2 %v6374_v15  ;;  %4890 = vmatpush.msrb.mxu3 %v6375_v19  ;;  %v5691_v19 = vld [vmem:[%s6723_s15 + $0x5] ss:$8 sm:$0xf] }
 0x52b   : > { %4831 = vmatpush.msrb.mxu0 %v6376_v0  ;;  %4851 = vmatpush.msrb.mxu1 %v6377_v10 }
 0x52c   : > { %4871 = vmatpush.msrb.mxu2 %v6378_v16  ;;  %4891 = vmatpush.msrb.mxu3 %v6379_v62 }
 0x52d   : > { %4832 = vmatpush.msrb.mxu0 %v6380_v14  ;;  %4852 = vmatpush.msrb.mxu1 %v6381_v9  ;;  %v5692_v14 = vld [vmem:[%s6723_s15 + $0x25] ss:$8 sm:$0xf] }
 0x52e   : > { %4872 = vmatpush.msrb.mxu2 %v6382_v42  ;;  %4892 = vmatpush.msrb.mxu3 %v6383_v54 }
 0x52f   : > { %4833 = vmatpush.msrb.mxu0 %v6384_v60  ;;  %4853 = vmatpush.msrb.mxu1 %v6385_v6  ;;  %v5693_v6 = vld [vmem:[%s6723_s15 + $0x45] ss:$8 sm:$0xf] }
 0x530   : > { %4873 = vmatpush.msrb.mxu2 %v6386_v41  ;;  %4893 = vmatpush.msrb.mxu3 %v6387_v35 }
 0x531   : > { %4834 = vmatpush.msrb.mxu0 %v6388_v25  ;;  %4854 = vmatpush.msrb.mxu1 %v6389_v23  ;;  %v5694_v25 = vld [vmem:[%s6723_s15 + $0x65] ss:$8 sm:$0xf] }
 0x532   : > { %4874 = vmatpush.msrb.mxu2 %v6390_v33  ;;  %4894 = vmatpush.msrb.mxu3 %v6391_v4 }
 0x533   : > { %4835 = vmatpush.msrb.mxu0 %v6392_v24  ;;  %4855 = vmatpush.msrb.mxu1 %v6393_v43  ;;  %v5695_v24 = vld [vmem:[%s6723_s15 + $0x85] ss:$8 sm:$0xf] }
 0x534   : > { %4875 = vmatpush.msrb.mxu2 %v6394_v26  ;;  %4895 = vmatpush.msrb.mxu3 %v6395_v48 }
 0x535   : > { %4836 = vmatpush.msrb.mxu0 %v6396_v13  ;;  %4856 = vmatpush.msrb.mxu1 %v6397_v28  ;;  %v5696_v13 = vld [vmem:[%s6723_s15 + $0xa5] ss:$8 sm:$0xf] }
 0x536   : > { %4876 = vmatpush.msrb.mxu2 %v6398_v32  ;;  %4896 = vmatpush.msrb.mxu3 %v6399_v40 }
 0x537   : > { %4837 = vmatpush.msrb.mxu0 %v6400_v39  ;;  %4857 = vmatpush.msrb.mxu1 %v6401_v46  ;;  %v5697_v39 = vld [vmem:[%s6723_s15 + $0xc5] ss:$8 sm:$0xf] }
 0x538   : > { %4877 = vmatpush.msrb.mxu2 %v6402_v56  ;;  %4897 = vmatpush.msrb.mxu3 %v6403_v36 }
 0x539   : > { %4838 = vmatpush.msrb.mxu0 %v6404_v61  ;;  %4858 = vmatpush.msrb.mxu1 %v6405_v34  ;;  %v5698_v61 = vld [vmem:[%s6723_s15 + $0xe5] ss:$8 sm:$0xf] }
 0x53a   : > { %4878 = vmatpush.msrb.mxu2 %v6406_v8  ;;  %4898 = vmatpush.msrb.mxu3 %v6407_v49 }
 0x596   : > { %v3626_v21 = vpop.f32.mrf.mxu1  ;;  %v3606_v18 = vpop.f32.mrf.mxu0 }
 0x597   : > { %v3673_v52 = vrot.slane %v3626_v21, 7 }
 0x599   : > { %v3679_v5 = vsel %vm565_vm0, %v3606_v18, %v3673_v52  ;;  %v3683_v1 = vsel %vm10526_vm10, %v3606_v18, %v3673_v52  ;;  %v3687_v29 = vsel %vm10530_vm4, %v3606_v18, %v3673_v52  ;;  %v3676_v53 = vsel %vm10546_vm3, %v3606_v18, %v3673_v52  ;;  %vm10554_vm10 = vmmov %vm10543_vm15 }
 0x59a   : > { %v3691_v50 = vsel %vm10547_vm2, %v3606_v18, %v3673_v52  ;;  %v3695_v12 = vsel %vm10548_vm6, %v3606_v18, %v3673_v52  ;;  %v3699_v60 = vsel %vm10554_vm10, %v3606_v18, %v3673_v52 }
 0x59d   : > { %v3646_v2 = vpop.f32.mrf.mxu2  ;;  %v3666_v30 = vpop.f32.mrf.mxu3 }
 0x59e   : > { %v3674_v44 = vrot.slane %v3646_v2, 6  ;;  %v3675_v59 = vrot.slane %v3666_v30, 5 }
 0x5a0   : > { %v3680_v7 = vsel %vm10538_vm8, %v3674_v44, %v3675_v59  ;;  %v3684_v22 = vsel %vm10539_vm11, %v3674_v44, %v3675_v59  ;;  %v3688_v37 = vsel %vm10540_vm12, %v3674_v44, %v3675_v59  ;;  %v3677_v38 = vsel %vm10541_vm13, %v3674_v44, %v3675_v59  ;;  %vm10552_vm11 = vmmov %vm10546_vm3 }
 0x5a1   : > { %v3681_v20 = vsel %vm10542_vm14, %v3679_v5, %v3680_v7  ;;  %v3692_v57 = vsel %vm10543_vm15, %v3674_v44, %v3675_v59  ;;  %v3685_v63 = vsel %vm10544_vm9, %v3683_v1, %v3684_v22  ;;  %v3696_v11 = vsel %vm10545_vm1, %v3675_v59, %v3674_v44  ;;  %vm10555_vm13 = vmmov %vm10545_vm1 }
 0x5a2   : > { %v3689_v15 = vsel %vm10549_vm7, %v3687_v29, %v3688_v37  ;;  %v3678_v0 = vsel %vm10550_vm5, %v3676_v53, %v3677_v38  ;;  %v3682_v10 = vrot.slane %v3681_v20, 1  ;;  %vm10551_vm8 = vcmask 1045508  }
 0x5a3   : > { %v3693_v16 = vsel %vm10551_vm8, %v3691_v50, %v3692_v57  ;;  %v3700_v62 = vsel %vm10552_vm11, %v3674_v44, %v3675_v59  ;;  %v3686_v9 = vrot.slane %v3685_v63, 2  ;;  %vm10553_vm12 = vcmask 1046533  }
 0x5a4   : > { %v3697_v42 = vsel %vm10553_vm12, %v3695_v12, %v3696_v11  ;;  %v3704_v54 = vsel %vm565_vm0, %v3674_v44, %v3675_v59  ;;  %v3690_v41 = vrot.slane %v3689_v15, 3  ;;  %v3703_v35 = vsel %vm10555_vm13, %v3673_v52, %v3606_v18 }
 0x5a5   : > { %v3694_v23 = vrot.slane %v3693_v16, 4  ;;  %vm10556_vm14 = vcmask 1045504   ;;  %v9112_v4 = vadd.f32 %v5691_v19, %v3678_v0  ;;  %v3698_v43 = vrot.slane %v3697_v42, 5 }
 0x5a6   : > { %v3701_v33 = vsel %vm10556_vm14, %v3700_v62, %v3699_v60  ;;  %vm10557_vm15 = vcmask 1046529   ;;  %v9116_v48 = vadd.f32 %v5692_v14, %v3682_v10  ;;  %v9119_v28 = vadd.f32 %v5693_v6, %v3686_v9 }
 0x5a7   : > { %v3705_v26 = vsel %vm10557_vm15, %v3704_v54, %v3703_v35  ;;  %v3702_v32 = vrot.slane %v3701_v33, 6  ;;  %v9121_v40 = vadd.f32 %v5694_v25, %v3690_v41  ;;  %v9124_v56 = vadd.f32 %v5695_v24, %v3694_v23 }
 0x5a8   : > { %v3706_v46 = vrot.slane %v3705_v26, 7  ;;  %v5699_v36 = vmul.f32 -1.442695, %v9112_v4  ;;  %v9128_v34 = vadd.f32 %v5696_v13, %v3698_v43  ;;  %v5700_v8 = vmul.f32 -1.442695, %v9116_v48 }
 0x5a9   : > { %v5701_v49 = vmul.f32 -1.442695, %v9119_v28  ;;  %v9132_v21 = vadd.f32 %v5697_v39, %v3702_v32  ;;  %v5702_v2 = vmul.f32 -1.442695, %v9121_v40  ;;  %v5703_v52 = vmul.f32 -1.442695, %v9124_v56 }
 0x5aa   : > { %v9135_v30 = vadd.f32 %v5698_v61, %v3706_v46  ;;  %6065 = vpow2.f32 %v5699_v36  ;;  %v5704_v44 = vmul.f32 -1.442695, %v9128_v34 }
 0x5ab   : > { %6067 = vpow2.f32 %v5700_v8  ;;  %v5705_v59 = vmul.f32 -1.442695, %v9132_v21 }
 0x5ac   : > { %6069 = vpow2.f32 %v5701_v49  ;;  %v5706_v7 = vmul.f32 -1.442695, %v9135_v30 }
 0x5ad   : > { %6071 = vpow2.f32 %v5702_v2 }
 0x5ae   : > { %6073 = vpow2.f32 %v5703_v52 }
 0x5af   : > { %6075 = vpow2.f32 %v5704_v44 }
 0x5b0   : > { %v6066_v18 = vpop.eup %6065  ;;  %6077 = vpow2.f32 %v5705_v59 }
 0x5b1   : > { %v6068_v22 = vpop.eup %6067  ;;  %v3779_v5 = vadd.f32 1.0, %v6066_v18  ;;  %6079 = vpow2.f32 %v5706_v7 }
 0x5b2   : > { %v6070_v37 = vpop.eup %6069  ;;  %v9141_v1 = vadd.f32 1.0, %v6068_v22 }
 0x5b3   : > { %v6072_v38 = vpop.eup %6071  ;;  %v9143_v20 = vadd.f32 1.0, %v6070_v37  ;;  %6081 = vrcp.f32 %v3779_v5  ;;  %v3796_v53 = vand.u32 2147483647, %v3779_v5  ;;  %v3798_v50 = vand.u32 2147483648, %v3779_v5 }
 0x5b4   : > { %v6074_v57 = vpop.eup %6073  ;;  %v9145_v29 = vadd.f32 1.0, %v6072_v38  ;;  %6083 = vrcp.f32 %v9141_v1  ;;  %v3811_v15 = vand.u32 2147483647, %v9141_v1  ;;  %v3813_v10 = vand.u32 2147483648, %v9141_v1 }
 0x5b5   : > { %v6076_v63 = vpop.eup %6075  ;;  %v9148_v11 = vadd.f32 1.0, %v6074_v57  ;;  %6085 = vrcp.f32 %v9143_v20  ;;  %vm3792_vm4 = vweird.f32 %v3779_v5  ;;  %vm3807_vm9 = vweird.f32 %v9141_v1 }
 0x5b6   : > { %v6078_v12 = vpop.eup %6077  ;;  %v9152_v0 = vadd.f32 1.0, %v6076_v63  ;;  %6087 = vrcp.f32 %v9145_v29  ;;  %v3826_v62 = vand.u32 2147483647, %v9143_v20  ;;  %vm9159_vm1 = vcmp.eq.f32.partialorder %v3796_v53, 8.507059e+37 }
 0x5b7   : > { %v6080_v19 = vpop.eup %6079  ;;  %6089 = vrcp.f32 %v9148_v11  ;;  %v3799_v54 = vor.u32 1.1754944e-38, %v3798_v50  ;;  %v3828_v60 = vand.u32 2147483648, %v9143_v20  ;;  %v9164_v6 = vadd.f32 1.0, %v6078_v12 }
 0x5b8   : > { %vm9167_vm3 = vcmp.eq.f32.partialorder %v3811_v15, 8.507059e+37  ;;  %vm3822_vm2 = vweird.f32 %v9143_v20  ;;  %v3841_v25 = vand.u32 2147483647, %v9145_v29  ;;  %v9173_v33 = vadd.f32 1.0, %v6080_v19 }
 0x5b9   : > { %v6082_v16 = vpop.eup %6081  ;;  %v3814_v43 = vor.u32 1.1754944e-38, %v3813_v10  ;;  %6091 = vrcp.f32 %v9152_v0  ;;  %vm9177_vm7 = vcmp.eq.f32.partialorder %v3826_v62, 8.507059e+37  ;;  %vm3837_vm5 = vweird.f32 %v9145_v29 }
 0x5ba   : > { %v6084_v14 = vpop.eup %6083  ;;  %v3788_v9 = vmul.f32 %v6082_v16, %v3779_v5  ;;  %vm3793_vm6 = vweird.f32 %v6082_v16  ;;  %v3843_v39 = vand.u32 2147483648, %v9145_v29  ;;  %v3829_v61 = vor.u32 1.1754944e-38, %v3828_v60 }
 0x5bb   : > { %v3803_v41 = vmul.f32 %v6084_v14, %v9141_v1  ;;  %v6086_v23 = vpop.eup %6085  ;;  %vm3808_vm8 = vweird.f32 %v6084_v14  ;;  %vm3852_vm11 = vweird.f32 %v9148_v11  ;;  %vm9185_vm12 = vcmp.eq.f32.partialorder %v3841_v25, 8.507059e+37  ;;  %vm3794_vm10 = vmor %vm3792_vm4, %vm3793_vm6 }
 0x5bc   : > { %v3789_v24 = vsub.f32 1.0, %v3788_v9  ;;  %v3818_v13 = vmul.f32 %v6086_v23, %v9143_v20  ;;  %v6088_v46 = vpop.eup %6087  ;;  %v3856_v18 = vand.u32 2147483647, %v9148_v11  ;;  %v3858_v22 = vand.u32 2147483648, %v9148_v11  ;;  %vm3809_vm14 = vmor %vm3807_vm9, %vm3808_vm8 }
 0x5bd   : > { %v3804_v26 = vsub.f32 1.0, %v3803_v41  ;;  %v6090_v8 = vpop.eup %6089  ;;  %v3833_v52 = vmul.f32 %v6088_v46, %v9145_v29  ;;  %vm3823_vm13 = vweird.f32 %v6086_v23  ;;  %vm3838_vm15 = vweird.f32 %v6088_v46 }
 0x5be   : > { %v3790_v36 = vmul.f32 %v6082_v16, %v3789_v24  ;;  %v3819_v2 = vsub.f32 1.0, %v3818_v13  ;;  %v3848_v7 = vmul.f32 %v6090_v8, %v9148_v11  ;;  %6093 = vrcp.f32 %v9164_v6  ;;  %vm3824_vm4 = vmor %vm3822_vm2, %vm3823_vm13 }
 0x5bf   : > { %v3805_v49 = vmul.f32 %v6084_v14, %v3804_v26  ;;  %v3834_v57 = vsub.f32 1.0, %v3833_v52  ;;  %v6092_v63 = vpop.eup %6091  ;;  %vm3853_vm9 = vweird.f32 %v6090_v8  ;;  %v3844_v42 = vor.u32 1.1754944e-38, %v3843_v39 }
 0x5c0   : > { %v3791_v59 = vadd.f32 %v6082_v16, %v3790_v36  ;;  %v3820_v38 = vmul.f32 %v6086_v23, %v3819_v2  ;;  %v3849_v50 = vsub.f32 1.0, %v3848_v7  ;;  %v3859_v60 = vor.u32 1.1754944e-38, %v3858_v22  ;;  %vm3854_vm2 = vmor %vm3852_vm11, %vm3853_vm9 }
 0x5c1   : > { %v3806_v37 = vadd.f32 %v6084_v14, %v3805_v49  ;;  %v3835_v19 = vmul.f32 %v6088_v46, %v3834_v57  ;;  %v3871_v25 = vand.u32 2147483647, %v9152_v0  ;;  %6095 = vrcp.f32 %v9173_v33 }
 0x5c2   : > { %v3795_v53 = vsel %vm3794_vm10, %v6082_v16, %v3791_v59  ;;  %v3821_v15 = vadd.f32 %v6086_v23, %v3820_v38  ;;  %v3850_v1 = vmul.f32 %v6090_v8, %v3849_v50  ;;  %v3863_v16 = vmul.f32 %v6092_v63, %v9152_v0 }
 0x5c3   : > { %v9200_v12 = vsel %vm9159_vm1, %v3799_v54, %v3795_v53  ;;  %v3810_v5 = vsel %vm3809_vm14, %v6084_v14, %v3806_v37  ;;  %v3836_v9 = vadd.f32 %v6088_v46, %v3835_v19  ;;  %vm9210_vm1 = vcmp.eq.f32.partialorder %v3856_v18, 8.507059e+37 }
 0x5c4   : > { %v9204_v10 = vsel %vm9167_vm3, %v3814_v43, %v3810_v5  ;;  %3915 = vst [vmem:[#allocation1] ss:$9 sm:$0xff] %v9200_v12  ;;  %v3825_v62 = vsel %vm3824_vm4, %v6086_v23, %v3821_v15  ;;  %vm3839_vm3 = vmor %vm3837_vm5, %vm3838_vm15  ;;  %v3851_v20 = vadd.f32 %v6090_v8, %v3850_v1  ;;  %v3864_v41 = vsub.f32 1.0, %v3863_v16  ;;  %v6094_v24 = vpop.eup %6093 }
 0x5c5   : > { %3917 = vst [vmem:[#allocation1 + $0x1] ss:$9 sm:$0xff] %v9204_v10  ;;  %v9217_v54 = vsel %vm9177_vm7, %v3829_v61, %v3825_v62  ;;  %v3840_v35 = vsel %vm3839_vm3, %v6088_v46, %v3836_v9  ;;  %v3873_v23 = vand.u32 2147483648, %v9152_v0  ;;  %vm3868_vm6 = vweird.f32 %v6092_v63 }
 0x5c6   : > { %3919 = vst [vmem:[#allocation1 + $0x2] ss:$9 sm:$0xff] %v9217_v54  ;;  %v9230_v29 = vsel %vm9185_vm12, %v3844_v42, %v3840_v35  ;;  %v3855_v43 = vsel %vm3854_vm2, %v6090_v8, %v3851_v20  ;;  %v3865_v26 = vmul.f32 %v6092_v63, %v3864_v41  ;;  %v3878_v13 = vmul.f32 %v6094_v24, %v9164_v6 }
 0x5c7   : > { %v9234_v11 = vsel %vm9210_vm1, %v3859_v60, %v3855_v43  ;;  %3921 = vst [vmem:[#allocation1 + $0x3] ss:$9 sm:$0xff] %v9230_v29  ;;  %vm3867_vm7 = vweird.f32 %v9152_v0  ;;  %v3874_v39 = vor.u32 1.1754944e-38, %v3873_v23  ;;  %vm3872_vm8 = vcmp.eq.f32.partialorder %v3871_v25, 8.507059e+37  ;;  %v6096_v8 = vpop.eup %6095  ;;  %v4031_v43 = vpop.permute.xlu1 %4030 }
 0x5c8   : > { %v3866_v32 = vadd.f32 %v6092_v63, %v3865_v26  ;;  %3923 = vst [vmem:[#allocation1 + $0x4] ss:$9 sm:$0xff] %v9234_v11  ;;  %vm3869_vm5 = vmor %vm3867_vm7, %vm3868_vm6  ;;  %v3879_v46 = vsub.f32 1.0, %v3878_v13  ;;  %v3888_v61 = vand.u32 2147483648, %v9164_v6  ;;  %vm3883_vm11 = vweird.f32 %v6094_v24  ;;  %v4036_v26 = vpop.permute.xlu2 %4035  ;;  %v9272_v13 = vpop.permute.xlu0 %4025 }
 0x5c9   : > { %v3886_v52 = vand.u32 2147483647, %v9164_v6  ;;  %v3893_v44 = vmul.f32 %v6096_v8, %v9173_v33  ;;  %vm3882_vm12 = vweird.f32 %v9164_v6  ;;  %v3903_v22 = vand.u32 2147483648, %v9173_v33 }
 0x5ca   : > { %v3870_v36 = vsel %vm3869_vm5, %v6092_v63, %v3866_v32  ;;  %v3880_v2 = vmul.f32 %v6094_v24, %v3879_v46  ;;  %vm3884_vm10 = vmor %vm3882_vm12, %vm3883_vm11  ;;  %v3889_v59 = vor.u32 1.1754944e-38, %v3888_v61  ;;  %vm3898_vm14 = vweird.f32 %v6096_v8 }
 0x5cb   : > { %v9241_v49 = vsel %vm3872_vm8, %v3874_v39, %v3870_v36  ;;  %v3894_v7 = vsub.f32 1.0, %v3893_v44  ;;  %vm3887_vm13 = vcmp.eq.f32.partialorder %v3886_v52, 8.507059e+37  ;;  %v3901_v57 = vand.u32 2147483647, %v9173_v33 }
 0x5cc   : > { %3925 = vst [vmem:[#allocation1 + $0x5] ss:$9 sm:$0xff] %v9241_v49  ;;  %v3881_v0 = vadd.f32 %v6094_v24, %v3880_v2  ;;  %v3731_v63 = vrot.slane %v9112_v4, 3  ;;  %v3732_v53 = vrot.slane %v9116_v48, 3  ;;  %vm3897_vm15 = vweird.f32 %v9173_v33 }
 0x5cd   : > { %v3895_v38 = vmul.f32 %v6096_v8, %v3894_v7  ;;  %v3733_v50 = vrot.slane %v9119_v28, 3  ;;  %vm3899_vm4 = vmor %vm3897_vm15, %vm3898_vm14  ;;  %v3904_v5 = vor.u32 1.1754944e-38, %v3903_v22  ;;  %v3734_v15 = vrot.slane %v9121_v40, 3 }
 0x5ce   : > { %v3885_v18 = vsel %vm3884_vm10, %v6094_v24, %v3881_v0  ;;  %vm3902_vm9 = vcmp.eq.f32.partialorder %v3901_v57, 8.507059e+37  ;;  %v3735_v1 = vrot.slane %v9124_v56, 3  ;;  %6097 = vtanh.f32 %v3731_v63 }
 0x5cf   : > { %v9248_v37 = vsel %vm3887_vm13, %v3889_v59, %v3885_v18  ;;  %v3896_v6 = vadd.f32 %v6096_v8, %v3895_v38  ;;  %v3736_v4 = vrot.slane %v9128_v34, 3  ;;  %6099 = vtanh.f32 %v3732_v53  ;;  %v4041_v2 = vpop.permute.xlu1 %4040 }
 0x5d0   : > { %3927 = vst [vmem:[#allocation1 + $0x6] ss:$9 sm:$0xff] %v9248_v37  ;;  %v3737_v48 = vrot.slane %v9132_v21, 3  ;;  %6101 = vtanh.f32 %v3733_v50  ;;  %v3738_v28 = vrot.slane %v9135_v30, 3  ;;  %v3968_v61 = vrot.slane %v9200_v12, 2  ;;  %v4046_v7 = vpop.permute.xlu2 %4045 }
 0x5d1   : > { %v3900_v19 = vsel %vm3899_vm4, %v6096_v8, %v3896_v6  ;;  %6103 = vtanh.f32 %v3734_v15  ;;  %v3969_v8 = vrot.slane %v9204_v10, 2  ;;  %v3970_v18 = vrot.slane %v9217_v54, 2  ;;  %v4051_v6 = vpop.permute.xlu0 %4050 }
 0x5d2   : > { %v9258_v16 = vsel %vm3902_vm9, %v3904_v5, %v3900_v19  ;;  %6105 = vtanh.f32 %v3735_v1  ;;  %v3971_v22 = vrot.slane %v9230_v29, 2  ;;  %v3972_v38 = vrot.slane %v9234_v11, 2 }
 0x5d3   : > { %3929 = vst [vmem:[#allocation1 + $0x7] ss:$9 sm:$0xff] %v9258_v16  ;;  %6107 = vtanh.f32 %v3736_v4  ;;  %v3973_v63 = vrot.slane %v9241_v49, 2  ;;  %v3974_v53 = vrot.slane %v9248_v37, 2  ;;  %vm10568_vm1 = vcmask 1042434  }
 0x5d4   : > { %v6098_v40 = vpop.eup %6097  ;;  %6109 = vtanh.f32 %v3737_v48  ;;  %vm10569_vm3 = vcmask 1043459   ;;  %vm10570_vm2 = vmmov %vm10568_vm1  ;;  %vm10571_vm6 = vcmask 1044484   ;;  %vm10573_vm5 = vcmask 1045509  }
 0x5d5   : > { %v6100_v33 = vpop.eup %6099  ;;  %6111 = vtanh.f32 %v3738_v28  ;;  %v3933_v56 = vmul.f32 %v6098_v40, %v9200_v12  ;;  %v3975_v12 = vrot.slane %v9258_v16, 2  ;;  %vm10572_vm7 = vmmov %vm10569_vm3  ;;  %vm10575_vm11 = vcmask 1046534  }
 0x5d6   : > { %v6102_v62 = vpop.eup %6101  ;;  %v3934_v34 = vmul.f32 %v6100_v33, %v9204_v10  ;;  %vm10574_vm8 = vmmov %vm10571_vm6  ;;  %vm10577_vm10 = vcmask 1047559  }
 0x5d7   : > { %v6104_v42 = vpop.eup %6103  ;;  %v3935_v14 = vmul.f32 %v6102_v62, %v9217_v54  ;;  %vm10576_vm12 = vmmov %vm10573_vm5 }
 0x5d8   : > { %v6106_v21 = vpop.eup %6105  ;;  %v3936_v30 = vmul.f32 %v6104_v42, %v9230_v29  ;;  %vm10578_vm13 = vmmov %vm10575_vm11 }
 0x5d9   : > { %v6108_v20 = vpop.eup %6107  ;;  %v3937_v60 = vmul.f32 %v6106_v21, %v9234_v11  ;;  %vm10579_vm14 = vmmov %vm10577_vm10 }
 0x5da   : > { %v3930_v9 = vld [vmem:[#allocation1 + $0x9] sm:$0xff]  ;;  %v6110_v41 = vpop.eup %6109  ;;  %v3938_v35 = vmul.f32 %v6108_v20, %v9241_v49  ;;  %vm10580_vm15 = vmmov %vm10569_vm3 }
 0x5db   : > { %3949 = vst [vmem:[#allocation1] ss:$9 sm:$0xff] %v3933_v56  ;;  %v6112_v25 = vpop.eup %6111  ;;  %v3939_v23 = vmul.f32 %v6110_v41, %v9248_v37  ;;  %v3932_v32 = vmul.f32 %v3930_v9, %v9029_v47  ;;  %vm10581_vm4 = vmmov %vm10571_vm6 }
 0x5dc   : > { %3951 = vst [vmem:[#allocation1 + $0x1] ss:$9 sm:$0xff] %v3934_v34  ;;  %v3940_v24 = vmul.f32 %v6112_v25, %v9258_v16  ;;  %vm10582_vm9 = vmmov %vm10573_vm5 }
 0x5dd   : > { %3953 = vst [vmem:[#allocation1 + $0x2] ss:$9 sm:$0xff] %v3935_v14 }
 0x5de   : > { %3955 = vst [vmem:[#allocation1 + $0x3] ss:$9 sm:$0xff] %v3936_v30 }
 0x5df   : > { %3957 = vst [vmem:[#allocation1 + $0x4] ss:$9 sm:$0xff] %v3937_v60 }
 0x5e0   : > { %3959 = vst [vmem:[#allocation1 + $0x5] ss:$9 sm:$0xff] %v3938_v35 }
 0x5e1   : > { %3961 = vst [vmem:[#allocation1 + $0x6] ss:$9 sm:$0xff] %v3939_v23  ;;  %v4056_v23 = vpop.permute.xlu1 %4055 }
 0x5e2   : > { %3963 = vst [vmem:[#allocation1 + $0x7] ss:$9 sm:$0xff] %v3940_v24 }
 0x5e9   : > { %v3964_v39 = vld [vmem:[#allocation1] sm:$0xff] }
 0x5ea   : > { %v3966_v46 = vadd.f32 %v3964_v39, %v3932_v32 }
 0x5ec   : > { %6113 = vtanh.f32 %v3966_v46  ;;  %v4095_v36 = vsub.f32 %v3966_v46, %v9029_v47  ;;  %v4061_v46 = vpop.permute.xlu2 %4060 }
 0x5ee   : > { %v4097_v52 = vrot.slane %v4095_v36, 1  ;;  %v4098_v44 = vrot.slane %v4095_v36, 2  ;;  %v4099_v0 = vrot.slane %v4095_v36, 3  ;;  %v4100_v59 = vrot.slane %v4095_v36, 4 }
 0x5ef   : > { %v4101_v57 = vrot.slane %v4095_v36, 5  ;;  %v4102_v50 = vrot.slane %v4095_v36, 6  ;;  %v4103_v5 = vrot.slane %v4095_v36, 7  ;;  %v4112_v15 = vmul.f32 %v4095_v36, %v9272_v13 }
 0x5f0   : > { %v4113_v10 = vmul.f32 %v4097_v52, %v4031_v43  ;;  %v4114_v19 = vmul.f32 %v4098_v44, %v4036_v26  ;;  %v4115_v54 = vmul.f32 %v4099_v0, %v4041_v2  ;;  %v4116_v4 = vmul.f32 %v4100_v59, %v4046_v7 }
 0x5f1   : > { %v4117_v29 = vmul.f32 %v4101_v57, %v4051_v6  ;;  %v4119_v52 = vmul.f32 %v4103_v5, %v4061_v46 }
 0x5f2   : > { %v6114_v1 = vpop.eup %6113  ;;  %v4128_v48 = vrot.slane %v4113_v10, 7  ;;  %v4132_v44 = vrot.slane %v4115_v54, 5 }
 0x5f3   : > { %v3985_v11 = vrot.slane %v6114_v1, 1  ;;  %v3986_v28 = vrot.slane %v6114_v1, 2  ;;  %v3987_v40 = vrot.slane %v6114_v1, 3  ;;  %v3988_v49 = vrot.slane %v6114_v1, 4 }
 0x5f4   : > { %v3989_v33 = vrot.slane %v6114_v1, 5  ;;  %v3990_v37 = vrot.slane %v6114_v1, 6  ;;  %v3991_v56 = vrot.slane %v6114_v1, 7  ;;  %v3999_v16 = vmul.f32 %v6114_v1, %v3968_v61 }
 0x5f5   : > { %v4000_v62 = vmul.f32 %v3985_v11, %v3969_v8  ;;  %v4001_v9 = vmul.f32 %v3986_v28, %v3970_v18  ;;  %v4002_v34 = vmul.f32 %v3987_v40, %v3971_v22  ;;  %v4003_v42 = vmul.f32 %v3988_v49, %v3972_v38 }
 0x5f6   : > { %v4004_v14 = vmul.f32 %v3989_v33, %v3973_v63  ;;  %v4005_v21 = vmul.f32 %v3990_v37, %v3974_v53  ;;  %v4006_v30 = vmul.f32 %v3991_v56, %v3975_v12  ;;  %v4015_v20 = vsub.f32 %v3999_v16, %v9033_v31 }
 0x5f7   : > { %v4016_v60 = vsub.f32 %v4000_v62, %v3528_v27  ;;  %v4017_v41 = vsub.f32 %v4001_v9, %v3529_v58  ;;  %v4018_v35 = vsub.f32 %v4002_v34, %v3530_v45  ;;  %v4019_v25 = vsub.f32 %v4003_v42, %v3531_v55 }
 0x5f8   : > { %v4020_v24 = vsub.f32 %v4004_v14, %v3532_v3  ;;  %v4021_v32 = vsub.f32 %v4005_v21, %v3533_v17  ;;  %v4022_v39 = vsub.f32 %v4006_v30, %v3534_v51  ;;  %v4130_v27 = vrot.slane %v4114_v19, 6 }
 0x5f9   : > { %v4064_v36 = vmul.f32 %v4031_v43, %v4016_v60  ;;  %v4065_v58 = vmul.f32 %v4036_v26, %v4017_v41  ;;  %v4066_v61 = vmul.f32 %v4041_v2, %v4018_v35  ;;  %v4118_v8 = vmul.f32 %v4102_v50, %v4056_v23 }
 0x5fa   : > { %v4067_v45 = vmul.f32 %v4046_v7, %v4019_v25  ;;  %v4129_v55 = vsel %vm565_vm0, %v4128_v48, %v4112_v15  ;;  %v4063_v0 = vmul.f32 %v9272_v13, %v4015_v20  ;;  %v4068_v3 = vmul.f32 %v4051_v6, %v4020_v24 }
 0x5fb   : > { %v4079_v59 = vrot.slane %v4064_v36, 7  ;;  %v4081_v18 = vrot.slane %v4065_v58, 6  ;;  %v4069_v17 = vmul.f32 %v4056_v23, %v4021_v32  ;;  %v4070_v22 = vmul.f32 %v4061_v46, %v4022_v39 }
 0x5fc   : > { %v4131_v51 = vsel %vm10568_vm1, %v4130_v27, %v4129_v55  ;;  %v4134_v38 = vrot.slane %v4116_v4, 4  ;;  %v4083_v26 = vrot.slane %v4066_v61, 5  ;;  %v4136_v7 = vrot.slane %v4117_v29, 3 }
 0x5fd   : > { %v4080_v43 = vsel %vm565_vm0, %v4079_v59, %v4063_v0  ;;  %v4133_v2 = vsel %vm10569_vm3, %v4132_v44, %v4131_v51  ;;  %v4085_v63 = vrot.slane %v4067_v45, 4  ;;  %v4138_v13 = vrot.slane %v4118_v8, 2  ;;  %vm10583_vm3 = vmmov %vm10568_vm1  ;;  %v5707_v59 = vld [vmem:[%s6723_s15 + $0x6] ss:$8 sm:$0xf] }
 0x5fe   : > { %v4082_v57 = vsel %vm10570_vm2, %v4081_v18, %v4080_v43  ;;  %v4135_v53 = vsel %vm10571_vm6, %v4134_v38, %v4133_v2  ;;  %v4087_v10 = vrot.slane %v4068_v3, 3  ;;  %v4140_v50 = vrot.slane %v4119_v52, 1  ;;  %vm10585_vm6 = vmmov %vm10575_vm11  ;;  %v5708_v38 = vld [vmem:[%s6723_s15 + $0x26] ss:$8 sm:$0xf] }
 0x5ff   : > { %v4084_v12 = vsel %vm10572_vm7, %v4083_v26, %v4082_v57  ;;  %v4137_v6 = vsel %vm10573_vm5, %v4136_v7, %v4135_v53  ;;  %v4089_v15 = vrot.slane %v4069_v17, 2  ;;  %v4091_v54 = vrot.slane %v4070_v22, 1  ;;  %v5709_v57 = vld [vmem:[%s6723_s15 + $0x46] ss:$8 sm:$0xf] }
 0x600   : > { %v4086_v5 = vsel %vm10574_vm8, %v4085_v63, %v4084_v12  ;;  %v4139_v19 = vsel %vm10575_vm11, %v4138_v13, %v4137_v6  ;;  %vm10584_vm2 = vcmask 1042433   ;;  %vm10586_vm5 = vcmask 1043458   ;;  %v5710_v13 = vld [vmem:[%s6723_s15 + $0x66] ss:$8 sm:$0xf] }
 0x601   : > { %v4088_v1 = vsel %vm10576_vm12, %v4087_v10, %v4086_v5  ;;  %v4141_v4 = vsel %vm10577_vm10, %v4140_v50, %v4139_v19  ;;  %vm10587_vm8 = vcmask 1046528   ;;  %vm10588_vm11 = vcmask 1040384   ;;  %vm10589_vm12 = vmmov %vm10581_vm4  ;;  %v5711_v50 = vld [vmem:[%s6723_s15 + $0x86] ss:$8 sm:$0xf] }
 0x602   : > { %v4090_v29 = vsel %vm10578_vm13, %v4089_v15, %v4088_v1  ;;  %v9315_v48 = vadd.f32 %v4141_v4, %v9029_v47  ;;  %vm10590_vm10 = vmmov %vm10582_vm9  ;;  %vm10591_vm13 = vcmask 1044483   ;;  %v5712_v1 = vld [vmem:[%s6723_s15 + $0xa6] ss:$8 sm:$0xf] }
 0x603   : > { %v4092_v11 = vsel %vm10579_vm14, %v4091_v54, %v4090_v29  ;;  %vm10592_vm14 = vcmask 1041408  }
 0x604   : > { %v9319_v28 = vadd.f32 %v4092_v11, %v9033_v31  ;;  %v4168_v40 = vrot.slane %v9315_v48, 1  ;;  %v4169_v49 = vrot.slane %v9315_v48, 2  ;;  %4182 = vst [vmem:[%s6738_s18 + $0x5] sm:$0x1] %v9315_v48  ;;  %v4170_v33 = vrot.slane %v9315_v48, 3 }
 0x605   : > { %v4171_v47 = vrot.slane %v9315_v48, 4  ;;  %v4172_v31 = vrot.slane %v9315_v48, 5  ;;  %v4173_v37 = vrot.slane %v9315_v48, 6  ;;  %v4174_v56 = vrot.slane %v9315_v48, 7 }
 0x606   : > { %4159 = vst [vmem:[%s6736_s17 + $0x5] sm:$0x1] %v9319_v28  ;;  %4222 = vmatmul.f32.vlgmr.msra.gmra.mxu0 %v9319_v28  ;;  %4242 = vmatmul.f32.vlgmr.msra.gmra.mxu1 %v9319_v28  ;;  %v4145_v16 = vrot.slane %v9319_v28, 1  ;;  %v4146_v62 = vrot.slane %v9319_v28, 2  ;;  %v4147_v9 = vrot.slane %v9319_v28, 3  ;;  %v4148_v34 = vrot.slane %v9319_v28, 4 }
 0x607   : > { %4183 = vst [vmem:[%s6738_s18 + $0xd] sm:$0x1] %v4168_v40  ;;  %4262 = vmatmul.f32.vlgmr.msra.gmra.mxu2 %v9319_v28  ;;  %4282 = vmatmul.f32.vlgmr.msra.gmra.mxu3 %v9319_v28  ;;  %v4149_v42 = vrot.slane %v9319_v28, 5  ;;  %v4150_v14 = vrot.slane %v9319_v28, 6  ;;  %v4151_v21 = vrot.slane %v9319_v28, 7 }
 0x608   : > { %4184 = vst [vmem:[%s6738_s18 + $0x15] sm:$0x1] %v4169_v49  ;;  %v5713_v11 = vld [vmem:[%s6723_s15 + $0xc6] ss:$8 sm:$0xf] }
 0x609   : > { %4185 = vst [vmem:[%s6738_s18 + $0x1d] sm:$0x1] %v4170_v33 }
 0x60a   : > { %4186 = vst [vmem:[%s6738_s18 + $0x25] sm:$0x1] %v4171_v47  ;;  %v5714_v47 = vld [vmem:[%s6723_s15 + $0xe6] ss:$8 sm:$0xf] }
 0x60b   : > { %4187 = vst [vmem:[%s6738_s18 + $0x2d] sm:$0x1] %v4172_v31 }
 0x60c   : > { %4188 = vst [vmem:[%s6738_s18 + $0x35] sm:$0x1] %v4173_v37 }
 0x60d   : > { %4189 = vst [vmem:[%s6738_s18 + $0x3d] sm:$0x1] %v4174_v56 }
 0x60e   : > { %4160 = vst [vmem:[%s6736_s17 + $0xd] sm:$0x1] %v4145_v16 }
 0x60f   : > { %4161 = vst [vmem:[%s6736_s17 + $0x15] sm:$0x1] %v4146_v62 }
 0x610   : > { %4162 = vst [vmem:[%s6736_s17 + $0x1d] sm:$0x1] %v4147_v9 }
 0x611   : > { %4163 = vst [vmem:[%s6736_s17 + $0x25] sm:$0x1] %v4148_v34 }
 0x612   : > { %4164 = vst [vmem:[%s6736_s17 + $0x2d] sm:$0x1] %v4149_v42 }
 0x613   : > { %4165 = vst [vmem:[%s6736_s17 + $0x35] sm:$0x1] %v4150_v14 }
 0x614   : > { %4166 = vst [vmem:[%s6736_s17 + $0x3d] sm:$0x1] %v4151_v21 }
 0x683   : > { %v4243_v30 = vpop.f32.mrf.mxu1  ;;  %v4223_v24 = vpop.f32.mrf.mxu0 }
 0x684   : > { %v4290_v41 = vrot.slane %v4243_v30, 7 }
 0x686   : > { %v4296_v39 = vsel %vm565_vm0, %v4223_v24, %v4290_v41  ;;  %v4300_v46 = vsel %vm10568_vm1, %v4223_v24, %v4290_v41  ;;  %v4304_v8 = vsel %vm10572_vm7, %v4223_v24, %v4290_v41  ;;  %v4293_v55 = vsel %vm10588_vm11, %v4223_v24, %v4290_v41  ;;  %vm10596_vm1 = vmmov %vm10585_vm6 }
 0x687   : > { %v4308_v44 = vsel %vm10589_vm12, %v4223_v24, %v4290_v41  ;;  %v4312_v0 = vsel %vm10590_vm10, %v4223_v24, %v4290_v41  ;;  %v4316_v7 = vsel %vm10596_vm1, %v4223_v24, %v4290_v41 }
 0x68a   : > { %v4263_v20 = vpop.f32.mrf.mxu2  ;;  %v4283_v60 = vpop.f32.mrf.mxu3 }
 0x68b   : > { %v4291_v35 = vrot.slane %v4263_v20, 6  ;;  %v4292_v25 = vrot.slane %v4283_v60, 5 }
 0x68d   : > { %v4297_v23 = vsel %vm10580_vm15, %v4291_v35, %v4292_v25  ;;  %v4301_v32 = vsel %vm10581_vm4, %v4291_v35, %v4292_v25  ;;  %v4305_v27 = vsel %vm10582_vm9, %v4291_v35, %v4292_v25  ;;  %v4294_v36 = vsel %vm10583_vm3, %v4291_v35, %v4292_v25  ;;  %vm10594_vm4 = vmmov %vm10588_vm11 }
 0x68e   : > { %v4298_v58 = vsel %vm10584_vm2, %v4296_v39, %v4297_v23  ;;  %v4309_v61 = vsel %vm10585_vm6, %v4291_v35, %v4292_v25  ;;  %v4302_v45 = vsel %vm10586_vm5, %v4300_v46, %v4301_v32  ;;  %v4313_v52 = vsel %vm10587_vm8, %v4292_v25, %v4291_v35  ;;  %vm10597_vm3 = vmmov %vm10587_vm8 }
 0x68f   : > { %v4306_v3 = vsel %vm10591_vm13, %v4304_v8, %v4305_v27  ;;  %v4295_v18 = vsel %vm10592_vm14, %v4293_v55, %v4294_v36  ;;  %v4299_v17 = vrot.slane %v4298_v58, 1  ;;  %vm10593_vm15 = vcmask 1045508  }
 0x690   : > { %v4310_v22 = vsel %vm10593_vm15, %v4308_v44, %v4309_v61  ;;  %v4317_v51 = vsel %vm10594_vm4, %v4291_v35, %v4292_v25  ;;  %v4303_v43 = vrot.slane %v4302_v45, 2  ;;  %vm10595_vm9 = vcmask 1046533  }
 0x691   : > { %v4314_v26 = vsel %vm10595_vm9, %v4312_v0, %v4313_v52  ;;  %v4321_v2 = vsel %vm565_vm0, %v4291_v35, %v4292_v25  ;;  %v4307_v63 = vrot.slane %v4306_v3, 3  ;;  %v4320_v53 = vsel %vm10597_vm3, %v4290_v41, %v4223_v24 }
 0x692   : > { %v4311_v12 = vrot.slane %v4310_v22, 4  ;;  %vm10598_vm2 = vcmask 1045504   ;;  %v9398_v6 = vadd.f32 %v5707_v59, %v4295_v18  ;;  %v4315_v5 = vrot.slane %v4314_v26, 5 }
 0x693   : > { %v4318_v10 = vsel %vm10598_vm2, %v4317_v51, %v4316_v7  ;;  %vm10599_vm6 = vcmask 1046529   ;;  %v9402_v19 = vadd.f32 %v5708_v38, %v4299_v17  ;;  %v9405_v54 = vadd.f32 %v5709_v57, %v4303_v43 }
 0x694   : > { %v4322_v15 = vsel %vm10599_vm6, %v4321_v2, %v4320_v53  ;;  %v4319_v4 = vrot.slane %v4318_v10, 6  ;;  %v9407_v29 = vadd.f32 %v5710_v13, %v4307_v63  ;;  %v9410_v49 = vadd.f32 %v5711_v50, %v4311_v12 }
 0x695   : > { %v4323_v40 = vrot.slane %v4322_v15, 7  ;;  %v5715_v33 = vmul.f32 -1.442695, %v9398_v6  ;;  %v9414_v31 = vadd.f32 %v5712_v1, %v4315_v5  ;;  %v5716_v37 = vmul.f32 -1.442695, %v9402_v19 }
 0x696   : > { %v5717_v56 = vmul.f32 -1.442695, %v9405_v54  ;;  %v9418_v30 = vadd.f32 %v5713_v11, %v4319_v4  ;;  %v5718_v20 = vmul.f32 -1.442695, %v9407_v29  ;;  %v5719_v41 = vmul.f32 -1.442695, %v9410_v49 }
 0x697   : > { %v9421_v60 = vadd.f32 %v5714_v47, %v4323_v40  ;;  %6115 = vpow2.f32 %v5715_v33  ;;  %v5720_v35 = vmul.f32 -1.442695, %v9414_v31 }
 0x698   : > { %6117 = vpow2.f32 %v5716_v37  ;;  %v5721_v25 = vmul.f32 -1.442695, %v9418_v30 }
 0x699   : > { %6119 = vpow2.f32 %v5717_v56  ;;  %v5722_v23 = vmul.f32 -1.442695, %v9421_v60 }
 0x69a   : > { %6121 = vpow2.f32 %v5718_v20 }
 0x69b   : > { %6123 = vpow2.f32 %v5719_v41 }
 0x69c   : > { %6125 = vpow2.f32 %v5720_v35 }
 0x69d   : > { %v6116_v24 = vpop.eup %6115  ;;  %6127 = vpow2.f32 %v5721_v25 }
 0x69e   : > { %v6118_v32 = vpop.eup %6117  ;;  %v4396_v39 = vadd.f32 1.0, %v6116_v24  ;;  %6129 = vpow2.f32 %v5722_v23 }
 0x69f   : > { %v6120_v27 = vpop.eup %6119  ;;  %v9427_v46 = vadd.f32 1.0, %v6118_v32 }
 0x6a0   : > { %v6122_v36 = vpop.eup %6121  ;;  %v9429_v58 = vadd.f32 1.0, %v6120_v27  ;;  %6131 = vrcp.f32 %v4396_v39  ;;  %v4413_v55 = vand.u32 2147483647, %v4396_v39  ;;  %v4415_v44 = vand.u32 2147483648, %v4396_v39 }
 0x6a1   : > { %v6124_v61 = vpop.eup %6123  ;;  %v9431_v8 = vadd.f32 1.0, %v6122_v36  ;;  %6133 = vrcp.f32 %v9427_v46  ;;  %v4428_v3 = vand.u32 2147483647, %v9427_v46  ;;  %v4430_v17 = vand.u32 2147483648, %v9427_v46 }
 0x6a2   : > { %v6126_v45 = vpop.eup %6125  ;;  %v9434_v52 = vadd.f32 1.0, %v6124_v61  ;;  %6135 = vrcp.f32 %v9429_v58  ;;  %vm4409_vm7 = vweird.f32 %v4396_v39  ;;  %vm4424_vm5 = vweird.f32 %v9427_v46 }
 0x6a3   : > { %v6128_v0 = vpop.eup %6127  ;;  %v9438_v18 = vadd.f32 1.0, %v6126_v45  ;;  %6137 = vrcp.f32 %v9431_v8  ;;  %v4443_v51 = vand.u32 2147483647, %v9429_v58  ;;  %vm9445_vm8 = vcmp.eq.f32.partialorder %v4413_v55, 8.507059e+37 }
 0x6a4   : > { %v6130_v59 = vpop.eup %6129  ;;  %6139 = vrcp.f32 %v9434_v52  ;;  %v4416_v2 = vor.u32 1.1754944e-38, %v4415_v44  ;;  %v4445_v7 = vand.u32 2147483648, %v9429_v58  ;;  %v9450_v57 = vadd.f32 1.0, %v6128_v0 }
 0x6a5   : > { %vm9453_vm11 = vcmp.eq.f32.partialorder %v4428_v3, 8.507059e+37  ;;  %vm4439_vm12 = vweird.f32 %v9429_v58  ;;  %v4458_v13 = vand.u32 2147483647, %v9431_v8  ;;  %v9459_v10 = vadd.f32 1.0, %v6130_v59 }
 0x6a6   : > { %v6132_v22 = vpop.eup %6131  ;;  %v4431_v5 = vor.u32 1.1754944e-38, %v4430_v17  ;;  %6141 = vrcp.f32 %v9438_v18  ;;  %vm9463_vm13 = vcmp.eq.f32.partialorder %v4443_v51, 8.507059e+37  ;;  %vm4454_vm14 = vweird.f32 %v9431_v8 }
 0x6a7   : > { %v6134_v38 = vpop.eup %6133  ;;  %v4405_v43 = vmul.f32 %v6132_v22, %v4396_v39  ;;  %vm4410_vm10 = vweird.f32 %v6132_v22  ;;  %v4460_v11 = vand.u32 2147483648, %v9431_v8  ;;  %v4446_v47 = vor.u32 1.1754944e-38, %v4445_v7 }
 0x6a8   : > { %v4420_v63 = vmul.f32 %v6134_v38, %v9427_v46  ;;  %v6136_v12 = vpop.eup %6135  ;;  %vm4425_vm15 = vweird.f32 %v6134_v38  ;;  %vm4469_vm4 = vweird.f32 %v9434_v52  ;;  %vm9471_vm9 = vcmp.eq.f32.partialorder %v4458_v13, 8.507059e+37  ;;  %vm4411_vm1 = vmor %vm4409_vm7, %vm4410_vm10 }
 0x6a9   : > { %v4406_v50 = vsub.f32 1.0, %v4405_v43  ;;  %v4435_v1 = vmul.f32 %v6136_v12, %v9429_v58  ;;  %v6138_v40 = vpop.eup %6137  ;;  %v4473_v24 = vand.u32 2147483647, %v9434_v52  ;;  %v4475_v32 = vand.u32 2147483648, %v9434_v52  ;;  %vm4426_vm2 = vmor %vm4424_vm5, %vm4425_vm15 }
 0x6aa   : > { %v4421_v15 = vsub.f32 1.0, %v4420_v63  ;;  %v6140_v37 = vpop.eup %6139  ;;  %v4450_v41 = vmul.f32 %v6138_v40, %v9431_v8  ;;  %vm4440_vm3 = vweird.f32 %v6136_v12  ;;  %vm4455_vm6 = vweird.f32 %v6138_v40 }
 0x6ab   : > { %v4407_v33 = vmul.f32 %v6132_v22, %v4406_v50  ;;  %v4436_v20 = vsub.f32 1.0, %v4435_v1  ;;  %v4465_v23 = vmul.f32 %v6140_v37, %v9434_v52  ;;  %6143 = vrcp.f32 %v9450_v57  ;;  %vm4441_vm7 = vmor %vm4439_vm12, %vm4440_vm3 }
 0x6ac   : > { %v4422_v56 = vmul.f32 %v6134_v38, %v4421_v15  ;;  %v4451_v61 = vsub.f32 1.0, %v4450_v41  ;;  %v6142_v45 = vpop.eup %6141  ;;  %vm4470_vm5 = vweird.f32 %v6140_v37  ;;  %v4461_v26 = vor.u32 1.1754944e-38, %v4460_v11 }
 0x6ad   : > { %v4408_v25 = vadd.f32 %v6132_v22, %v4407_v33  ;;  %v4437_v36 = vmul.f32 %v6136_v12, %v4436_v20  ;;  %v4466_v44 = vsub.f32 1.0, %v4465_v23  ;;  %v4476_v7 = vor.u32 1.1754944e-38, %v4475_v32  ;;  %vm4471_vm12 = vmor %vm4469_vm4, %vm4470_vm5 }
 0x6ae   : > { %v4423_v27 = vadd.f32 %v6134_v38, %v4422_v56  ;;  %v4452_v59 = vmul.f32 %v6138_v40, %v4451_v61  ;;  %v4488_v13 = vand.u32 2147483647, %v9438_v18  ;;  %6145 = vrcp.f32 %v9459_v10 }
 0x6af   : > { %v4412_v55 = vsel %vm4411_vm1, %v6132_v22, %v4408_v25  ;;  %v4438_v3 = vadd.f32 %v6136_v12, %v4437_v36  ;;  %v4467_v46 = vmul.f32 %v6140_v37, %v4466_v44  ;;  %v4480_v22 = vmul.f32 %v6142_v45, %v9438_v18 }
 0x6b0   : > { %v9486_v0 = vsel %vm9445_vm8, %v4416_v2, %v4412_v55  ;;  %v4427_v39 = vsel %vm4426_vm2, %v6134_v38, %v4423_v27  ;;  %v4453_v43 = vadd.f32 %v6138_v40, %v4452_v59  ;;  %vm9496_vm8 = vcmp.eq.f32.partialorder %v4473_v24, 8.507059e+37 }
 0x6b1   : > { %v9490_v17 = vsel %vm9453_vm11, %v4431_v5, %v4427_v39  ;;  %4532 = vst [vmem:[#allocation1] ss:$9 sm:$0xff] %v9486_v0  ;;  %v4442_v51 = vsel %vm4441_vm7, %v6136_v12, %v4438_v3  ;;  %vm4456_vm11 = vmor %vm4454_vm14, %vm4455_vm6  ;;  %v4468_v58 = vadd.f32 %v6140_v37, %v4467_v46  ;;  %v4481_v63 = vsub.f32 1.0, %v4480_v22  ;;  %v6144_v50 = vpop.eup %6143 }
 0x6b2   : > { %4534 = vst [vmem:[#allocation1 + $0x1] ss:$9 sm:$0xff] %v9490_v17  ;;  %v9503_v2 = vsel %vm9463_vm13, %v4446_v47, %v4442_v51  ;;  %v4457_v53 = vsel %vm4456_vm11, %v6138_v40, %v4453_v43  ;;  %v4490_v12 = vand.u32 2147483648, %v9438_v18  ;;  %vm4485_vm10 = vweird.f32 %v6142_v45 }
 0x6b3   : > { %4536 = vst [vmem:[#allocation1 + $0x2] ss:$9 sm:$0xff] %v9503_v2  ;;  %v9516_v8 = vsel %vm9471_vm9, %v4461_v26, %v4457_v53  ;;  %v4472_v5 = vsel %vm4471_vm12, %v6140_v37, %v4468_v58  ;;  %v4482_v15 = vmul.f32 %v6142_v45, %v4481_v63  ;;  %v4495_v1 = vmul.f32 %v6144_v50, %v9450_v57 }
 0x6b4   : > { %v9520_v52 = vsel %vm9496_vm8, %v4476_v7, %v4472_v5  ;;  %4538 = vst [vmem:[#allocation1 + $0x3] ss:$9 sm:$0xff] %v9516_v8  ;;  %vm4484_vm13 = vweird.f32 %v9438_v18  ;;  %v4491_v11 = vor.u32 1.1754944e-38, %v4490_v12  ;;  %vm4489_vm15 = vcmp.eq.f32.partialorder %v4488_v13, 8.507059e+37  ;;  %v6146_v37 = vpop.eup %6145  ;;  %v4648_v5 = vpop.permute.xlu0 %4647 }
 0x6b5   : > { %v4483_v4 = vadd.f32 %v6142_v45, %v4482_v15  ;;  %4540 = vst [vmem:[#allocation1 + $0x4] ss:$9 sm:$0xff] %v9520_v52  ;;  %vm4486_vm14 = vmor %vm4484_vm13, %vm4485_vm10  ;;  %v4496_v40 = vsub.f32 1.0, %v4495_v1  ;;  %v4505_v47 = vand.u32 2147483648, %v9450_v57  ;;  %vm4500_vm4 = vweird.f32 %v6144_v50  ;;  %v4653_v15 = vpop.permute.xlu1 %4652  ;;  %v9558_v1 = vpop.permute.xlu2 %4642 }
 0x6b6   : > { %v4503_v41 = vand.u32 2147483647, %v9450_v57  ;;  %v4510_v35 = vmul.f32 %v6146_v37, %v9459_v10  ;;  %vm4499_vm9 = vweird.f32 %v9450_v57  ;;  %v4520_v32 = vand.u32 2147483648, %v9459_v10 }
 0x6b7   : > { %v4487_v33 = vsel %vm4486_vm14, %v6142_v45, %v4483_v4  ;;  %v4497_v20 = vmul.f32 %v6144_v50, %v4496_v40  ;;  %vm4501_vm1 = vmor %vm4499_vm9, %vm4500_vm4  ;;  %v4506_v25 = vor.u32 1.1754944e-38, %v4505_v47  ;;  %vm4515_vm2 = vweird.f32 %v6146_v37 }
 0x6b8   : > { %v9527_v56 = vsel %vm4489_vm15, %v4491_v11, %v4487_v33  ;;  %v4511_v23 = vsub.f32 1.0, %v4510_v35  ;;  %vm4504_vm3 = vcmp.eq.f32.partialorder %v4503_v41, 8.507059e+37  ;;  %v4518_v61 = vand.u32 2147483647, %v9459_v10 }
 0x6b9   : > { %4542 = vst [vmem:[#allocation1 + $0x5] ss:$9 sm:$0xff] %v9527_v56  ;;  %v4498_v18 = vadd.f32 %v6144_v50, %v4497_v20  ;;  %v4348_v45 = vrot.slane %v9398_v6, 3  ;;  %v4349_v55 = vrot.slane %v9402_v19, 3  ;;  %vm4514_vm6 = vweird.f32 %v9459_v10 }
 0x6ba   : > { %v4512_v36 = vmul.f32 %v6146_v37, %v4511_v23  ;;  %v4350_v44 = vrot.slane %v9405_v54, 3  ;;  %vm4516_vm7 = vmor %vm4514_vm6, %vm4515_vm2  ;;  %v4521_v39 = vor.u32 1.1754944e-38, %v4520_v32  ;;  %v4351_v3 = vrot.slane %v9407_v29, 3 }
 0x6bb   : > { %v4502_v24 = vsel %vm4501_vm1, %v6144_v50, %v4498_v18  ;;  %vm4519_vm5 = vcmp.eq.f32.partialorder %v4518_v61, 8.507059e+37  ;;  %v4352_v46 = vrot.slane %v9410_v49, 3  ;;  %6147 = vtanh.f32 %v4348_v45 }
 0x6bc   : > { %v9534_v27 = vsel %vm4504_vm3, %v4506_v25, %v4502_v24  ;;  %v4513_v57 = vadd.f32 %v6146_v37, %v4512_v36  ;;  %v4353_v6 = vrot.slane %v9414_v31, 3  ;;  %6149 = vtanh.f32 %v4349_v55  ;;  %v4658_v20 = vpop.permute.xlu0 %4657 }
 0x6bd   : > { %4544 = vst [vmem:[#allocation1 + $0x6] ss:$9 sm:$0xff] %v9534_v27  ;;  %v4354_v19 = vrot.slane %v9418_v30, 3  ;;  %6151 = vtanh.f32 %v4350_v44  ;;  %v4355_v54 = vrot.slane %v9421_v60, 3  ;;  %v4585_v47 = vrot.slane %v9486_v0, 2  ;;  %v4663_v23 = vpop.permute.xlu1 %4662 }
 0x6be   : > { %v4517_v59 = vsel %vm4516_vm7, %v6146_v37, %v4513_v57  ;;  %6153 = vtanh.f32 %v4351_v3  ;;  %v4586_v37 = vrot.slane %v9490_v17, 2  ;;  %v4587_v24 = vrot.slane %v9503_v2, 2  ;;  %v4668_v57 = vpop.permute.xlu2 %4667 }
 0x6bf   : > { %v9544_v22 = vsel %vm4519_vm5, %v4521_v39, %v4517_v59  ;;  %6155 = vtanh.f32 %v4352_v46  ;;  %v4588_v32 = vrot.slane %v9516_v8, 2  ;;  %v4589_v36 = vrot.slane %v9520_v52, 2 }
 0x6c0   : > { %4546 = vst [vmem:[#allocation1 + $0x7] ss:$9 sm:$0xff] %v9544_v22  ;;  %6157 = vtanh.f32 %v4353_v6  ;;  %v4590_v45 = vrot.slane %v9527_v56, 2  ;;  %v4591_v55 = vrot.slane %v9534_v27, 2  ;;  %vm10610_vm8 = vcmask 1042434  }
 0x6c1   : > { %v6148_v29 = vpop.eup %6147  ;;  %6159 = vtanh.f32 %v4354_v19  ;;  %vm10611_vm11 = vcmask 1043459   ;;  %vm10612_vm12 = vmmov %vm10610_vm8  ;;  %vm10613_vm10 = vcmask 1044484   ;;  %vm10615_vm14 = vcmask 1045509  }
 0x6c2   : > { %v6150_v10 = vpop.eup %6149  ;;  %6161 = vtanh.f32 %v4355_v54  ;;  %v4550_v49 = vmul.f32 %v6148_v29, %v9486_v0  ;;  %v4592_v0 = vrot.slane %v9544_v22, 2  ;;  %vm10614_vm13 = vmmov %vm10611_vm11  ;;  %vm10617_vm4 = vcmask 1046534  }
 0x6c3   : > { %v6152_v51 = vpop.eup %6151  ;;  %v4551_v31 = vmul.f32 %v6150_v10, %v9490_v17  ;;  %vm10616_vm15 = vmmov %vm10613_vm10  ;;  %vm10619_vm1 = vcmask 1047559  }
 0x6c4   : > { %v6154_v26 = vpop.eup %6153  ;;  %v4552_v38 = vmul.f32 %v6152_v51, %v9503_v2  ;;  %vm10618_vm9 = vmmov %vm10615_vm14 }
 0x6c5   : > { %v6156_v30 = vpop.eup %6155  ;;  %v4553_v60 = vmul.f32 %v6154_v26, %v9516_v8  ;;  %vm10620_vm3 = vmmov %vm10617_vm4 }
 0x6c6   : > { %v6158_v58 = vpop.eup %6157  ;;  %v4554_v7 = vmul.f32 %v6156_v30, %v9520_v52  ;;  %vm10621_vm2 = vmmov %vm10619_vm1 }
 0x6c7   : > { %v4547_v43 = vld [vmem:[#allocation1 + $0x9] sm:$0xff]  ;;  %v6160_v63 = vpop.eup %6159  ;;  %v4555_v53 = vmul.f32 %v6158_v58, %v9527_v56  ;;  %vm10622_vm6 = vmmov %vm10611_vm11 }
 0x6c8   : > { %4566 = vst [vmem:[#allocation1] ss:$9 sm:$0xff] %v4550_v49  ;;  %v6162_v13 = vpop.eup %6161  ;;  %v4556_v12 = vmul.f32 %v6160_v63, %v9534_v27  ;;  %v4549_v4 = vmul.f32 %v4547_v43, %v9315_v48  ;;  %vm10623_vm7 = vmmov %vm10613_vm10 }
 0x6c9   : > { %4568 = vst [vmem:[#allocation1 + $0x1] ss:$9 sm:$0xff] %v4551_v31  ;;  %v4557_v50 = vmul.f32 %v6162_v13, %v9544_v22  ;;  %vm10624_vm5 = vmmov %vm10618_vm9 }
 0x6ca   : > { %4570 = vst [vmem:[#allocation1 + $0x2] ss:$9 sm:$0xff] %v4552_v38 }
 0x6cb   : > { %4572 = vst [vmem:[#allocation1 + $0x3] ss:$9 sm:$0xff] %v4553_v60 }
 0x6cc   : > { %4574 = vst [vmem:[#allocation1 + $0x4] ss:$9 sm:$0xff] %v4554_v7 }
 0x6cd   : > { %4576 = vst [vmem:[#allocation1 + $0x5] ss:$9 sm:$0xff] %v4555_v53 }
 0x6ce   : > { %4578 = vst [vmem:[#allocation1 + $0x6] ss:$9 sm:$0xff] %v4556_v12  ;;  %v4673_v12 = vpop.permute.xlu0 %4672 }
 0x6cf   : > { %4580 = vst [vmem:[#allocation1 + $0x7] ss:$9 sm:$0xff] %v4557_v50 }
 0x6d6   : > { %v4581_v11 = vld [vmem:[#allocation1] sm:$0xff] }
 0x6d7   : > { %v4583_v40 = vadd.f32 %v4581_v11, %v4549_v4 }
 0x6d9   : > { %6163 = vtanh.f32 %v4583_v40  ;;  %v4712_v33 = vsub.f32 %v4583_v40, %v9315_v48  ;;  %v4678_v40 = vpop.permute.xlu1 %4677 }
 0x6db   : > { %v4714_v41 = vrot.slane %v4712_v33, 1  ;;  %v4715_v35 = vrot.slane %v4712_v33, 2  ;;  %v4716_v18 = vrot.slane %v4712_v33, 3  ;;  %v4717_v25 = vrot.slane %v4712_v33, 4 }
 0x6dc   : > { %v4718_v61 = vrot.slane %v4712_v33, 5  ;;  %v4719_v44 = vrot.slane %v4712_v33, 6  ;;  %v4720_v39 = vrot.slane %v4712_v33, 7  ;;  %v4729_v3 = vmul.f32 %v4712_v33, %v9558_v1 }
 0x6dd   : > { %v4730_v17 = vmul.f32 %v4714_v41, %v4648_v5  ;;  %v4731_v59 = vmul.f32 %v4715_v35, %v4653_v15  ;;  %v4732_v2 = vmul.f32 %v4716_v18, %v4658_v20  ;;  %v4733_v6 = vmul.f32 %v4717_v25, %v4663_v23 }
 0x6de   : > { %v4734_v8 = vmul.f32 %v4718_v61, %v4668_v57  ;;  %v4736_v41 = vmul.f32 %v4720_v39, %v4678_v40 }
 0x6df   : > { %v6164_v46 = vpop.eup %6163  ;;  %v4745_v19 = vrot.slane %v4730_v17, 7  ;;  %v4749_v35 = vrot.slane %v4732_v2, 5 }
 0x6e0   : > { %v4602_v52 = vrot.slane %v6164_v46, 1  ;;  %v4603_v54 = vrot.slane %v6164_v46, 2  ;;  %v4604_v29 = vrot.slane %v6164_v46, 3  ;;  %v4605_v56 = vrot.slane %v6164_v46, 4 }
 0x6e1   : > { %v4606_v10 = vrot.slane %v6164_v46, 5  ;;  %v4607_v27 = vrot.slane %v6164_v46, 6  ;;  %v4608_v49 = vrot.slane %v6164_v46, 7  ;;  %v4616_v22 = vmul.f32 %v6164_v46, %v4585_v47 }
 0x6e2   : > { %v4617_v51 = vmul.f32 %v4602_v52, %v4586_v37  ;;  %v4618_v43 = vmul.f32 %v4603_v54, %v4587_v24  ;;  %v4619_v31 = vmul.f32 %v4604_v29, %v4588_v32  ;;  %v4620_v26 = vmul.f32 %v4605_v56, %v4589_v36 }
 0x6e3   : > { %v4621_v38 = vmul.f32 %v4606_v10, %v4590_v45  ;;  %v4622_v30 = vmul.f32 %v4607_v27, %v4591_v55  ;;  %v4623_v60 = vmul.f32 %v4608_v49, %v4592_v0  ;;  %v4632_v58 = vsub.f32 %v4616_v22, %v9319_v28 }
 0x6e4   : > { %v4633_v7 = vsub.f32 %v4617_v51, %v4145_v16  ;;  %v4634_v63 = vsub.f32 %v4618_v43, %v4146_v62  ;;  %v4635_v53 = vsub.f32 %v4619_v31, %v4147_v9  ;;  %v4636_v13 = vsub.f32 %v4620_v26, %v4148_v34 }
 0x6e5   : > { %v4637_v50 = vsub.f32 %v4621_v38, %v4149_v42  ;;  %v4638_v4 = vsub.f32 %v4622_v30, %v4150_v14  ;;  %v4639_v11 = vsub.f32 %v4623_v60, %v4151_v21  ;;  %v4747_v16 = vrot.slane %v4731_v59, 6 }
 0x6e6   : > { %v4681_v33 = vmul.f32 %v4648_v5, %v4633_v7  ;;  %v4682_v62 = vmul.f32 %v4653_v15, %v4634_v63  ;;  %v4683_v47 = vmul.f32 %v4658_v20, %v4635_v53  ;;  %v4735_v37 = vmul.f32 %v4719_v44, %v4673_v12 }
 0x6e7   : > { %v4684_v9 = vmul.f32 %v4663_v23, %v4636_v13  ;;  %v4746_v34 = vsel %vm565_vm0, %v4745_v19, %v4729_v3  ;;  %v4680_v18 = vmul.f32 %v9558_v1, %v4632_v58  ;;  %v4685_v42 = vmul.f32 %v4668_v57, %v4637_v50 }
 0x6e8   : > { %v4696_v25 = vrot.slane %v4681_v33, 7  ;;  %v4698_v24 = vrot.slane %v4682_v62, 6  ;;  %v4686_v14 = vmul.f32 %v4673_v12, %v4638_v4  ;;  %v4687_v32 = vmul.f32 %v4678_v40, %v4639_v11 }
 0x6e9   : > { %v4748_v21 = vsel %vm10610_vm8, %v4747_v16, %v4746_v34  ;;  %v4751_v36 = vrot.slane %v4733_v6, 4  ;;  %v4700_v15 = vrot.slane %v4683_v47, 5  ;;  %v4753_v23 = vrot.slane %v4734_v8, 3 }
 0x6ea   : > { %v4697_v5 = vsel %vm565_vm0, %v4696_v25, %v4680_v18  ;;  %v4750_v20 = vsel %vm10611_vm11, %v4749_v35, %v4748_v21  ;;  %v4702_v45 = vrot.slane %v4684_v9, 4  ;;  %v4755_v1 = vrot.slane %v4735_v37, 2  ;;  %vm10625_vm11 = vmmov %vm10610_vm8  ;;  %v5723_v25 = vld [vmem:[%s6723_s15 + $0x7] ss:$8 sm:$0xf] }
 0x6eb   : > { %v4699_v61 = vsel %vm10612_vm12, %v4698_v24, %v4697_v5  ;;  %v4752_v55 = vsel %vm10613_vm10, %v4751_v36, %v4750_v20  ;;  %v4704_v17 = vrot.slane %v4685_v42, 3  ;;  %v4757_v44 = vrot.slane %v4736_v41, 1  ;;  %vm10627_vm10 = vmmov %vm10620_vm3  ;;  %v5724_v36 = vld [vmem:[%s6723_s15 + $0x27] ss:$8 sm:$0xf] }
 0x6ec   : > { %v4701_v0 = vsel %vm10614_vm13, %v4700_v15, %v4699_v61  ;;  %v4754_v57 = vsel %vm10615_vm14, %v4753_v23, %v4752_v55  ;;  %v4706_v3 = vrot.slane %v4686_v14, 2  ;;  %v4708_v2 = vrot.slane %v4687_v32, 1  ;;  %vm10628_vm13 = vmmov %vm10622_vm6  ;;  %v5725_v61 = vld [vmem:[%s6723_s15 + $0x47] ss:$8 sm:$0xf] }
 0x6ed   : > { %v4703_v39 = vsel %vm10616_vm15, %v4702_v45, %v4701_v0  ;;  %v4756_v59 = vsel %vm10617_vm4, %v4755_v1, %v4754_v57  ;;  %vm10626_vm12 = vcmask 1042433   ;;  %vm10629_vm14 = vcmask 1043458   ;;  %v5726_v1 = vld [vmem:[%s6723_s15 + $0x67] ss:$8 sm:$0xf] }
 0x6ee   : > { %v4705_v46 = vsel %vm10618_vm9, %v4704_v17, %v4703_v39  ;;  %v4758_v6 = vsel %vm10619_vm1, %v4757_v44, %v4756_v59  ;;  %vm10630_vm15 = vcmask 1046528   ;;  %vm10631_vm4 = vcmask 1040384   ;;  %vm10632_vm9 = vmmov %vm10623_vm7  ;;  %v5727_v44 = vld [vmem:[%s6723_s15 + $0x87] ss:$8 sm:$0xf] }
 0x6ef   : > { %v4707_v8 = vsel %vm10620_vm3, %v4706_v3, %v4705_v46  ;;  %v9601_v19 = vadd.f32 %v4758_v6, %v9315_v48  ;;  %vm10633_vm1 = vmmov %vm10624_vm5  ;;  %vm10634_vm3 = vcmask 1044483   ;;  %v5728_v46 = vld [vmem:[%s6723_s15 + $0xa7] ss:$8 sm:$0xf] }
 0x6f0   : > { %v4709_v52 = vsel %vm10621_vm2, %v4708_v2, %v4707_v8  ;;  %vm10635_vm2 = vcmask 1041408  }
 0x6f1   : > { %v9605_v54 = vadd.f32 %v4709_v52, %v9319_v28  ;;  %v4785_v29 = vrot.slane %v9601_v19, 1  ;;  %v4786_v56 = vrot.slane %v9601_v19, 2  ;;  %4799 = vst [vmem:[%s6738_s18 + $0x6] sm:$0x1] %v9601_v19  ;;  %v4787_v10 = vrot.slane %v9601_v19, 3 }
 0x6f2   : > { %v4788_v48 = vrot.slane %v9601_v19, 4  ;;  %v4789_v28 = vrot.slane %v9601_v19, 5  ;;  %v4790_v27 = vrot.slane %v9601_v19, 6  ;;  %v4791_v49 = vrot.slane %v9601_v19, 7 }
 0x6f3   : > { %4776 = vst [vmem:[%s6736_s17 + $0x6] sm:$0x1] %v9605_v54  ;;  %4839 = vmatmul.f32.vlgmr.msrb.gmra.mxu0 %v9605_v54  ;;  %4859 = vmatmul.f32.vlgmr.msrb.gmra.mxu1 %v9605_v54  ;;  %v4762_v22 = vrot.slane %v9605_v54, 1  ;;  %v4763_v51 = vrot.slane %v9605_v54, 2  ;;  %v4764_v43 = vrot.slane %v9605_v54, 3  ;;  %v4765_v31 = vrot.slane %v9605_v54, 4 }
 0x6f4   : > { %4800 = vst [vmem:[%s6738_s18 + $0xe] sm:$0x1] %v4785_v29  ;;  %4879 = vmatmul.f32.vlgmr.msrb.gmra.mxu2 %v9605_v54  ;;  %4899 = vmatmul.f32.vlgmr.msrb.gmra.mxu3 %v9605_v54  ;;  %v4766_v26 = vrot.slane %v9605_v54, 5  ;;  %v4767_v38 = vrot.slane %v9605_v54, 6  ;;  %v4768_v30 = vrot.slane %v9605_v54, 7 }
 0x6f5   : > { %4801 = vst [vmem:[%s6738_s18 + $0x16] sm:$0x1] %v4786_v56  ;;  %v5729_v52 = vld [vmem:[%s6723_s15 + $0xc7] ss:$8 sm:$0xf] }
 0x6f6   : > { %4802 = vst [vmem:[%s6738_s18 + $0x1e] sm:$0x1] %v4787_v10 }
 0x6f7   : > { %4803 = vst [vmem:[%s6738_s18 + $0x26] sm:$0x1] %v4788_v48  ;;  %v5730_v48 = vld [vmem:[%s6723_s15 + $0xe7] ss:$8 sm:$0xf]  ;;  %s5461_s15 = sshll.u32 %s5458_s19, 4  ;;  %s9919_s15 = int_to_ptr.hbm [resolvable:$true] %s5461_s15 }
 0x6f8   : > { %4804 = vst [vmem:[%s6738_s18 + $0x2e] sm:$0x1] %v4789_v28 }
 0x6f9   : > { %4805 = vst [vmem:[%s6738_s18 + $0x36] sm:$0x1] %v4790_v27 }
 0x6fa   : > { %4806 = vst [vmem:[%s6738_s18 + $0x3e] sm:$0x1] %v4791_v49 }
 0x6fb   : > { %4777 = vst [vmem:[%s6736_s17 + $0xe] sm:$0x1] %v4762_v22 }
 0x6fc   : > { %4778 = vst [vmem:[%s6736_s17 + $0x16] sm:$0x1] %v4763_v51 }
 0x6fd   : > { %4779 = vst [vmem:[%s6736_s17 + $0x1e] sm:$0x1] %v4764_v43 }
 0x6fe   : > { %4780 = vst [vmem:[%s6736_s17 + $0x26] sm:$0x1] %v4765_v31 }
 0x6ff   : > { %4781 = vst [vmem:[%s6736_s17 + $0x2e] sm:$0x1] %v4766_v26 }
 0x700   : > { %4782 = vst [vmem:[%s6736_s17 + $0x36] sm:$0x1] %v4767_v38 }
 0x701   : > { %4783 = vst [vmem:[%s6736_s17 + $0x3e] sm:$0x1] %v4768_v30 }
 0x770   : > { %v4860_v60 = vpop.f32.mrf.mxu1  ;;  %v4840_v50 = vpop.f32.mrf.mxu0 }
 0x771   : > { %v4907_v63 = vrot.slane %v4860_v60, 7 }
 0x773   : > { %v4913_v11 = vsel %vm565_vm0, %v4840_v50, %v4907_v63  ;;  %v4917_v40 = vsel %vm10610_vm8, %v4840_v50, %v4907_v63  ;;  %v4921_v37 = vsel %vm10628_vm13, %v4840_v50, %v4907_v63  ;;  %v4910_v34 = vsel %vm10631_vm4, %v4840_v50, %v4907_v63  ;;  %vm10639_vm8 = vmmov %vm10627_vm10 }
 0x774   : > { %v4925_v35 = vsel %vm10632_vm9, %v4840_v50, %v4907_v63  ;;  %v4929_v18 = vsel %vm10633_vm1, %v4840_v50, %v4907_v63  ;;  %v4933_v23 = vsel %vm10639_vm8, %v4840_v50, %v4907_v63 }
 0x777   : > { %v4880_v58 = vpop.f32.mrf.mxu2  ;;  %v4900_v7 = vpop.f32.mrf.mxu3 }
 0x778   : > { %v4908_v53 = vrot.slane %v4880_v58, 6  ;;  %v4909_v13 = vrot.slane %v4900_v7, 5 }
 0x77a   : > { %v4914_v12 = vsel %vm10622_vm6, %v4908_v53, %v4909_v13  ;;  %v4918_v4 = vsel %vm10623_vm7, %v4908_v53, %v4909_v13  ;;  %v4922_v16 = vsel %vm10624_vm5, %v4908_v53, %v4909_v13  ;;  %v4911_v33 = vsel %vm10625_vm11, %v4908_v53, %v4909_v13  ;;  %vm10637_vm7 = vmmov %vm10631_vm4 }
 0x77b   : > { %v4915_v62 = vsel %vm10626_vm12, %v4913_v11, %v4914_v12  ;;  %v4926_v47 = vsel %vm10627_vm10, %v4908_v53, %v4909_v13  ;;  %v4919_v9 = vsel %vm10629_vm14, %v4917_v40, %v4918_v4  ;;  %v4930_v41 = vsel %vm10630_vm15, %v4909_v13, %v4908_v53  ;;  %vm10640_vm11 = vmmov %vm10630_vm15 }
 0x77c   : > { %v4923_v42 = vsel %vm10634_vm3, %v4921_v37, %v4922_v16  ;;  %v4912_v24 = vsel %vm10635_vm2, %v4910_v34, %v4911_v33  ;;  %v4916_v14 = vrot.slane %v4915_v62, 1  ;;  %vm10636_vm6 = vcmask 1045508  }
 0x77d   : > { %v4927_v32 = vsel %vm10636_vm6, %v4925_v35, %v4926_v47  ;;  %v4934_v21 = vsel %vm10637_vm7, %v4908_v53, %v4909_v13  ;;  %v4920_v5 = vrot.slane %v4919_v9, 2  ;;  %vm10638_vm5 = vcmask 1046533  }
 0x77e   : > { %v4931_v15 = vsel %vm10638_vm5, %v4929_v18, %v4930_v41  ;;  %v4938_v20 = vsel %vm565_vm0, %v4908_v53, %v4909_v13  ;;  %v4924_v45 = vrot.slane %v4923_v42, 3  ;;  %v4937_v55 = vsel %vm10640_vm11, %v4907_v63, %v4840_v50 }
 0x77f   : > { %v4928_v0 = vrot.slane %v4927_v32, 4  ;;  %vm10641_vm12 = vcmask 1045504   ;;  %v9684_v57 = vadd.f32 %v5723_v25, %v4912_v24  ;;  %v4932_v39 = vrot.slane %v4931_v15, 5 }
 0x780   : > { %v4935_v17 = vsel %vm10641_vm12, %v4934_v21, %v4933_v23  ;;  %vm10642_vm10 = vcmask 1046529   ;;  %v9688_v59 = vadd.f32 %v5724_v36, %v4916_v14  ;;  %v9691_v2 = vadd.f32 %v5725_v61, %v4920_v5 }
 0x781   : > { %v4939_v3 = vsel %vm10642_vm10, %v4938_v20, %v4937_v55  ;;  %v4936_v6 = vrot.slane %v4935_v17, 6  ;;  %v9693_v8 = vadd.f32 %v5726_v1, %v4924_v45  ;;  %v9696_v56 = vadd.f32 %v5727_v44, %v4928_v0 }
 0x782   : > { %v4940_v29 = vrot.slane %v4939_v3, 7  ;;  %v5731_v10 = vmul.f32 -1.442695, %v9684_v57  ;;  %v9700_v28 = vadd.f32 %v5728_v46, %v4932_v39  ;;  %v5732_v27 = vmul.f32 -1.442695, %v9688_v59 }
 0x783   : > { %v5733_v49 = vmul.f32 -1.442695, %v9691_v2  ;;  %v9704_v60 = vadd.f32 %v5729_v52, %v4936_v6  ;;  %v5734_v58 = vmul.f32 -1.442695, %v9693_v8  ;;  %v5735_v63 = vmul.f32 -1.442695, %v9696_v56 }
 0x784   : > { %v9707_v7 = vadd.f32 %v5730_v48, %v4940_v29  ;;  %6165 = vpow2.f32 %v5731_v10  ;;  %v5736_v53 = vmul.f32 -1.442695, %v9700_v28 }
 0x785   : > { %6167 = vpow2.f32 %v5732_v27  ;;  %v5737_v13 = vmul.f32 -1.442695, %v9704_v60 }
 0x786   : > { %6169 = vpow2.f32 %v5733_v49  ;;  %v5738_v12 = vmul.f32 -1.442695, %v9707_v7 }
 0x787   : > { %6171 = vpow2.f32 %v5734_v58 }
 0x788   : > { %6173 = vpow2.f32 %v5735_v63 }
 0x789   : > { %6175 = vpow2.f32 %v5736_v53 }
 0x78a   : > { %v6166_v50 = vpop.eup %6165  ;;  %6177 = vpow2.f32 %v5737_v13 }
 0x78b   : > { %v6168_v4 = vpop.eup %6167  ;;  %v5013_v11 = vadd.f32 1.0, %v6166_v50  ;;  %6179 = vpow2.f32 %v5738_v12 }
 0x78c   : > { %v6170_v16 = vpop.eup %6169  ;;  %v9713_v40 = vadd.f32 1.0, %v6168_v4 }
 0x78d   : > { %v6172_v33 = vpop.eup %6171  ;;  %v9715_v62 = vadd.f32 1.0, %v6170_v16  ;;  %6181 = vrcp.f32 %v5013_v11  ;;  %v5030_v34 = vand.u32 2147483647, %v5013_v11  ;;  %v5032_v35 = vand.u32 2147483648, %v5013_v11 }
 0x78e   : > { %v6174_v47 = vpop.eup %6173  ;;  %v9717_v37 = vadd.f32 1.0, %v6172_v33  ;;  %6183 = vrcp.f32 %v9713_v40  ;;  %v5045_v42 = vand.u32 2147483647, %v9713_v40  ;;  %v5047_v14 = vand.u32 2147483648, %v9713_v40 }
 0x78f   : > { %v6176_v9 = vpop.eup %6175  ;;  %v9720_v41 = vadd.f32 1.0, %v6174_v47  ;;  %6185 = vrcp.f32 %v9715_v62  ;;  %vm5026_vm13 = vweird.f32 %v5013_v11  ;;  %vm5041_vm14 = vweird.f32 %v9713_v40 }
 0x790   : > { %v6178_v18 = vpop.eup %6177  ;;  %v9724_v24 = vadd.f32 1.0, %v6176_v9  ;;  %6187 = vrcp.f32 %v9717_v37  ;;  %v5060_v21 = vand.u32 2147483647, %v9715_v62  ;;  %vm9731_vm15 = vcmp.eq.f32.partialorder %v5030_v34, 8.507059e+37 }
 0x791   : > { %v6180_v25 = vpop.eup %6179  ;;  %6189 = vrcp.f32 %v9720_v41  ;;  %v5033_v20 = vor.u32 1.1754944e-38, %v5032_v35  ;;  %v5062_v23 = vand.u32 2147483648, %v9715_v62  ;;  %v9736_v61 = vadd.f32 1.0, %v6178_v18 }
 0x792   : > { %vm9739_vm4 = vcmp.eq.f32.partialorder %v5045_v42, 8.507059e+37  ;;  %vm5056_vm9 = vweird.f32 %v9715_v62  ;;  %v5075_v1 = vand.u32 2147483647, %v9717_v37  ;;  %v9745_v17 = vadd.f32 1.0, %v6180_v25 }
 0x793   : > { %v6182_v32 = vpop.eup %6181  ;;  %v5048_v39 = vor.u32 1.1754944e-38, %v5047_v14  ;;  %6191 = vrcp.f32 %v9724_v24  ;;  %vm9749_vm3 = vcmp.eq.f32.partialorder %v5060_v21, 8.507059e+37  ;;  %vm5071_vm2 = vweird.f32 %v9717_v37 }
 0x794   : > { %v6184_v36 = vpop.eup %6183  ;;  %v5022_v5 = vmul.f32 %v6182_v32, %v5013_v11  ;;  %vm5027_vm1 = vweird.f32 %v6182_v32  ;;  %v5077_v52 = vand.u32 2147483648, %v9717_v37  ;;  %v5063_v48 = vor.u32 1.1754944e-38, %v5062_v23 }
 0x795   : > { %v5037_v45 = vmul.f32 %v6184_v36, %v9713_v40  ;;  %v6186_v0 = vpop.eup %6185  ;;  %vm5042_vm6 = vweird.f32 %v6184_v36  ;;  %vm5086_vm7 = vweird.f32 %v9720_v41  ;;  %vm9757_vm5 = vcmp.eq.f32.partialorder %v5075_v1, 8.507059e+37  ;;  %vm5028_vm8 = vmor %vm5026_vm13, %vm5027_vm1 }
 0x796   : > { %v5023_v44 = vsub.f32 1.0, %v5022_v5  ;;  %v5052_v46 = vmul.f32 %v6186_v0, %v9715_v62  ;;  %v6188_v29 = vpop.eup %6187  ;;  %v5090_v50 = vand.u32 2147483647, %v9720_v41  ;;  %v5092_v4 = vand.u32 2147483648, %v9720_v41  ;;  %vm5043_vm12 = vmor %vm5041_vm14, %vm5042_vm6 }
 0x797   : > { %v5038_v3 = vsub.f32 1.0, %v5037_v45  ;;  %v6190_v27 = vpop.eup %6189  ;;  %v5067_v63 = vmul.f32 %v6188_v29, %v9717_v37  ;;  %vm5057_vm11 = vweird.f32 %v6186_v0  ;;  %vm5072_vm10 = vweird.f32 %v6188_v29 }
 0x798   : > { %v5024_v10 = vmul.f32 %v6182_v32, %v5023_v44  ;;  %v5053_v58 = vsub.f32 1.0, %v5052_v46  ;;  %v5082_v12 = vmul.f32 %v6190_v27, %v9720_v41  ;;  %6193 = vrcp.f32 %v9736_v61  ;;  %vm5058_vm13 = vmor %vm5056_vm9, %vm5057_vm11 }
 0x799   : > { %v5039_v49 = vmul.f32 %v6184_v36, %v5038_v3  ;;  %v5068_v47 = vsub.f32 1.0, %v5067_v63  ;;  %v6192_v9 = vpop.eup %6191  ;;  %vm5087_vm14 = vweird.f32 %v6190_v27  ;;  %v5078_v15 = vor.u32 1.1754944e-38, %v5077_v52 }
 0x79a   : > { %v5025_v13 = vadd.f32 %v6182_v32, %v5024_v10  ;;  %v5054_v33 = vmul.f32 %v6186_v0, %v5053_v58  ;;  %v5083_v35 = vsub.f32 1.0, %v5082_v12  ;;  %v5093_v23 = vor.u32 1.1754944e-38, %v5092_v4  ;;  %vm5088_vm9 = vmor %vm5086_vm7, %vm5087_vm14 }
 0x79b   : > { %v5040_v16 = vadd.f32 %v6184_v36, %v5039_v49  ;;  %v5069_v25 = vmul.f32 %v6188_v29, %v5068_v47  ;;  %v5105_v1 = vand.u32 2147483647, %v9724_v24  ;;  %6195 = vrcp.f32 %v9745_v17 }
 0x79c   : > { %v5029_v34 = vsel %vm5028_vm8, %v6182_v32, %v5025_v13  ;;  %v5055_v42 = vadd.f32 %v6186_v0, %v5054_v33  ;;  %v5084_v40 = vmul.f32 %v6190_v27, %v5083_v35  ;;  %v5097_v32 = vmul.f32 %v6192_v9, %v9724_v24 }
 0x79d   : > { %v9772_v18 = vsel %vm9731_vm15, %v5033_v20, %v5029_v34  ;;  %v5044_v11 = vsel %vm5043_vm12, %v6184_v36, %v5040_v16  ;;  %v5070_v5 = vadd.f32 %v6188_v29, %v5069_v25  ;;  %vm9782_vm15 = vcmp.eq.f32.partialorder %v5090_v50, 8.507059e+37 }
 0x79e   : > { %v9776_v14 = vsel %vm9739_vm4, %v5048_v39, %v5044_v11  ;;  %5149 = vst [vmem:[#allocation1] ss:$9 sm:$0xff] %v9772_v18  ;;  %v5059_v21 = vsel %vm5058_vm13, %v6186_v0, %v5055_v42  ;;  %vm5073_vm4 = vmor %vm5071_vm2, %vm5072_vm10  ;;  %v5085_v62 = vadd.f32 %v6190_v27, %v5084_v40  ;;  %v5098_v45 = vsub.f32 1.0, %v5097_v32  ;;  %v6194_v44 = vpop.eup %6193 }
 0x79f   : > { %5151 = vst [vmem:[#allocation1 + $0x1] ss:$9 sm:$0xff] %v9776_v14  ;;  %v9789_v20 = vsel %vm9749_vm3, %v5063_v48, %v5059_v21  ;;  %v5074_v55 = vsel %vm5073_vm4, %v6188_v29, %v5070_v5  ;;  %v5107_v0 = vand.u32 2147483648, %v9724_v24  ;;  %vm5102_vm1 = vweird.f32 %v6192_v9 }
 0x7a0   : > { %5153 = vst [vmem:[#allocation1 + $0x2] ss:$9 sm:$0xff] %v9789_v20  ;;  %v9802_v37 = vsel %vm9757_vm5, %v5078_v15, %v5074_v55  ;;  %v5089_v39 = vsel %vm5088_vm9, %v6190_v27, %v5085_v62  ;;  %v5099_v3 = vmul.f32 %v6192_v9, %v5098_v45  ;;  %v5112_v46 = vmul.f32 %v6194_v44, %v9736_v61 }
 0x7a1   : > { %v9806_v41 = vsel %vm9782_vm15, %v5093_v23, %v5089_v39  ;;  %5155 = vst [vmem:[#allocation1 + $0x3] ss:$9 sm:$0xff] %v9802_v37  ;;  %vm5101_vm3 = vweird.f32 %v9724_v24  ;;  %v5108_v52 = vor.u32 1.1754944e-38, %v5107_v0  ;;  %vm5106_vm6 = vcmp.eq.f32.partialorder %v5105_v1, 8.507059e+37  ;;  %v6196_v27 = vpop.eup %6195  ;;  %v5265_v39 = vpop.permute.xlu2 %5264 }
 0x7a2   : > { %v5100_v6 = vadd.f32 %v6192_v9, %v5099_v3  ;;  %5157 = vst [vmem:[#allocation1 + $0x4] ss:$9 sm:$0xff] %v9806_v41  ;;  %vm5103_vm2 = vmor %vm5101_vm3, %vm5102_vm1  ;;  %v5113_v29 = vsub.f32 1.0, %v5112_v46  ;;  %v5122_v48 = vand.u32 2147483648, %v9736_v61  ;;  %vm5117_vm7 = vweird.f32 %v6194_v44  ;;  %v5270_v3 = vpop.permute.xlu0 %5269  ;;  %v9844_v46 = vpop.permute.xlu1 %5259 }
 0x7a3   : > { %v5120_v63 = vand.u32 2147483647, %v9736_v61  ;;  %v5127_v53 = vmul.f32 %v6196_v27, %v9745_v17  ;;  %vm5116_vm5 = vweird.f32 %v9736_v61  ;;  %v5137_v4 = vand.u32 2147483648, %v9745_v17 }
 0x7a4   : > { %v5104_v10 = vsel %vm5103_vm2, %v6192_v9, %v5100_v6  ;;  %v5114_v58 = vmul.f32 %v6194_v44, %v5113_v29  ;;  %vm5118_vm8 = vmor %vm5116_vm5, %vm5117_vm7  ;;  %v5123_v13 = vor.u32 1.1754944e-38, %v5122_v48  ;;  %vm5132_vm12 = vweird.f32 %v6196_v27 }
 0x7a5   : > { %v9813_v49 = vsel %vm5106_vm6, %v5108_v52, %v5104_v10  ;;  %v5128_v12 = vsub.f32 1.0, %v5127_v53  ;;  %vm5121_vm11 = vcmp.eq.f32.partialorder %v5120_v63, 8.507059e+37  ;;  %v5135_v47 = vand.u32 2147483647, %v9745_v17 }
 0x7a6   : > { %5159 = vst [vmem:[#allocation1 + $0x5] ss:$9 sm:$0xff] %v9813_v49  ;;  %v5115_v24 = vadd.f32 %v6194_v44, %v5114_v58  ;;  %v4965_v9 = vrot.slane %v9684_v57, 3  ;;  %v4966_v34 = vrot.slane %v9688_v59, 3  ;;  %vm5131_vm10 = vweird.f32 %v9745_v17 }
 0x7a7   : > { %v5129_v33 = vmul.f32 %v6196_v27, %v5128_v12  ;;  %v4967_v35 = vrot.slane %v9691_v2, 3  ;;  %vm5133_vm13 = vmor %vm5131_vm10, %vm5132_vm12  ;;  %v5138_v11 = vor.u32 1.1754944e-38, %v5137_v4  ;;  %v4968_v42 = vrot.slane %v9693_v8, 3 }
 0x7a8   : > { %v5119_v50 = vsel %vm5118_vm8, %v6194_v44, %v5115_v24  ;;  %vm5136_vm14 = vcmp.eq.f32.partialorder %v5135_v47, 8.507059e+37  ;;  %v4969_v40 = vrot.slane %v9696_v56, 3  ;;  %6197 = vtanh.f32 %v4965_v9 }
 0x7a9   : > { %v9820_v16 = vsel %vm5121_vm11, %v5123_v13, %v5119_v50  ;;  %v5130_v61 = vadd.f32 %v6196_v27, %v5129_v33  ;;  %v4970_v57 = vrot.slane %v9700_v28, 3  ;;  %6199 = vtanh.f32 %v4966_v34  ;;  %v5275_v58 = vpop.permute.xlu2 %5274 }
 0x7aa   : > { %5161 = vst [vmem:[#allocation1 + $0x6] ss:$9 sm:$0xff] %v9820_v16  ;;  %v4971_v59 = vrot.slane %v9704_v60, 3  ;;  %6201 = vtanh.f32 %v4967_v35  ;;  %v4972_v2 = vrot.slane %v9707_v7, 3  ;;  %v5202_v48 = vrot.slane %v9772_v18, 2  ;;  %v5280_v12 = vpop.permute.xlu0 %5279 }
 0x7ab   : > { %v5134_v25 = vsel %vm5133_vm13, %v6196_v27, %v5130_v61  ;;  %6203 = vtanh.f32 %v4968_v42  ;;  %v5203_v27 = vrot.slane %v9776_v14, 2  ;;  %v5204_v50 = vrot.slane %v9789_v20, 2  ;;  %v5285_v61 = vpop.permute.xlu1 %5284 }
 0x7ac   : > { %v9830_v32 = vsel %vm5136_vm14, %v5138_v11, %v5134_v25  ;;  %6205 = vtanh.f32 %v4969_v40  ;;  %v5205_v4 = vrot.slane %v9802_v37, 2  ;;  %v5206_v33 = vrot.slane %v9806_v41, 2 }
 0x7ad   : > { %5163 = vst [vmem:[#allocation1 + $0x7] ss:$9 sm:$0xff] %v9830_v32  ;;  %6207 = vtanh.f32 %v4970_v57  ;;  %v5207_v9 = vrot.slane %v9813_v49, 2  ;;  %v5208_v34 = vrot.slane %v9820_v16, 2  ;;  %vm10653_vm15 = vcmask 1042434  }
 0x7ae   : > { %v6198_v8 = vpop.eup %6197  ;;  %6209 = vtanh.f32 %v4971_v59  ;;  %vm10654_vm4 = vcmask 1043459   ;;  %vm10655_vm9 = vmmov %vm10653_vm15  ;;  %vm10656_vm1 = vcmask 1044484   ;;  %vm10658_vm2 = vcmask 1045509  }
 0x7af   : > { %v6200_v17 = vpop.eup %6199  ;;  %6211 = vtanh.f32 %v4972_v2  ;;  %v5167_v56 = vmul.f32 %v6198_v8, %v9772_v18  ;;  %v5209_v18 = vrot.slane %v9830_v32, 2  ;;  %vm10657_vm3 = vmmov %vm10654_vm4  ;;  %vm10662_vm5 = vcmask 1047559  }
 0x7b0   : > { %v6202_v21 = vpop.eup %6201  ;;  %v5168_v28 = vmul.f32 %v6200_v17, %v9776_v14  ;;  %vm10659_vm6 = vmmov %vm10656_vm1 }
 0x7b1   : > { %v6204_v15 = vpop.eup %6203  ;;  %v5169_v36 = vmul.f32 %v6202_v21, %v9789_v20  ;;  %vm10661_vm7 = vmmov %vm10658_vm2 }
 0x7b2   : > { %v6206_v60 = vpop.eup %6205  ;;  %v5170_v7 = vmul.f32 %v6204_v15, %v9802_v37  ;;  %vm10664_vm11 = vmmov %vm10662_vm5 }
 0x7b3   : > { %v6208_v62 = vpop.eup %6207  ;;  %v5171_v23 = vmul.f32 %v6206_v60, %v9806_v41 }
 0x7b4   : > { %v5164_v5 = vld [vmem:[#allocation1 + $0x9] sm:$0xff]  ;;  %v6210_v45 = vpop.eup %6209  ;;  %v5172_v55 = vmul.f32 %v6208_v62, %v9813_v49 }
 0x7b5   : > { %5183 = vst [vmem:[#allocation1] ss:$9 sm:$0xff] %v5167_v56  ;;  %v6212_v1 = vpop.eup %6211  ;;  %v5173_v0 = vmul.f32 %v6210_v45, %v9820_v16  ;;  %v5166_v6 = vmul.f32 %v5164_v5, %v9601_v19 }
 0x7b6   : > { %5185 = vst [vmem:[#allocation1 + $0x1] ss:$9 sm:$0xff] %v5168_v28  ;;  %v5174_v44 = vmul.f32 %v6212_v1, %v9830_v32 }
 0x7b7   : > { %5187 = vst [vmem:[#allocation1 + $0x2] ss:$9 sm:$0xff] %v5169_v36 }
 0x7b8   : > { %5189 = vst [vmem:[#allocation1 + $0x3] ss:$9 sm:$0xff] %v5170_v7 }
 0x7b9   : > { %5191 = vst [vmem:[#allocation1 + $0x4] ss:$9 sm:$0xff] %v5171_v23 }
 0x7ba   : > { %5193 = vst [vmem:[#allocation1 + $0x5] ss:$9 sm:$0xff] %v5172_v55 }
 0x7bb   : > { %5195 = vst [vmem:[#allocation1 + $0x6] ss:$9 sm:$0xff] %v5173_v0  ;;  %v5290_v0 = vpop.permute.xlu2 %5289 }
 0x7bc   : > { %5197 = vst [vmem:[#allocation1 + $0x7] ss:$9 sm:$0xff] %v5174_v44 }
 0x7c3   : > { %v5198_v52 = vld [vmem:[#allocation1] sm:$0xff] }
 0x7c4   : > { %v5200_v29 = vadd.f32 %v5198_v52, %v5166_v6 }
 0x7c6   : > { %6213 = vtanh.f32 %v5200_v29  ;;  %v5329_v10 = vsub.f32 %v5200_v29, %v9601_v19  ;;  %v5295_v29 = vpop.permute.xlu0 %5294 }
 0x7c8   : > { %v5331_v63 = vrot.slane %v5329_v10, 1  ;;  %v5332_v53 = vrot.slane %v5329_v10, 2  ;;  %v5333_v24 = vrot.slane %v5329_v10, 3  ;;  %v5334_v13 = vrot.slane %v5329_v10, 4 }
 0x7c9   : > { %v5335_v47 = vrot.slane %v5329_v10, 5  ;;  %v5336_v35 = vrot.slane %v5329_v10, 6  ;;  %v5337_v11 = vrot.slane %v5329_v10, 7  ;;  %v5346_v42 = vmul.f32 %v5329_v10, %v9844_v46 }
 0x7ca   : > { %v5347_v14 = vmul.f32 %v5331_v63, %v5265_v39  ;;  %v5348_v25 = vmul.f32 %v5332_v53, %v5270_v3  ;;  %v5349_v20 = vmul.f32 %v5333_v24, %v5275_v58  ;;  %v5350_v57 = vmul.f32 %v5334_v13, %v5280_v12 }
 0x7cb   : > { %v5351_v37 = vmul.f32 %v5335_v47, %v5285_v61  ;;  %v5353_v63 = vmul.f32 %v5337_v11, %v5295_v29 }
 0x7cc   : > { %v6214_v40 = vpop.eup %6213  ;;  %v5362_v59 = vrot.slane %v5347_v14, 7  ;;  %v5366_v53 = vrot.slane %v5349_v20, 5 }
 0x7cd   : > { %v5219_v41 = vrot.slane %v6214_v40, 1  ;;  %v5220_v2 = vrot.slane %v6214_v40, 2  ;;  %v5221_v8 = vrot.slane %v6214_v40, 3  ;;  %v5222_v49 = vrot.slane %v6214_v40, 4 }
 0x7ce   : > { %v5223_v17 = vrot.slane %v6214_v40, 5  ;;  %v5224_v16 = vrot.slane %v6214_v40, 6  ;;  %v5225_v56 = vrot.slane %v6214_v40, 7  ;;  %v5233_v32 = vmul.f32 %v6214_v40, %v5202_v48 }
 0x7cf   : > { %v5234_v21 = vmul.f32 %v5219_v41, %v5203_v27  ;;  %v5235_v5 = vmul.f32 %v5220_v2, %v5204_v50  ;;  %v5236_v28 = vmul.f32 %v5221_v8, %v5205_v4  ;;  %v5237_v15 = vmul.f32 %v5222_v49, %v5206_v33 }
 0x7d0   : > { %v5238_v36 = vmul.f32 %v5223_v17, %v5207_v9  ;;  %v5239_v60 = vmul.f32 %v5224_v16, %v5208_v34  ;;  %v5240_v7 = vmul.f32 %v5225_v56, %v5209_v18  ;;  %v5249_v62 = vsub.f32 %v5233_v32, %v9605_v54 }
 0x7d1   : > { %v5250_v23 = vsub.f32 %v5234_v21, %v4762_v22  ;;  %v5251_v45 = vsub.f32 %v5235_v5, %v4763_v51  ;;  %v5252_v55 = vsub.f32 %v5236_v28, %v4764_v43  ;;  %v5253_v1 = vsub.f32 %v5237_v15, %v4765_v31 }
 0x7d2   : > { %v5254_v44 = vsub.f32 %v5238_v36, %v4766_v26  ;;  %v5255_v6 = vsub.f32 %v5239_v60, %v4767_v38  ;;  %v5256_v52 = vsub.f32 %v5240_v7, %v4768_v30  ;;  %v5364_v22 = vrot.slane %v5348_v25, 6 }
 0x7d3   : > { %v5298_v10 = vmul.f32 %v5265_v39, %v5250_v23  ;;  %v5299_v51 = vmul.f32 %v5270_v3, %v5251_v45  ;;  %v5300_v48 = vmul.f32 %v5275_v58, %v5252_v55  ;;  %v5352_v27 = vmul.f32 %v5336_v35, %v5290_v0 }
 0x7d4   : > { %v5301_v43 = vmul.f32 %v5280_v12, %v5253_v1  ;;  %v5363_v31 = vsel %vm565_vm0, %v5362_v59, %v5346_v42  ;;  %v5297_v24 = vmul.f32 %v9844_v46, %v5249_v62  ;;  %v5302_v26 = vmul.f32 %v5285_v61, %v5254_v44 }
 0x7d5   : > { %v5313_v13 = vrot.slane %v5298_v10, 7  ;;  %v5315_v50 = vrot.slane %v5299_v51, 6  ;;  %v5303_v38 = vmul.f32 %v5290_v0, %v5255_v6  ;;  %v5304_v4 = vmul.f32 %v5295_v29, %v5256_v52 }
 0x7d6   : > { %v5365_v30 = vsel %vm10653_vm15, %v5364_v22, %v5363_v31  ;;  %v5368_v33 = vrot.slane %v5350_v57, 4  ;;  %v5317_v3 = vrot.slane %v5300_v48, 5  ;;  %v5370_v12 = vrot.slane %v5351_v37, 3 }
 0x7d7   : > { %v5314_v39 = vsel %vm565_vm0, %v5313_v13, %v5297_v24  ;;  %v5367_v58 = vsel %vm10654_vm4, %v5366_v53, %v5365_v30  ;;  %v5319_v9 = vrot.slane %v5301_v43, 4  ;;  %v5372_v46 = vrot.slane %v5352_v27, 2 }
 0x7d8   : > { %v5316_v47 = vsel %vm10655_vm9, %v5315_v50, %v5314_v39  ;;  %v5369_v34 = vsel %vm10656_vm1, %v5368_v33, %v5367_v58  ;;  %v5321_v14 = vrot.slane %v5302_v26, 3  ;;  %v5374_v35 = vrot.slane %v5353_v63, 1 }
 0x7d9   : > { %v5318_v18 = vsel %vm10657_vm3, %v5317_v3, %v5316_v47  ;;  %v5371_v61 = vsel %vm10658_vm2, %v5370_v12, %v5369_v34  ;;  %v5323_v42 = vrot.slane %v5303_v38, 2  ;;  %vm10660_vm0 = vcmask 1046534  }
 0x7da   : > { %v5320_v11 = vsel %vm10659_vm6, %v5319_v9, %v5318_v18  ;;  %v5373_v25 = vsel %vm10660_vm0, %v5372_v46, %v5371_v61  ;;  %v5325_v20 = vrot.slane %v5304_v4, 1  ;;  %vm10663_vm8 = vmmov %vm10660_vm0 }
 0x7db   : > { %v5322_v40 = vsel %vm10661_vm7, %v5321_v14, %v5320_v11  ;;  %v5375_v57 = vsel %vm10662_vm5, %v5374_v35, %v5373_v25 }
 0x7dc   : > { %v5324_v37 = vsel %vm10663_vm8, %v5323_v42, %v5322_v40  ;;  %v5377_v59 = vadd.f32 %v5375_v57, %v9601_v19 }
 0x7dd   : > { %v5326_v41 = vsel %vm10664_vm11, %v5325_v20, %v5324_v37 }
 0x7de   : > { %v5328_v2 = vadd.f32 %v5326_v41, %v9605_v54  ;;  %v5402_v8 = vrot.slane %v5377_v59, 1  ;;  %5416 = vst [vmem:[%s6738_s18 + $0x7] sm:$0x1] %v5377_v59  ;;  %v5403_v21 = vrot.slane %v5377_v59, 2  ;;  %v5404_v5 = vrot.slane %v5377_v59, 3 }
 0x7df   : > { %5425 = vst [vmem:[#allocation3] sm:$0xff] %v5377_v59  ;;  %v5405_v28 = vrot.slane %v5377_v59, 4  ;;  %v5406_v15 = vrot.slane %v5377_v59, 5  ;;  %v5407_v36 = vrot.slane %v5377_v59, 6  ;;  %v5408_v60 = vrot.slane %v5377_v59, 7 }
 0x7e0   : > { %v5379_v49 = vrot.slane %v5328_v2, 1  ;;  %v5380_v17 = vrot.slane %v5328_v2, 2  ;;  %v5381_v16 = vrot.slane %v5328_v2, 3  ;;  %5393 = vst [vmem:[%s6736_s17 + $0x7] sm:$0x1] %v5328_v2  ;;  %v5382_v56 = vrot.slane %v5328_v2, 4 }
 0x7e1   : > { %5417 = vst [vmem:[%s6738_s18 + $0xf] sm:$0x1] %v5402_v8  ;;  %v5383_v19 = vrot.slane %v5328_v2, 5  ;;  %v5384_v32 = vrot.slane %v5328_v2, 6  ;;  %v5385_v54 = vrot.slane %v5328_v2, 7 }
 0x7e2   : > { %5394 = vst [vmem:[%s6736_s17 + $0xf] sm:$0x1] %v5379_v49 }
 0x7e3   : > { %5395 = vst [vmem:[%s6736_s17 + $0x17] sm:$0x1] %v5380_v17 }
 0x7e4   : > { %5396 = vst [vmem:[%s6736_s17 + $0x1f] sm:$0x1] %v5381_v16 }
 0x7e5   : > { %5397 = vst [vmem:[%s6736_s17 + $0x27] sm:$0x1] %v5382_v56 }
 0x7e6   : > { %5398 = vst [vmem:[%s6736_s17 + $0x2f] sm:$0x1] %v5383_v19 }
 0x7e7   : > { %5399 = vst [vmem:[%s6736_s17 + $0x37] sm:$0x1] %v5384_v32 }
 0x7e8   : > { %5400 = vst [vmem:[%s6736_s17 + $0x3f] sm:$0x1] %v5385_v54  ;;  %s6482_s17 = scalar_lea.hbm %s6481_s11, 64 }
 0x7e9   : > { %5418 = vst [vmem:[%s6738_s18 + $0x17] sm:$0x1] %v5403_v21  ;;  %p6483_p4 = scmp.ne.s32.totalorder %s6481_s11, %s6482_s17  ;;  %p6488_p1 = scmp.lt.s32.totalorder %s6486_s20, %s6482_s17 }
 0x7ea   : > { %5419 = vst [vmem:[%s6738_s18 + $0x1f] sm:$0x1] %v5404_v5 }
 0x7eb   : > { %5420 = vst [vmem:[%s6738_s18 + $0x27] sm:$0x1] %v5405_v28  ;;  %p6484_p5 = pnand %p6483_p4, %p6667_p11  ;;  %p6489_p3 = por %p6488_p1, %p6487_p13 }
 0x7ec   : > { %5421 = vst [vmem:[%s6738_s18 + $0x2f] sm:$0x1] %v5406_v15 }
 0x7ed   : > { %5422 = vst [vmem:[%s6738_s18 + $0x37] sm:$0x1] %v5407_v36  ;;  %p6485_p6 = pneg %p6484_p5 }
 0x7ee   : > { %5423 = vst [vmem:[%s6738_s18 + $0x3f] sm:$0x1] %v5408_v60 }
 0x7ef   : > { %5424 = vst [vmem:[#allocation2] sm:$0xff] %v5328_v2  ;;  %p6490_p7 = pnand %p6489_p3, %p6485_p6 }
 0x7f1   : > { %6493 = shalt.err (!%p6490_p7)
}
 0x7f2   : > { %s6577_s18 = smov 128   ;;  %s6578_s2 = smov 256  }
 0x7f3   : > { %s6579_s30 = smov 8   ;;  %s5432_s12 = scalar_lea.sflag [#allocation12], %s6719_s7 }
 0x7f4   : > { %5752 = dma.vmem_to_hbm [thread:$0]  (%p6667_p11), %s9908_s25, 1024, %s9910_s27, %s5427_s16, %s6577_s18, %s6578_s2, %s6579_s30  }
 0x7f5   : > { %s6508_s23 = sshra.s32 %s9919_s15, 4  ;;  %s6514_s17 = scalar_lea.hbm %s9974_s6, 128  ;;  %s6509_s23 = int_to_ptr.hbm [resolvable:$true] %s6508_s23 }
 0x7f6   : > { %s6510_s14 = scalar_lea.hbm %s6509_s23, 64  ;;  %p6515_p2 = scmp.lt.s32.totalorder %s6509_s23, %s9974_s6 }
 0x7f7   : > { %p6511_p8 = scmp.ne.s32.totalorder %s6509_s23, %s6510_s14  ;;  %p6516_p0 = scmp.lt.s32.totalorder %s6514_s17, %s6510_s14 }
 0x7f9   : > { %p6512_p9 = pnand %p6511_p8, %p6667_p11  ;;  %p6517_p4 = por %p6516_p0, %p6515_p2 }
 0x7fb   : > { %p6513_p10 = pneg %p6512_p9 }
 0x7fd   : > { %p6518_p5 = pnand %p6517_p4, %p6513_p10 }
 0x7ff   : > { %6521 = shalt.err (!%p6518_p5)
}
 0x800   : > { %5753 = dma.vmem_to_hbm [thread:$0]  (%p6667_p11), %s9917_s13, 1024, %s9919_s15, %s5432_s12, %s6577_s18, %s6578_s2, %s6579_s30  }
 0x801 PF: > { %s5476_s7 = sand.u32 1, %s6556_s21   ;;  %p10665_p6 = scmp.ge.s32.totalorder %s6568_s24, 2 }
 0x802   : > { %s5477_s25 = scalar_lea.sflag [#allocation6], %s5476_s7 }
 0x803   : > { %p5761_p13 = pnand %p10665_p6, %p6671_p12 }
 0x805   : > { %p5762_p1 = pneg %p5761_p13 }
 0x807   : > { %6547 = dma.done.wait (%p5762_p1), %s5477_s25, 1024  }
 0x808   : > { %6549 = vsyncadd (%p5762_p1), %s5477_s25, 4294966272  ;;  %s5487_s27 = scalar_lea.sflag [#allocation12], %s5476_s7 }
 0x809   : > { %6551 = dma.done.wait (%p5762_p1), %s5487_s27, 1024  }
 0x80a   : > { %6553 = vsyncadd (%p5762_p1), %s5487_s27, 4294966272  ;;  %s10666_s24 = sld [smem:[#allocation18_spill]]  ;;  %s10669_s21 = smov %s6560_s22 }
 0x80b   : > { %s10667_s9 = sld [smem:[#allocation17_spill]] }
 0x80c   : > { %s10668_s23 = sld [smem:[#allocation19_spill]] }
 0x810   : > { %p24_p11 = scmp.ge.s32.totalorder %s10666_s24, 4  }
 0x811   : > { %s10670_s22 = smov %s10667_s9 }
 0x812   :  { %26 = sbr.rel (!%p24_p11) target bundleno = 10 (0xa), region = 331 }
 0x817   :  { %5493 = vsyncpa [#allocation5], 1 }
 0x818   :  { %5495 = vsyncpa [#allocation5 + $0x1], 1 }
 0x819   :  { %5496 = vsyncpa [#allocation9], 1 }
 0x81a   :  { %5497 = vsyncpa [#allocation6], 1 }
 0x81b   :  { %5499 = vsyncpa [#allocation6 + $0x1], 1 }
 0x81c   :  { %5500 = vsyncpa [#allocation12], 1 }
 0x81d   :  { %5502 = vsyncpa [#allocation12 + $0x1], 1 }

</bundles_post_ra>
